<compile_context>
chip_gen: v7x
topology: tpu7x:2x2x1
jax: 0.10.0
libtpu: 0.0.40
codegen_flags: <defaults>
</compile_context>

<pallas_src>
import math

import jax
import jax.numpy as jnp
from jax import lax
from jax.experimental import pallas as pl
from jax.experimental.pallas import tpu as pltpu

_K = 7            # AttentionGate kernel size
_PAD = _K // 2    # 3
_BN_EPS = 1e-5    # BatchNorm2d eps in BasicConv


def _triplet_attention_kernel(x_ref, w_ref, shift_ref, out_ref):
    # x_ref/out_ref block: (Bblk, C, H, W).  w_ref: (3, 98) f32 SMEM (BN scale folded in).
    # shift_ref: (3,) f32 SMEM (folded BN shift).  Branch order: 0=cw, 1=hc, 2=hw.
    Bblk, C, H, W = x_ref.shape

    def zpool(axis):
        xv = x_ref[...]                                     # read per-use; short live range
        mx = jnp.max(xv, axis=axis).astype(jnp.float32)
        mn = jnp.mean(xv.astype(jnp.float32), axis=axis)
        return mx, mn                                       # each (Bblk, P, Q)

    def pad2(p, P, Q):
        # Zero halo of width _PAD on the last two dims, built as a value (no scratch).
        zr = jnp.zeros((Bblk, _PAD, Q), jnp.float32)
        p = jnp.concatenate([zr, p, zr], axis=1)
        zc = jnp.zeros((Bblk, P + 2 * _PAD, _PAD), jnp.float32)
        return jnp.concatenate([zc, p, zc], axis=2)         # (Bblk, P+6, Q+6)

    def gate(branch, pool_axis, P, Q):
        p_max, p_mean = zpool(pool_axis)
        planes = (pad2(p_max, P, Q), pad2(p_mean, P, Q))    # resident values, read once
        acc = shift_ref[branch] + jnp.zeros((Bblk, P, Q), jnp.float32)
        for ci in range(2):
            pad = planes[ci]
            for ky in range(_K):
                for kx in range(_K):
                    wgt = w_ref[branch, (ci * _K + ky) * _K + kx]   # SMEM scalar
                    acc = acc + wgt * pad[:, ky:ky + P, kx:kx + Q]  # static value slices
        return jax.nn.sigmoid(acc)

    s_cw = gate(0, 2, C, W)      # ZPool over H -> (Bblk, C, W)
    s_hc = gate(1, 3, C, H)      # ZPool over W -> (Bblk, C, H) == true hc gate, transposed
    s_hw = gate(2, 1, H, W)      # ZPool over C -> (Bblk, H, W)

    g = (s_hw[:, None, :, :] + s_cw[:, :, None, :] + s_hc[:, :, :, None]) * (1.0 / 3.0)
    out_ref[...] = (x_ref[...].astype(jnp.float32) * g).astype(out_ref.dtype)


def _fold_branch(w, gamma, beta, mean, var, transpose_spatial=False):
    """Fold BN into the conv: returns (flattened scaled weights (98,), scalar shift)."""
    w = w.astype(jnp.float32)
    if transpose_spatial:
        w = jnp.transpose(w, (0, 1, 3, 2))
    scale = gamma.astype(jnp.float32) / jnp.sqrt(var.astype(jnp.float32) + _BN_EPS)
    shift = beta.astype(jnp.float32) - mean.astype(jnp.float32) * scale
    return (w * scale).reshape(2 * _K * _K), shift.reshape(())


def _choose_batch_block(B, per_image_bytes):
    budget = 4 << 20                                 # ~4 MiB per block keeps 2x(in+out) tiny
    cap = max(1, budget // max(per_image_bytes, 1))
    if B >= 2:
        cap = min(cap, B // 2)                       # keep >= 2 grid steps for v7x dual-TC
    best = 1
    for d in range(1, B + 1):
        if B % d == 0 and d <= cap:
            best = d
    return best


def triplet_attention_forward(x, params):
    B, C, H, W = x.shape

    w_cw, s_cw = _fold_branch(params["cw_w"], params["cw_bn_gamma"], params["cw_bn_beta"],
                              params["cw_bn_mean"], params["cw_bn_var"])
    w_hc, s_hc = _fold_branch(params["hc_w"], params["hc_bn_gamma"], params["hc_bn_beta"],
                              params["hc_bn_mean"], params["hc_bn_var"],
                              transpose_spatial=True)
    w_hw, s_hw = _fold_branch(params["hw_w"], params["hw_bn_gamma"], params["hw_bn_beta"],
                              params["hw_bn_mean"], params["hw_bn_var"])

    w_all = jnp.stack([w_cw, w_hc, w_hw], axis=0)        # (3, 98)  -> SMEM scalars
    shift_all = jnp.stack([s_cw, s_hc, s_hw], axis=0)    # (3,)     -> SMEM scalars

    itemsize = jnp.dtype(x.dtype).itemsize
    bblk = _choose_batch_block(B, C * H * W * itemsize)
    blk_bytes = bblk * C * H * W * itemsize
    vmem_limit = int(min(max(32 << 20, 8 * blk_bytes), 48 << 20))

    out = pl.pallas_call(
        _triplet_attention_kernel,
        out_shape=jax.ShapeDtypeStruct((B, C, H, W), x.dtype),
        grid_spec=pltpu.PrefetchScalarGridSpec(
            num_scalar_prefetch=0,
            grid=(B // bblk,),
            in_specs=[
                pl.BlockSpec((bblk, C, H, W), lambda b: (b, 0, 0, 0)),       # x (VMEM)
                pl.BlockSpec(memory_space=pltpu.MemorySpace.SMEM),           # folded weights
                pl.BlockSpec(memory_space=pltpu.MemorySpace.SMEM),           # folded shifts
            ],
            out_specs=pl.BlockSpec((bblk, C, H, W), lambda b: (b, 0, 0, 0)),
        ),
        compiler_params=pltpu.CompilerParams(
            dimension_semantics=("parallel",),
            vmem_limit_bytes=vmem_limit,
        ),
    )(x, w_all, shift_all)
    return out


# ---------------- pure-JAX reference (matches the PyTorch module) ----------------
def _attention_gate_ref(x, w, gamma, beta, mean, var):
    pooled = jnp.concatenate([jnp.max(x, axis=1, keepdims=True),
                              jnp.mean(x, axis=1, keepdims=True)], axis=1)
    y = lax.conv_general_dilated(pooled, w.astype(jnp.float32), window_strides=(1, 1),
                                 padding=((_PAD, _PAD), (_PAD, _PAD)),
                                 dimension_numbers=("NCHW", "OIHW", "NCHW"))
    scale = gamma / jnp.sqrt(var + _BN_EPS)
    shift = beta - mean * scale
    y = y * scale.reshape(1, -1, 1, 1) + shift.reshape(1, -1, 1, 1)
    return x * jax.nn.sigmoid(y)


def triplet_attention_ref(x, p):
    o_cw = jnp.transpose(_attention_gate_ref(jnp.transpose(x, (0, 2, 1, 3)), p["cw_w"],
                                             p["cw_bn_gamma"], p["cw_bn_beta"],
                                             p["cw_bn_mean"], p["cw_bn_var"]), (0, 2, 1, 3))
    o_hc = jnp.transpose(_attention_gate_ref(jnp.transpose(x, (0, 3, 2, 1)), p["hc_w"],
                                             p["hc_bn_gamma"], p["hc_bn_beta"],
                                             p["hc_bn_mean"], p["hc_bn_var"]), (0, 3, 2, 1))
    o_hw = _attention_gate_ref(x, p["hw_w"], p["hw_bn_gamma"], p["hw_bn_beta"],
                               p["hw_bn_mean"], p["hw_bn_var"])
    return (o_hw + o_cw + o_hc) / 3.0


if __name__ == "__main__":
    B, C, H, W = 2, 4, 16, 16
    key = jax.random.PRNGKey(0)
    ks = jax.random.split(key, 16)
    bound = 1.0 / math.sqrt(2 * _K * _K)     # Conv2d default init bound (fan_in = 2*7*7)

    params = {}
    for i, name in enumerate(("cw", "hc", "hw")):
        params[f"{name}_w"] = jax.random.uniform(
            ks[4 * i + 0], (1, 2, _K, _K), jnp.float32, minval=-bound, maxval=bound)
        # Deterministic non-default BN stats so the BN-fold path is exercised.
        params[f"{name}_bn_gamma"] = 1.0 + 0.1 * jax.random.normal(ks[4 * i + 1], (1,), jnp.float32)
        params[f"{name}_bn_beta"] = 0.1 * jax.random.normal(ks[4 * i + 2], (1,), jnp.float32)
        params[f"{name}_bn_mean"] = 0.1 * jax.random.normal(ks[4 * i + 3], (1,), jnp.float32)
        params[f"{name}_bn_var"] = jnp.ones((1,), jnp.float32)

    x = jax.random.normal(ks[15], (B, C, H, W), jnp.float32)     # NCHW like PyTorch

    y = jax.block_until_ready(triplet_attention_forward(x, params))
    y_ref = jax.block_until_ready(triplet_attention_ref(x, params))

    assert y.shape == (B, C, H, W), y.shape
    assert bool(jnp.all(jnp.isfinite(y)))
    err = float(jnp.max(jnp.abs(y - y_ref)))
    assert err < 1e-3, err
    print("KERNEL_OK")
</pallas_src>

<mosaic_0001>
module attributes {stable_mosaic.version = 11 : i64} {
  func.func @_triplet_attention_kernel(%arg0: i32, %arg1: memref<1x4x16x16xf32, #tpu.memory_space<vmem>>, %arg2: memref<3x98xf32, #tpu.memory_space<smem>>, %arg3: memref<3xf32, #tpu.memory_space<smem>>, %arg4: memref<1x4x16x16xf32, #tpu.memory_space<vmem>>) attributes {dimension_semantics = [#tpu.dimension_semantics<parallel>], iteration_bounds = array<i64: 2>, scalar_prefetch = 0 : i64, scratch_operands = 0 : i64, tpu.core_type = #tpu.core_type<tc>, window_params = [{transform_indices = @transform_0, window_bounds = array<i64: 1, 4, 16, 16>}, {transform_indices = @transform_1, window_bounds = array<i64: 3, 98>}, {transform_indices = @transform_2, window_bounds = array<i64: 3>}, {transform_indices = @transform_3, window_bounds = array<i64: 1, 4, 16, 16>}]} {
    %c0 = arith.constant 0 : index
    %c0_0 = arith.constant 0 : index
    %c0_1 = arith.constant 0 : index
    %c0_2 = arith.constant 0 : index
    %0 = vector.load %arg1[%c0, %c0_0, %c0_1, %c0_2] : memref<1x4x16x16xf32, #tpu.memory_space<vmem>>, vector<1x4x16x16xf32>
    %cst = arith.constant dense<0xFF800000> : vector<1x4x16xf32>
    %1 = vector.multi_reduction <maximumf>, %0, %cst [2] : vector<1x4x16x16xf32> to vector<1x4x16xf32>
    %cst_3 = arith.constant dense<0.000000e+00> : vector<1x4x16xf32>
    %2 = vector.multi_reduction <add>, %0, %cst_3 [2] : vector<1x4x16x16xf32> to vector<1x4x16xf32>
    %cst_4 = arith.constant 1.600000e+01 : f32
    %3 = vector.broadcast %cst_4 : f32 to vector<1x4x16xf32>
    %4 = arith.divf %2, %3 : vector<1x4x16xf32>
    %cst_5 = arith.constant 0.000000e+00 : f32
    %5 = vector.broadcast %cst_5 : f32 to vector<1x3x16xf32>
    %6 = tpu.concatenate %5, %1, %5 in 1 : vector<1x3x16xf32>, vector<1x4x16xf32>, vector<1x3x16xf32> -> vector<1x10x16xf32>
    %cst_6 = arith.constant 0.000000e+00 : f32
    %7 = vector.broadcast %cst_6 : f32 to vector<1x10x3xf32>
    %8 = tpu.concatenate %7, %6, %7 in 2 : vector<1x10x3xf32>, vector<1x10x16xf32>, vector<1x10x3xf32> -> vector<1x10x22xf32>
    %cst_7 = arith.constant 0.000000e+00 : f32
    %9 = vector.broadcast %cst_7 : f32 to vector<1x3x16xf32>
    %10 = tpu.concatenate %9, %4, %9 in 1 : vector<1x3x16xf32>, vector<1x4x16xf32>, vector<1x3x16xf32> -> vector<1x10x16xf32>
    %cst_8 = arith.constant 0.000000e+00 : f32
    %11 = vector.broadcast %cst_8 : f32 to vector<1x10x3xf32>
    %12 = tpu.concatenate %11, %10, %11 in 2 : vector<1x10x3xf32>, vector<1x10x16xf32>, vector<1x10x3xf32> -> vector<1x10x22xf32>
    %c0_9 = arith.constant 0 : index
    %13 = memref.load %arg3[%c0_9] : memref<3xf32, #tpu.memory_space<smem>>
    %cst_10 = arith.constant 0.000000e+00 : f32
    %14 = vector.broadcast %cst_10 : f32 to vector<1x4x16xf32>
    %15 = vector.broadcast %13 : f32 to vector<1x4x16xf32>
    %16 = arith.addf %15, %14 : vector<1x4x16xf32>
    %c0_11 = arith.constant 0 : index
    %c0_12 = arith.constant 0 : index
    %17 = memref.load %arg2[%c0_11, %c0_12] : memref<3x98xf32, #tpu.memory_space<smem>>
    %18 = vector.extract_strided_slice %8 {offsets = [0, 0, 0], sizes = [1, 4, 16], strides = [1, 1, 1]} : vector<1x10x22xf32> to vector<1x4x16xf32>
    %19 = vector.broadcast %17 : f32 to vector<1x4x16xf32>
    %20 = arith.mulf %19, %18 : vector<1x4x16xf32>
    %21 = arith.addf %16, %20 : vector<1x4x16xf32>
    %c0_13 = arith.constant 0 : index
    %c1 = arith.constant 1 : index
    %22 = memref.load %arg2[%c0_13, %c1] : memref<3x98xf32, #tpu.memory_space<smem>>
    %23 = vector.extract_strided_slice %8 {offsets = [0, 0, 1], sizes = [1, 4, 16], strides = [1, 1, 1]} : vector<1x10x22xf32> to vector<1x4x16xf32>
    %24 = vector.broadcast %22 : f32 to vector<1x4x16xf32>
    %25 = arith.mulf %24, %23 : vector<1x4x16xf32>
    %26 = arith.addf %21, %25 : vector<1x4x16xf32>
    %c0_14 = arith.constant 0 : index
    %c2 = arith.constant 2 : index
    %27 = memref.load %arg2[%c0_14, %c2] : memref<3x98xf32, #tpu.memory_space<smem>>
    %28 = vector.extract_strided_slice %8 {offsets = [0, 0, 2], sizes = [1, 4, 16], strides = [1, 1, 1]} : vector<1x10x22xf32> to vector<1x4x16xf32>
    %29 = vector.broadcast %27 : f32 to vector<1x4x16xf32>
    %30 = arith.mulf %29, %28 : vector<1x4x16xf32>
    %31 = arith.addf %26, %30 : vector<1x4x16xf32>
    %c0_15 = arith.constant 0 : index
    %c3 = arith.constant 3 : index
    %32 = memref.load %arg2[%c0_15, %c3] : memref<3x98xf32, #tpu.memory_space<smem>>
    %33 = vector.extract_strided_slice %8 {offsets = [0, 0, 3], sizes = [1, 4, 16], strides = [1, 1, 1]} : vector<1x10x22xf32> to vector<1x4x16xf32>
    %34 = vector.broadcast %32 : f32 to vector<1x4x16xf32>
    %35 = arith.mulf %34, %33 : vector<1x4x16xf32>
    %36 = arith.addf %31, %35 : vector<1x4x16xf32>
    %c0_16 = arith.constant 0 : index
    %c4 = arith.constant 4 : index
    %37 = memref.load %arg2[%c0_16, %c4] : memref<3x98xf32, #tpu.memory_space<smem>>
    %38 = vector.extract_strided_slice %8 {offsets = [0, 0, 4], sizes = [1, 4, 16], strides = [1, 1, 1]} : vector<1x10x22xf32> to vector<1x4x16xf32>
    %39 = vector.broadcast %37 : f32 to vector<1x4x16xf32>
    %40 = arith.mulf %39, %38 : vector<1x4x16xf32>
    %41 = arith.addf %36, %40 : vector<1x4x16xf32>
    %c0_17 = arith.constant 0 : index
    %c5 = arith.constant 5 : index
    %42 = memref.load %arg2[%c0_17, %c5] : memref<3x98xf32, #tpu.memory_space<smem>>
    %43 = vector.extract_strided_slice %8 {offsets = [0, 0, 5], sizes = [1, 4, 16], strides = [1, 1, 1]} : vector<1x10x22xf32> to vector<1x4x16xf32>
    %44 = vector.broadcast %42 : f32 to vector<1x4x16xf32>
    %45 = arith.mulf %44, %43 : vector<1x4x16xf32>
    %46 = arith.addf %41, %45 : vector<1x4x16xf32>
    %c0_18 = arith.constant 0 : index
    %c6 = arith.constant 6 : index
    %47 = memref.load %arg2[%c0_18, %c6] : memref<3x98xf32, #tpu.memory_space<smem>>
    %48 = vector.extract_strided_slice %8 {offsets = [0, 0, 6], sizes = [1, 4, 16], strides = [1, 1, 1]} : vector<1x10x22xf32> to vector<1x4x16xf32>
    %49 = vector.broadcast %47 : f32 to vector<1x4x16xf32>
    %50 = arith.mulf %49, %48 : vector<1x4x16xf32>
    %51 = arith.addf %46, %50 : vector<1x4x16xf32>
    %c0_19 = arith.constant 0 : index
    %c7 = arith.constant 7 : index
    %52 = memref.load %arg2[%c0_19, %c7] : memref<3x98xf32, #tpu.memory_space<smem>>
    %53 = vector.extract_strided_slice %8 {offsets = [0, 1, 0], sizes = [1, 4, 16], strides = [1, 1, 1]} : vector<1x10x22xf32> to vector<1x4x16xf32>
    %54 = vector.broadcast %52 : f32 to vector<1x4x16xf32>
    %55 = arith.mulf %54, %53 : vector<1x4x16xf32>
    %56 = arith.addf %51, %55 : vector<1x4x16xf32>
    %c0_20 = arith.constant 0 : index
    %c8 = arith.constant 8 : index
    %57 = memref.load %arg2[%c0_20, %c8] : memref<3x98xf32, #tpu.memory_space<smem>>
    %58 = vector.extract_strided_slice %8 {offsets = [0, 1, 1], sizes = [1, 4, 16], strides = [1, 1, 1]} : vector<1x10x22xf32> to vector<1x4x16xf32>
    %59 = vector.broadcast %57 : f32 to vector<1x4x16xf32>
    %60 = arith.mulf %59, %58 : vector<1x4x16xf32>
    %61 = arith.addf %56, %60 : vector<1x4x16xf32>
    %c0_21 = arith.constant 0 : index
    %c9 = arith.constant 9 : index
    %62 = memref.load %arg2[%c0_21, %c9] : memref<3x98xf32, #tpu.memory_space<smem>>
    %63 = vector.extract_strided_slice %8 {offsets = [0, 1, 2], sizes = [1, 4, 16], strides = [1, 1, 1]} : vector<1x10x22xf32> to vector<1x4x16xf32>
    %64 = vector.broadcast %62 : f32 to vector<1x4x16xf32>
    %65 = arith.mulf %64, %63 : vector<1x4x16xf32>
    %66 = arith.addf %61, %65 : vector<1x4x16xf32>
    %c0_22 = arith.constant 0 : index
    %c10 = arith.constant 10 : index
    %67 = memref.load %arg2[%c0_22, %c10] : memref<3x98xf32, #tpu.memory_space<smem>>
    %68 = vector.extract_strided_slice %8 {offsets = [0, 1, 3], sizes = [1, 4, 16], strides = [1, 1, 1]} : vector<1x10x22xf32> to vector<1x4x16xf32>
    %69 = vector.broadcast %67 : f32 to vector<1x4x16xf32>
    %70 = arith.mulf %69, %68 : vector<1x4x16xf32>
    %71 = arith.addf %66, %70 : vector<1x4x16xf32>
    %c0_23 = arith.constant 0 : index
    %c11 = arith.constant 11 : index
    %72 = memref.load %arg2[%c0_23, %c11] : memref<3x98xf32, #tpu.memory_space<smem>>
    %73 = vector.extract_strided_slice %8 {offsets = [0, 1, 4], sizes = [1, 4, 16], strides = [1, 1, 1]} : vector<1x10x22xf32> to vector<1x4x16xf32>
    %74 = vector.broadcast %72 : f32 to vector<1x4x16xf32>
    %75 = arith.mulf %74, %73 : vector<1x4x16xf32>
    %76 = arith.addf %71, %75 : vector<1x4x16xf32>
    %c0_24 = arith.constant 0 : index
    %c12 = arith.constant 12 : index
    %77 = memref.load %arg2[%c0_24, %c12] : memref<3x98xf32, #tpu.memory_space<smem>>
    %78 = vector.extract_strided_slice %8 {offsets = [0, 1, 5], sizes = [1, 4, 16], strides = [1, 1, 1]} : vector<1x10x22xf32> to vector<1x4x16xf32>
    %79 = vector.broadcast %77 : f32 to vector<1x4x16xf32>
    %80 = arith.mulf %79, %78 : vector<1x4x16xf32>
    %81 = arith.addf %76, %80 : vector<1x4x16xf32>
    %c0_25 = arith.constant 0 : index
    %c13 = arith.constant 13 : index
    %82 = memref.load %arg2[%c0_25, %c13] : memref<3x98xf32, #tpu.memory_space<smem>>
    %83 = vector.extract_strided_slice %8 {offsets = [0, 1, 6], sizes = [1, 4, 16], strides = [1, 1, 1]} : vector<1x10x22xf32> to vector<1x4x16xf32>
    %84 = vector.broadcast %82 : f32 to vector<1x4x16xf32>
    %85 = arith.mulf %84, %83 : vector<1x4x16xf32>
    %86 = arith.addf %81, %85 : vector<1x4x16xf32>
    %c0_26 = arith.constant 0 : index
    %c14 = arith.constant 14 : index
    %87 = memref.load %arg2[%c0_26, %c14] : memref<3x98xf32, #tpu.memory_space<smem>>
    %88 = vector.extract_strided_slice %8 {offsets = [0, 2, 0], sizes = [1, 4, 16], strides = [1, 1, 1]} : vector<1x10x22xf32> to vector<1x4x16xf32>
    %89 = vector.broadcast %87 : f32 to vector<1x4x16xf32>
    %90 = arith.mulf %89, %88 : vector<1x4x16xf32>
    %91 = arith.addf %86, %90 : vector<1x4x16xf32>
    %c0_27 = arith.constant 0 : index
    %c15 = arith.constant 15 : index
    %92 = memref.load %arg2[%c0_27, %c15] : memref<3x98xf32, #tpu.memory_space<smem>>
    %93 = vector.extract_strided_slice %8 {offsets = [0, 2, 1], sizes = [1, 4, 16], strides = [1, 1, 1]} : vector<1x10x22xf32> to vector<1x4x16xf32>
    %94 = vector.broadcast %92 : f32 to vector<1x4x16xf32>
    %95 = arith.mulf %94, %93 : vector<1x4x16xf32>
    %96 = arith.addf %91, %95 : vector<1x4x16xf32>
    %c0_28 = arith.constant 0 : index
    %c16 = arith.constant 16 : index
    %97 = memref.load %arg2[%c0_28, %c16] : memref<3x98xf32, #tpu.memory_space<smem>>
    %98 = vector.extract_strided_slice %8 {offsets = [0, 2, 2], sizes = [1, 4, 16], strides = [1, 1, 1]} : vector<1x10x22xf32> to vector<1x4x16xf32>
    %99 = vector.broadcast %97 : f32 to vector<1x4x16xf32>
    %100 = arith.mulf %99, %98 : vector<1x4x16xf32>
    %101 = arith.addf %96, %100 : vector<1x4x16xf32>
    %c0_29 = arith.constant 0 : index
    %c17 = arith.constant 17 : index
    %102 = memref.load %arg2[%c0_29, %c17] : memref<3x98xf32, #tpu.memory_space<smem>>
    %103 = vector.extract_strided_slice %8 {offsets = [0, 2, 3], sizes = [1, 4, 16], strides = [1, 1, 1]} : vector<1x10x22xf32> to vector<1x4x16xf32>
    %104 = vector.broadcast %102 : f32 to vector<1x4x16xf32>
    %105 = arith.mulf %104, %103 : vector<1x4x16xf32>
    %106 = arith.addf %101, %105 : vector<1x4x16xf32>
    %c0_30 = arith.constant 0 : index
    %c18 = arith.constant 18 : index
    %107 = memref.load %arg2[%c0_30, %c18] : memref<3x98xf32, #tpu.memory_space<smem>>
    %108 = vector.extract_strided_slice %8 {offsets = [0, 2, 4], sizes = [1, 4, 16], strides = [1, 1, 1]} : vector<1x10x22xf32> to vector<1x4x16xf32>
    %109 = vector.broadcast %107 : f32 to vector<1x4x16xf32>
    %110 = arith.mulf %109, %108 : vector<1x4x16xf32>
    %111 = arith.addf %106, %110 : vector<1x4x16xf32>
    %c0_31 = arith.constant 0 : index
    %c19 = arith.constant 19 : index
    %112 = memref.load %arg2[%c0_31, %c19] : memref<3x98xf32, #tpu.memory_space<smem>>
    %113 = vector.extract_strided_slice %8 {offsets = [0, 2, 5], sizes = [1, 4, 16], strides = [1, 1, 1]} : vector<1x10x22xf32> to vector<1x4x16xf32>
    %114 = vector.broadcast %112 : f32 to vector<1x4x16xf32>
    %115 = arith.mulf %114, %113 : vector<1x4x16xf32>
    %116 = arith.addf %111, %115 : vector<1x4x16xf32>
    %c0_32 = arith.constant 0 : index
    %c20 = arith.constant 20 : index
    %117 = memref.load %arg2[%c0_32, %c20] : memref<3x98xf32, #tpu.memory_space<smem>>
    %118 = vector.extract_strided_slice %8 {offsets = [0, 2, 6], sizes = [1, 4, 16], strides = [1, 1, 1]} : vector<1x10x22xf32> to vector<1x4x16xf32>
    %119 = vector.broadcast %117 : f32 to vector<1x4x16xf32>
    %120 = arith.mulf %119, %118 : vector<1x4x16xf32>
    %121 = arith.addf %116, %120 : vector<1x4x16xf32>
    %c0_33 = arith.constant 0 : index
    %c21 = arith.constant 21 : index
    %122 = memref.load %arg2[%c0_33, %c21] : memref<3x98xf32, #tpu.memory_space<smem>>
    %123 = vector.extract_strided_slice %8 {offsets = [0, 3, 0], sizes = [1, 4, 16], strides = [1, 1, 1]} : vector<1x10x22xf32> to vector<1x4x16xf32>
    %124 = vector.broadcast %122 : f32 to vector<1x4x16xf32>
    %125 = arith.mulf %124, %123 : vector<1x4x16xf32>
    %126 = arith.addf %121, %125 : vector<1x4x16xf32>
    %c0_34 = arith.constant 0 : index
    %c22 = arith.constant 22 : index
    %127 = memref.load %arg2[%c0_34, %c22] : memref<3x98xf32, #tpu.memory_space<smem>>
    %128 = vector.extract_strided_slice %8 {offsets = [0, 3, 1], sizes = [1, 4, 16], strides = [1, 1, 1]} : vector<1x10x22xf32> to vector<1x4x16xf32>
    %129 = vector.broadcast %127 : f32 to vector<1x4x16xf32>
    %130 = arith.mulf %129, %128 : vector<1x4x16xf32>
    %131 = arith.addf %126, %130 : vector<1x4x16xf32>
    %c0_35 = arith.constant 0 : index
    %c23 = arith.constant 23 : index
    %132 = memref.load %arg2[%c0_35, %c23] : memref<3x98xf32, #tpu.memory_space<smem>>
    %133 = vector.extract_strided_slice %8 {offsets = [0, 3, 2], sizes = [1, 4, 16], strides = [1, 1, 1]} : vector<1x10x22xf32> to vector<1x4x16xf32>
    %134 = vector.broadcast %132 : f32 to vector<1x4x16xf32>
    %135 = arith.mulf %134, %133 : vector<1x4x16xf32>
    %136 = arith.addf %131, %135 : vector<1x4x16xf32>
    %c0_36 = arith.constant 0 : index
    %c24 = arith.constant 24 : index
    %137 = memref.load %arg2[%c0_36, %c24] : memref<3x98xf32, #tpu.memory_space<smem>>
    %138 = vector.extract_strided_slice %8 {offsets = [0, 3, 3], sizes = [1, 4, 16], strides = [1, 1, 1]} : vector<1x10x22xf32> to vector<1x4x16xf32>
    %139 = vector.broadcast %137 : f32 to vector<1x4x16xf32>
    %140 = arith.mulf %139, %138 : vector<1x4x16xf32>
    %141 = arith.addf %136, %140 : vector<1x4x16xf32>
    %c0_37 = arith.constant 0 : index
    %c25 = arith.constant 25 : index
    %142 = memref.load %arg2[%c0_37, %c25] : memref<3x98xf32, #tpu.memory_space<smem>>
    %143 = vector.extract_strided_slice %8 {offsets = [0, 3, 4], sizes = [1, 4, 16], strides = [1, 1, 1]} : vector<1x10x22xf32> to vector<1x4x16xf32>
    %144 = vector.broadcast %142 : f32 to vector<1x4x16xf32>
    %145 = arith.mulf %144, %143 : vector<1x4x16xf32>
    %146 = arith.addf %141, %145 : vector<1x4x16xf32>
    %c0_38 = arith.constant 0 : index
    %c26 = arith.constant 26 : index
    %147 = memref.load %arg2[%c0_38, %c26] : memref<3x98xf32, #tpu.memory_space<smem>>
    %148 = vector.extract_strided_slice %8 {offsets = [0, 3, 5], sizes = [1, 4, 16], strides = [1, 1, 1]} : vector<1x10x22xf32> to vector<1x4x16xf32>
    %149 = vector.broadcast %147 : f32 to vector<1x4x16xf32>
    %150 = arith.mulf %149, %148 : vector<1x4x16xf32>
    %151 = arith.addf %146, %150 : vector<1x4x16xf32>
    %c0_39 = arith.constant 0 : index
    %c27 = arith.constant 27 : index
    %152 = memref.load %arg2[%c0_39, %c27] : memref<3x98xf32, #tpu.memory_space<smem>>
    %153 = vector.extract_strided_slice %8 {offsets = [0, 3, 6], sizes = [1, 4, 16], strides = [1, 1, 1]} : vector<1x10x22xf32> to vector<1x4x16xf32>
    %154 = vector.broadcast %152 : f32 to vector<1x4x16xf32>
    %155 = arith.mulf %154, %153 : vector<1x4x16xf32>
    %156 = arith.addf %151, %155 : vector<1x4x16xf32>
    %c0_40 = arith.constant 0 : index
    %c28 = arith.constant 28 : index
    %157 = memref.load %arg2[%c0_40, %c28] : memref<3x98xf32, #tpu.memory_space<smem>>
    %158 = vector.extract_strided_slice %8 {offsets = [0, 4, 0], sizes = [1, 4, 16], strides = [1, 1, 1]} : vector<1x10x22xf32> to vector<1x4x16xf32>
    %159 = vector.broadcast %157 : f32 to vector<1x4x16xf32>
    %160 = arith.mulf %159, %158 : vector<1x4x16xf32>
    %161 = arith.addf %156, %160 : vector<1x4x16xf32>
    %c0_41 = arith.constant 0 : index
    %c29 = arith.constant 29 : index
    %162 = memref.load %arg2[%c0_41, %c29] : memref<3x98xf32, #tpu.memory_space<smem>>
    %163 = vector.extract_strided_slice %8 {offsets = [0, 4, 1], sizes = [1, 4, 16], strides = [1, 1, 1]} : vector<1x10x22xf32> to vector<1x4x16xf32>
    %164 = vector.broadcast %162 : f32 to vector<1x4x16xf32>
    %165 = arith.mulf %164, %163 : vector<1x4x16xf32>
    %166 = arith.addf %161, %165 : vector<1x4x16xf32>
    %c0_42 = arith.constant 0 : index
    %c30 = arith.constant 30 : index
    %167 = memref.load %arg2[%c0_42, %c30] : memref<3x98xf32, #tpu.memory_space<smem>>
    %168 = vector.extract_strided_slice %8 {offsets = [0, 4, 2], sizes = [1, 4, 16], strides = [1, 1, 1]} : vector<1x10x22xf32> to vector<1x4x16xf32>
    %169 = vector.broadcast %167 : f32 to vector<1x4x16xf32>
    %170 = arith.mulf %169, %168 : vector<1x4x16xf32>
    %171 = arith.addf %166, %170 : vector<1x4x16xf32>
    %c0_43 = arith.constant 0 : index
    %c31 = arith.constant 31 : index
    %172 = memref.load %arg2[%c0_43, %c31] : memref<3x98xf32, #tpu.memory_space<smem>>
    %173 = vector.extract_strided_slice %8 {offsets = [0, 4, 3], sizes = [1, 4, 16], strides = [1, 1, 1]} : vector<1x10x22xf32> to vector<1x4x16xf32>
    %174 = vector.broadcast %172 : f32 to vector<1x4x16xf32>
    %175 = arith.mulf %174, %173 : vector<1x4x16xf32>
    %176 = arith.addf %171, %175 : vector<1x4x16xf32>
    %c0_44 = arith.constant 0 : index
    %c32 = arith.constant 32 : index
    %177 = memref.load %arg2[%c0_44, %c32] : memref<3x98xf32, #tpu.memory_space<smem>>
    %178 = vector.extract_strided_slice %8 {offsets = [0, 4, 4], sizes = [1, 4, 16], strides = [1, 1, 1]} : vector<1x10x22xf32> to vector<1x4x16xf32>
    %179 = vector.broadcast %177 : f32 to vector<1x4x16xf32>
    %180 = arith.mulf %179, %178 : vector<1x4x16xf32>
    %181 = arith.addf %176, %180 : vector<1x4x16xf32>
    %c0_45 = arith.constant 0 : index
    %c33 = arith.constant 33 : index
    %182 = memref.load %arg2[%c0_45, %c33] : memref<3x98xf32, #tpu.memory_space<smem>>
    %183 = vector.extract_strided_slice %8 {offsets = [0, 4, 5], sizes = [1, 4, 16], strides = [1, 1, 1]} : vector<1x10x22xf32> to vector<1x4x16xf32>
    %184 = vector.broadcast %182 : f32 to vector<1x4x16xf32>
    %185 = arith.mulf %184, %183 : vector<1x4x16xf32>
    %186 = arith.addf %181, %185 : vector<1x4x16xf32>
    %c0_46 = arith.constant 0 : index
    %c34 = arith.constant 34 : index
    %187 = memref.load %arg2[%c0_46, %c34] : memref<3x98xf32, #tpu.memory_space<smem>>
    %188 = vector.extract_strided_slice %8 {offsets = [0, 4, 6], sizes = [1, 4, 16], strides = [1, 1, 1]} : vector<1x10x22xf32> to vector<1x4x16xf32>
    %189 = vector.broadcast %187 : f32 to vector<1x4x16xf32>
    %190 = arith.mulf %189, %188 : vector<1x4x16xf32>
    %191 = arith.addf %186, %190 : vector<1x4x16xf32>
    %c0_47 = arith.constant 0 : index
    %c35 = arith.constant 35 : index
    %192 = memref.load %arg2[%c0_47, %c35] : memref<3x98xf32, #tpu.memory_space<smem>>
    %193 = vector.extract_strided_slice %8 {offsets = [0, 5, 0], sizes = [1, 4, 16], strides = [1, 1, 1]} : vector<1x10x22xf32> to vector<1x4x16xf32>
    %194 = vector.broadcast %192 : f32 to vector<1x4x16xf32>
    %195 = arith.mulf %194, %193 : vector<1x4x16xf32>
    %196 = arith.addf %191, %195 : vector<1x4x16xf32>
    %c0_48 = arith.constant 0 : index
    %c36 = arith.constant 36 : index
    %197 = memref.load %arg2[%c0_48, %c36] : memref<3x98xf32, #tpu.memory_space<smem>>
    %198 = vector.extract_strided_slice %8 {offsets = [0, 5, 1], sizes = [1, 4, 16], strides = [1, 1, 1]} : vector<1x10x22xf32> to vector<1x4x16xf32>
    %199 = vector.broadcast %197 : f32 to vector<1x4x16xf32>
    %200 = arith.mulf %199, %198 : vector<1x4x16xf32>
    %201 = arith.addf %196, %200 : vector<1x4x16xf32>
    %c0_49 = arith.constant 0 : index
    %c37 = arith.constant 37 : index
    %202 = memref.load %arg2[%c0_49, %c37] : memref<3x98xf32, #tpu.memory_space<smem>>
    %203 = vector.extract_strided_slice %8 {offsets = [0, 5, 2], sizes = [1, 4, 16], strides = [1, 1, 1]} : vector<1x10x22xf32> to vector<1x4x16xf32>
    %204 = vector.broadcast %202 : f32 to vector<1x4x16xf32>
    %205 = arith.mulf %204, %203 : vector<1x4x16xf32>
    %206 = arith.addf %201, %205 : vector<1x4x16xf32>
    %c0_50 = arith.constant 0 : index
    %c38 = arith.constant 38 : index
    %207 = memref.load %arg2[%c0_50, %c38] : memref<3x98xf32, #tpu.memory_space<smem>>
    %208 = vector.extract_strided_slice %8 {offsets = [0, 5, 3], sizes = [1, 4, 16], strides = [1, 1, 1]} : vector<1x10x22xf32> to vector<1x4x16xf32>
    %209 = vector.broadcast %207 : f32 to vector<1x4x16xf32>
    %210 = arith.mulf %209, %208 : vector<1x4x16xf32>
    %211 = arith.addf %206, %210 : vector<1x4x16xf32>
    %c0_51 = arith.constant 0 : index
    %c39 = arith.constant 39 : index
    %212 = memref.load %arg2[%c0_51, %c39] : memref<3x98xf32, #tpu.memory_space<smem>>
    %213 = vector.extract_strided_slice %8 {offsets = [0, 5, 4], sizes = [1, 4, 16], strides = [1, 1, 1]} : vector<1x10x22xf32> to vector<1x4x16xf32>
    %214 = vector.broadcast %212 : f32 to vector<1x4x16xf32>
    %215 = arith.mulf %214, %213 : vector<1x4x16xf32>
    %216 = arith.addf %211, %215 : vector<1x4x16xf32>
    %c0_52 = arith.constant 0 : index
    %c40 = arith.constant 40 : index
    %217 = memref.load %arg2[%c0_52, %c40] : memref<3x98xf32, #tpu.memory_space<smem>>
    %218 = vector.extract_strided_slice %8 {offsets = [0, 5, 5], sizes = [1, 4, 16], strides = [1, 1, 1]} : vector<1x10x22xf32> to vector<1x4x16xf32>
    %219 = vector.broadcast %217 : f32 to vector<1x4x16xf32>
    %220 = arith.mulf %219, %218 : vector<1x4x16xf32>
    %221 = arith.addf %216, %220 : vector<1x4x16xf32>
    %c0_53 = arith.constant 0 : index
    %c41 = arith.constant 41 : index
    %222 = memref.load %arg2[%c0_53, %c41] : memref<3x98xf32, #tpu.memory_space<smem>>
    %223 = vector.extract_strided_slice %8 {offsets = [0, 5, 6], sizes = [1, 4, 16], strides = [1, 1, 1]} : vector<1x10x22xf32> to vector<1x4x16xf32>
    %224 = vector.broadcast %222 : f32 to vector<1x4x16xf32>
    %225 = arith.mulf %224, %223 : vector<1x4x16xf32>
    %226 = arith.addf %221, %225 : vector<1x4x16xf32>
    %c0_54 = arith.constant 0 : index
    %c42 = arith.constant 42 : index
    %227 = memref.load %arg2[%c0_54, %c42] : memref<3x98xf32, #tpu.memory_space<smem>>
    %228 = vector.extract_strided_slice %8 {offsets = [0, 6, 0], sizes = [1, 4, 16], strides = [1, 1, 1]} : vector<1x10x22xf32> to vector<1x4x16xf32>
    %229 = vector.broadcast %227 : f32 to vector<1x4x16xf32>
    %230 = arith.mulf %229, %228 : vector<1x4x16xf32>
    %231 = arith.addf %226, %230 : vector<1x4x16xf32>
    %c0_55 = arith.constant 0 : index
    %c43 = arith.constant 43 : index
    %232 = memref.load %arg2[%c0_55, %c43] : memref<3x98xf32, #tpu.memory_space<smem>>
    %233 = vector.extract_strided_slice %8 {offsets = [0, 6, 1], sizes = [1, 4, 16], strides = [1, 1, 1]} : vector<1x10x22xf32> to vector<1x4x16xf32>
    %234 = vector.broadcast %232 : f32 to vector<1x4x16xf32>
    %235 = arith.mulf %234, %233 : vector<1x4x16xf32>
    %236 = arith.addf %231, %235 : vector<1x4x16xf32>
    %c0_56 = arith.constant 0 : index
    %c44 = arith.constant 44 : index
    %237 = memref.load %arg2[%c0_56, %c44] : memref<3x98xf32, #tpu.memory_space<smem>>
    %238 = vector.extract_strided_slice %8 {offsets = [0, 6, 2], sizes = [1, 4, 16], strides = [1, 1, 1]} : vector<1x10x22xf32> to vector<1x4x16xf32>
    %239 = vector.broadcast %237 : f32 to vector<1x4x16xf32>
    %240 = arith.mulf %239, %238 : vector<1x4x16xf32>
    %241 = arith.addf %236, %240 : vector<1x4x16xf32>
    %c0_57 = arith.constant 0 : index
    %c45 = arith.constant 45 : index
    %242 = memref.load %arg2[%c0_57, %c45] : memref<3x98xf32, #tpu.memory_space<smem>>
    %243 = vector.extract_strided_slice %8 {offsets = [0, 6, 3], sizes = [1, 4, 16], strides = [1, 1, 1]} : vector<1x10x22xf32> to vector<1x4x16xf32>
    %244 = vector.broadcast %242 : f32 to vector<1x4x16xf32>
    %245 = arith.mulf %244, %243 : vector<1x4x16xf32>
    %246 = arith.addf %241, %245 : vector<1x4x16xf32>
    %c0_58 = arith.constant 0 : index
    %c46 = arith.constant 46 : index
    %247 = memref.load %arg2[%c0_58, %c46] : memref<3x98xf32, #tpu.memory_space<smem>>
    %248 = vector.extract_strided_slice %8 {offsets = [0, 6, 4], sizes = [1, 4, 16], strides = [1, 1, 1]} : vector<1x10x22xf32> to vector<1x4x16xf32>
    %249 = vector.broadcast %247 : f32 to vector<1x4x16xf32>
    %250 = arith.mulf %249, %248 : vector<1x4x16xf32>
    %251 = arith.addf %246, %250 : vector<1x4x16xf32>
    %c0_59 = arith.constant 0 : index
    %c47 = arith.constant 47 : index
    %252 = memref.load %arg2[%c0_59, %c47] : memref<3x98xf32, #tpu.memory_space<smem>>
    %253 = vector.extract_strided_slice %8 {offsets = [0, 6, 5], sizes = [1, 4, 16], strides = [1, 1, 1]} : vector<1x10x22xf32> to vector<1x4x16xf32>
    %254 = vector.broadcast %252 : f32 to vector<1x4x16xf32>
    %255 = arith.mulf %254, %253 : vector<1x4x16xf32>
    %256 = arith.addf %251, %255 : vector<1x4x16xf32>
    %c0_60 = arith.constant 0 : index
    %c48 = arith.constant 48 : index
    %257 = memref.load %arg2[%c0_60, %c48] : memref<3x98xf32, #tpu.memory_space<smem>>
    %258 = vector.extract_strided_slice %8 {offsets = [0, 6, 6], sizes = [1, 4, 16], strides = [1, 1, 1]} : vector<1x10x22xf32> to vector<1x4x16xf32>
    %259 = vector.broadcast %257 : f32 to vector<1x4x16xf32>
    %260 = arith.mulf %259, %258 : vector<1x4x16xf32>
    %261 = arith.addf %256, %260 : vector<1x4x16xf32>
    %c0_61 = arith.constant 0 : index
    %c49 = arith.constant 49 : index
    %262 = memref.load %arg2[%c0_61, %c49] : memref<3x98xf32, #tpu.memory_space<smem>>
    %263 = vector.extract_strided_slice %12 {offsets = [0, 0, 0], sizes = [1, 4, 16], strides = [1, 1, 1]} : vector<1x10x22xf32> to vector<1x4x16xf32>
    %264 = vector.broadcast %262 : f32 to vector<1x4x16xf32>
    %265 = arith.mulf %264, %263 : vector<1x4x16xf32>
    %266 = arith.addf %261, %265 : vector<1x4x16xf32>
    %c0_62 = arith.constant 0 : index
    %c50 = arith.constant 50 : index
    %267 = memref.load %arg2[%c0_62, %c50] : memref<3x98xf32, #tpu.memory_space<smem>>
    %268 = vector.extract_strided_slice %12 {offsets = [0, 0, 1], sizes = [1, 4, 16], strides = [1, 1, 1]} : vector<1x10x22xf32> to vector<1x4x16xf32>
    %269 = vector.broadcast %267 : f32 to vector<1x4x16xf32>
    %270 = arith.mulf %269, %268 : vector<1x4x16xf32>
    %271 = arith.addf %266, %270 : vector<1x4x16xf32>
    %c0_63 = arith.constant 0 : index
    %c51 = arith.constant 51 : index
    %272 = memref.load %arg2[%c0_63, %c51] : memref<3x98xf32, #tpu.memory_space<smem>>
    %273 = vector.extract_strided_slice %12 {offsets = [0, 0, 2], sizes = [1, 4, 16], strides = [1, 1, 1]} : vector<1x10x22xf32> to vector<1x4x16xf32>
    %274 = vector.broadcast %272 : f32 to vector<1x4x16xf32>
    %275 = arith.mulf %274, %273 : vector<1x4x16xf32>
    %276 = arith.addf %271, %275 : vector<1x4x16xf32>
    %c0_64 = arith.constant 0 : index
    %c52 = arith.constant 52 : index
    %277 = memref.load %arg2[%c0_64, %c52] : memref<3x98xf32, #tpu.memory_space<smem>>
    %278 = vector.extract_strided_slice %12 {offsets = [0, 0, 3], sizes = [1, 4, 16], strides = [1, 1, 1]} : vector<1x10x22xf32> to vector<1x4x16xf32>
    %279 = vector.broadcast %277 : f32 to vector<1x4x16xf32>
    %280 = arith.mulf %279, %278 : vector<1x4x16xf32>
    %281 = arith.addf %276, %280 : vector<1x4x16xf32>
    %c0_65 = arith.constant 0 : index
    %c53 = arith.constant 53 : index
    %282 = memref.load %arg2[%c0_65, %c53] : memref<3x98xf32, #tpu.memory_space<smem>>
    %283 = vector.extract_strided_slice %12 {offsets = [0, 0, 4], sizes = [1, 4, 16], strides = [1, 1, 1]} : vector<1x10x22xf32> to vector<1x4x16xf32>
    %284 = vector.broadcast %282 : f32 to vector<1x4x16xf32>
    %285 = arith.mulf %284, %283 : vector<1x4x16xf32>
    %286 = arith.addf %281, %285 : vector<1x4x16xf32>
    %c0_66 = arith.constant 0 : index
    %c54 = arith.constant 54 : index
    %287 = memref.load %arg2[%c0_66, %c54] : memref<3x98xf32, #tpu.memory_space<smem>>
    %288 = vector.extract_strided_slice %12 {offsets = [0, 0, 5], sizes = [1, 4, 16], strides = [1, 1, 1]} : vector<1x10x22xf32> to vector<1x4x16xf32>
    %289 = vector.broadcast %287 : f32 to vector<1x4x16xf32>
    %290 = arith.mulf %289, %288 : vector<1x4x16xf32>
    %291 = arith.addf %286, %290 : vector<1x4x16xf32>
    %c0_67 = arith.constant 0 : index
    %c55 = arith.constant 55 : index
    %292 = memref.load %arg2[%c0_67, %c55] : memref<3x98xf32, #tpu.memory_space<smem>>
    %293 = vector.extract_strided_slice %12 {offsets = [0, 0, 6], sizes = [1, 4, 16], strides = [1, 1, 1]} : vector<1x10x22xf32> to vector<1x4x16xf32>
    %294 = vector.broadcast %292 : f32 to vector<1x4x16xf32>
    %295 = arith.mulf %294, %293 : vector<1x4x16xf32>
    %296 = arith.addf %291, %295 : vector<1x4x16xf32>
    %c0_68 = arith.constant 0 : index
    %c56 = arith.constant 56 : index
    %297 = memref.load %arg2[%c0_68, %c56] : memref<3x98xf32, #tpu.memory_space<smem>>
    %298 = vector.extract_strided_slice %12 {offsets = [0, 1, 0], sizes = [1, 4, 16], strides = [1, 1, 1]} : vector<1x10x22xf32> to vector<1x4x16xf32>
    %299 = vector.broadcast %297 : f32 to vector<1x4x16xf32>
    %300 = arith.mulf %299, %298 : vector<1x4x16xf32>
    %301 = arith.addf %296, %300 : vector<1x4x16xf32>
    %c0_69 = arith.constant 0 : index
    %c57 = arith.constant 57 : index
    %302 = memref.load %arg2[%c0_69, %c57] : memref<3x98xf32, #tpu.memory_space<smem>>
    %303 = vector.extract_strided_slice %12 {offsets = [0, 1, 1], sizes = [1, 4, 16], strides = [1, 1, 1]} : vector<1x10x22xf32> to vector<1x4x16xf32>
    %304 = vector.broadcast %302 : f32 to vector<1x4x16xf32>
    %305 = arith.mulf %304, %303 : vector<1x4x16xf32>
    %306 = arith.addf %301, %305 : vector<1x4x16xf32>
    %c0_70 = arith.constant 0 : index
    %c58 = arith.constant 58 : index
    %307 = memref.load %arg2[%c0_70, %c58] : memref<3x98xf32, #tpu.memory_space<smem>>
    %308 = vector.extract_strided_slice %12 {offsets = [0, 1, 2], sizes = [1, 4, 16], strides = [1, 1, 1]} : vector<1x10x22xf32> to vector<1x4x16xf32>
    %309 = vector.broadcast %307 : f32 to vector<1x4x16xf32>
    %310 = arith.mulf %309, %308 : vector<1x4x16xf32>
    %311 = arith.addf %306, %310 : vector<1x4x16xf32>
    %c0_71 = arith.constant 0 : index
    %c59 = arith.constant 59 : index
    %312 = memref.load %arg2[%c0_71, %c59] : memref<3x98xf32, #tpu.memory_space<smem>>
    %313 = vector.extract_strided_slice %12 {offsets = [0, 1, 3], sizes = [1, 4, 16], strides = [1, 1, 1]} : vector<1x10x22xf32> to vector<1x4x16xf32>
    %314 = vector.broadcast %312 : f32 to vector<1x4x16xf32>
    %315 = arith.mulf %314, %313 : vector<1x4x16xf32>
    %316 = arith.addf %311, %315 : vector<1x4x16xf32>
    %c0_72 = arith.constant 0 : index
    %c60 = arith.constant 60 : index
    %317 = memref.load %arg2[%c0_72, %c60] : memref<3x98xf32, #tpu.memory_space<smem>>
    %318 = vector.extract_strided_slice %12 {offsets = [0, 1, 4], sizes = [1, 4, 16], strides = [1, 1, 1]} : vector<1x10x22xf32> to vector<1x4x16xf32>
    %319 = vector.broadcast %317 : f32 to vector<1x4x16xf32>
    %320 = arith.mulf %319, %318 : vector<1x4x16xf32>
    %321 = arith.addf %316, %320 : vector<1x4x16xf32>
    %c0_73 = arith.constant 0 : index
    %c61 = arith.constant 61 : index
    %322 = memref.load %arg2[%c0_73, %c61] : memref<3x98xf32, #tpu.memory_space<smem>>
    %323 = vector.extract_strided_slice %12 {offsets = [0, 1, 5], sizes = [1, 4, 16], strides = [1, 1, 1]} : vector<1x10x22xf32> to vector<1x4x16xf32>
    %324 = vector.broadcast %322 : f32 to vector<1x4x16xf32>
    %325 = arith.mulf %324, %323 : vector<1x4x16xf32>
    %326 = arith.addf %321, %325 : vector<1x4x16xf32>
    %c0_74 = arith.constant 0 : index
    %c62 = arith.constant 62 : index
    %327 = memref.load %arg2[%c0_74, %c62] : memref<3x98xf32, #tpu.memory_space<smem>>
    %328 = vector.extract_strided_slice %12 {offsets = [0, 1, 6], sizes = [1, 4, 16], strides = [1, 1, 1]} : vector<1x10x22xf32> to vector<1x4x16xf32>
    %329 = vector.broadcast %327 : f32 to vector<1x4x16xf32>
    %330 = arith.mulf %329, %328 : vector<1x4x16xf32>
    %331 = arith.addf %326, %330 : vector<1x4x16xf32>
    %c0_75 = arith.constant 0 : index
    %c63 = arith.constant 63 : index
    %332 = memref.load %arg2[%c0_75, %c63] : memref<3x98xf32, #tpu.memory_space<smem>>
    %333 = vector.extract_strided_slice %12 {offsets = [0, 2, 0], sizes = [1, 4, 16], strides = [1, 1, 1]} : vector<1x10x22xf32> to vector<1x4x16xf32>
    %334 = vector.broadcast %332 : f32 to vector<1x4x16xf32>
    %335 = arith.mulf %334, %333 : vector<1x4x16xf32>
    %336 = arith.addf %331, %335 : vector<1x4x16xf32>
    %c0_76 = arith.constant 0 : index
    %c64 = arith.constant 64 : index
    %337 = memref.load %arg2[%c0_76, %c64] : memref<3x98xf32, #tpu.memory_space<smem>>
    %338 = vector.extract_strided_slice %12 {offsets = [0, 2, 1], sizes = [1, 4, 16], strides = [1, 1, 1]} : vector<1x10x22xf32> to vector<1x4x16xf32>
    %339 = vector.broadcast %337 : f32 to vector<1x4x16xf32>
    %340 = arith.mulf %339, %338 : vector<1x4x16xf32>
    %341 = arith.addf %336, %340 : vector<1x4x16xf32>
    %c0_77 = arith.constant 0 : index
    %c65 = arith.constant 65 : index
    %342 = memref.load %arg2[%c0_77, %c65] : memref<3x98xf32, #tpu.memory_space<smem>>
    %343 = vector.extract_strided_slice %12 {offsets = [0, 2, 2], sizes = [1, 4, 16], strides = [1, 1, 1]} : vector<1x10x22xf32> to vector<1x4x16xf32>
    %344 = vector.broadcast %342 : f32 to vector<1x4x16xf32>
    %345 = arith.mulf %344, %343 : vector<1x4x16xf32>
    %346 = arith.addf %341, %345 : vector<1x4x16xf32>
    %c0_78 = arith.constant 0 : index
    %c66 = arith.constant 66 : index
    %347 = memref.load %arg2[%c0_78, %c66] : memref<3x98xf32, #tpu.memory_space<smem>>
    %348 = vector.extract_strided_slice %12 {offsets = [0, 2, 3], sizes = [1, 4, 16], strides = [1, 1, 1]} : vector<1x10x22xf32> to vector<1x4x16xf32>
    %349 = vector.broadcast %347 : f32 to vector<1x4x16xf32>
    %350 = arith.mulf %349, %348 : vector<1x4x16xf32>
    %351 = arith.addf %346, %350 : vector<1x4x16xf32>
    %c0_79 = arith.constant 0 : index
    %c67 = arith.constant 67 : index
    %352 = memref.load %arg2[%c0_79, %c67] : memref<3x98xf32, #tpu.memory_space<smem>>
    %353 = vector.extract_strided_slice %12 {offsets = [0, 2, 4], sizes = [1, 4, 16], strides = [1, 1, 1]} : vector<1x10x22xf32> to vector<1x4x16xf32>
    %354 = vector.broadcast %352 : f32 to vector<1x4x16xf32>
    %355 = arith.mulf %354, %353 : vector<1x4x16xf32>
    %356 = arith.addf %351, %355 : vector<1x4x16xf32>
    %c0_80 = arith.constant 0 : index
    %c68 = arith.constant 68 : index
    %357 = memref.load %arg2[%c0_80, %c68] : memref<3x98xf32, #tpu.memory_space<smem>>
    %358 = vector.extract_strided_slice %12 {offsets = [0, 2, 5], sizes = [1, 4, 16], strides = [1, 1, 1]} : vector<1x10x22xf32> to vector<1x4x16xf32>
    %359 = vector.broadcast %357 : f32 to vector<1x4x16xf32>
    %360 = arith.mulf %359, %358 : vector<1x4x16xf32>
    %361 = arith.addf %356, %360 : vector<1x4x16xf32>
    %c0_81 = arith.constant 0 : index
    %c69 = arith.constant 69 : index
    %362 = memref.load %arg2[%c0_81, %c69] : memref<3x98xf32, #tpu.memory_space<smem>>
    %363 = vector.extract_strided_slice %12 {offsets = [0, 2, 6], sizes = [1, 4, 16], strides = [1, 1, 1]} : vector<1x10x22xf32> to vector<1x4x16xf32>
    %364 = vector.broadcast %362 : f32 to vector<1x4x16xf32>
    %365 = arith.mulf %364, %363 : vector<1x4x16xf32>
    %366 = arith.addf %361, %365 : vector<1x4x16xf32>
    %c0_82 = arith.constant 0 : index
    %c70 = arith.constant 70 : index
    %367 = memref.load %arg2[%c0_82, %c70] : memref<3x98xf32, #tpu.memory_space<smem>>
    %368 = vector.extract_strided_slice %12 {offsets = [0, 3, 0], sizes = [1, 4, 16], strides = [1, 1, 1]} : vector<1x10x22xf32> to vector<1x4x16xf32>
    %369 = vector.broadcast %367 : f32 to vector<1x4x16xf32>
    %370 = arith.mulf %369, %368 : vector<1x4x16xf32>
    %371 = arith.addf %366, %370 : vector<1x4x16xf32>
    %c0_83 = arith.constant 0 : index
    %c71 = arith.constant 71 : index
    %372 = memref.load %arg2[%c0_83, %c71] : memref<3x98xf32, #tpu.memory_space<smem>>
    %373 = vector.extract_strided_slice %12 {offsets = [0, 3, 1], sizes = [1, 4, 16], strides = [1, 1, 1]} : vector<1x10x22xf32> to vector<1x4x16xf32>
    %374 = vector.broadcast %372 : f32 to vector<1x4x16xf32>
    %375 = arith.mulf %374, %373 : vector<1x4x16xf32>
    %376 = arith.addf %371, %375 : vector<1x4x16xf32>
    %c0_84 = arith.constant 0 : index
    %c72 = arith.constant 72 : index
    %377 = memref.load %arg2[%c0_84, %c72] : memref<3x98xf32, #tpu.memory_space<smem>>
    %378 = vector.extract_strided_slice %12 {offsets = [0, 3, 2], sizes = [1, 4, 16], strides = [1, 1, 1]} : vector<1x10x22xf32> to vector<1x4x16xf32>
    %379 = vector.broadcast %377 : f32 to vector<1x4x16xf32>
    %380 = arith.mulf %379, %378 : vector<1x4x16xf32>
    %381 = arith.addf %376, %380 : vector<1x4x16xf32>
    %c0_85 = arith.constant 0 : index
    %c73 = arith.constant 73 : index
    %382 = memref.load %arg2[%c0_85, %c73] : memref<3x98xf32, #tpu.memory_space<smem>>
    %383 = vector.extract_strided_slice %12 {offsets = [0, 3, 3], sizes = [1, 4, 16], strides = [1, 1, 1]} : vector<1x10x22xf32> to vector<1x4x16xf32>
    %384 = vector.broadcast %382 : f32 to vector<1x4x16xf32>
    %385 = arith.mulf %384, %383 : vector<1x4x16xf32>
    %386 = arith.addf %381, %385 : vector<1x4x16xf32>
    %c0_86 = arith.constant 0 : index
    %c74 = arith.constant 74 : index
    %387 = memref.load %arg2[%c0_86, %c74] : memref<3x98xf32, #tpu.memory_space<smem>>
    %388 = vector.extract_strided_slice %12 {offsets = [0, 3, 4], sizes = [1, 4, 16], strides = [1, 1, 1]} : vector<1x10x22xf32> to vector<1x4x16xf32>
    %389 = vector.broadcast %387 : f32 to vector<1x4x16xf32>
    %390 = arith.mulf %389, %388 : vector<1x4x16xf32>
    %391 = arith.addf %386, %390 : vector<1x4x16xf32>
    %c0_87 = arith.constant 0 : index
    %c75 = arith.constant 75 : index
    %392 = memref.load %arg2[%c0_87, %c75] : memref<3x98xf32, #tpu.memory_space<smem>>
    %393 = vector.extract_strided_slice %12 {offsets = [0, 3, 5], sizes = [1, 4, 16], strides = [1, 1, 1]} : vector<1x10x22xf32> to vector<1x4x16xf32>
    %394 = vector.broadcast %392 : f32 to vector<1x4x16xf32>
    %395 = arith.mulf %394, %393 : vector<1x4x16xf32>
    %396 = arith.addf %391, %395 : vector<1x4x16xf32>
    %c0_88 = arith.constant 0 : index
    %c76 = arith.constant 76 : index
    %397 = memref.load %arg2[%c0_88, %c76] : memref<3x98xf32, #tpu.memory_space<smem>>
    %398 = vector.extract_strided_slice %12 {offsets = [0, 3, 6], sizes = [1, 4, 16], strides = [1, 1, 1]} : vector<1x10x22xf32> to vector<1x4x16xf32>
    %399 = vector.broadcast %397 : f32 to vector<1x4x16xf32>
    %400 = arith.mulf %399, %398 : vector<1x4x16xf32>
    %401 = arith.addf %396, %400 : vector<1x4x16xf32>
    %c0_89 = arith.constant 0 : index
    %c77 = arith.constant 77 : index
    %402 = memref.load %arg2[%c0_89, %c77] : memref<3x98xf32, #tpu.memory_space<smem>>
    %403 = vector.extract_strided_slice %12 {offsets = [0, 4, 0], sizes = [1, 4, 16], strides = [1, 1, 1]} : vector<1x10x22xf32> to vector<1x4x16xf32>
    %404 = vector.broadcast %402 : f32 to vector<1x4x16xf32>
    %405 = arith.mulf %404, %403 : vector<1x4x16xf32>
    %406 = arith.addf %401, %405 : vector<1x4x16xf32>
    %c0_90 = arith.constant 0 : index
    %c78 = arith.constant 78 : index
    %407 = memref.load %arg2[%c0_90, %c78] : memref<3x98xf32, #tpu.memory_space<smem>>
    %408 = vector.extract_strided_slice %12 {offsets = [0, 4, 1], sizes = [1, 4, 16], strides = [1, 1, 1]} : vector<1x10x22xf32> to vector<1x4x16xf32>
    %409 = vector.broadcast %407 : f32 to vector<1x4x16xf32>
    %410 = arith.mulf %409, %408 : vector<1x4x16xf32>
    %411 = arith.addf %406, %410 : vector<1x4x16xf32>
    %c0_91 = arith.constant 0 : index
    %c79 = arith.constant 79 : index
    %412 = memref.load %arg2[%c0_91, %c79] : memref<3x98xf32, #tpu.memory_space<smem>>
    %413 = vector.extract_strided_slice %12 {offsets = [0, 4, 2], sizes = [1, 4, 16], strides = [1, 1, 1]} : vector<1x10x22xf32> to vector<1x4x16xf32>
    %414 = vector.broadcast %412 : f32 to vector<1x4x16xf32>
    %415 = arith.mulf %414, %413 : vector<1x4x16xf32>
    %416 = arith.addf %411, %415 : vector<1x4x16xf32>
    %c0_92 = arith.constant 0 : index
    %c80 = arith.constant 80 : index
    %417 = memref.load %arg2[%c0_92, %c80] : memref<3x98xf32, #tpu.memory_space<smem>>
    %418 = vector.extract_strided_slice %12 {offsets = [0, 4, 3], sizes = [1, 4, 16], strides = [1, 1, 1]} : vector<1x10x22xf32> to vector<1x4x16xf32>
    %419 = vector.broadcast %417 : f32 to vector<1x4x16xf32>
    %420 = arith.mulf %419, %418 : vector<1x4x16xf32>
    %421 = arith.addf %416, %420 : vector<1x4x16xf32>
    %c0_93 = arith.constant 0 : index
    %c81 = arith.constant 81 : index
    %422 = memref.load %arg2[%c0_93, %c81] : memref<3x98xf32, #tpu.memory_space<smem>>
    %423 = vector.extract_strided_slice %12 {offsets = [0, 4, 4], sizes = [1, 4, 16], strides = [1, 1, 1]} : vector<1x10x22xf32> to vector<1x4x16xf32>
    %424 = vector.broadcast %422 : f32 to vector<1x4x16xf32>
    %425 = arith.mulf %424, %423 : vector<1x4x16xf32>
    %426 = arith.addf %421, %425 : vector<1x4x16xf32>
    %c0_94 = arith.constant 0 : index
    %c82 = arith.constant 82 : index
    %427 = memref.load %arg2[%c0_94, %c82] : memref<3x98xf32, #tpu.memory_space<smem>>
    %428 = vector.extract_strided_slice %12 {offsets = [0, 4, 5], sizes = [1, 4, 16], strides = [1, 1, 1]} : vector<1x10x22xf32> to vector<1x4x16xf32>
    %429 = vector.broadcast %427 : f32 to vector<1x4x16xf32>
    %430 = arith.mulf %429, %428 : vector<1x4x16xf32>
    %431 = arith.addf %426, %430 : vector<1x4x16xf32>
    %c0_95 = arith.constant 0 : index
    %c83 = arith.constant 83 : index
    %432 = memref.load %arg2[%c0_95, %c83] : memref<3x98xf32, #tpu.memory_space<smem>>
    %433 = vector.extract_strided_slice %12 {offsets = [0, 4, 6], sizes = [1, 4, 16], strides = [1, 1, 1]} : vector<1x10x22xf32> to vector<1x4x16xf32>
    %434 = vector.broadcast %432 : f32 to vector<1x4x16xf32>
    %435 = arith.mulf %434, %433 : vector<1x4x16xf32>
    %436 = arith.addf %431, %435 : vector<1x4x16xf32>
    %c0_96 = arith.constant 0 : index
    %c84 = arith.constant 84 : index
    %437 = memref.load %arg2[%c0_96, %c84] : memref<3x98xf32, #tpu.memory_space<smem>>
    %438 = vector.extract_strided_slice %12 {offsets = [0, 5, 0], sizes = [1, 4, 16], strides = [1, 1, 1]} : vector<1x10x22xf32> to vector<1x4x16xf32>
    %439 = vector.broadcast %437 : f32 to vector<1x4x16xf32>
    %440 = arith.mulf %439, %438 : vector<1x4x16xf32>
    %441 = arith.addf %436, %440 : vector<1x4x16xf32>
    %c0_97 = arith.constant 0 : index
    %c85 = arith.constant 85 : index
    %442 = memref.load %arg2[%c0_97, %c85] : memref<3x98xf32, #tpu.memory_space<smem>>
    %443 = vector.extract_strided_slice %12 {offsets = [0, 5, 1], sizes = [1, 4, 16], strides = [1, 1, 1]} : vector<1x10x22xf32> to vector<1x4x16xf32>
    %444 = vector.broadcast %442 : f32 to vector<1x4x16xf32>
    %445 = arith.mulf %444, %443 : vector<1x4x16xf32>
    %446 = arith.addf %441, %445 : vector<1x4x16xf32>
    %c0_98 = arith.constant 0 : index
    %c86 = arith.constant 86 : index
    %447 = memref.load %arg2[%c0_98, %c86] : memref<3x98xf32, #tpu.memory_space<smem>>
    %448 = vector.extract_strided_slice %12 {offsets = [0, 5, 2], sizes = [1, 4, 16], strides = [1, 1, 1]} : vector<1x10x22xf32> to vector<1x4x16xf32>
    %449 = vector.broadcast %447 : f32 to vector<1x4x16xf32>
    %450 = arith.mulf %449, %448 : vector<1x4x16xf32>
    %451 = arith.addf %446, %450 : vector<1x4x16xf32>
    %c0_99 = arith.constant 0 : index
    %c87 = arith.constant 87 : index
    %452 = memref.load %arg2[%c0_99, %c87] : memref<3x98xf32, #tpu.memory_space<smem>>
    %453 = vector.extract_strided_slice %12 {offsets = [0, 5, 3], sizes = [1, 4, 16], strides = [1, 1, 1]} : vector<1x10x22xf32> to vector<1x4x16xf32>
    %454 = vector.broadcast %452 : f32 to vector<1x4x16xf32>
    %455 = arith.mulf %454, %453 : vector<1x4x16xf32>
    %456 = arith.addf %451, %455 : vector<1x4x16xf32>
    %c0_100 = arith.constant 0 : index
    %c88 = arith.constant 88 : index
    %457 = memref.load %arg2[%c0_100, %c88] : memref<3x98xf32, #tpu.memory_space<smem>>
    %458 = vector.extract_strided_slice %12 {offsets = [0, 5, 4], sizes = [1, 4, 16], strides = [1, 1, 1]} : vector<1x10x22xf32> to vector<1x4x16xf32>
    %459 = vector.broadcast %457 : f32 to vector<1x4x16xf32>
    %460 = arith.mulf %459, %458 : vector<1x4x16xf32>
    %461 = arith.addf %456, %460 : vector<1x4x16xf32>
    %c0_101 = arith.constant 0 : index
    %c89 = arith.constant 89 : index
    %462 = memref.load %arg2[%c0_101, %c89] : memref<3x98xf32, #tpu.memory_space<smem>>
    %463 = vector.extract_strided_slice %12 {offsets = [0, 5, 5], sizes = [1, 4, 16], strides = [1, 1, 1]} : vector<1x10x22xf32> to vector<1x4x16xf32>
    %464 = vector.broadcast %462 : f32 to vector<1x4x16xf32>
    %465 = arith.mulf %464, %463 : vector<1x4x16xf32>
    %466 = arith.addf %461, %465 : vector<1x4x16xf32>
    %c0_102 = arith.constant 0 : index
    %c90 = arith.constant 90 : index
    %467 = memref.load %arg2[%c0_102, %c90] : memref<3x98xf32, #tpu.memory_space<smem>>
    %468 = vector.extract_strided_slice %12 {offsets = [0, 5, 6], sizes = [1, 4, 16], strides = [1, 1, 1]} : vector<1x10x22xf32> to vector<1x4x16xf32>
    %469 = vector.broadcast %467 : f32 to vector<1x4x16xf32>
    %470 = arith.mulf %469, %468 : vector<1x4x16xf32>
    %471 = arith.addf %466, %470 : vector<1x4x16xf32>
    %c0_103 = arith.constant 0 : index
    %c91 = arith.constant 91 : index
    %472 = memref.load %arg2[%c0_103, %c91] : memref<3x98xf32, #tpu.memory_space<smem>>
    %473 = vector.extract_strided_slice %12 {offsets = [0, 6, 0], sizes = [1, 4, 16], strides = [1, 1, 1]} : vector<1x10x22xf32> to vector<1x4x16xf32>
    %474 = vector.broadcast %472 : f32 to vector<1x4x16xf32>
    %475 = arith.mulf %474, %473 : vector<1x4x16xf32>
    %476 = arith.addf %471, %475 : vector<1x4x16xf32>
    %c0_104 = arith.constant 0 : index
    %c92 = arith.constant 92 : index
    %477 = memref.load %arg2[%c0_104, %c92] : memref<3x98xf32, #tpu.memory_space<smem>>
    %478 = vector.extract_strided_slice %12 {offsets = [0, 6, 1], sizes = [1, 4, 16], strides = [1, 1, 1]} : vector<1x10x22xf32> to vector<1x4x16xf32>
    %479 = vector.broadcast %477 : f32 to vector<1x4x16xf32>
    %480 = arith.mulf %479, %478 : vector<1x4x16xf32>
    %481 = arith.addf %476, %480 : vector<1x4x16xf32>
    %c0_105 = arith.constant 0 : index
    %c93 = arith.constant 93 : index
    %482 = memref.load %arg2[%c0_105, %c93] : memref<3x98xf32, #tpu.memory_space<smem>>
    %483 = vector.extract_strided_slice %12 {offsets = [0, 6, 2], sizes = [1, 4, 16], strides = [1, 1, 1]} : vector<1x10x22xf32> to vector<1x4x16xf32>
    %484 = vector.broadcast %482 : f32 to vector<1x4x16xf32>
    %485 = arith.mulf %484, %483 : vector<1x4x16xf32>
    %486 = arith.addf %481, %485 : vector<1x4x16xf32>
    %c0_106 = arith.constant 0 : index
    %c94 = arith.constant 94 : index
    %487 = memref.load %arg2[%c0_106, %c94] : memref<3x98xf32, #tpu.memory_space<smem>>
    %488 = vector.extract_strided_slice %12 {offsets = [0, 6, 3], sizes = [1, 4, 16], strides = [1, 1, 1]} : vector<1x10x22xf32> to vector<1x4x16xf32>
    %489 = vector.broadcast %487 : f32 to vector<1x4x16xf32>
    %490 = arith.mulf %489, %488 : vector<1x4x16xf32>
    %491 = arith.addf %486, %490 : vector<1x4x16xf32>
    %c0_107 = arith.constant 0 : index
    %c95 = arith.constant 95 : index
    %492 = memref.load %arg2[%c0_107, %c95] : memref<3x98xf32, #tpu.memory_space<smem>>
    %493 = vector.extract_strided_slice %12 {offsets = [0, 6, 4], sizes = [1, 4, 16], strides = [1, 1, 1]} : vector<1x10x22xf32> to vector<1x4x16xf32>
    %494 = vector.broadcast %492 : f32 to vector<1x4x16xf32>
    %495 = arith.mulf %494, %493 : vector<1x4x16xf32>
    %496 = arith.addf %491, %495 : vector<1x4x16xf32>
    %c0_108 = arith.constant 0 : index
    %c96 = arith.constant 96 : index
    %497 = memref.load %arg2[%c0_108, %c96] : memref<3x98xf32, #tpu.memory_space<smem>>
    %498 = vector.extract_strided_slice %12 {offsets = [0, 6, 5], sizes = [1, 4, 16], strides = [1, 1, 1]} : vector<1x10x22xf32> to vector<1x4x16xf32>
    %499 = vector.broadcast %497 : f32 to vector<1x4x16xf32>
    %500 = arith.mulf %499, %498 : vector<1x4x16xf32>
    %501 = arith.addf %496, %500 : vector<1x4x16xf32>
    %c0_109 = arith.constant 0 : index
    %c97 = arith.constant 97 : index
    %502 = memref.load %arg2[%c0_109, %c97] : memref<3x98xf32, #tpu.memory_space<smem>>
    %503 = vector.extract_strided_slice %12 {offsets = [0, 6, 6], sizes = [1, 4, 16], strides = [1, 1, 1]} : vector<1x10x22xf32> to vector<1x4x16xf32>
    %504 = vector.broadcast %502 : f32 to vector<1x4x16xf32>
    %505 = arith.mulf %504, %503 : vector<1x4x16xf32>
    %506 = arith.addf %501, %505 : vector<1x4x16xf32>
    %507 = arith.negf %506 : vector<1x4x16xf32>
    %508 = math.exp %507 : vector<1x4x16xf32>
    %cst_110 = arith.constant 1.000000e+00 : f32
    %509 = vector.broadcast %cst_110 : f32 to vector<1x4x16xf32>
    %510 = arith.addf %509, %508 : vector<1x4x16xf32>
    %511 = arith.divf %509, %510 : vector<1x4x16xf32>
    %c0_111 = arith.constant 0 : index
    %c0_112 = arith.constant 0 : index
    %c0_113 = arith.constant 0 : index
    %c0_114 = arith.constant 0 : index
    %512 = vector.load %arg1[%c0_111, %c0_112, %c0_113, %c0_114] : memref<1x4x16x16xf32, #tpu.memory_space<vmem>>, vector<1x4x16x16xf32>
    %cst_115 = arith.constant dense<0xFF800000> : vector<1x4x16xf32>
    %513 = vector.multi_reduction <maximumf>, %512, %cst_115 [3] : vector<1x4x16x16xf32> to vector<1x4x16xf32>
    %cst_116 = arith.constant dense<0.000000e+00> : vector<1x4x16xf32>
    %514 = vector.multi_reduction <add>, %512, %cst_116 [3] : vector<1x4x16x16xf32> to vector<1x4x16xf32>
    %cst_117 = arith.constant 1.600000e+01 : f32
    %515 = vector.broadcast %cst_117 : f32 to vector<1x4x16xf32>
    %516 = arith.divf %514, %515 : vector<1x4x16xf32>
    %cst_118 = arith.constant 0.000000e+00 : f32
    %517 = vector.broadcast %cst_118 : f32 to vector<1x3x16xf32>
    %518 = tpu.concatenate %517, %513, %517 in 1 : vector<1x3x16xf32>, vector<1x4x16xf32>, vector<1x3x16xf32> -> vector<1x10x16xf32>
    %cst_119 = arith.constant 0.000000e+00 : f32
    %519 = vector.broadcast %cst_119 : f32 to vector<1x10x3xf32>
    %520 = tpu.concatenate %519, %518, %519 in 2 : vector<1x10x3xf32>, vector<1x10x16xf32>, vector<1x10x3xf32> -> vector<1x10x22xf32>
    %cst_120 = arith.constant 0.000000e+00 : f32
    %521 = vector.broadcast %cst_120 : f32 to vector<1x3x16xf32>
    %522 = tpu.concatenate %521, %516, %521 in 1 : vector<1x3x16xf32>, vector<1x4x16xf32>, vector<1x3x16xf32> -> vector<1x10x16xf32>
    %cst_121 = arith.constant 0.000000e+00 : f32
    %523 = vector.broadcast %cst_121 : f32 to vector<1x10x3xf32>
    %524 = tpu.concatenate %523, %522, %523 in 2 : vector<1x10x3xf32>, vector<1x10x16xf32>, vector<1x10x3xf32> -> vector<1x10x22xf32>
    %c1_122 = arith.constant 1 : index
    %525 = memref.load %arg3[%c1_122] : memref<3xf32, #tpu.memory_space<smem>>
    %cst_123 = arith.constant 0.000000e+00 : f32
    %526 = vector.broadcast %cst_123 : f32 to vector<1x4x16xf32>
    %527 = vector.broadcast %525 : f32 to vector<1x4x16xf32>
    %528 = arith.addf %527, %526 : vector<1x4x16xf32>
    %c1_124 = arith.constant 1 : index
    %c0_125 = arith.constant 0 : index
    %529 = memref.load %arg2[%c1_124, %c0_125] : memref<3x98xf32, #tpu.memory_space<smem>>
    %530 = vector.extract_strided_slice %520 {offsets = [0, 0, 0], sizes = [1, 4, 16], strides = [1, 1, 1]} : vector<1x10x22xf32> to vector<1x4x16xf32>
    %531 = vector.broadcast %529 : f32 to vector<1x4x16xf32>
    %532 = arith.mulf %531, %530 : vector<1x4x16xf32>
    %533 = arith.addf %528, %532 : vector<1x4x16xf32>
    %c1_126 = arith.constant 1 : index
    %c1_127 = arith.constant 1 : index
    %534 = memref.load %arg2[%c1_126, %c1_127] : memref<3x98xf32, #tpu.memory_space<smem>>
    %535 = vector.extract_strided_slice %520 {offsets = [0, 0, 1], sizes = [1, 4, 16], strides = [1, 1, 1]} : vector<1x10x22xf32> to vector<1x4x16xf32>
    %536 = vector.broadcast %534 : f32 to vector<1x4x16xf32>
    %537 = arith.mulf %536, %535 : vector<1x4x16xf32>
    %538 = arith.addf %533, %537 : vector<1x4x16xf32>
    %c1_128 = arith.constant 1 : index
    %c2_129 = arith.constant 2 : index
    %539 = memref.load %arg2[%c1_128, %c2_129] : memref<3x98xf32, #tpu.memory_space<smem>>
    %540 = vector.extract_strided_slice %520 {offsets = [0, 0, 2], sizes = [1, 4, 16], strides = [1, 1, 1]} : vector<1x10x22xf32> to vector<1x4x16xf32>
    %541 = vector.broadcast %539 : f32 to vector<1x4x16xf32>
    %542 = arith.mulf %541, %540 : vector<1x4x16xf32>
    %543 = arith.addf %538, %542 : vector<1x4x16xf32>
    %c1_130 = arith.constant 1 : index
    %c3_131 = arith.constant 3 : index
    %544 = memref.load %arg2[%c1_130, %c3_131] : memref<3x98xf32, #tpu.memory_space<smem>>
    %545 = vector.extract_strided_slice %520 {offsets = [0, 0, 3], sizes = [1, 4, 16], strides = [1, 1, 1]} : vector<1x10x22xf32> to vector<1x4x16xf32>
    %546 = vector.broadcast %544 : f32 to vector<1x4x16xf32>
    %547 = arith.mulf %546, %545 : vector<1x4x16xf32>
    %548 = arith.addf %543, %547 : vector<1x4x16xf32>
    %c1_132 = arith.constant 1 : index
    %c4_133 = arith.constant 4 : index
    %549 = memref.load %arg2[%c1_132, %c4_133] : memref<3x98xf32, #tpu.memory_space<smem>>
    %550 = vector.extract_strided_slice %520 {offsets = [0, 0, 4], sizes = [1, 4, 16], strides = [1, 1, 1]} : vector<1x10x22xf32> to vector<1x4x16xf32>
    %551 = vector.broadcast %549 : f32 to vector<1x4x16xf32>
    %552 = arith.mulf %551, %550 : vector<1x4x16xf32>
    %553 = arith.addf %548, %552 : vector<1x4x16xf32>
    %c1_134 = arith.constant 1 : index
    %c5_135 = arith.constant 5 : index
    %554 = memref.load %arg2[%c1_134, %c5_135] : memref<3x98xf32, #tpu.memory_space<smem>>
    %555 = vector.extract_strided_slice %520 {offsets = [0, 0, 5], sizes = [1, 4, 16], strides = [1, 1, 1]} : vector<1x10x22xf32> to vector<1x4x16xf32>
    %556 = vector.broadcast %554 : f32 to vector<1x4x16xf32>
    %557 = arith.mulf %556, %555 : vector<1x4x16xf32>
    %558 = arith.addf %553, %557 : vector<1x4x16xf32>
    %c1_136 = arith.constant 1 : index
    %c6_137 = arith.constant 6 : index
    %559 = memref.load %arg2[%c1_136, %c6_137] : memref<3x98xf32, #tpu.memory_space<smem>>
    %560 = vector.extract_strided_slice %520 {offsets = [0, 0, 6], sizes = [1, 4, 16], strides = [1, 1, 1]} : vector<1x10x22xf32> to vector<1x4x16xf32>
    %561 = vector.broadcast %559 : f32 to vector<1x4x16xf32>
    %562 = arith.mulf %561, %560 : vector<1x4x16xf32>
    %563 = arith.addf %558, %562 : vector<1x4x16xf32>
    %c1_138 = arith.constant 1 : index
    %c7_139 = arith.constant 7 : index
    %564 = memref.load %arg2[%c1_138, %c7_139] : memref<3x98xf32, #tpu.memory_space<smem>>
    %565 = vector.extract_strided_slice %520 {offsets = [0, 1, 0], sizes = [1, 4, 16], strides = [1, 1, 1]} : vector<1x10x22xf32> to vector<1x4x16xf32>
    %566 = vector.broadcast %564 : f32 to vector<1x4x16xf32>
    %567 = arith.mulf %566, %565 : vector<1x4x16xf32>
    %568 = arith.addf %563, %567 : vector<1x4x16xf32>
    %c1_140 = arith.constant 1 : index
    %c8_141 = arith.constant 8 : index
    %569 = memref.load %arg2[%c1_140, %c8_141] : memref<3x98xf32, #tpu.memory_space<smem>>
    %570 = vector.extract_strided_slice %520 {offsets = [0, 1, 1], sizes = [1, 4, 16], strides = [1, 1, 1]} : vector<1x10x22xf32> to vector<1x4x16xf32>
    %571 = vector.broadcast %569 : f32 to vector<1x4x16xf32>
    %572 = arith.mulf %571, %570 : vector<1x4x16xf32>
    %573 = arith.addf %568, %572 : vector<1x4x16xf32>
    %c1_142 = arith.constant 1 : index
    %c9_143 = arith.constant 9 : index
    %574 = memref.load %arg2[%c1_142, %c9_143] : memref<3x98xf32, #tpu.memory_space<smem>>
    %575 = vector.extract_strided_slice %520 {offsets = [0, 1, 2], sizes = [1, 4, 16], strides = [1, 1, 1]} : vector<1x10x22xf32> to vector<1x4x16xf32>
    %576 = vector.broadcast %574 : f32 to vector<1x4x16xf32>
    %577 = arith.mulf %576, %575 : vector<1x4x16xf32>
    %578 = arith.addf %573, %577 : vector<1x4x16xf32>
    %c1_144 = arith.constant 1 : index
    %c10_145 = arith.constant 10 : index
    %579 = memref.load %arg2[%c1_144, %c10_145] : memref<3x98xf32, #tpu.memory_space<smem>>
    %580 = vector.extract_strided_slice %520 {offsets = [0, 1, 3], sizes = [1, 4, 16], strides = [1, 1, 1]} : vector<1x10x22xf32> to vector<1x4x16xf32>
    %581 = vector.broadcast %579 : f32 to vector<1x4x16xf32>
    %582 = arith.mulf %581, %580 : vector<1x4x16xf32>
    %583 = arith.addf %578, %582 : vector<1x4x16xf32>
    %c1_146 = arith.constant 1 : index
    %c11_147 = arith.constant 11 : index
    %584 = memref.load %arg2[%c1_146, %c11_147] : memref<3x98xf32, #tpu.memory_space<smem>>
    %585 = vector.extract_strided_slice %520 {offsets = [0, 1, 4], sizes = [1, 4, 16], strides = [1, 1, 1]} : vector<1x10x22xf32> to vector<1x4x16xf32>
    %586 = vector.broadcast %584 : f32 to vector<1x4x16xf32>
    %587 = arith.mulf %586, %585 : vector<1x4x16xf32>
    %588 = arith.addf %583, %587 : vector<1x4x16xf32>
    %c1_148 = arith.constant 1 : index
    %c12_149 = arith.constant 12 : index
    %589 = memref.load %arg2[%c1_148, %c12_149] : memref<3x98xf32, #tpu.memory_space<smem>>
    %590 = vector.extract_strided_slice %520 {offsets = [0, 1, 5], sizes = [1, 4, 16], strides = [1, 1, 1]} : vector<1x10x22xf32> to vector<1x4x16xf32>
    %591 = vector.broadcast %589 : f32 to vector<1x4x16xf32>
    %592 = arith.mulf %591, %590 : vector<1x4x16xf32>
    %593 = arith.addf %588, %592 : vector<1x4x16xf32>
    %c1_150 = arith.constant 1 : index
    %c13_151 = arith.constant 13 : index
    %594 = memref.load %arg2[%c1_150, %c13_151] : memref<3x98xf32, #tpu.memory_space<smem>>
    %595 = vector.extract_strided_slice %520 {offsets = [0, 1, 6], sizes = [1, 4, 16], strides = [1, 1, 1]} : vector<1x10x22xf32> to vector<1x4x16xf32>
    %596 = vector.broadcast %594 : f32 to vector<1x4x16xf32>
    %597 = arith.mulf %596, %595 : vector<1x4x16xf32>
    %598 = arith.addf %593, %597 : vector<1x4x16xf32>
    %c1_152 = arith.constant 1 : index
    %c14_153 = arith.constant 14 : index
    %599 = memref.load %arg2[%c1_152, %c14_153] : memref<3x98xf32, #tpu.memory_space<smem>>
    %600 = vector.extract_strided_slice %520 {offsets = [0, 2, 0], sizes = [1, 4, 16], strides = [1, 1, 1]} : vector<1x10x22xf32> to vector<1x4x16xf32>
    %601 = vector.broadcast %599 : f32 to vector<1x4x16xf32>
    %602 = arith.mulf %601, %600 : vector<1x4x16xf32>
    %603 = arith.addf %598, %602 : vector<1x4x16xf32>
    %c1_154 = arith.constant 1 : index
    %c15_155 = arith.constant 15 : index
    %604 = memref.load %arg2[%c1_154, %c15_155] : memref<3x98xf32, #tpu.memory_space<smem>>
    %605 = vector.extract_strided_slice %520 {offsets = [0, 2, 1], sizes = [1, 4, 16], strides = [1, 1, 1]} : vector<1x10x22xf32> to vector<1x4x16xf32>
    %606 = vector.broadcast %604 : f32 to vector<1x4x16xf32>
    %607 = arith.mulf %606, %605 : vector<1x4x16xf32>
    %608 = arith.addf %603, %607 : vector<1x4x16xf32>
    %c1_156 = arith.constant 1 : index
    %c16_157 = arith.constant 16 : index
    %609 = memref.load %arg2[%c1_156, %c16_157] : memref<3x98xf32, #tpu.memory_space<smem>>
    %610 = vector.extract_strided_slice %520 {offsets = [0, 2, 2], sizes = [1, 4, 16], strides = [1, 1, 1]} : vector<1x10x22xf32> to vector<1x4x16xf32>
    %611 = vector.broadcast %609 : f32 to vector<1x4x16xf32>
    %612 = arith.mulf %611, %610 : vector<1x4x16xf32>
    %613 = arith.addf %608, %612 : vector<1x4x16xf32>
    %c1_158 = arith.constant 1 : index
    %c17_159 = arith.constant 17 : index
    %614 = memref.load %arg2[%c1_158, %c17_159] : memref<3x98xf32, #tpu.memory_space<smem>>
    %615 = vector.extract_strided_slice %520 {offsets = [0, 2, 3], sizes = [1, 4, 16], strides = [1, 1, 1]} : vector<1x10x22xf32> to vector<1x4x16xf32>
    %616 = vector.broadcast %614 : f32 to vector<1x4x16xf32>
    %617 = arith.mulf %616, %615 : vector<1x4x16xf32>
    %618 = arith.addf %613, %617 : vector<1x4x16xf32>
    %c1_160 = arith.constant 1 : index
    %c18_161 = arith.constant 18 : index
    %619 = memref.load %arg2[%c1_160, %c18_161] : memref<3x98xf32, #tpu.memory_space<smem>>
    %620 = vector.extract_strided_slice %520 {offsets = [0, 2, 4], sizes = [1, 4, 16], strides = [1, 1, 1]} : vector<1x10x22xf32> to vector<1x4x16xf32>
    %621 = vector.broadcast %619 : f32 to vector<1x4x16xf32>
    %622 = arith.mulf %621, %620 : vector<1x4x16xf32>
    %623 = arith.addf %618, %622 : vector<1x4x16xf32>
    %c1_162 = arith.constant 1 : index
    %c19_163 = arith.constant 19 : index
    %624 = memref.load %arg2[%c1_162, %c19_163] : memref<3x98xf32, #tpu.memory_space<smem>>
    %625 = vector.extract_strided_slice %520 {offsets = [0, 2, 5], sizes = [1, 4, 16], strides = [1, 1, 1]} : vector<1x10x22xf32> to vector<1x4x16xf32>
    %626 = vector.broadcast %624 : f32 to vector<1x4x16xf32>
    %627 = arith.mulf %626, %625 : vector<1x4x16xf32>
    %628 = arith.addf %623, %627 : vector<1x4x16xf32>
    %c1_164 = arith.constant 1 : index
    %c20_165 = arith.constant 20 : index
    %629 = memref.load %arg2[%c1_164, %c20_165] : memref<3x98xf32, #tpu.memory_space<smem>>
    %630 = vector.extract_strided_slice %520 {offsets = [0, 2, 6], sizes = [1, 4, 16], strides = [1, 1, 1]} : vector<1x10x22xf32> to vector<1x4x16xf32>
    %631 = vector.broadcast %629 : f32 to vector<1x4x16xf32>
    %632 = arith.mulf %631, %630 : vector<1x4x16xf32>
    %633 = arith.addf %628, %632 : vector<1x4x16xf32>
    %c1_166 = arith.constant 1 : index
    %c21_167 = arith.constant 21 : index
    %634 = memref.load %arg2[%c1_166, %c21_167] : memref<3x98xf32, #tpu.memory_space<smem>>
    %635 = vector.extract_strided_slice %520 {offsets = [0, 3, 0], sizes = [1, 4, 16], strides = [1, 1, 1]} : vector<1x10x22xf32> to vector<1x4x16xf32>
    %636 = vector.broadcast %634 : f32 to vector<1x4x16xf32>
    %637 = arith.mulf %636, %635 : vector<1x4x16xf32>
    %638 = arith.addf %633, %637 : vector<1x4x16xf32>
    %c1_168 = arith.constant 1 : index
    %c22_169 = arith.constant 22 : index
    %639 = memref.load %arg2[%c1_168, %c22_169] : memref<3x98xf32, #tpu.memory_space<smem>>
    %640 = vector.extract_strided_slice %520 {offsets = [0, 3, 1], sizes = [1, 4, 16], strides = [1, 1, 1]} : vector<1x10x22xf32> to vector<1x4x16xf32>
    %641 = vector.broadcast %639 : f32 to vector<1x4x16xf32>
    %642 = arith.mulf %641, %640 : vector<1x4x16xf32>
    %643 = arith.addf %638, %642 : vector<1x4x16xf32>
    %c1_170 = arith.constant 1 : index
    %c23_171 = arith.constant 23 : index
    %644 = memref.load %arg2[%c1_170, %c23_171] : memref<3x98xf32, #tpu.memory_space<smem>>
    %645 = vector.extract_strided_slice %520 {offsets = [0, 3, 2], sizes = [1, 4, 16], strides = [1, 1, 1]} : vector<1x10x22xf32> to vector<1x4x16xf32>
    %646 = vector.broadcast %644 : f32 to vector<1x4x16xf32>
    %647 = arith.mulf %646, %645 : vector<1x4x16xf32>
    %648 = arith.addf %643, %647 : vector<1x4x16xf32>
    %c1_172 = arith.constant 1 : index
    %c24_173 = arith.constant 24 : index
    %649 = memref.load %arg2[%c1_172, %c24_173] : memref<3x98xf32, #tpu.memory_space<smem>>
    %650 = vector.extract_strided_slice %520 {offsets = [0, 3, 3], sizes = [1, 4, 16], strides = [1, 1, 1]} : vector<1x10x22xf32> to vector<1x4x16xf32>
    %651 = vector.broadcast %649 : f32 to vector<1x4x16xf32>
    %652 = arith.mulf %651, %650 : vector<1x4x16xf32>
    %653 = arith.addf %648, %652 : vector<1x4x16xf32>
    %c1_174 = arith.constant 1 : index
    %c25_175 = arith.constant 25 : index
    %654 = memref.load %arg2[%c1_174, %c25_175] : memref<3x98xf32, #tpu.memory_space<smem>>
    %655 = vector.extract_strided_slice %520 {offsets = [0, 3, 4], sizes = [1, 4, 16], strides = [1, 1, 1]} : vector<1x10x22xf32> to vector<1x4x16xf32>
    %656 = vector.broadcast %654 : f32 to vector<1x4x16xf32>
    %657 = arith.mulf %656, %655 : vector<1x4x16xf32>
    %658 = arith.addf %653, %657 : vector<1x4x16xf32>
    %c1_176 = arith.constant 1 : index
    %c26_177 = arith.constant 26 : index
    %659 = memref.load %arg2[%c1_176, %c26_177] : memref<3x98xf32, #tpu.memory_space<smem>>
    %660 = vector.extract_strided_slice %520 {offsets = [0, 3, 5], sizes = [1, 4, 16], strides = [1, 1, 1]} : vector<1x10x22xf32> to vector<1x4x16xf32>
    %661 = vector.broadcast %659 : f32 to vector<1x4x16xf32>
    %662 = arith.mulf %661, %660 : vector<1x4x16xf32>
    %663 = arith.addf %658, %662 : vector<1x4x16xf32>
    %c1_178 = arith.constant 1 : index
    %c27_179 = arith.constant 27 : index
    %664 = memref.load %arg2[%c1_178, %c27_179] : memref<3x98xf32, #tpu.memory_space<smem>>
    %665 = vector.extract_strided_slice %520 {offsets = [0, 3, 6], sizes = [1, 4, 16], strides = [1, 1, 1]} : vector<1x10x22xf32> to vector<1x4x16xf32>
    %666 = vector.broadcast %664 : f32 to vector<1x4x16xf32>
    %667 = arith.mulf %666, %665 : vector<1x4x16xf32>
    %668 = arith.addf %663, %667 : vector<1x4x16xf32>
    %c1_180 = arith.constant 1 : index
    %c28_181 = arith.constant 28 : index
    %669 = memref.load %arg2[%c1_180, %c28_181] : memref<3x98xf32, #tpu.memory_space<smem>>
    %670 = vector.extract_strided_slice %520 {offsets = [0, 4, 0], sizes = [1, 4, 16], strides = [1, 1, 1]} : vector<1x10x22xf32> to vector<1x4x16xf32>
    %671 = vector.broadcast %669 : f32 to vector<1x4x16xf32>
    %672 = arith.mulf %671, %670 : vector<1x4x16xf32>
    %673 = arith.addf %668, %672 : vector<1x4x16xf32>
    %c1_182 = arith.constant 1 : index
    %c29_183 = arith.constant 29 : index
    %674 = memref.load %arg2[%c1_182, %c29_183] : memref<3x98xf32, #tpu.memory_space<smem>>
    %675 = vector.extract_strided_slice %520 {offsets = [0, 4, 1], sizes = [1, 4, 16], strides = [1, 1, 1]} : vector<1x10x22xf32> to vector<1x4x16xf32>
    %676 = vector.broadcast %674 : f32 to vector<1x4x16xf32>
    %677 = arith.mulf %676, %675 : vector<1x4x16xf32>
    %678 = arith.addf %673, %677 : vector<1x4x16xf32>
    %c1_184 = arith.constant 1 : index
    %c30_185 = arith.constant 30 : index
    %679 = memref.load %arg2[%c1_184, %c30_185] : memref<3x98xf32, #tpu.memory_space<smem>>
    %680 = vector.extract_strided_slice %520 {offsets = [0, 4, 2], sizes = [1, 4, 16], strides = [1, 1, 1]} : vector<1x10x22xf32> to vector<1x4x16xf32>
    %681 = vector.broadcast %679 : f32 to vector<1x4x16xf32>
    %682 = arith.mulf %681, %680 : vector<1x4x16xf32>
    %683 = arith.addf %678, %682 : vector<1x4x16xf32>
    %c1_186 = arith.constant 1 : index
    %c31_187 = arith.constant 31 : index
    %684 = memref.load %arg2[%c1_186, %c31_187] : memref<3x98xf32, #tpu.memory_space<smem>>
    %685 = vector.extract_strided_slice %520 {offsets = [0, 4, 3], sizes = [1, 4, 16], strides = [1, 1, 1]} : vector<1x10x22xf32> to vector<1x4x16xf32>
    %686 = vector.broadcast %684 : f32 to vector<1x4x16xf32>
    %687 = arith.mulf %686, %685 : vector<1x4x16xf32>
    %688 = arith.addf %683, %687 : vector<1x4x16xf32>
    %c1_188 = arith.constant 1 : index
    %c32_189 = arith.constant 32 : index
    %689 = memref.load %arg2[%c1_188, %c32_189] : memref<3x98xf32, #tpu.memory_space<smem>>
    %690 = vector.extract_strided_slice %520 {offsets = [0, 4, 4], sizes = [1, 4, 16], strides = [1, 1, 1]} : vector<1x10x22xf32> to vector<1x4x16xf32>
    %691 = vector.broadcast %689 : f32 to vector<1x4x16xf32>
    %692 = arith.mulf %691, %690 : vector<1x4x16xf32>
    %693 = arith.addf %688, %692 : vector<1x4x16xf32>
    %c1_190 = arith.constant 1 : index
    %c33_191 = arith.constant 33 : index
    %694 = memref.load %arg2[%c1_190, %c33_191] : memref<3x98xf32, #tpu.memory_space<smem>>
    %695 = vector.extract_strided_slice %520 {offsets = [0, 4, 5], sizes = [1, 4, 16], strides = [1, 1, 1]} : vector<1x10x22xf32> to vector<1x4x16xf32>
    %696 = vector.broadcast %694 : f32 to vector<1x4x16xf32>
    %697 = arith.mulf %696, %695 : vector<1x4x16xf32>
    %698 = arith.addf %693, %697 : vector<1x4x16xf32>
    %c1_192 = arith.constant 1 : index
    %c34_193 = arith.constant 34 : index
    %699 = memref.load %arg2[%c1_192, %c34_193] : memref<3x98xf32, #tpu.memory_space<smem>>
    %700 = vector.extract_strided_slice %520 {offsets = [0, 4, 6], sizes = [1, 4, 16], strides = [1, 1, 1]} : vector<1x10x22xf32> to vector<1x4x16xf32>
    %701 = vector.broadcast %699 : f32 to vector<1x4x16xf32>
    %702 = arith.mulf %701, %700 : vector<1x4x16xf32>
    %703 = arith.addf %698, %702 : vector<1x4x16xf32>
    %c1_194 = arith.constant 1 : index
    %c35_195 = arith.constant 35 : index
    %704 = memref.load %arg2[%c1_194, %c35_195] : memref<3x98xf32, #tpu.memory_space<smem>>
    %705 = vector.extract_strided_slice %520 {offsets = [0, 5, 0], sizes = [1, 4, 16], strides = [1, 1, 1]} : vector<1x10x22xf32> to vector<1x4x16xf32>
    %706 = vector.broadcast %704 : f32 to vector<1x4x16xf32>
    %707 = arith.mulf %706, %705 : vector<1x4x16xf32>
    %708 = arith.addf %703, %707 : vector<1x4x16xf32>
    %c1_196 = arith.constant 1 : index
    %c36_197 = arith.constant 36 : index
    %709 = memref.load %arg2[%c1_196, %c36_197] : memref<3x98xf32, #tpu.memory_space<smem>>
    %710 = vector.extract_strided_slice %520 {offsets = [0, 5, 1], sizes = [1, 4, 16], strides = [1, 1, 1]} : vector<1x10x22xf32> to vector<1x4x16xf32>
    %711 = vector.broadcast %709 : f32 to vector<1x4x16xf32>
    %712 = arith.mulf %711, %710 : vector<1x4x16xf32>
    %713 = arith.addf %708, %712 : vector<1x4x16xf32>
    %c1_198 = arith.constant 1 : index
    %c37_199 = arith.constant 37 : index
    %714 = memref.load %arg2[%c1_198, %c37_199] : memref<3x98xf32, #tpu.memory_space<smem>>
    %715 = vector.extract_strided_slice %520 {offsets = [0, 5, 2], sizes = [1, 4, 16], strides = [1, 1, 1]} : vector<1x10x22xf32> to vector<1x4x16xf32>
    %716 = vector.broadcast %714 : f32 to vector<1x4x16xf32>
    %717 = arith.mulf %716, %715 : vector<1x4x16xf32>
    %718 = arith.addf %713, %717 : vector<1x4x16xf32>
    %c1_200 = arith.constant 1 : index
    %c38_201 = arith.constant 38 : index
    %719 = memref.load %arg2[%c1_200, %c38_201] : memref<3x98xf32, #tpu.memory_space<smem>>
    %720 = vector.extract_strided_slice %520 {offsets = [0, 5, 3], sizes = [1, 4, 16], strides = [1, 1, 1]} : vector<1x10x22xf32> to vector<1x4x16xf32>
    %721 = vector.broadcast %719 : f32 to vector<1x4x16xf32>
    %722 = arith.mulf %721, %720 : vector<1x4x16xf32>
    %723 = arith.addf %718, %722 : vector<1x4x16xf32>
    %c1_202 = arith.constant 1 : index
    %c39_203 = arith.constant 39 : index
    %724 = memref.load %arg2[%c1_202, %c39_203] : memref<3x98xf32, #tpu.memory_space<smem>>
    %725 = vector.extract_strided_slice %520 {offsets = [0, 5, 4], sizes = [1, 4, 16], strides = [1, 1, 1]} : vector<1x10x22xf32> to vector<1x4x16xf32>
    %726 = vector.broadcast %724 : f32 to vector<1x4x16xf32>
    %727 = arith.mulf %726, %725 : vector<1x4x16xf32>
    %728 = arith.addf %723, %727 : vector<1x4x16xf32>
    %c1_204 = arith.constant 1 : index
    %c40_205 = arith.constant 40 : index
    %729 = memref.load %arg2[%c1_204, %c40_205] : memref<3x98xf32, #tpu.memory_space<smem>>
    %730 = vector.extract_strided_slice %520 {offsets = [0, 5, 5], sizes = [1, 4, 16], strides = [1, 1, 1]} : vector<1x10x22xf32> to vector<1x4x16xf32>
    %731 = vector.broadcast %729 : f32 to vector<1x4x16xf32>
    %732 = arith.mulf %731, %730 : vector<1x4x16xf32>
    %733 = arith.addf %728, %732 : vector<1x4x16xf32>
    %c1_206 = arith.constant 1 : index
    %c41_207 = arith.constant 41 : index
    %734 = memref.load %arg2[%c1_206, %c41_207] : memref<3x98xf32, #tpu.memory_space<smem>>
    %735 = vector.extract_strided_slice %520 {offsets = [0, 5, 6], sizes = [1, 4, 16], strides = [1, 1, 1]} : vector<1x10x22xf32> to vector<1x4x16xf32>
    %736 = vector.broadcast %734 : f32 to vector<1x4x16xf32>
    %737 = arith.mulf %736, %735 : vector<1x4x16xf32>
    %738 = arith.addf %733, %737 : vector<1x4x16xf32>
    %c1_208 = arith.constant 1 : index
    %c42_209 = arith.constant 42 : index
    %739 = memref.load %arg2[%c1_208, %c42_209] : memref<3x98xf32, #tpu.memory_space<smem>>
    %740 = vector.extract_strided_slice %520 {offsets = [0, 6, 0], sizes = [1, 4, 16], strides = [1, 1, 1]} : vector<1x10x22xf32> to vector<1x4x16xf32>
    %741 = vector.broadcast %739 : f32 to vector<1x4x16xf32>
    %742 = arith.mulf %741, %740 : vector<1x4x16xf32>
    %743 = arith.addf %738, %742 : vector<1x4x16xf32>
    %c1_210 = arith.constant 1 : index
    %c43_211 = arith.constant 43 : index
    %744 = memref.load %arg2[%c1_210, %c43_211] : memref<3x98xf32, #tpu.memory_space<smem>>
    %745 = vector.extract_strided_slice %520 {offsets = [0, 6, 1], sizes = [1, 4, 16], strides = [1, 1, 1]} : vector<1x10x22xf32> to vector<1x4x16xf32>
    %746 = vector.broadcast %744 : f32 to vector<1x4x16xf32>
    %747 = arith.mulf %746, %745 : vector<1x4x16xf32>
    %748 = arith.addf %743, %747 : vector<1x4x16xf32>
    %c1_212 = arith.constant 1 : index
    %c44_213 = arith.constant 44 : index
    %749 = memref.load %arg2[%c1_212, %c44_213] : memref<3x98xf32, #tpu.memory_space<smem>>
    %750 = vector.extract_strided_slice %520 {offsets = [0, 6, 2], sizes = [1, 4, 16], strides = [1, 1, 1]} : vector<1x10x22xf32> to vector<1x4x16xf32>
    %751 = vector.broadcast %749 : f32 to vector<1x4x16xf32>
    %752 = arith.mulf %751, %750 : vector<1x4x16xf32>
    %753 = arith.addf %748, %752 : vector<1x4x16xf32>
    %c1_214 = arith.constant 1 : index
    %c45_215 = arith.constant 45 : index
    %754 = memref.load %arg2[%c1_214, %c45_215] : memref<3x98xf32, #tpu.memory_space<smem>>
    %755 = vector.extract_strided_slice %520 {offsets = [0, 6, 3], sizes = [1, 4, 16], strides = [1, 1, 1]} : vector<1x10x22xf32> to vector<1x4x16xf32>
    %756 = vector.broadcast %754 : f32 to vector<1x4x16xf32>
    %757 = arith.mulf %756, %755 : vector<1x4x16xf32>
    %758 = arith.addf %753, %757 : vector<1x4x16xf32>
    %c1_216 = arith.constant 1 : index
    %c46_217 = arith.constant 46 : index
    %759 = memref.load %arg2[%c1_216, %c46_217] : memref<3x98xf32, #tpu.memory_space<smem>>
    %760 = vector.extract_strided_slice %520 {offsets = [0, 6, 4], sizes = [1, 4, 16], strides = [1, 1, 1]} : vector<1x10x22xf32> to vector<1x4x16xf32>
    %761 = vector.broadcast %759 : f32 to vector<1x4x16xf32>
    %762 = arith.mulf %761, %760 : vector<1x4x16xf32>
    %763 = arith.addf %758, %762 : vector<1x4x16xf32>
    %c1_218 = arith.constant 1 : index
    %c47_219 = arith.constant 47 : index
    %764 = memref.load %arg2[%c1_218, %c47_219] : memref<3x98xf32, #tpu.memory_space<smem>>
    %765 = vector.extract_strided_slice %520 {offsets = [0, 6, 5], sizes = [1, 4, 16], strides = [1, 1, 1]} : vector<1x10x22xf32> to vector<1x4x16xf32>
    %766 = vector.broadcast %764 : f32 to vector<1x4x16xf32>
    %767 = arith.mulf %766, %765 : vector<1x4x16xf32>
    %768 = arith.addf %763, %767 : vector<1x4x16xf32>
    %c1_220 = arith.constant 1 : index
    %c48_221 = arith.constant 48 : index
    %769 = memref.load %arg2[%c1_220, %c48_221] : memref<3x98xf32, #tpu.memory_space<smem>>
    %770 = vector.extract_strided_slice %520 {offsets = [0, 6, 6], sizes = [1, 4, 16], strides = [1, 1, 1]} : vector<1x10x22xf32> to vector<1x4x16xf32>
    %771 = vector.broadcast %769 : f32 to vector<1x4x16xf32>
    %772 = arith.mulf %771, %770 : vector<1x4x16xf32>
    %773 = arith.addf %768, %772 : vector<1x4x16xf32>
    %c1_222 = arith.constant 1 : index
    %c49_223 = arith.constant 49 : index
    %774 = memref.load %arg2[%c1_222, %c49_223] : memref<3x98xf32, #tpu.memory_space<smem>>
    %775 = vector.extract_strided_slice %524 {offsets = [0, 0, 0], sizes = [1, 4, 16], strides = [1, 1, 1]} : vector<1x10x22xf32> to vector<1x4x16xf32>
    %776 = vector.broadcast %774 : f32 to vector<1x4x16xf32>
    %777 = arith.mulf %776, %775 : vector<1x4x16xf32>
    %778 = arith.addf %773, %777 : vector<1x4x16xf32>
    %c1_224 = arith.constant 1 : index
    %c50_225 = arith.constant 50 : index
    %779 = memref.load %arg2[%c1_224, %c50_225] : memref<3x98xf32, #tpu.memory_space<smem>>
    %780 = vector.extract_strided_slice %524 {offsets = [0, 0, 1], sizes = [1, 4, 16], strides = [1, 1, 1]} : vector<1x10x22xf32> to vector<1x4x16xf32>
    %781 = vector.broadcast %779 : f32 to vector<1x4x16xf32>
    %782 = arith.mulf %781, %780 : vector<1x4x16xf32>
    %783 = arith.addf %778, %782 : vector<1x4x16xf32>
    %c1_226 = arith.constant 1 : index
    %c51_227 = arith.constant 51 : index
    %784 = memref.load %arg2[%c1_226, %c51_227] : memref<3x98xf32, #tpu.memory_space<smem>>
    %785 = vector.extract_strided_slice %524 {offsets = [0, 0, 2], sizes = [1, 4, 16], strides = [1, 1, 1]} : vector<1x10x22xf32> to vector<1x4x16xf32>
    %786 = vector.broadcast %784 : f32 to vector<1x4x16xf32>
    %787 = arith.mulf %786, %785 : vector<1x4x16xf32>
    %788 = arith.addf %783, %787 : vector<1x4x16xf32>
    %c1_228 = arith.constant 1 : index
    %c52_229 = arith.constant 52 : index
    %789 = memref.load %arg2[%c1_228, %c52_229] : memref<3x98xf32, #tpu.memory_space<smem>>
    %790 = vector.extract_strided_slice %524 {offsets = [0, 0, 3], sizes = [1, 4, 16], strides = [1, 1, 1]} : vector<1x10x22xf32> to vector<1x4x16xf32>
    %791 = vector.broadcast %789 : f32 to vector<1x4x16xf32>
    %792 = arith.mulf %791, %790 : vector<1x4x16xf32>
    %793 = arith.addf %788, %792 : vector<1x4x16xf32>
    %c1_230 = arith.constant 1 : index
    %c53_231 = arith.constant 53 : index
    %794 = memref.load %arg2[%c1_230, %c53_231] : memref<3x98xf32, #tpu.memory_space<smem>>
    %795 = vector.extract_strided_slice %524 {offsets = [0, 0, 4], sizes = [1, 4, 16], strides = [1, 1, 1]} : vector<1x10x22xf32> to vector<1x4x16xf32>
    %796 = vector.broadcast %794 : f32 to vector<1x4x16xf32>
    %797 = arith.mulf %796, %795 : vector<1x4x16xf32>
    %798 = arith.addf %793, %797 : vector<1x4x16xf32>
    %c1_232 = arith.constant 1 : index
    %c54_233 = arith.constant 54 : index
    %799 = memref.load %arg2[%c1_232, %c54_233] : memref<3x98xf32, #tpu.memory_space<smem>>
    %800 = vector.extract_strided_slice %524 {offsets = [0, 0, 5], sizes = [1, 4, 16], strides = [1, 1, 1]} : vector<1x10x22xf32> to vector<1x4x16xf32>
    %801 = vector.broadcast %799 : f32 to vector<1x4x16xf32>
    %802 = arith.mulf %801, %800 : vector<1x4x16xf32>
    %803 = arith.addf %798, %802 : vector<1x4x16xf32>
    %c1_234 = arith.constant 1 : index
    %c55_235 = arith.constant 55 : index
    %804 = memref.load %arg2[%c1_234, %c55_235] : memref<3x98xf32, #tpu.memory_space<smem>>
    %805 = vector.extract_strided_slice %524 {offsets = [0, 0, 6], sizes = [1, 4, 16], strides = [1, 1, 1]} : vector<1x10x22xf32> to vector<1x4x16xf32>
    %806 = vector.broadcast %804 : f32 to vector<1x4x16xf32>
    %807 = arith.mulf %806, %805 : vector<1x4x16xf32>
    %808 = arith.addf %803, %807 : vector<1x4x16xf32>
    %c1_236 = arith.constant 1 : index
    %c56_237 = arith.constant 56 : index
    %809 = memref.load %arg2[%c1_236, %c56_237] : memref<3x98xf32, #tpu.memory_space<smem>>
    %810 = vector.extract_strided_slice %524 {offsets = [0, 1, 0], sizes = [1, 4, 16], strides = [1, 1, 1]} : vector<1x10x22xf32> to vector<1x4x16xf32>
    %811 = vector.broadcast %809 : f32 to vector<1x4x16xf32>
    %812 = arith.mulf %811, %810 : vector<1x4x16xf32>
    %813 = arith.addf %808, %812 : vector<1x4x16xf32>
    %c1_238 = arith.constant 1 : index
    %c57_239 = arith.constant 57 : index
    %814 = memref.load %arg2[%c1_238, %c57_239] : memref<3x98xf32, #tpu.memory_space<smem>>
    %815 = vector.extract_strided_slice %524 {offsets = [0, 1, 1], sizes = [1, 4, 16], strides = [1, 1, 1]} : vector<1x10x22xf32> to vector<1x4x16xf32>
    %816 = vector.broadcast %814 : f32 to vector<1x4x16xf32>
    %817 = arith.mulf %816, %815 : vector<1x4x16xf32>
    %818 = arith.addf %813, %817 : vector<1x4x16xf32>
    %c1_240 = arith.constant 1 : index
    %c58_241 = arith.constant 58 : index
    %819 = memref.load %arg2[%c1_240, %c58_241] : memref<3x98xf32, #tpu.memory_space<smem>>
    %820 = vector.extract_strided_slice %524 {offsets = [0, 1, 2], sizes = [1, 4, 16], strides = [1, 1, 1]} : vector<1x10x22xf32> to vector<1x4x16xf32>
    %821 = vector.broadcast %819 : f32 to vector<1x4x16xf32>
    %822 = arith.mulf %821, %820 : vector<1x4x16xf32>
    %823 = arith.addf %818, %822 : vector<1x4x16xf32>
    %c1_242 = arith.constant 1 : index
    %c59_243 = arith.constant 59 : index
    %824 = memref.load %arg2[%c1_242, %c59_243] : memref<3x98xf32, #tpu.memory_space<smem>>
    %825 = vector.extract_strided_slice %524 {offsets = [0, 1, 3], sizes = [1, 4, 16], strides = [1, 1, 1]} : vector<1x10x22xf32> to vector<1x4x16xf32>
    %826 = vector.broadcast %824 : f32 to vector<1x4x16xf32>
    %827 = arith.mulf %826, %825 : vector<1x4x16xf32>
    %828 = arith.addf %823, %827 : vector<1x4x16xf32>
    %c1_244 = arith.constant 1 : index
    %c60_245 = arith.constant 60 : index
    %829 = memref.load %arg2[%c1_244, %c60_245] : memref<3x98xf32, #tpu.memory_space<smem>>
    %830 = vector.extract_strided_slice %524 {offsets = [0, 1, 4], sizes = [1, 4, 16], strides = [1, 1, 1]} : vector<1x10x22xf32> to vector<1x4x16xf32>
    %831 = vector.broadcast %829 : f32 to vector<1x4x16xf32>
    %832 = arith.mulf %831, %830 : vector<1x4x16xf32>
    %833 = arith.addf %828, %832 : vector<1x4x16xf32>
    %c1_246 = arith.constant 1 : index
    %c61_247 = arith.constant 61 : index
    %834 = memref.load %arg2[%c1_246, %c61_247] : memref<3x98xf32, #tpu.memory_space<smem>>
    %835 = vector.extract_strided_slice %524 {offsets = [0, 1, 5], sizes = [1, 4, 16], strides = [1, 1, 1]} : vector<1x10x22xf32> to vector<1x4x16xf32>
    %836 = vector.broadcast %834 : f32 to vector<1x4x16xf32>
    %837 = arith.mulf %836, %835 : vector<1x4x16xf32>
    %838 = arith.addf %833, %837 : vector<1x4x16xf32>
    %c1_248 = arith.constant 1 : index
    %c62_249 = arith.constant 62 : index
    %839 = memref.load %arg2[%c1_248, %c62_249] : memref<3x98xf32, #tpu.memory_space<smem>>
    %840 = vector.extract_strided_slice %524 {offsets = [0, 1, 6], sizes = [1, 4, 16], strides = [1, 1, 1]} : vector<1x10x22xf32> to vector<1x4x16xf32>
    %841 = vector.broadcast %839 : f32 to vector<1x4x16xf32>
    %842 = arith.mulf %841, %840 : vector<1x4x16xf32>
    %843 = arith.addf %838, %842 : vector<1x4x16xf32>
    %c1_250 = arith.constant 1 : index
    %c63_251 = arith.constant 63 : index
    %844 = memref.load %arg2[%c1_250, %c63_251] : memref<3x98xf32, #tpu.memory_space<smem>>
    %845 = vector.extract_strided_slice %524 {offsets = [0, 2, 0], sizes = [1, 4, 16], strides = [1, 1, 1]} : vector<1x10x22xf32> to vector<1x4x16xf32>
    %846 = vector.broadcast %844 : f32 to vector<1x4x16xf32>
    %847 = arith.mulf %846, %845 : vector<1x4x16xf32>
    %848 = arith.addf %843, %847 : vector<1x4x16xf32>
    %c1_252 = arith.constant 1 : index
    %c64_253 = arith.constant 64 : index
    %849 = memref.load %arg2[%c1_252, %c64_253] : memref<3x98xf32, #tpu.memory_space<smem>>
    %850 = vector.extract_strided_slice %524 {offsets = [0, 2, 1], sizes = [1, 4, 16], strides = [1, 1, 1]} : vector<1x10x22xf32> to vector<1x4x16xf32>
    %851 = vector.broadcast %849 : f32 to vector<1x4x16xf32>
    %852 = arith.mulf %851, %850 : vector<1x4x16xf32>
    %853 = arith.addf %848, %852 : vector<1x4x16xf32>
    %c1_254 = arith.constant 1 : index
    %c65_255 = arith.constant 65 : index
    %854 = memref.load %arg2[%c1_254, %c65_255] : memref<3x98xf32, #tpu.memory_space<smem>>
    %855 = vector.extract_strided_slice %524 {offsets = [0, 2, 2], sizes = [1, 4, 16], strides = [1, 1, 1]} : vector<1x10x22xf32> to vector<1x4x16xf32>
    %856 = vector.broadcast %854 : f32 to vector<1x4x16xf32>
    %857 = arith.mulf %856, %855 : vector<1x4x16xf32>
    %858 = arith.addf %853, %857 : vector<1x4x16xf32>
    %c1_256 = arith.constant 1 : index
    %c66_257 = arith.constant 66 : index
    %859 = memref.load %arg2[%c1_256, %c66_257] : memref<3x98xf32, #tpu.memory_space<smem>>
    %860 = vector.extract_strided_slice %524 {offsets = [0, 2, 3], sizes = [1, 4, 16], strides = [1, 1, 1]} : vector<1x10x22xf32> to vector<1x4x16xf32>
    %861 = vector.broadcast %859 : f32 to vector<1x4x16xf32>
    %862 = arith.mulf %861, %860 : vector<1x4x16xf32>
    %863 = arith.addf %858, %862 : vector<1x4x16xf32>
    %c1_258 = arith.constant 1 : index
    %c67_259 = arith.constant 67 : index
    %864 = memref.load %arg2[%c1_258, %c67_259] : memref<3x98xf32, #tpu.memory_space<smem>>
    %865 = vector.extract_strided_slice %524 {offsets = [0, 2, 4], sizes = [1, 4, 16], strides = [1, 1, 1]} : vector<1x10x22xf32> to vector<1x4x16xf32>
    %866 = vector.broadcast %864 : f32 to vector<1x4x16xf32>
    %867 = arith.mulf %866, %865 : vector<1x4x16xf32>
    %868 = arith.addf %863, %867 : vector<1x4x16xf32>
    %c1_260 = arith.constant 1 : index
    %c68_261 = arith.constant 68 : index
    %869 = memref.load %arg2[%c1_260, %c68_261] : memref<3x98xf32, #tpu.memory_space<smem>>
    %870 = vector.extract_strided_slice %524 {offsets = [0, 2, 5], sizes = [1, 4, 16], strides = [1, 1, 1]} : vector<1x10x22xf32> to vector<1x4x16xf32>
    %871 = vector.broadcast %869 : f32 to vector<1x4x16xf32>
    %872 = arith.mulf %871, %870 : vector<1x4x16xf32>
    %873 = arith.addf %868, %872 : vector<1x4x16xf32>
    %c1_262 = arith.constant 1 : index
    %c69_263 = arith.constant 69 : index
    %874 = memref.load %arg2[%c1_262, %c69_263] : memref<3x98xf32, #tpu.memory_space<smem>>
    %875 = vector.extract_strided_slice %524 {offsets = [0, 2, 6], sizes = [1, 4, 16], strides = [1, 1, 1]} : vector<1x10x22xf32> to vector<1x4x16xf32>
    %876 = vector.broadcast %874 : f32 to vector<1x4x16xf32>
    %877 = arith.mulf %876, %875 : vector<1x4x16xf32>
    %878 = arith.addf %873, %877 : vector<1x4x16xf32>
    %c1_264 = arith.constant 1 : index
    %c70_265 = arith.constant 70 : index
    %879 = memref.load %arg2[%c1_264, %c70_265] : memref<3x98xf32, #tpu.memory_space<smem>>
    %880 = vector.extract_strided_slice %524 {offsets = [0, 3, 0], sizes = [1, 4, 16], strides = [1, 1, 1]} : vector<1x10x22xf32> to vector<1x4x16xf32>
    %881 = vector.broadcast %879 : f32 to vector<1x4x16xf32>
    %882 = arith.mulf %881, %880 : vector<1x4x16xf32>
    %883 = arith.addf %878, %882 : vector<1x4x16xf32>
    %c1_266 = arith.constant 1 : index
    %c71_267 = arith.constant 71 : index
    %884 = memref.load %arg2[%c1_266, %c71_267] : memref<3x98xf32, #tpu.memory_space<smem>>
    %885 = vector.extract_strided_slice %524 {offsets = [0, 3, 1], sizes = [1, 4, 16], strides = [1, 1, 1]} : vector<1x10x22xf32> to vector<1x4x16xf32>
    %886 = vector.broadcast %884 : f32 to vector<1x4x16xf32>
    %887 = arith.mulf %886, %885 : vector<1x4x16xf32>
    %888 = arith.addf %883, %887 : vector<1x4x16xf32>
    %c1_268 = arith.constant 1 : index
    %c72_269 = arith.constant 72 : index
    %889 = memref.load %arg2[%c1_268, %c72_269] : memref<3x98xf32, #tpu.memory_space<smem>>
    %890 = vector.extract_strided_slice %524 {offsets = [0, 3, 2], sizes = [1, 4, 16], strides = [1, 1, 1]} : vector<1x10x22xf32> to vector<1x4x16xf32>
    %891 = vector.broadcast %889 : f32 to vector<1x4x16xf32>
    %892 = arith.mulf %891, %890 : vector<1x4x16xf32>
    %893 = arith.addf %888, %892 : vector<1x4x16xf32>
    %c1_270 = arith.constant 1 : index
    %c73_271 = arith.constant 73 : index
    %894 = memref.load %arg2[%c1_270, %c73_271] : memref<3x98xf32, #tpu.memory_space<smem>>
    %895 = vector.extract_strided_slice %524 {offsets = [0, 3, 3], sizes = [1, 4, 16], strides = [1, 1, 1]} : vector<1x10x22xf32> to vector<1x4x16xf32>
    %896 = vector.broadcast %894 : f32 to vector<1x4x16xf32>
    %897 = arith.mulf %896, %895 : vector<1x4x16xf32>
    %898 = arith.addf %893, %897 : vector<1x4x16xf32>
    %c1_272 = arith.constant 1 : index
    %c74_273 = arith.constant 74 : index
    %899 = memref.load %arg2[%c1_272, %c74_273] : memref<3x98xf32, #tpu.memory_space<smem>>
    %900 = vector.extract_strided_slice %524 {offsets = [0, 3, 4], sizes = [1, 4, 16], strides = [1, 1, 1]} : vector<1x10x22xf32> to vector<1x4x16xf32>
    %901 = vector.broadcast %899 : f32 to vector<1x4x16xf32>
    %902 = arith.mulf %901, %900 : vector<1x4x16xf32>
    %903 = arith.addf %898, %902 : vector<1x4x16xf32>
    %c1_274 = arith.constant 1 : index
    %c75_275 = arith.constant 75 : index
    %904 = memref.load %arg2[%c1_274, %c75_275] : memref<3x98xf32, #tpu.memory_space<smem>>
    %905 = vector.extract_strided_slice %524 {offsets = [0, 3, 5], sizes = [1, 4, 16], strides = [1, 1, 1]} : vector<1x10x22xf32> to vector<1x4x16xf32>
    %906 = vector.broadcast %904 : f32 to vector<1x4x16xf32>
    %907 = arith.mulf %906, %905 : vector<1x4x16xf32>
    %908 = arith.addf %903, %907 : vector<1x4x16xf32>
    %c1_276 = arith.constant 1 : index
    %c76_277 = arith.constant 76 : index
    %909 = memref.load %arg2[%c1_276, %c76_277] : memref<3x98xf32, #tpu.memory_space<smem>>
    %910 = vector.extract_strided_slice %524 {offsets = [0, 3, 6], sizes = [1, 4, 16], strides = [1, 1, 1]} : vector<1x10x22xf32> to vector<1x4x16xf32>
    %911 = vector.broadcast %909 : f32 to vector<1x4x16xf32>
    %912 = arith.mulf %911, %910 : vector<1x4x16xf32>
    %913 = arith.addf %908, %912 : vector<1x4x16xf32>
    %c1_278 = arith.constant 1 : index
    %c77_279 = arith.constant 77 : index
    %914 = memref.load %arg2[%c1_278, %c77_279] : memref<3x98xf32, #tpu.memory_space<smem>>
    %915 = vector.extract_strided_slice %524 {offsets = [0, 4, 0], sizes = [1, 4, 16], strides = [1, 1, 1]} : vector<1x10x22xf32> to vector<1x4x16xf32>
    %916 = vector.broadcast %914 : f32 to vector<1x4x16xf32>
    %917 = arith.mulf %916, %915 : vector<1x4x16xf32>
    %918 = arith.addf %913, %917 : vector<1x4x16xf32>
    %c1_280 = arith.constant 1 : index
    %c78_281 = arith.constant 78 : index
    %919 = memref.load %arg2[%c1_280, %c78_281] : memref<3x98xf32, #tpu.memory_space<smem>>
    %920 = vector.extract_strided_slice %524 {offsets = [0, 4, 1], sizes = [1, 4, 16], strides = [1, 1, 1]} : vector<1x10x22xf32> to vector<1x4x16xf32>
    %921 = vector.broadcast %919 : f32 to vector<1x4x16xf32>
    %922 = arith.mulf %921, %920 : vector<1x4x16xf32>
    %923 = arith.addf %918, %922 : vector<1x4x16xf32>
    %c1_282 = arith.constant 1 : index
    %c79_283 = arith.constant 79 : index
    %924 = memref.load %arg2[%c1_282, %c79_283] : memref<3x98xf32, #tpu.memory_space<smem>>
    %925 = vector.extract_strided_slice %524 {offsets = [0, 4, 2], sizes = [1, 4, 16], strides = [1, 1, 1]} : vector<1x10x22xf32> to vector<1x4x16xf32>
    %926 = vector.broadcast %924 : f32 to vector<1x4x16xf32>
    %927 = arith.mulf %926, %925 : vector<1x4x16xf32>
    %928 = arith.addf %923, %927 : vector<1x4x16xf32>
    %c1_284 = arith.constant 1 : index
    %c80_285 = arith.constant 80 : index
    %929 = memref.load %arg2[%c1_284, %c80_285] : memref<3x98xf32, #tpu.memory_space<smem>>
    %930 = vector.extract_strided_slice %524 {offsets = [0, 4, 3], sizes = [1, 4, 16], strides = [1, 1, 1]} : vector<1x10x22xf32> to vector<1x4x16xf32>
    %931 = vector.broadcast %929 : f32 to vector<1x4x16xf32>
    %932 = arith.mulf %931, %930 : vector<1x4x16xf32>
    %933 = arith.addf %928, %932 : vector<1x4x16xf32>
    %c1_286 = arith.constant 1 : index
    %c81_287 = arith.constant 81 : index
    %934 = memref.load %arg2[%c1_286, %c81_287] : memref<3x98xf32, #tpu.memory_space<smem>>
    %935 = vector.extract_strided_slice %524 {offsets = [0, 4, 4], sizes = [1, 4, 16], strides = [1, 1, 1]} : vector<1x10x22xf32> to vector<1x4x16xf32>
    %936 = vector.broadcast %934 : f32 to vector<1x4x16xf32>
    %937 = arith.mulf %936, %935 : vector<1x4x16xf32>
    %938 = arith.addf %933, %937 : vector<1x4x16xf32>
    %c1_288 = arith.constant 1 : index
    %c82_289 = arith.constant 82 : index
    %939 = memref.load %arg2[%c1_288, %c82_289] : memref<3x98xf32, #tpu.memory_space<smem>>
    %940 = vector.extract_strided_slice %524 {offsets = [0, 4, 5], sizes = [1, 4, 16], strides = [1, 1, 1]} : vector<1x10x22xf32> to vector<1x4x16xf32>
    %941 = vector.broadcast %939 : f32 to vector<1x4x16xf32>
    %942 = arith.mulf %941, %940 : vector<1x4x16xf32>
    %943 = arith.addf %938, %942 : vector<1x4x16xf32>
    %c1_290 = arith.constant 1 : index
    %c83_291 = arith.constant 83 : index
    %944 = memref.load %arg2[%c1_290, %c83_291] : memref<3x98xf32, #tpu.memory_space<smem>>
    %945 = vector.extract_strided_slice %524 {offsets = [0, 4, 6], sizes = [1, 4, 16], strides = [1, 1, 1]} : vector<1x10x22xf32> to vector<1x4x16xf32>
    %946 = vector.broadcast %944 : f32 to vector<1x4x16xf32>
    %947 = arith.mulf %946, %945 : vector<1x4x16xf32>
    %948 = arith.addf %943, %947 : vector<1x4x16xf32>
    %c1_292 = arith.constant 1 : index
    %c84_293 = arith.constant 84 : index
    %949 = memref.load %arg2[%c1_292, %c84_293] : memref<3x98xf32, #tpu.memory_space<smem>>
    %950 = vector.extract_strided_slice %524 {offsets = [0, 5, 0], sizes = [1, 4, 16], strides = [1, 1, 1]} : vector<1x10x22xf32> to vector<1x4x16xf32>
    %951 = vector.broadcast %949 : f32 to vector<1x4x16xf32>
    %952 = arith.mulf %951, %950 : vector<1x4x16xf32>
    %953 = arith.addf %948, %952 : vector<1x4x16xf32>
    %c1_294 = arith.constant 1 : index
    %c85_295 = arith.constant 85 : index
    %954 = memref.load %arg2[%c1_294, %c85_295] : memref<3x98xf32, #tpu.memory_space<smem>>
    %955 = vector.extract_strided_slice %524 {offsets = [0, 5, 1], sizes = [1, 4, 16], strides = [1, 1, 1]} : vector<1x10x22xf32> to vector<1x4x16xf32>
    %956 = vector.broadcast %954 : f32 to vector<1x4x16xf32>
    %957 = arith.mulf %956, %955 : vector<1x4x16xf32>
    %958 = arith.addf %953, %957 : vector<1x4x16xf32>
    %c1_296 = arith.constant 1 : index
    %c86_297 = arith.constant 86 : index
    %959 = memref.load %arg2[%c1_296, %c86_297] : memref<3x98xf32, #tpu.memory_space<smem>>
    %960 = vector.extract_strided_slice %524 {offsets = [0, 5, 2], sizes = [1, 4, 16], strides = [1, 1, 1]} : vector<1x10x22xf32> to vector<1x4x16xf32>
    %961 = vector.broadcast %959 : f32 to vector<1x4x16xf32>
    %962 = arith.mulf %961, %960 : vector<1x4x16xf32>
    %963 = arith.addf %958, %962 : vector<1x4x16xf32>
    %c1_298 = arith.constant 1 : index
    %c87_299 = arith.constant 87 : index
    %964 = memref.load %arg2[%c1_298, %c87_299] : memref<3x98xf32, #tpu.memory_space<smem>>
    %965 = vector.extract_strided_slice %524 {offsets = [0, 5, 3], sizes = [1, 4, 16], strides = [1, 1, 1]} : vector<1x10x22xf32> to vector<1x4x16xf32>
    %966 = vector.broadcast %964 : f32 to vector<1x4x16xf32>
    %967 = arith.mulf %966, %965 : vector<1x4x16xf32>
    %968 = arith.addf %963, %967 : vector<1x4x16xf32>
    %c1_300 = arith.constant 1 : index
    %c88_301 = arith.constant 88 : index
    %969 = memref.load %arg2[%c1_300, %c88_301] : memref<3x98xf32, #tpu.memory_space<smem>>
    %970 = vector.extract_strided_slice %524 {offsets = [0, 5, 4], sizes = [1, 4, 16], strides = [1, 1, 1]} : vector<1x10x22xf32> to vector<1x4x16xf32>
    %971 = vector.broadcast %969 : f32 to vector<1x4x16xf32>
    %972 = arith.mulf %971, %970 : vector<1x4x16xf32>
    %973 = arith.addf %968, %972 : vector<1x4x16xf32>
    %c1_302 = arith.constant 1 : index
    %c89_303 = arith.constant 89 : index
    %974 = memref.load %arg2[%c1_302, %c89_303] : memref<3x98xf32, #tpu.memory_space<smem>>
    %975 = vector.extract_strided_slice %524 {offsets = [0, 5, 5], sizes = [1, 4, 16], strides = [1, 1, 1]} : vector<1x10x22xf32> to vector<1x4x16xf32>
    %976 = vector.broadcast %974 : f32 to vector<1x4x16xf32>
    %977 = arith.mulf %976, %975 : vector<1x4x16xf32>
    %978 = arith.addf %973, %977 : vector<1x4x16xf32>
    %c1_304 = arith.constant 1 : index
    %c90_305 = arith.constant 90 : index
    %979 = memref.load %arg2[%c1_304, %c90_305] : memref<3x98xf32, #tpu.memory_space<smem>>
    %980 = vector.extract_strided_slice %524 {offsets = [0, 5, 6], sizes = [1, 4, 16], strides = [1, 1, 1]} : vector<1x10x22xf32> to vector<1x4x16xf32>
    %981 = vector.broadcast %979 : f32 to vector<1x4x16xf32>
    %982 = arith.mulf %981, %980 : vector<1x4x16xf32>
    %983 = arith.addf %978, %982 : vector<1x4x16xf32>
    %c1_306 = arith.constant 1 : index
    %c91_307 = arith.constant 91 : index
    %984 = memref.load %arg2[%c1_306, %c91_307] : memref<3x98xf32, #tpu.memory_space<smem>>
    %985 = vector.extract_strided_slice %524 {offsets = [0, 6, 0], sizes = [1, 4, 16], strides = [1, 1, 1]} : vector<1x10x22xf32> to vector<1x4x16xf32>
    %986 = vector.broadcast %984 : f32 to vector<1x4x16xf32>
    %987 = arith.mulf %986, %985 : vector<1x4x16xf32>
    %988 = arith.addf %983, %987 : vector<1x4x16xf32>
    %c1_308 = arith.constant 1 : index
    %c92_309 = arith.constant 92 : index
    %989 = memref.load %arg2[%c1_308, %c92_309] : memref<3x98xf32, #tpu.memory_space<smem>>
    %990 = vector.extract_strided_slice %524 {offsets = [0, 6, 1], sizes = [1, 4, 16], strides = [1, 1, 1]} : vector<1x10x22xf32> to vector<1x4x16xf32>
    %991 = vector.broadcast %989 : f32 to vector<1x4x16xf32>
    %992 = arith.mulf %991, %990 : vector<1x4x16xf32>
    %993 = arith.addf %988, %992 : vector<1x4x16xf32>
    %c1_310 = arith.constant 1 : index
    %c93_311 = arith.constant 93 : index
    %994 = memref.load %arg2[%c1_310, %c93_311] : memref<3x98xf32, #tpu.memory_space<smem>>
    %995 = vector.extract_strided_slice %524 {offsets = [0, 6, 2], sizes = [1, 4, 16], strides = [1, 1, 1]} : vector<1x10x22xf32> to vector<1x4x16xf32>
    %996 = vector.broadcast %994 : f32 to vector<1x4x16xf32>
    %997 = arith.mulf %996, %995 : vector<1x4x16xf32>
    %998 = arith.addf %993, %997 : vector<1x4x16xf32>
    %c1_312 = arith.constant 1 : index
    %c94_313 = arith.constant 94 : index
    %999 = memref.load %arg2[%c1_312, %c94_313] : memref<3x98xf32, #tpu.memory_space<smem>>
    %1000 = vector.extract_strided_slice %524 {offsets = [0, 6, 3], sizes = [1, 4, 16], strides = [1, 1, 1]} : vector<1x10x22xf32> to vector<1x4x16xf32>
    %1001 = vector.broadcast %999 : f32 to vector<1x4x16xf32>
    %1002 = arith.mulf %1001, %1000 : vector<1x4x16xf32>
    %1003 = arith.addf %998, %1002 : vector<1x4x16xf32>
    %c1_314 = arith.constant 1 : index
    %c95_315 = arith.constant 95 : index
    %1004 = memref.load %arg2[%c1_314, %c95_315] : memref<3x98xf32, #tpu.memory_space<smem>>
    %1005 = vector.extract_strided_slice %524 {offsets = [0, 6, 4], sizes = [1, 4, 16], strides = [1, 1, 1]} : vector<1x10x22xf32> to vector<1x4x16xf32>
    %1006 = vector.broadcast %1004 : f32 to vector<1x4x16xf32>
    %1007 = arith.mulf %1006, %1005 : vector<1x4x16xf32>
    %1008 = arith.addf %1003, %1007 : vector<1x4x16xf32>
    %c1_316 = arith.constant 1 : index
    %c96_317 = arith.constant 96 : index
    %1009 = memref.load %arg2[%c1_316, %c96_317] : memref<3x98xf32, #tpu.memory_space<smem>>
    %1010 = vector.extract_strided_slice %524 {offsets = [0, 6, 5], sizes = [1, 4, 16], strides = [1, 1, 1]} : vector<1x10x22xf32> to vector<1x4x16xf32>
    %1011 = vector.broadcast %1009 : f32 to vector<1x4x16xf32>
    %1012 = arith.mulf %1011, %1010 : vector<1x4x16xf32>
    %1013 = arith.addf %1008, %1012 : vector<1x4x16xf32>
    %c1_318 = arith.constant 1 : index
    %c97_319 = arith.constant 97 : index
    %1014 = memref.load %arg2[%c1_318, %c97_319] : memref<3x98xf32, #tpu.memory_space<smem>>
    %1015 = vector.extract_strided_slice %524 {offsets = [0, 6, 6], sizes = [1, 4, 16], strides = [1, 1, 1]} : vector<1x10x22xf32> to vector<1x4x16xf32>
    %1016 = vector.broadcast %1014 : f32 to vector<1x4x16xf32>
    %1017 = arith.mulf %1016, %1015 : vector<1x4x16xf32>
    %1018 = arith.addf %1013, %1017 : vector<1x4x16xf32>
    %1019 = arith.negf %1018 : vector<1x4x16xf32>
    %1020 = math.exp %1019 : vector<1x4x16xf32>
    %cst_320 = arith.constant 1.000000e+00 : f32
    %1021 = vector.broadcast %cst_320 : f32 to vector<1x4x16xf32>
    %1022 = arith.addf %1021, %1020 : vector<1x4x16xf32>
    %1023 = arith.divf %1021, %1022 : vector<1x4x16xf32>
    %c0_321 = arith.constant 0 : index
    %c0_322 = arith.constant 0 : index
    %c0_323 = arith.constant 0 : index
    %c0_324 = arith.constant 0 : index
    %1024 = vector.load %arg1[%c0_321, %c0_322, %c0_323, %c0_324] : memref<1x4x16x16xf32, #tpu.memory_space<vmem>>, vector<1x4x16x16xf32>
    %cst_325 = arith.constant dense<0xFF800000> : vector<1x16x16xf32>
    %1025 = vector.multi_reduction <maximumf>, %1024, %cst_325 [1] : vector<1x4x16x16xf32> to vector<1x16x16xf32>
    %cst_326 = arith.constant dense<0.000000e+00> : vector<1x16x16xf32>
    %1026 = vector.multi_reduction <add>, %1024, %cst_326 [1] : vector<1x4x16x16xf32> to vector<1x16x16xf32>
    %cst_327 = arith.constant 4.000000e+00 : f32
    %1027 = vector.broadcast %cst_327 : f32 to vector<1x16x16xf32>
    %1028 = arith.divf %1026, %1027 : vector<1x16x16xf32>
    %cst_328 = arith.constant 0.000000e+00 : f32
    %1029 = vector.broadcast %cst_328 : f32 to vector<1x3x16xf32>
    %1030 = tpu.concatenate %1029, %1025, %1029 in 1 : vector<1x3x16xf32>, vector<1x16x16xf32>, vector<1x3x16xf32> -> vector<1x22x16xf32>
    %cst_329 = arith.constant 0.000000e+00 : f32
    %1031 = vector.broadcast %cst_329 : f32 to vector<1x22x3xf32>
    %1032 = tpu.concatenate %1031, %1030, %1031 in 2 : vector<1x22x3xf32>, vector<1x22x16xf32>, vector<1x22x3xf32> -> vector<1x22x22xf32>
    %cst_330 = arith.constant 0.000000e+00 : f32
    %1033 = vector.broadcast %cst_330 : f32 to vector<1x3x16xf32>
    %1034 = tpu.concatenate %1033, %1028, %1033 in 1 : vector<1x3x16xf32>, vector<1x16x16xf32>, vector<1x3x16xf32> -> vector<1x22x16xf32>
    %cst_331 = arith.constant 0.000000e+00 : f32
    %1035 = vector.broadcast %cst_331 : f32 to vector<1x22x3xf32>
    %1036 = tpu.concatenate %1035, %1034, %1035 in 2 : vector<1x22x3xf32>, vector<1x22x16xf32>, vector<1x22x3xf32> -> vector<1x22x22xf32>
    %c2_332 = arith.constant 2 : index
    %1037 = memref.load %arg3[%c2_332] : memref<3xf32, #tpu.memory_space<smem>>
    %cst_333 = arith.constant 0.000000e+00 : f32
    %1038 = vector.broadcast %cst_333 : f32 to vector<1x16x16xf32>
    %1039 = vector.broadcast %1037 : f32 to vector<1x16x16xf32>
    %1040 = arith.addf %1039, %1038 : vector<1x16x16xf32>
    %c2_334 = arith.constant 2 : index
    %c0_335 = arith.constant 0 : index
    %1041 = memref.load %arg2[%c2_334, %c0_335] : memref<3x98xf32, #tpu.memory_space<smem>>
    %1042 = vector.extract_strided_slice %1032 {offsets = [0, 0, 0], sizes = [1, 16, 16], strides = [1, 1, 1]} : vector<1x22x22xf32> to vector<1x16x16xf32>
    %1043 = vector.broadcast %1041 : f32 to vector<1x16x16xf32>
    %1044 = arith.mulf %1043, %1042 : vector<1x16x16xf32>
    %1045 = arith.addf %1040, %1044 : vector<1x16x16xf32>
    %c2_336 = arith.constant 2 : index
    %c1_337 = arith.constant 1 : index
    %1046 = memref.load %arg2[%c2_336, %c1_337] : memref<3x98xf32, #tpu.memory_space<smem>>
    %1047 = vector.extract_strided_slice %1032 {offsets = [0, 0, 1], sizes = [1, 16, 16], strides = [1, 1, 1]} : vector<1x22x22xf32> to vector<1x16x16xf32>
    %1048 = vector.broadcast %1046 : f32 to vector<1x16x16xf32>
    %1049 = arith.mulf %1048, %1047 : vector<1x16x16xf32>
    %1050 = arith.addf %1045, %1049 : vector<1x16x16xf32>
    %c2_338 = arith.constant 2 : index
    %c2_339 = arith.constant 2 : index
    %1051 = memref.load %arg2[%c2_338, %c2_339] : memref<3x98xf32, #tpu.memory_space<smem>>
    %1052 = vector.extract_strided_slice %1032 {offsets = [0, 0, 2], sizes = [1, 16, 16], strides = [1, 1, 1]} : vector<1x22x22xf32> to vector<1x16x16xf32>
    %1053 = vector.broadcast %1051 : f32 to vector<1x16x16xf32>
    %1054 = arith.mulf %1053, %1052 : vector<1x16x16xf32>
    %1055 = arith.addf %1050, %1054 : vector<1x16x16xf32>
    %c2_340 = arith.constant 2 : index
    %c3_341 = arith.constant 3 : index
    %1056 = memref.load %arg2[%c2_340, %c3_341] : memref<3x98xf32, #tpu.memory_space<smem>>
    %1057 = vector.extract_strided_slice %1032 {offsets = [0, 0, 3], sizes = [1, 16, 16], strides = [1, 1, 1]} : vector<1x22x22xf32> to vector<1x16x16xf32>
    %1058 = vector.broadcast %1056 : f32 to vector<1x16x16xf32>
    %1059 = arith.mulf %1058, %1057 : vector<1x16x16xf32>
    %1060 = arith.addf %1055, %1059 : vector<1x16x16xf32>
    %c2_342 = arith.constant 2 : index
    %c4_343 = arith.constant 4 : index
    %1061 = memref.load %arg2[%c2_342, %c4_343] : memref<3x98xf32, #tpu.memory_space<smem>>
    %1062 = vector.extract_strided_slice %1032 {offsets = [0, 0, 4], sizes = [1, 16, 16], strides = [1, 1, 1]} : vector<1x22x22xf32> to vector<1x16x16xf32>
    %1063 = vector.broadcast %1061 : f32 to vector<1x16x16xf32>
    %1064 = arith.mulf %1063, %1062 : vector<1x16x16xf32>
    %1065 = arith.addf %1060, %1064 : vector<1x16x16xf32>
    %c2_344 = arith.constant 2 : index
    %c5_345 = arith.constant 5 : index
    %1066 = memref.load %arg2[%c2_344, %c5_345] : memref<3x98xf32, #tpu.memory_space<smem>>
    %1067 = vector.extract_strided_slice %1032 {offsets = [0, 0, 5], sizes = [1, 16, 16], strides = [1, 1, 1]} : vector<1x22x22xf32> to vector<1x16x16xf32>
    %1068 = vector.broadcast %1066 : f32 to vector<1x16x16xf32>
    %1069 = arith.mulf %1068, %1067 : vector<1x16x16xf32>
    %1070 = arith.addf %1065, %1069 : vector<1x16x16xf32>
    %c2_346 = arith.constant 2 : index
    %c6_347 = arith.constant 6 : index
    %1071 = memref.load %arg2[%c2_346, %c6_347] : memref<3x98xf32, #tpu.memory_space<smem>>
    %1072 = vector.extract_strided_slice %1032 {offsets = [0, 0, 6], sizes = [1, 16, 16], strides = [1, 1, 1]} : vector<1x22x22xf32> to vector<1x16x16xf32>
    %1073 = vector.broadcast %1071 : f32 to vector<1x16x16xf32>
    %1074 = arith.mulf %1073, %1072 : vector<1x16x16xf32>
    %1075 = arith.addf %1070, %1074 : vector<1x16x16xf32>
    %c2_348 = arith.constant 2 : index
    %c7_349 = arith.constant 7 : index
    %1076 = memref.load %arg2[%c2_348, %c7_349] : memref<3x98xf32, #tpu.memory_space<smem>>
    %1077 = vector.extract_strided_slice %1032 {offsets = [0, 1, 0], sizes = [1, 16, 16], strides = [1, 1, 1]} : vector<1x22x22xf32> to vector<1x16x16xf32>
    %1078 = vector.broadcast %1076 : f32 to vector<1x16x16xf32>
    %1079 = arith.mulf %1078, %1077 : vector<1x16x16xf32>
    %1080 = arith.addf %1075, %1079 : vector<1x16x16xf32>
    %c2_350 = arith.constant 2 : index
    %c8_351 = arith.constant 8 : index
    %1081 = memref.load %arg2[%c2_350, %c8_351] : memref<3x98xf32, #tpu.memory_space<smem>>
    %1082 = vector.extract_strided_slice %1032 {offsets = [0, 1, 1], sizes = [1, 16, 16], strides = [1, 1, 1]} : vector<1x22x22xf32> to vector<1x16x16xf32>
    %1083 = vector.broadcast %1081 : f32 to vector<1x16x16xf32>
    %1084 = arith.mulf %1083, %1082 : vector<1x16x16xf32>
    %1085 = arith.addf %1080, %1084 : vector<1x16x16xf32>
    %c2_352 = arith.constant 2 : index
    %c9_353 = arith.constant 9 : index
    %1086 = memref.load %arg2[%c2_352, %c9_353] : memref<3x98xf32, #tpu.memory_space<smem>>
    %1087 = vector.extract_strided_slice %1032 {offsets = [0, 1, 2], sizes = [1, 16, 16], strides = [1, 1, 1]} : vector<1x22x22xf32> to vector<1x16x16xf32>
    %1088 = vector.broadcast %1086 : f32 to vector<1x16x16xf32>
    %1089 = arith.mulf %1088, %1087 : vector<1x16x16xf32>
    %1090 = arith.addf %1085, %1089 : vector<1x16x16xf32>
    %c2_354 = arith.constant 2 : index
    %c10_355 = arith.constant 10 : index
    %1091 = memref.load %arg2[%c2_354, %c10_355] : memref<3x98xf32, #tpu.memory_space<smem>>
    %1092 = vector.extract_strided_slice %1032 {offsets = [0, 1, 3], sizes = [1, 16, 16], strides = [1, 1, 1]} : vector<1x22x22xf32> to vector<1x16x16xf32>
    %1093 = vector.broadcast %1091 : f32 to vector<1x16x16xf32>
    %1094 = arith.mulf %1093, %1092 : vector<1x16x16xf32>
    %1095 = arith.addf %1090, %1094 : vector<1x16x16xf32>
    %c2_356 = arith.constant 2 : index
    %c11_357 = arith.constant 11 : index
    %1096 = memref.load %arg2[%c2_356, %c11_357] : memref<3x98xf32, #tpu.memory_space<smem>>
    %1097 = vector.extract_strided_slice %1032 {offsets = [0, 1, 4], sizes = [1, 16, 16], strides = [1, 1, 1]} : vector<1x22x22xf32> to vector<1x16x16xf32>
    %1098 = vector.broadcast %1096 : f32 to vector<1x16x16xf32>
    %1099 = arith.mulf %1098, %1097 : vector<1x16x16xf32>
    %1100 = arith.addf %1095, %1099 : vector<1x16x16xf32>
    %c2_358 = arith.constant 2 : index
    %c12_359 = arith.constant 12 : index
    %1101 = memref.load %arg2[%c2_358, %c12_359] : memref<3x98xf32, #tpu.memory_space<smem>>
    %1102 = vector.extract_strided_slice %1032 {offsets = [0, 1, 5], sizes = [1, 16, 16], strides = [1, 1, 1]} : vector<1x22x22xf32> to vector<1x16x16xf32>
    %1103 = vector.broadcast %1101 : f32 to vector<1x16x16xf32>
    %1104 = arith.mulf %1103, %1102 : vector<1x16x16xf32>
    %1105 = arith.addf %1100, %1104 : vector<1x16x16xf32>
    %c2_360 = arith.constant 2 : index
    %c13_361 = arith.constant 13 : index
    %1106 = memref.load %arg2[%c2_360, %c13_361] : memref<3x98xf32, #tpu.memory_space<smem>>
    %1107 = vector.extract_strided_slice %1032 {offsets = [0, 1, 6], sizes = [1, 16, 16], strides = [1, 1, 1]} : vector<1x22x22xf32> to vector<1x16x16xf32>
    %1108 = vector.broadcast %1106 : f32 to vector<1x16x16xf32>
    %1109 = arith.mulf %1108, %1107 : vector<1x16x16xf32>
    %1110 = arith.addf %1105, %1109 : vector<1x16x16xf32>
    %c2_362 = arith.constant 2 : index
    %c14_363 = arith.constant 14 : index
    %1111 = memref.load %arg2[%c2_362, %c14_363] : memref<3x98xf32, #tpu.memory_space<smem>>
    %1112 = vector.extract_strided_slice %1032 {offsets = [0, 2, 0], sizes = [1, 16, 16], strides = [1, 1, 1]} : vector<1x22x22xf32> to vector<1x16x16xf32>
    %1113 = vector.broadcast %1111 : f32 to vector<1x16x16xf32>
    %1114 = arith.mulf %1113, %1112 : vector<1x16x16xf32>
    %1115 = arith.addf %1110, %1114 : vector<1x16x16xf32>
    %c2_364 = arith.constant 2 : index
    %c15_365 = arith.constant 15 : index
    %1116 = memref.load %arg2[%c2_364, %c15_365] : memref<3x98xf32, #tpu.memory_space<smem>>
    %1117 = vector.extract_strided_slice %1032 {offsets = [0, 2, 1], sizes = [1, 16, 16], strides = [1, 1, 1]} : vector<1x22x22xf32> to vector<1x16x16xf32>
    %1118 = vector.broadcast %1116 : f32 to vector<1x16x16xf32>
    %1119 = arith.mulf %1118, %1117 : vector<1x16x16xf32>
    %1120 = arith.addf %1115, %1119 : vector<1x16x16xf32>
    %c2_366 = arith.constant 2 : index
    %c16_367 = arith.constant 16 : index
    %1121 = memref.load %arg2[%c2_366, %c16_367] : memref<3x98xf32, #tpu.memory_space<smem>>
    %1122 = vector.extract_strided_slice %1032 {offsets = [0, 2, 2], sizes = [1, 16, 16], strides = [1, 1, 1]} : vector<1x22x22xf32> to vector<1x16x16xf32>
    %1123 = vector.broadcast %1121 : f32 to vector<1x16x16xf32>
    %1124 = arith.mulf %1123, %1122 : vector<1x16x16xf32>
    %1125 = arith.addf %1120, %1124 : vector<1x16x16xf32>
    %c2_368 = arith.constant 2 : index
    %c17_369 = arith.constant 17 : index
    %1126 = memref.load %arg2[%c2_368, %c17_369] : memref<3x98xf32, #tpu.memory_space<smem>>
    %1127 = vector.extract_strided_slice %1032 {offsets = [0, 2, 3], sizes = [1, 16, 16], strides = [1, 1, 1]} : vector<1x22x22xf32> to vector<1x16x16xf32>
    %1128 = vector.broadcast %1126 : f32 to vector<1x16x16xf32>
    %1129 = arith.mulf %1128, %1127 : vector<1x16x16xf32>
    %1130 = arith.addf %1125, %1129 : vector<1x16x16xf32>
    %c2_370 = arith.constant 2 : index
    %c18_371 = arith.constant 18 : index
    %1131 = memref.load %arg2[%c2_370, %c18_371] : memref<3x98xf32, #tpu.memory_space<smem>>
    %1132 = vector.extract_strided_slice %1032 {offsets = [0, 2, 4], sizes = [1, 16, 16], strides = [1, 1, 1]} : vector<1x22x22xf32> to vector<1x16x16xf32>
    %1133 = vector.broadcast %1131 : f32 to vector<1x16x16xf32>
    %1134 = arith.mulf %1133, %1132 : vector<1x16x16xf32>
    %1135 = arith.addf %1130, %1134 : vector<1x16x16xf32>
    %c2_372 = arith.constant 2 : index
    %c19_373 = arith.constant 19 : index
    %1136 = memref.load %arg2[%c2_372, %c19_373] : memref<3x98xf32, #tpu.memory_space<smem>>
    %1137 = vector.extract_strided_slice %1032 {offsets = [0, 2, 5], sizes = [1, 16, 16], strides = [1, 1, 1]} : vector<1x22x22xf32> to vector<1x16x16xf32>
    %1138 = vector.broadcast %1136 : f32 to vector<1x16x16xf32>
    %1139 = arith.mulf %1138, %1137 : vector<1x16x16xf32>
    %1140 = arith.addf %1135, %1139 : vector<1x16x16xf32>
    %c2_374 = arith.constant 2 : index
    %c20_375 = arith.constant 20 : index
    %1141 = memref.load %arg2[%c2_374, %c20_375] : memref<3x98xf32, #tpu.memory_space<smem>>
    %1142 = vector.extract_strided_slice %1032 {offsets = [0, 2, 6], sizes = [1, 16, 16], strides = [1, 1, 1]} : vector<1x22x22xf32> to vector<1x16x16xf32>
    %1143 = vector.broadcast %1141 : f32 to vector<1x16x16xf32>
    %1144 = arith.mulf %1143, %1142 : vector<1x16x16xf32>
    %1145 = arith.addf %1140, %1144 : vector<1x16x16xf32>
    %c2_376 = arith.constant 2 : index
    %c21_377 = arith.constant 21 : index
    %1146 = memref.load %arg2[%c2_376, %c21_377] : memref<3x98xf32, #tpu.memory_space<smem>>
    %1147 = vector.extract_strided_slice %1032 {offsets = [0, 3, 0], sizes = [1, 16, 16], strides = [1, 1, 1]} : vector<1x22x22xf32> to vector<1x16x16xf32>
    %1148 = vector.broadcast %1146 : f32 to vector<1x16x16xf32>
    %1149 = arith.mulf %1148, %1147 : vector<1x16x16xf32>
    %1150 = arith.addf %1145, %1149 : vector<1x16x16xf32>
    %c2_378 = arith.constant 2 : index
    %c22_379 = arith.constant 22 : index
    %1151 = memref.load %arg2[%c2_378, %c22_379] : memref<3x98xf32, #tpu.memory_space<smem>>
    %1152 = vector.extract_strided_slice %1032 {offsets = [0, 3, 1], sizes = [1, 16, 16], strides = [1, 1, 1]} : vector<1x22x22xf32> to vector<1x16x16xf32>
    %1153 = vector.broadcast %1151 : f32 to vector<1x16x16xf32>
    %1154 = arith.mulf %1153, %1152 : vector<1x16x16xf32>
    %1155 = arith.addf %1150, %1154 : vector<1x16x16xf32>
    %c2_380 = arith.constant 2 : index
    %c23_381 = arith.constant 23 : index
    %1156 = memref.load %arg2[%c2_380, %c23_381] : memref<3x98xf32, #tpu.memory_space<smem>>
    %1157 = vector.extract_strided_slice %1032 {offsets = [0, 3, 2], sizes = [1, 16, 16], strides = [1, 1, 1]} : vector<1x22x22xf32> to vector<1x16x16xf32>
    %1158 = vector.broadcast %1156 : f32 to vector<1x16x16xf32>
    %1159 = arith.mulf %1158, %1157 : vector<1x16x16xf32>
    %1160 = arith.addf %1155, %1159 : vector<1x16x16xf32>
    %c2_382 = arith.constant 2 : index
    %c24_383 = arith.constant 24 : index
    %1161 = memref.load %arg2[%c2_382, %c24_383] : memref<3x98xf32, #tpu.memory_space<smem>>
    %1162 = vector.extract_strided_slice %1032 {offsets = [0, 3, 3], sizes = [1, 16, 16], strides = [1, 1, 1]} : vector<1x22x22xf32> to vector<1x16x16xf32>
    %1163 = vector.broadcast %1161 : f32 to vector<1x16x16xf32>
    %1164 = arith.mulf %1163, %1162 : vector<1x16x16xf32>
    %1165 = arith.addf %1160, %1164 : vector<1x16x16xf32>
    %c2_384 = arith.constant 2 : index
    %c25_385 = arith.constant 25 : index
    %1166 = memref.load %arg2[%c2_384, %c25_385] : memref<3x98xf32, #tpu.memory_space<smem>>
    %1167 = vector.extract_strided_slice %1032 {offsets = [0, 3, 4], sizes = [1, 16, 16], strides = [1, 1, 1]} : vector<1x22x22xf32> to vector<1x16x16xf32>
    %1168 = vector.broadcast %1166 : f32 to vector<1x16x16xf32>
    %1169 = arith.mulf %1168, %1167 : vector<1x16x16xf32>
    %1170 = arith.addf %1165, %1169 : vector<1x16x16xf32>
    %c2_386 = arith.constant 2 : index
    %c26_387 = arith.constant 26 : index
    %1171 = memref.load %arg2[%c2_386, %c26_387] : memref<3x98xf32, #tpu.memory_space<smem>>
    %1172 = vector.extract_strided_slice %1032 {offsets = [0, 3, 5], sizes = [1, 16, 16], strides = [1, 1, 1]} : vector<1x22x22xf32> to vector<1x16x16xf32>
    %1173 = vector.broadcast %1171 : f32 to vector<1x16x16xf32>
    %1174 = arith.mulf %1173, %1172 : vector<1x16x16xf32>
    %1175 = arith.addf %1170, %1174 : vector<1x16x16xf32>
    %c2_388 = arith.constant 2 : index
    %c27_389 = arith.constant 27 : index
    %1176 = memref.load %arg2[%c2_388, %c27_389] : memref<3x98xf32, #tpu.memory_space<smem>>
    %1177 = vector.extract_strided_slice %1032 {offsets = [0, 3, 6], sizes = [1, 16, 16], strides = [1, 1, 1]} : vector<1x22x22xf32> to vector<1x16x16xf32>
    %1178 = vector.broadcast %1176 : f32 to vector<1x16x16xf32>
    %1179 = arith.mulf %1178, %1177 : vector<1x16x16xf32>
    %1180 = arith.addf %1175, %1179 : vector<1x16x16xf32>
    %c2_390 = arith.constant 2 : index
    %c28_391 = arith.constant 28 : index
    %1181 = memref.load %arg2[%c2_390, %c28_391] : memref<3x98xf32, #tpu.memory_space<smem>>
    %1182 = vector.extract_strided_slice %1032 {offsets = [0, 4, 0], sizes = [1, 16, 16], strides = [1, 1, 1]} : vector<1x22x22xf32> to vector<1x16x16xf32>
    %1183 = vector.broadcast %1181 : f32 to vector<1x16x16xf32>
    %1184 = arith.mulf %1183, %1182 : vector<1x16x16xf32>
    %1185 = arith.addf %1180, %1184 : vector<1x16x16xf32>
    %c2_392 = arith.constant 2 : index
    %c29_393 = arith.constant 29 : index
    %1186 = memref.load %arg2[%c2_392, %c29_393] : memref<3x98xf32, #tpu.memory_space<smem>>
    %1187 = vector.extract_strided_slice %1032 {offsets = [0, 4, 1], sizes = [1, 16, 16], strides = [1, 1, 1]} : vector<1x22x22xf32> to vector<1x16x16xf32>
    %1188 = vector.broadcast %1186 : f32 to vector<1x16x16xf32>
    %1189 = arith.mulf %1188, %1187 : vector<1x16x16xf32>
    %1190 = arith.addf %1185, %1189 : vector<1x16x16xf32>
    %c2_394 = arith.constant 2 : index
    %c30_395 = arith.constant 30 : index
    %1191 = memref.load %arg2[%c2_394, %c30_395] : memref<3x98xf32, #tpu.memory_space<smem>>
    %1192 = vector.extract_strided_slice %1032 {offsets = [0, 4, 2], sizes = [1, 16, 16], strides = [1, 1, 1]} : vector<1x22x22xf32> to vector<1x16x16xf32>
    %1193 = vector.broadcast %1191 : f32 to vector<1x16x16xf32>
    %1194 = arith.mulf %1193, %1192 : vector<1x16x16xf32>
    %1195 = arith.addf %1190, %1194 : vector<1x16x16xf32>
    %c2_396 = arith.constant 2 : index
    %c31_397 = arith.constant 31 : index
    %1196 = memref.load %arg2[%c2_396, %c31_397] : memref<3x98xf32, #tpu.memory_space<smem>>
    %1197 = vector.extract_strided_slice %1032 {offsets = [0, 4, 3], sizes = [1, 16, 16], strides = [1, 1, 1]} : vector<1x22x22xf32> to vector<1x16x16xf32>
    %1198 = vector.broadcast %1196 : f32 to vector<1x16x16xf32>
    %1199 = arith.mulf %1198, %1197 : vector<1x16x16xf32>
    %1200 = arith.addf %1195, %1199 : vector<1x16x16xf32>
    %c2_398 = arith.constant 2 : index
    %c32_399 = arith.constant 32 : index
    %1201 = memref.load %arg2[%c2_398, %c32_399] : memref<3x98xf32, #tpu.memory_space<smem>>
    %1202 = vector.extract_strided_slice %1032 {offsets = [0, 4, 4], sizes = [1, 16, 16], strides = [1, 1, 1]} : vector<1x22x22xf32> to vector<1x16x16xf32>
    %1203 = vector.broadcast %1201 : f32 to vector<1x16x16xf32>
    %1204 = arith.mulf %1203, %1202 : vector<1x16x16xf32>
    %1205 = arith.addf %1200, %1204 : vector<1x16x16xf32>
    %c2_400 = arith.constant 2 : index
    %c33_401 = arith.constant 33 : index
    %1206 = memref.load %arg2[%c2_400, %c33_401] : memref<3x98xf32, #tpu.memory_space<smem>>
    %1207 = vector.extract_strided_slice %1032 {offsets = [0, 4, 5], sizes = [1, 16, 16], strides = [1, 1, 1]} : vector<1x22x22xf32> to vector<1x16x16xf32>
    %1208 = vector.broadcast %1206 : f32 to vector<1x16x16xf32>
    %1209 = arith.mulf %1208, %1207 : vector<1x16x16xf32>
    %1210 = arith.addf %1205, %1209 : vector<1x16x16xf32>
    %c2_402 = arith.constant 2 : index
    %c34_403 = arith.constant 34 : index
    %1211 = memref.load %arg2[%c2_402, %c34_403] : memref<3x98xf32, #tpu.memory_space<smem>>
    %1212 = vector.extract_strided_slice %1032 {offsets = [0, 4, 6], sizes = [1, 16, 16], strides = [1, 1, 1]} : vector<1x22x22xf32> to vector<1x16x16xf32>
    %1213 = vector.broadcast %1211 : f32 to vector<1x16x16xf32>
    %1214 = arith.mulf %1213, %1212 : vector<1x16x16xf32>
    %1215 = arith.addf %1210, %1214 : vector<1x16x16xf32>
    %c2_404 = arith.constant 2 : index
    %c35_405 = arith.constant 35 : index
    %1216 = memref.load %arg2[%c2_404, %c35_405] : memref<3x98xf32, #tpu.memory_space<smem>>
    %1217 = vector.extract_strided_slice %1032 {offsets = [0, 5, 0], sizes = [1, 16, 16], strides = [1, 1, 1]} : vector<1x22x22xf32> to vector<1x16x16xf32>
    %1218 = vector.broadcast %1216 : f32 to vector<1x16x16xf32>
    %1219 = arith.mulf %1218, %1217 : vector<1x16x16xf32>
    %1220 = arith.addf %1215, %1219 : vector<1x16x16xf32>
    %c2_406 = arith.constant 2 : index
    %c36_407 = arith.constant 36 : index
    %1221 = memref.load %arg2[%c2_406, %c36_407] : memref<3x98xf32, #tpu.memory_space<smem>>
    %1222 = vector.extract_strided_slice %1032 {offsets = [0, 5, 1], sizes = [1, 16, 16], strides = [1, 1, 1]} : vector<1x22x22xf32> to vector<1x16x16xf32>
    %1223 = vector.broadcast %1221 : f32 to vector<1x16x16xf32>
    %1224 = arith.mulf %1223, %1222 : vector<1x16x16xf32>
    %1225 = arith.addf %1220, %1224 : vector<1x16x16xf32>
    %c2_408 = arith.constant 2 : index
    %c37_409 = arith.constant 37 : index
    %1226 = memref.load %arg2[%c2_408, %c37_409] : memref<3x98xf32, #tpu.memory_space<smem>>
    %1227 = vector.extract_strided_slice %1032 {offsets = [0, 5, 2], sizes = [1, 16, 16], strides = [1, 1, 1]} : vector<1x22x22xf32> to vector<1x16x16xf32>
    %1228 = vector.broadcast %1226 : f32 to vector<1x16x16xf32>
    %1229 = arith.mulf %1228, %1227 : vector<1x16x16xf32>
    %1230 = arith.addf %1225, %1229 : vector<1x16x16xf32>
    %c2_410 = arith.constant 2 : index
    %c38_411 = arith.constant 38 : index
    %1231 = memref.load %arg2[%c2_410, %c38_411] : memref<3x98xf32, #tpu.memory_space<smem>>
    %1232 = vector.extract_strided_slice %1032 {offsets = [0, 5, 3], sizes = [1, 16, 16], strides = [1, 1, 1]} : vector<1x22x22xf32> to vector<1x16x16xf32>
    %1233 = vector.broadcast %1231 : f32 to vector<1x16x16xf32>
    %1234 = arith.mulf %1233, %1232 : vector<1x16x16xf32>
    %1235 = arith.addf %1230, %1234 : vector<1x16x16xf32>
    %c2_412 = arith.constant 2 : index
    %c39_413 = arith.constant 39 : index
    %1236 = memref.load %arg2[%c2_412, %c39_413] : memref<3x98xf32, #tpu.memory_space<smem>>
    %1237 = vector.extract_strided_slice %1032 {offsets = [0, 5, 4], sizes = [1, 16, 16], strides = [1, 1, 1]} : vector<1x22x22xf32> to vector<1x16x16xf32>
    %1238 = vector.broadcast %1236 : f32 to vector<1x16x16xf32>
    %1239 = arith.mulf %1238, %1237 : vector<1x16x16xf32>
    %1240 = arith.addf %1235, %1239 : vector<1x16x16xf32>
    %c2_414 = arith.constant 2 : index
    %c40_415 = arith.constant 40 : index
    %1241 = memref.load %arg2[%c2_414, %c40_415] : memref<3x98xf32, #tpu.memory_space<smem>>
    %1242 = vector.extract_strided_slice %1032 {offsets = [0, 5, 5], sizes = [1, 16, 16], strides = [1, 1, 1]} : vector<1x22x22xf32> to vector<1x16x16xf32>
    %1243 = vector.broadcast %1241 : f32 to vector<1x16x16xf32>
    %1244 = arith.mulf %1243, %1242 : vector<1x16x16xf32>
    %1245 = arith.addf %1240, %1244 : vector<1x16x16xf32>
    %c2_416 = arith.constant 2 : index
    %c41_417 = arith.constant 41 : index
    %1246 = memref.load %arg2[%c2_416, %c41_417] : memref<3x98xf32, #tpu.memory_space<smem>>
    %1247 = vector.extract_strided_slice %1032 {offsets = [0, 5, 6], sizes = [1, 16, 16], strides = [1, 1, 1]} : vector<1x22x22xf32> to vector<1x16x16xf32>
    %1248 = vector.broadcast %1246 : f32 to vector<1x16x16xf32>
    %1249 = arith.mulf %1248, %1247 : vector<1x16x16xf32>
    %1250 = arith.addf %1245, %1249 : vector<1x16x16xf32>
    %c2_418 = arith.constant 2 : index
    %c42_419 = arith.constant 42 : index
    %1251 = memref.load %arg2[%c2_418, %c42_419] : memref<3x98xf32, #tpu.memory_space<smem>>
    %1252 = vector.extract_strided_slice %1032 {offsets = [0, 6, 0], sizes = [1, 16, 16], strides = [1, 1, 1]} : vector<1x22x22xf32> to vector<1x16x16xf32>
    %1253 = vector.broadcast %1251 : f32 to vector<1x16x16xf32>
    %1254 = arith.mulf %1253, %1252 : vector<1x16x16xf32>
    %1255 = arith.addf %1250, %1254 : vector<1x16x16xf32>
    %c2_420 = arith.constant 2 : index
    %c43_421 = arith.constant 43 : index
    %1256 = memref.load %arg2[%c2_420, %c43_421] : memref<3x98xf32, #tpu.memory_space<smem>>
    %1257 = vector.extract_strided_slice %1032 {offsets = [0, 6, 1], sizes = [1, 16, 16], strides = [1, 1, 1]} : vector<1x22x22xf32> to vector<1x16x16xf32>
    %1258 = vector.broadcast %1256 : f32 to vector<1x16x16xf32>
    %1259 = arith.mulf %1258, %1257 : vector<1x16x16xf32>
    %1260 = arith.addf %1255, %1259 : vector<1x16x16xf32>
    %c2_422 = arith.constant 2 : index
    %c44_423 = arith.constant 44 : index
    %1261 = memref.load %arg2[%c2_422, %c44_423] : memref<3x98xf32, #tpu.memory_space<smem>>
    %1262 = vector.extract_strided_slice %1032 {offsets = [0, 6, 2], sizes = [1, 16, 16], strides = [1, 1, 1]} : vector<1x22x22xf32> to vector<1x16x16xf32>
    %1263 = vector.broadcast %1261 : f32 to vector<1x16x16xf32>
    %1264 = arith.mulf %1263, %1262 : vector<1x16x16xf32>
    %1265 = arith.addf %1260, %1264 : vector<1x16x16xf32>
    %c2_424 = arith.constant 2 : index
    %c45_425 = arith.constant 45 : index
    %1266 = memref.load %arg2[%c2_424, %c45_425] : memref<3x98xf32, #tpu.memory_space<smem>>
    %1267 = vector.extract_strided_slice %1032 {offsets = [0, 6, 3], sizes = [1, 16, 16], strides = [1, 1, 1]} : vector<1x22x22xf32> to vector<1x16x16xf32>
    %1268 = vector.broadcast %1266 : f32 to vector<1x16x16xf32>
    %1269 = arith.mulf %1268, %1267 : vector<1x16x16xf32>
    %1270 = arith.addf %1265, %1269 : vector<1x16x16xf32>
    %c2_426 = arith.constant 2 : index
    %c46_427 = arith.constant 46 : index
    %1271 = memref.load %arg2[%c2_426, %c46_427] : memref<3x98xf32, #tpu.memory_space<smem>>
    %1272 = vector.extract_strided_slice %1032 {offsets = [0, 6, 4], sizes = [1, 16, 16], strides = [1, 1, 1]} : vector<1x22x22xf32> to vector<1x16x16xf32>
    %1273 = vector.broadcast %1271 : f32 to vector<1x16x16xf32>
    %1274 = arith.mulf %1273, %1272 : vector<1x16x16xf32>
    %1275 = arith.addf %1270, %1274 : vector<1x16x16xf32>
    %c2_428 = arith.constant 2 : index
    %c47_429 = arith.constant 47 : index
    %1276 = memref.load %arg2[%c2_428, %c47_429] : memref<3x98xf32, #tpu.memory_space<smem>>
    %1277 = vector.extract_strided_slice %1032 {offsets = [0, 6, 5], sizes = [1, 16, 16], strides = [1, 1, 1]} : vector<1x22x22xf32> to vector<1x16x16xf32>
    %1278 = vector.broadcast %1276 : f32 to vector<1x16x16xf32>
    %1279 = arith.mulf %1278, %1277 : vector<1x16x16xf32>
    %1280 = arith.addf %1275, %1279 : vector<1x16x16xf32>
    %c2_430 = arith.constant 2 : index
    %c48_431 = arith.constant 48 : index
    %1281 = memref.load %arg2[%c2_430, %c48_431] : memref<3x98xf32, #tpu.memory_space<smem>>
    %1282 = vector.extract_strided_slice %1032 {offsets = [0, 6, 6], sizes = [1, 16, 16], strides = [1, 1, 1]} : vector<1x22x22xf32> to vector<1x16x16xf32>
    %1283 = vector.broadcast %1281 : f32 to vector<1x16x16xf32>
    %1284 = arith.mulf %1283, %1282 : vector<1x16x16xf32>
    %1285 = arith.addf %1280, %1284 : vector<1x16x16xf32>
    %c2_432 = arith.constant 2 : index
    %c49_433 = arith.constant 49 : index
    %1286 = memref.load %arg2[%c2_432, %c49_433] : memref<3x98xf32, #tpu.memory_space<smem>>
    %1287 = vector.extract_strided_slice %1036 {offsets = [0, 0, 0], sizes = [1, 16, 16], strides = [1, 1, 1]} : vector<1x22x22xf32> to vector<1x16x16xf32>
    %1288 = vector.broadcast %1286 : f32 to vector<1x16x16xf32>
    %1289 = arith.mulf %1288, %1287 : vector<1x16x16xf32>
    %1290 = arith.addf %1285, %1289 : vector<1x16x16xf32>
    %c2_434 = arith.constant 2 : index
    %c50_435 = arith.constant 50 : index
    %1291 = memref.load %arg2[%c2_434, %c50_435] : memref<3x98xf32, #tpu.memory_space<smem>>
    %1292 = vector.extract_strided_slice %1036 {offsets = [0, 0, 1], sizes = [1, 16, 16], strides = [1, 1, 1]} : vector<1x22x22xf32> to vector<1x16x16xf32>
    %1293 = vector.broadcast %1291 : f32 to vector<1x16x16xf32>
    %1294 = arith.mulf %1293, %1292 : vector<1x16x16xf32>
    %1295 = arith.addf %1290, %1294 : vector<1x16x16xf32>
    %c2_436 = arith.constant 2 : index
    %c51_437 = arith.constant 51 : index
    %1296 = memref.load %arg2[%c2_436, %c51_437] : memref<3x98xf32, #tpu.memory_space<smem>>
    %1297 = vector.extract_strided_slice %1036 {offsets = [0, 0, 2], sizes = [1, 16, 16], strides = [1, 1, 1]} : vector<1x22x22xf32> to vector<1x16x16xf32>
    %1298 = vector.broadcast %1296 : f32 to vector<1x16x16xf32>
    %1299 = arith.mulf %1298, %1297 : vector<1x16x16xf32>
    %1300 = arith.addf %1295, %1299 : vector<1x16x16xf32>
    %c2_438 = arith.constant 2 : index
    %c52_439 = arith.constant 52 : index
    %1301 = memref.load %arg2[%c2_438, %c52_439] : memref<3x98xf32, #tpu.memory_space<smem>>
    %1302 = vector.extract_strided_slice %1036 {offsets = [0, 0, 3], sizes = [1, 16, 16], strides = [1, 1, 1]} : vector<1x22x22xf32> to vector<1x16x16xf32>
    %1303 = vector.broadcast %1301 : f32 to vector<1x16x16xf32>
    %1304 = arith.mulf %1303, %1302 : vector<1x16x16xf32>
    %1305 = arith.addf %1300, %1304 : vector<1x16x16xf32>
    %c2_440 = arith.constant 2 : index
    %c53_441 = arith.constant 53 : index
    %1306 = memref.load %arg2[%c2_440, %c53_441] : memref<3x98xf32, #tpu.memory_space<smem>>
    %1307 = vector.extract_strided_slice %1036 {offsets = [0, 0, 4], sizes = [1, 16, 16], strides = [1, 1, 1]} : vector<1x22x22xf32> to vector<1x16x16xf32>
    %1308 = vector.broadcast %1306 : f32 to vector<1x16x16xf32>
    %1309 = arith.mulf %1308, %1307 : vector<1x16x16xf32>
    %1310 = arith.addf %1305, %1309 : vector<1x16x16xf32>
    %c2_442 = arith.constant 2 : index
    %c54_443 = arith.constant 54 : index
    %1311 = memref.load %arg2[%c2_442, %c54_443] : memref<3x98xf32, #tpu.memory_space<smem>>
    %1312 = vector.extract_strided_slice %1036 {offsets = [0, 0, 5], sizes = [1, 16, 16], strides = [1, 1, 1]} : vector<1x22x22xf32> to vector<1x16x16xf32>
    %1313 = vector.broadcast %1311 : f32 to vector<1x16x16xf32>
    %1314 = arith.mulf %1313, %1312 : vector<1x16x16xf32>
    %1315 = arith.addf %1310, %1314 : vector<1x16x16xf32>
    %c2_444 = arith.constant 2 : index
    %c55_445 = arith.constant 55 : index
    %1316 = memref.load %arg2[%c2_444, %c55_445] : memref<3x98xf32, #tpu.memory_space<smem>>
    %1317 = vector.extract_strided_slice %1036 {offsets = [0, 0, 6], sizes = [1, 16, 16], strides = [1, 1, 1]} : vector<1x22x22xf32> to vector<1x16x16xf32>
    %1318 = vector.broadcast %1316 : f32 to vector<1x16x16xf32>
    %1319 = arith.mulf %1318, %1317 : vector<1x16x16xf32>
    %1320 = arith.addf %1315, %1319 : vector<1x16x16xf32>
    %c2_446 = arith.constant 2 : index
    %c56_447 = arith.constant 56 : index
    %1321 = memref.load %arg2[%c2_446, %c56_447] : memref<3x98xf32, #tpu.memory_space<smem>>
    %1322 = vector.extract_strided_slice %1036 {offsets = [0, 1, 0], sizes = [1, 16, 16], strides = [1, 1, 1]} : vector<1x22x22xf32> to vector<1x16x16xf32>
    %1323 = vector.broadcast %1321 : f32 to vector<1x16x16xf32>
    %1324 = arith.mulf %1323, %1322 : vector<1x16x16xf32>
    %1325 = arith.addf %1320, %1324 : vector<1x16x16xf32>
    %c2_448 = arith.constant 2 : index
    %c57_449 = arith.constant 57 : index
    %1326 = memref.load %arg2[%c2_448, %c57_449] : memref<3x98xf32, #tpu.memory_space<smem>>
    %1327 = vector.extract_strided_slice %1036 {offsets = [0, 1, 1], sizes = [1, 16, 16], strides = [1, 1, 1]} : vector<1x22x22xf32> to vector<1x16x16xf32>
    %1328 = vector.broadcast %1326 : f32 to vector<1x16x16xf32>
    %1329 = arith.mulf %1328, %1327 : vector<1x16x16xf32>
    %1330 = arith.addf %1325, %1329 : vector<1x16x16xf32>
    %c2_450 = arith.constant 2 : index
    %c58_451 = arith.constant 58 : index
    %1331 = memref.load %arg2[%c2_450, %c58_451] : memref<3x98xf32, #tpu.memory_space<smem>>
    %1332 = vector.extract_strided_slice %1036 {offsets = [0, 1, 2], sizes = [1, 16, 16], strides = [1, 1, 1]} : vector<1x22x22xf32> to vector<1x16x16xf32>
    %1333 = vector.broadcast %1331 : f32 to vector<1x16x16xf32>
    %1334 = arith.mulf %1333, %1332 : vector<1x16x16xf32>
    %1335 = arith.addf %1330, %1334 : vector<1x16x16xf32>
    %c2_452 = arith.constant 2 : index
    %c59_453 = arith.constant 59 : index
    %1336 = memref.load %arg2[%c2_452, %c59_453] : memref<3x98xf32, #tpu.memory_space<smem>>
    %1337 = vector.extract_strided_slice %1036 {offsets = [0, 1, 3], sizes = [1, 16, 16], strides = [1, 1, 1]} : vector<1x22x22xf32> to vector<1x16x16xf32>
    %1338 = vector.broadcast %1336 : f32 to vector<1x16x16xf32>
    %1339 = arith.mulf %1338, %1337 : vector<1x16x16xf32>
    %1340 = arith.addf %1335, %1339 : vector<1x16x16xf32>
    %c2_454 = arith.constant 2 : index
    %c60_455 = arith.constant 60 : index
    %1341 = memref.load %arg2[%c2_454, %c60_455] : memref<3x98xf32, #tpu.memory_space<smem>>
    %1342 = vector.extract_strided_slice %1036 {offsets = [0, 1, 4], sizes = [1, 16, 16], strides = [1, 1, 1]} : vector<1x22x22xf32> to vector<1x16x16xf32>
    %1343 = vector.broadcast %1341 : f32 to vector<1x16x16xf32>
    %1344 = arith.mulf %1343, %1342 : vector<1x16x16xf32>
    %1345 = arith.addf %1340, %1344 : vector<1x16x16xf32>
    %c2_456 = arith.constant 2 : index
    %c61_457 = arith.constant 61 : index
    %1346 = memref.load %arg2[%c2_456, %c61_457] : memref<3x98xf32, #tpu.memory_space<smem>>
    %1347 = vector.extract_strided_slice %1036 {offsets = [0, 1, 5], sizes = [1, 16, 16], strides = [1, 1, 1]} : vector<1x22x22xf32> to vector<1x16x16xf32>
    %1348 = vector.broadcast %1346 : f32 to vector<1x16x16xf32>
    %1349 = arith.mulf %1348, %1347 : vector<1x16x16xf32>
    %1350 = arith.addf %1345, %1349 : vector<1x16x16xf32>
    %c2_458 = arith.constant 2 : index
    %c62_459 = arith.constant 62 : index
    %1351 = memref.load %arg2[%c2_458, %c62_459] : memref<3x98xf32, #tpu.memory_space<smem>>
    %1352 = vector.extract_strided_slice %1036 {offsets = [0, 1, 6], sizes = [1, 16, 16], strides = [1, 1, 1]} : vector<1x22x22xf32> to vector<1x16x16xf32>
    %1353 = vector.broadcast %1351 : f32 to vector<1x16x16xf32>
    %1354 = arith.mulf %1353, %1352 : vector<1x16x16xf32>
    %1355 = arith.addf %1350, %1354 : vector<1x16x16xf32>
    %c2_460 = arith.constant 2 : index
    %c63_461 = arith.constant 63 : index
    %1356 = memref.load %arg2[%c2_460, %c63_461] : memref<3x98xf32, #tpu.memory_space<smem>>
    %1357 = vector.extract_strided_slice %1036 {offsets = [0, 2, 0], sizes = [1, 16, 16], strides = [1, 1, 1]} : vector<1x22x22xf32> to vector<1x16x16xf32>
    %1358 = vector.broadcast %1356 : f32 to vector<1x16x16xf32>
    %1359 = arith.mulf %1358, %1357 : vector<1x16x16xf32>
    %1360 = arith.addf %1355, %1359 : vector<1x16x16xf32>
    %c2_462 = arith.constant 2 : index
    %c64_463 = arith.constant 64 : index
    %1361 = memref.load %arg2[%c2_462, %c64_463] : memref<3x98xf32, #tpu.memory_space<smem>>
    %1362 = vector.extract_strided_slice %1036 {offsets = [0, 2, 1], sizes = [1, 16, 16], strides = [1, 1, 1]} : vector<1x22x22xf32> to vector<1x16x16xf32>
    %1363 = vector.broadcast %1361 : f32 to vector<1x16x16xf32>
    %1364 = arith.mulf %1363, %1362 : vector<1x16x16xf32>
    %1365 = arith.addf %1360, %1364 : vector<1x16x16xf32>
    %c2_464 = arith.constant 2 : index
    %c65_465 = arith.constant 65 : index
    %1366 = memref.load %arg2[%c2_464, %c65_465] : memref<3x98xf32, #tpu.memory_space<smem>>
    %1367 = vector.extract_strided_slice %1036 {offsets = [0, 2, 2], sizes = [1, 16, 16], strides = [1, 1, 1]} : vector<1x22x22xf32> to vector<1x16x16xf32>
    %1368 = vector.broadcast %1366 : f32 to vector<1x16x16xf32>
    %1369 = arith.mulf %1368, %1367 : vector<1x16x16xf32>
    %1370 = arith.addf %1365, %1369 : vector<1x16x16xf32>
    %c2_466 = arith.constant 2 : index
    %c66_467 = arith.constant 66 : index
    %1371 = memref.load %arg2[%c2_466, %c66_467] : memref<3x98xf32, #tpu.memory_space<smem>>
    %1372 = vector.extract_strided_slice %1036 {offsets = [0, 2, 3], sizes = [1, 16, 16], strides = [1, 1, 1]} : vector<1x22x22xf32> to vector<1x16x16xf32>
    %1373 = vector.broadcast %1371 : f32 to vector<1x16x16xf32>
    %1374 = arith.mulf %1373, %1372 : vector<1x16x16xf32>
    %1375 = arith.addf %1370, %1374 : vector<1x16x16xf32>
    %c2_468 = arith.constant 2 : index
    %c67_469 = arith.constant 67 : index
    %1376 = memref.load %arg2[%c2_468, %c67_469] : memref<3x98xf32, #tpu.memory_space<smem>>
    %1377 = vector.extract_strided_slice %1036 {offsets = [0, 2, 4], sizes = [1, 16, 16], strides = [1, 1, 1]} : vector<1x22x22xf32> to vector<1x16x16xf32>
    %1378 = vector.broadcast %1376 : f32 to vector<1x16x16xf32>
    %1379 = arith.mulf %1378, %1377 : vector<1x16x16xf32>
    %1380 = arith.addf %1375, %1379 : vector<1x16x16xf32>
    %c2_470 = arith.constant 2 : index
    %c68_471 = arith.constant 68 : index
    %1381 = memref.load %arg2[%c2_470, %c68_471] : memref<3x98xf32, #tpu.memory_space<smem>>
    %1382 = vector.extract_strided_slice %1036 {offsets = [0, 2, 5], sizes = [1, 16, 16], strides = [1, 1, 1]} : vector<1x22x22xf32> to vector<1x16x16xf32>
    %1383 = vector.broadcast %1381 : f32 to vector<1x16x16xf32>
    %1384 = arith.mulf %1383, %1382 : vector<1x16x16xf32>
    %1385 = arith.addf %1380, %1384 : vector<1x16x16xf32>
    %c2_472 = arith.constant 2 : index
    %c69_473 = arith.constant 69 : index
    %1386 = memref.load %arg2[%c2_472, %c69_473] : memref<3x98xf32, #tpu.memory_space<smem>>
    %1387 = vector.extract_strided_slice %1036 {offsets = [0, 2, 6], sizes = [1, 16, 16], strides = [1, 1, 1]} : vector<1x22x22xf32> to vector<1x16x16xf32>
    %1388 = vector.broadcast %1386 : f32 to vector<1x16x16xf32>
    %1389 = arith.mulf %1388, %1387 : vector<1x16x16xf32>
    %1390 = arith.addf %1385, %1389 : vector<1x16x16xf32>
    %c2_474 = arith.constant 2 : index
    %c70_475 = arith.constant 70 : index
    %1391 = memref.load %arg2[%c2_474, %c70_475] : memref<3x98xf32, #tpu.memory_space<smem>>
    %1392 = vector.extract_strided_slice %1036 {offsets = [0, 3, 0], sizes = [1, 16, 16], strides = [1, 1, 1]} : vector<1x22x22xf32> to vector<1x16x16xf32>
    %1393 = vector.broadcast %1391 : f32 to vector<1x16x16xf32>
    %1394 = arith.mulf %1393, %1392 : vector<1x16x16xf32>
    %1395 = arith.addf %1390, %1394 : vector<1x16x16xf32>
    %c2_476 = arith.constant 2 : index
    %c71_477 = arith.constant 71 : index
    %1396 = memref.load %arg2[%c2_476, %c71_477] : memref<3x98xf32, #tpu.memory_space<smem>>
    %1397 = vector.extract_strided_slice %1036 {offsets = [0, 3, 1], sizes = [1, 16, 16], strides = [1, 1, 1]} : vector<1x22x22xf32> to vector<1x16x16xf32>
    %1398 = vector.broadcast %1396 : f32 to vector<1x16x16xf32>
    %1399 = arith.mulf %1398, %1397 : vector<1x16x16xf32>
    %1400 = arith.addf %1395, %1399 : vector<1x16x16xf32>
    %c2_478 = arith.constant 2 : index
    %c72_479 = arith.constant 72 : index
    %1401 = memref.load %arg2[%c2_478, %c72_479] : memref<3x98xf32, #tpu.memory_space<smem>>
    %1402 = vector.extract_strided_slice %1036 {offsets = [0, 3, 2], sizes = [1, 16, 16], strides = [1, 1, 1]} : vector<1x22x22xf32> to vector<1x16x16xf32>
    %1403 = vector.broadcast %1401 : f32 to vector<1x16x16xf32>
    %1404 = arith.mulf %1403, %1402 : vector<1x16x16xf32>
    %1405 = arith.addf %1400, %1404 : vector<1x16x16xf32>
    %c2_480 = arith.constant 2 : index
    %c73_481 = arith.constant 73 : index
    %1406 = memref.load %arg2[%c2_480, %c73_481] : memref<3x98xf32, #tpu.memory_space<smem>>
    %1407 = vector.extract_strided_slice %1036 {offsets = [0, 3, 3], sizes = [1, 16, 16], strides = [1, 1, 1]} : vector<1x22x22xf32> to vector<1x16x16xf32>
    %1408 = vector.broadcast %1406 : f32 to vector<1x16x16xf32>
    %1409 = arith.mulf %1408, %1407 : vector<1x16x16xf32>
    %1410 = arith.addf %1405, %1409 : vector<1x16x16xf32>
    %c2_482 = arith.constant 2 : index
    %c74_483 = arith.constant 74 : index
    %1411 = memref.load %arg2[%c2_482, %c74_483] : memref<3x98xf32, #tpu.memory_space<smem>>
    %1412 = vector.extract_strided_slice %1036 {offsets = [0, 3, 4], sizes = [1, 16, 16], strides = [1, 1, 1]} : vector<1x22x22xf32> to vector<1x16x16xf32>
    %1413 = vector.broadcast %1411 : f32 to vector<1x16x16xf32>
    %1414 = arith.mulf %1413, %1412 : vector<1x16x16xf32>
    %1415 = arith.addf %1410, %1414 : vector<1x16x16xf32>
    %c2_484 = arith.constant 2 : index
    %c75_485 = arith.constant 75 : index
    %1416 = memref.load %arg2[%c2_484, %c75_485] : memref<3x98xf32, #tpu.memory_space<smem>>
    %1417 = vector.extract_strided_slice %1036 {offsets = [0, 3, 5], sizes = [1, 16, 16], strides = [1, 1, 1]} : vector<1x22x22xf32> to vector<1x16x16xf32>
    %1418 = vector.broadcast %1416 : f32 to vector<1x16x16xf32>
    %1419 = arith.mulf %1418, %1417 : vector<1x16x16xf32>
    %1420 = arith.addf %1415, %1419 : vector<1x16x16xf32>
    %c2_486 = arith.constant 2 : index
    %c76_487 = arith.constant 76 : index
    %1421 = memref.load %arg2[%c2_486, %c76_487] : memref<3x98xf32, #tpu.memory_space<smem>>
    %1422 = vector.extract_strided_slice %1036 {offsets = [0, 3, 6], sizes = [1, 16, 16], strides = [1, 1, 1]} : vector<1x22x22xf32> to vector<1x16x16xf32>
    %1423 = vector.broadcast %1421 : f32 to vector<1x16x16xf32>
    %1424 = arith.mulf %1423, %1422 : vector<1x16x16xf32>
    %1425 = arith.addf %1420, %1424 : vector<1x16x16xf32>
    %c2_488 = arith.constant 2 : index
    %c77_489 = arith.constant 77 : index
    %1426 = memref.load %arg2[%c2_488, %c77_489] : memref<3x98xf32, #tpu.memory_space<smem>>
    %1427 = vector.extract_strided_slice %1036 {offsets = [0, 4, 0], sizes = [1, 16, 16], strides = [1, 1, 1]} : vector<1x22x22xf32> to vector<1x16x16xf32>
    %1428 = vector.broadcast %1426 : f32 to vector<1x16x16xf32>
    %1429 = arith.mulf %1428, %1427 : vector<1x16x16xf32>
    %1430 = arith.addf %1425, %1429 : vector<1x16x16xf32>
    %c2_490 = arith.constant 2 : index
    %c78_491 = arith.constant 78 : index
    %1431 = memref.load %arg2[%c2_490, %c78_491] : memref<3x98xf32, #tpu.memory_space<smem>>
    %1432 = vector.extract_strided_slice %1036 {offsets = [0, 4, 1], sizes = [1, 16, 16], strides = [1, 1, 1]} : vector<1x22x22xf32> to vector<1x16x16xf32>
    %1433 = vector.broadcast %1431 : f32 to vector<1x16x16xf32>
    %1434 = arith.mulf %1433, %1432 : vector<1x16x16xf32>
    %1435 = arith.addf %1430, %1434 : vector<1x16x16xf32>
    %c2_492 = arith.constant 2 : index
    %c79_493 = arith.constant 79 : index
    %1436 = memref.load %arg2[%c2_492, %c79_493] : memref<3x98xf32, #tpu.memory_space<smem>>
    %1437 = vector.extract_strided_slice %1036 {offsets = [0, 4, 2], sizes = [1, 16, 16], strides = [1, 1, 1]} : vector<1x22x22xf32> to vector<1x16x16xf32>
    %1438 = vector.broadcast %1436 : f32 to vector<1x16x16xf32>
    %1439 = arith.mulf %1438, %1437 : vector<1x16x16xf32>
    %1440 = arith.addf %1435, %1439 : vector<1x16x16xf32>
    %c2_494 = arith.constant 2 : index
    %c80_495 = arith.constant 80 : index
    %1441 = memref.load %arg2[%c2_494, %c80_495] : memref<3x98xf32, #tpu.memory_space<smem>>
    %1442 = vector.extract_strided_slice %1036 {offsets = [0, 4, 3], sizes = [1, 16, 16], strides = [1, 1, 1]} : vector<1x22x22xf32> to vector<1x16x16xf32>
    %1443 = vector.broadcast %1441 : f32 to vector<1x16x16xf32>
    %1444 = arith.mulf %1443, %1442 : vector<1x16x16xf32>
    %1445 = arith.addf %1440, %1444 : vector<1x16x16xf32>
    %c2_496 = arith.constant 2 : index
    %c81_497 = arith.constant 81 : index
    %1446 = memref.load %arg2[%c2_496, %c81_497] : memref<3x98xf32, #tpu.memory_space<smem>>
    %1447 = vector.extract_strided_slice %1036 {offsets = [0, 4, 4], sizes = [1, 16, 16], strides = [1, 1, 1]} : vector<1x22x22xf32> to vector<1x16x16xf32>
    %1448 = vector.broadcast %1446 : f32 to vector<1x16x16xf32>
    %1449 = arith.mulf %1448, %1447 : vector<1x16x16xf32>
    %1450 = arith.addf %1445, %1449 : vector<1x16x16xf32>
    %c2_498 = arith.constant 2 : index
    %c82_499 = arith.constant 82 : index
    %1451 = memref.load %arg2[%c2_498, %c82_499] : memref<3x98xf32, #tpu.memory_space<smem>>
    %1452 = vector.extract_strided_slice %1036 {offsets = [0, 4, 5], sizes = [1, 16, 16], strides = [1, 1, 1]} : vector<1x22x22xf32> to vector<1x16x16xf32>
    %1453 = vector.broadcast %1451 : f32 to vector<1x16x16xf32>
    %1454 = arith.mulf %1453, %1452 : vector<1x16x16xf32>
    %1455 = arith.addf %1450, %1454 : vector<1x16x16xf32>
    %c2_500 = arith.constant 2 : index
    %c83_501 = arith.constant 83 : index
    %1456 = memref.load %arg2[%c2_500, %c83_501] : memref<3x98xf32, #tpu.memory_space<smem>>
    %1457 = vector.extract_strided_slice %1036 {offsets = [0, 4, 6], sizes = [1, 16, 16], strides = [1, 1, 1]} : vector<1x22x22xf32> to vector<1x16x16xf32>
    %1458 = vector.broadcast %1456 : f32 to vector<1x16x16xf32>
    %1459 = arith.mulf %1458, %1457 : vector<1x16x16xf32>
    %1460 = arith.addf %1455, %1459 : vector<1x16x16xf32>
    %c2_502 = arith.constant 2 : index
    %c84_503 = arith.constant 84 : index
    %1461 = memref.load %arg2[%c2_502, %c84_503] : memref<3x98xf32, #tpu.memory_space<smem>>
    %1462 = vector.extract_strided_slice %1036 {offsets = [0, 5, 0], sizes = [1, 16, 16], strides = [1, 1, 1]} : vector<1x22x22xf32> to vector<1x16x16xf32>
    %1463 = vector.broadcast %1461 : f32 to vector<1x16x16xf32>
    %1464 = arith.mulf %1463, %1462 : vector<1x16x16xf32>
    %1465 = arith.addf %1460, %1464 : vector<1x16x16xf32>
    %c2_504 = arith.constant 2 : index
    %c85_505 = arith.constant 85 : index
    %1466 = memref.load %arg2[%c2_504, %c85_505] : memref<3x98xf32, #tpu.memory_space<smem>>
    %1467 = vector.extract_strided_slice %1036 {offsets = [0, 5, 1], sizes = [1, 16, 16], strides = [1, 1, 1]} : vector<1x22x22xf32> to vector<1x16x16xf32>
    %1468 = vector.broadcast %1466 : f32 to vector<1x16x16xf32>
    %1469 = arith.mulf %1468, %1467 : vector<1x16x16xf32>
    %1470 = arith.addf %1465, %1469 : vector<1x16x16xf32>
    %c2_506 = arith.constant 2 : index
    %c86_507 = arith.constant 86 : index
    %1471 = memref.load %arg2[%c2_506, %c86_507] : memref<3x98xf32, #tpu.memory_space<smem>>
    %1472 = vector.extract_strided_slice %1036 {offsets = [0, 5, 2], sizes = [1, 16, 16], strides = [1, 1, 1]} : vector<1x22x22xf32> to vector<1x16x16xf32>
    %1473 = vector.broadcast %1471 : f32 to vector<1x16x16xf32>
    %1474 = arith.mulf %1473, %1472 : vector<1x16x16xf32>
    %1475 = arith.addf %1470, %1474 : vector<1x16x16xf32>
    %c2_508 = arith.constant 2 : index
    %c87_509 = arith.constant 87 : index
    %1476 = memref.load %arg2[%c2_508, %c87_509] : memref<3x98xf32, #tpu.memory_space<smem>>
    %1477 = vector.extract_strided_slice %1036 {offsets = [0, 5, 3], sizes = [1, 16, 16], strides = [1, 1, 1]} : vector<1x22x22xf32> to vector<1x16x16xf32>
    %1478 = vector.broadcast %1476 : f32 to vector<1x16x16xf32>
    %1479 = arith.mulf %1478, %1477 : vector<1x16x16xf32>
    %1480 = arith.addf %1475, %1479 : vector<1x16x16xf32>
    %c2_510 = arith.constant 2 : index
    %c88_511 = arith.constant 88 : index
    %1481 = memref.load %arg2[%c2_510, %c88_511] : memref<3x98xf32, #tpu.memory_space<smem>>
    %1482 = vector.extract_strided_slice %1036 {offsets = [0, 5, 4], sizes = [1, 16, 16], strides = [1, 1, 1]} : vector<1x22x22xf32> to vector<1x16x16xf32>
    %1483 = vector.broadcast %1481 : f32 to vector<1x16x16xf32>
    %1484 = arith.mulf %1483, %1482 : vector<1x16x16xf32>
    %1485 = arith.addf %1480, %1484 : vector<1x16x16xf32>
    %c2_512 = arith.constant 2 : index
    %c89_513 = arith.constant 89 : index
    %1486 = memref.load %arg2[%c2_512, %c89_513] : memref<3x98xf32, #tpu.memory_space<smem>>
    %1487 = vector.extract_strided_slice %1036 {offsets = [0, 5, 5], sizes = [1, 16, 16], strides = [1, 1, 1]} : vector<1x22x22xf32> to vector<1x16x16xf32>
    %1488 = vector.broadcast %1486 : f32 to vector<1x16x16xf32>
    %1489 = arith.mulf %1488, %1487 : vector<1x16x16xf32>
    %1490 = arith.addf %1485, %1489 : vector<1x16x16xf32>
    %c2_514 = arith.constant 2 : index
    %c90_515 = arith.constant 90 : index
    %1491 = memref.load %arg2[%c2_514, %c90_515] : memref<3x98xf32, #tpu.memory_space<smem>>
    %1492 = vector.extract_strided_slice %1036 {offsets = [0, 5, 6], sizes = [1, 16, 16], strides = [1, 1, 1]} : vector<1x22x22xf32> to vector<1x16x16xf32>
    %1493 = vector.broadcast %1491 : f32 to vector<1x16x16xf32>
    %1494 = arith.mulf %1493, %1492 : vector<1x16x16xf32>
    %1495 = arith.addf %1490, %1494 : vector<1x16x16xf32>
    %c2_516 = arith.constant 2 : index
    %c91_517 = arith.constant 91 : index
    %1496 = memref.load %arg2[%c2_516, %c91_517] : memref<3x98xf32, #tpu.memory_space<smem>>
    %1497 = vector.extract_strided_slice %1036 {offsets = [0, 6, 0], sizes = [1, 16, 16], strides = [1, 1, 1]} : vector<1x22x22xf32> to vector<1x16x16xf32>
    %1498 = vector.broadcast %1496 : f32 to vector<1x16x16xf32>
    %1499 = arith.mulf %1498, %1497 : vector<1x16x16xf32>
    %1500 = arith.addf %1495, %1499 : vector<1x16x16xf32>
    %c2_518 = arith.constant 2 : index
    %c92_519 = arith.constant 92 : index
    %1501 = memref.load %arg2[%c2_518, %c92_519] : memref<3x98xf32, #tpu.memory_space<smem>>
    %1502 = vector.extract_strided_slice %1036 {offsets = [0, 6, 1], sizes = [1, 16, 16], strides = [1, 1, 1]} : vector<1x22x22xf32> to vector<1x16x16xf32>
    %1503 = vector.broadcast %1501 : f32 to vector<1x16x16xf32>
    %1504 = arith.mulf %1503, %1502 : vector<1x16x16xf32>
    %1505 = arith.addf %1500, %1504 : vector<1x16x16xf32>
    %c2_520 = arith.constant 2 : index
    %c93_521 = arith.constant 93 : index
    %1506 = memref.load %arg2[%c2_520, %c93_521] : memref<3x98xf32, #tpu.memory_space<smem>>
    %1507 = vector.extract_strided_slice %1036 {offsets = [0, 6, 2], sizes = [1, 16, 16], strides = [1, 1, 1]} : vector<1x22x22xf32> to vector<1x16x16xf32>
    %1508 = vector.broadcast %1506 : f32 to vector<1x16x16xf32>
    %1509 = arith.mulf %1508, %1507 : vector<1x16x16xf32>
    %1510 = arith.addf %1505, %1509 : vector<1x16x16xf32>
    %c2_522 = arith.constant 2 : index
    %c94_523 = arith.constant 94 : index
    %1511 = memref.load %arg2[%c2_522, %c94_523] : memref<3x98xf32, #tpu.memory_space<smem>>
    %1512 = vector.extract_strided_slice %1036 {offsets = [0, 6, 3], sizes = [1, 16, 16], strides = [1, 1, 1]} : vector<1x22x22xf32> to vector<1x16x16xf32>
    %1513 = vector.broadcast %1511 : f32 to vector<1x16x16xf32>
    %1514 = arith.mulf %1513, %1512 : vector<1x16x16xf32>
    %1515 = arith.addf %1510, %1514 : vector<1x16x16xf32>
    %c2_524 = arith.constant 2 : index
    %c95_525 = arith.constant 95 : index
    %1516 = memref.load %arg2[%c2_524, %c95_525] : memref<3x98xf32, #tpu.memory_space<smem>>
    %1517 = vector.extract_strided_slice %1036 {offsets = [0, 6, 4], sizes = [1, 16, 16], strides = [1, 1, 1]} : vector<1x22x22xf32> to vector<1x16x16xf32>
    %1518 = vector.broadcast %1516 : f32 to vector<1x16x16xf32>
    %1519 = arith.mulf %1518, %1517 : vector<1x16x16xf32>
    %1520 = arith.addf %1515, %1519 : vector<1x16x16xf32>
    %c2_526 = arith.constant 2 : index
    %c96_527 = arith.constant 96 : index
    %1521 = memref.load %arg2[%c2_526, %c96_527] : memref<3x98xf32, #tpu.memory_space<smem>>
    %1522 = vector.extract_strided_slice %1036 {offsets = [0, 6, 5], sizes = [1, 16, 16], strides = [1, 1, 1]} : vector<1x22x22xf32> to vector<1x16x16xf32>
    %1523 = vector.broadcast %1521 : f32 to vector<1x16x16xf32>
    %1524 = arith.mulf %1523, %1522 : vector<1x16x16xf32>
    %1525 = arith.addf %1520, %1524 : vector<1x16x16xf32>
    %c2_528 = arith.constant 2 : index
    %c97_529 = arith.constant 97 : index
    %1526 = memref.load %arg2[%c2_528, %c97_529] : memref<3x98xf32, #tpu.memory_space<smem>>
    %1527 = vector.extract_strided_slice %1036 {offsets = [0, 6, 6], sizes = [1, 16, 16], strides = [1, 1, 1]} : vector<1x22x22xf32> to vector<1x16x16xf32>
    %1528 = vector.broadcast %1526 : f32 to vector<1x16x16xf32>
    %1529 = arith.mulf %1528, %1527 : vector<1x16x16xf32>
    %1530 = arith.addf %1525, %1529 : vector<1x16x16xf32>
    %1531 = arith.negf %1530 : vector<1x16x16xf32>
    %1532 = math.exp %1531 : vector<1x16x16xf32>
    %cst_530 = arith.constant 1.000000e+00 : f32
    %1533 = vector.broadcast %cst_530 : f32 to vector<1x16x16xf32>
    %1534 = arith.addf %1533, %1532 : vector<1x16x16xf32>
    %1535 = arith.divf %1533, %1534 : vector<1x16x16xf32>
    %1536 = vector.shape_cast %1535 : vector<1x16x16xf32> to vector<1x1x16x16xf32>
    %1537 = vector.shape_cast %511 : vector<1x4x16xf32> to vector<1x4x1x16xf32>
    %1538 = vector.broadcast %1536 : vector<1x1x16x16xf32> to vector<1x4x16x16xf32>
    %1539 = vector.broadcast %1537 : vector<1x4x1x16xf32> to vector<1x4x16x16xf32>
    %1540 = arith.addf %1538, %1539 : vector<1x4x16x16xf32>
    %1541 = vector.shape_cast %1023 : vector<1x4x16xf32> to vector<1x4x16x1xf32>
    %1542 = vector.broadcast %1541 : vector<1x4x16x1xf32> to vector<1x4x16x16xf32>
    %1543 = arith.addf %1540, %1542 : vector<1x4x16x16xf32>
    %cst_531 = arith.constant 0.333333343 : f32
    %1544 = vector.broadcast %cst_531 : f32 to vector<1x4x16x16xf32>
    %1545 = arith.mulf %1543, %1544 : vector<1x4x16x16xf32>
    %c0_532 = arith.constant 0 : index
    %c0_533 = arith.constant 0 : index
    %c0_534 = arith.constant 0 : index
    %c0_535 = arith.constant 0 : index
    %1546 = vector.load %arg1[%c0_532, %c0_533, %c0_534, %c0_535] : memref<1x4x16x16xf32, #tpu.memory_space<vmem>>, vector<1x4x16x16xf32>
    %1547 = arith.mulf %1546, %1545 : vector<1x4x16x16xf32>
    %c0_536 = arith.constant 0 : index
    %c0_537 = arith.constant 0 : index
    %c0_538 = arith.constant 0 : index
    %c0_539 = arith.constant 0 : index
    %1548 = vector.load %arg4[%c0_536, %c0_537, %c0_538, %c0_539] : memref<1x4x16x16xf32, #tpu.memory_space<vmem>>, vector<1x4x16x16xf32>
    tpu.vector_store %arg4[%c0_536, %c0_537, %c0_538, %c0_539], %1547 {strides = array<i32>} : memref<1x4x16x16xf32, #tpu.memory_space<vmem>>, vector<1x4x16x16xf32>,
    return
  }
  func.func @transform_0(%arg0: i32) -> (i32, i32, i32, i32) {
    %c0_i32 = arith.constant 0 : i32
    %c0_i32_0 = arith.constant 0 : i32
    %c0_i32_1 = arith.constant 0 : i32
    %c0_i32_2 = arith.constant 0 : i32
    return %arg0, %c0_i32, %c0_i32_0, %c0_i32_1 : i32, i32, i32, i32
  }
  func.func @transform_1(%arg0: i32) -> (i32, i32) {
    %c0_i32 = arith.constant 0 : i32
    %c0_i32_0 = arith.constant 0 : i32
    %c0_i32_1 = arith.constant 0 : i32
    return %c0_i32, %c0_i32_0 : i32, i32
  }
  func.func @transform_2(%arg0: i32) -> i32 {
    %c0_i32 = arith.constant 0 : i32
    %c0_i32_0 = arith.constant 0 : i32
    return %c0_i32 : i32
  }
  func.func @transform_3(%arg0: i32) -> (i32, i32, i32, i32) {
    %c0_i32 = arith.constant 0 : i32
    %c0_i32_0 = arith.constant 0 : i32
    %c0_i32_1 = arith.constant 0 : i32
    %c0_i32_2 = arith.constant 0 : i32
    return %arg0, %c0_i32, %c0_i32_0, %c0_i32_1 : i32, i32, i32, i32
  }
}

</mosaic_0001>

<bundles_post_ra>
// kernel: tpu_custom_call.1
= control target key start
LH: loop header
LB: loop body
LE: loop exit
PB: predicated region body
PF: predicated region fallthrough
CT: control target
= control target key end

     0   :  { %8 = vsyncpa [#allocation3], 0  ;;  %s7534_s0 = inlined_call_operand.hbm [shape: f32[2,4,16,16], index: 0, kind: input, shape index: {}]   ;;  %s7535_s1 = inlined_call_operand.hbm [shape: f32[3,98], index: 1, kind: input, shape index: {}]   ;;  %s7536_s2 = inlined_call_operand.vmem [shape: f32[3], index: 2, kind: input, shape index: {}]   ;;  %s7537_s3 = inlined_call_operand.hbm [shape: f32[2,4,16,16], index: 3, kind: output, shape index: {}]  }
   0x1   :  { %10 = vsyncpa [#allocation3 + $0x1], 0 }
   0x2   :  { %11 = vsyncpa [#allocation5], 0 }
   0x3   :  { %12 = vsyncpa [#allocation6], 0 }
   0x4   :  { %13 = vsyncpa [#allocation4], 0 }
   0x5   :  { %15 = vsyncpa [#allocation4 + $0x1], 0  ;;  %s5231_s12 = smov 0   ;;  %s5233_s13 = smov 0  }
   0x6   :  { %s5235_s14 = smov 0   ;;  %s5237_s15 = smov 0  }
   0x7 LB: > { %s5252_s16 = sadd.s32 4294967295, %s5192_s15   ;;  %s4637_s17 = sadd.s32 4294967294, %s5192_s15   ;;  %s5192_s15 = sphi %s5237_s15, %s7578_s15   ;;  %s5188_s14 = sphi %s5235_s14, %s7577_s14   ;;  %s5184_s13 = sphi %s5233_s13, %s7576_s13   ;;  %s5180_s12 = sphi %s5231_s12, %s7575_s12  }
   0x8   : > { %s5256_s18 = sadd.s32 1, %s5192_s15   ;;  %s28_s19 = sadd.s32 1, %s5188_s14 }
   0x9   : > { %s25_s20 = ssub.s32 %s5192_s15, %s5256_s18  ;;  %p35_p0 = scmp.ne.s32.totalorder %s5188_s14, %s5184_s13 }
   0xa   : > { %p26_p1 = scmp.eq.s32.totalorder %s25_s20, 0  ;;  %p36_p2 = scmp.eq.s32.totalorder %s5192_s15, 0 }
   0xb   : > { %p41_p3 = scmp.ne.s32.totalorder %s5184_s13, %s5180_s12  ;;  %p7538_p4 = scmp.eq.s32.totalorder %s5252_s16, 0 }
   0xc   : > { %s5268_s21 = scalar_select %p26_p1, %s5188_s14, %s28_s19  }
   0xd   : > { %p5270_p5 = por %p36_p2, %p35_p0  ;;  %p5276_p6 = por %p7538_p4, %p41_p3 }
   0xe   : > { %p107_p7 = scmp.eq.s32.totalorder %s5252_s16, 1  ;;  %p113_p8 = scmp.eq.s32.totalorder %s4637_s17, 1 }
   0xf   : > { %s7551_s23 = scalar_select %p5276_p6, 1, 0 }
  0x10   : > { %p4638_p9 = scmp.ge.s32.totalorder %s5192_s15, 1  ;;  %p120_p10 = scmp.lt.s32.totalorder %s5192_s15, 3 }
  0x11   : > { %p5283_p11 = por %p107_p7, %p35_p0  ;;  %p5287_p12 = por %p113_p8, %p41_p3 }
  0x12   : > { %p5291_p13 = pnand %p4638_p9, %p120_p10  ;;  %p4985_p4 = scmp.lt.s32.totalorder %s5192_s15, 2 }
  0x13   : > { %s7552_s24 = scalar_select %p5283_p11, 1, 0 }
  0x14   : > { %s7553_s25 = scalar_select %p5287_p12, 1, 0 }
  0x15   : > { %p4968_p2 = pneg %p5291_p13  ;;  %s142_s29 = sshll.u32 %s7536_s2, 4  ;;  %s143_s29 = int_to_ptr.vmem [resolvable:$true] %s142_s29 }
  0x16   : > { %p7555_p0 = scmp.eq.s32.totalorder %s5252_s16, 0  ;;  %p5310_p3 = pnand %p4985_p4, %p5270_p5 }
  0x17   : > { %s153_s5 = sand.u32 1, %s5188_s14   ;;  %s5060_s8 = scalar_lea.hbm %s7535_s1, 64 }
  0x18   : > { %p5304_p7 = pnand %p4968_p2, %p7555_p0  ;;  %p5061_p8 = scmp.ne.s32.totalorder %s7535_s1, %s5060_s8 }
  0x19   : > { %p5067_p4 = scmp.lt.u32.totalorder %s5060_s8, %s7535_s1 }
  0x1a   : > { %p5062_p9 = pneg %p5304_p7 }
  0x1c   : > { %p5063_p10 = pnand %p5062_p9, %p5061_p8 }
  0x1e   : > { %p5064_p2 = pneg %p5063_p10 }
  0x20   : > { %p5069_p5 = pnand %p5067_p4, %p5064_p2 }
  0x22   : > { %5072 = shalt.err (!%p5069_p5)
}
  0x23   : > { %s5194_s19 = smov [#allocation7]   ;;  %s5073_s27 = scalar_lea.vmem %s143_s29, 16 }
  0x24   : > { %4971 = dma.hbm_to_smem (!%p5304_p7), %s7535_s1, 64, %s5194_s19, [#allocation5]  }
  0x25   : > { %p5074_p0 = scmp.ne.s32.totalorder %s143_s29, %s5073_s27  ;;  %p5081_p11 = scmp.lt.s32.totalorder %s143_s29, %s143_s29 }
  0x26   : > { %p5082_p8 = scmp.lt.s32.totalorder %s5073_s27, %s5073_s27 }
  0x27   : > { %p5076_p1 = pnand %p5074_p0, %p5062_p9 }
  0x28   : > { %p5083_p10 = por %p5082_p8, %p5081_p11 }
  0x29   : > { %p5077_p12 = pneg %p5076_p1 }
  0x2b   : > { %p5084_p6 = pnand %p5083_p10, %p5077_p12 }
  0x2d   : > { %5087 = shalt.err (!%p5084_p6)
}
  0x2e   : > { %s5195_s28 = smov [#allocation8]   ;;  %s4642_s6 = sshll.u32 %s153_s5, 6 }
  0x2f   : > { %4974 = dma.vmem_to_smem (!%p5304_p7), %s143_s29, 16, %s5195_s28, [#allocation6]  }
  0x30   : > { %s4954_s7 = sshll.u32 %s5192_s15, 10  ;;  %s157_s11 = scalar_lea.vmem [#allocation2], %s4642_s6 }
  0x31   : > { %s5337_s10 = scalar_lea.hbm %s7534_s0, %s4954_s7  ;;  %s164_s17 = sshll.u32 %s157_s11, 4  ;;  %s5339_s17 = int_to_ptr.vmem [resolvable:$true] %s164_s17 }
  0x32   : > { %s5341_s30 = scalar_lea.sflag [#allocation3], %s153_s5  ;;  %s5088_s19 = scalar_lea.hbm %s5337_s10, 1024 }
  0x33   : > { %p5089_p6 = scmp.ne.s32.totalorder %s5337_s10, %s5088_s19  ;;  %p5090_p11 = pneg %p5310_p3 }
  0x34   : > { %s5093_s22 = scalar_lea.hbm %s7534_s0, 2048  ;;  %p5094_p7 = scmp.lt.u32.totalorder %s5337_s10, %s7534_s0 }
  0x35   : > { %p5091_p12 = pnand %p5090_p11, %p5089_p6  ;;  %p5095_p9 = scmp.lt.u32.totalorder %s5093_s22, %s5088_s19 }
  0x36   : > { %p5097_p4 = scmp.lt.u32.totalorder %s5088_s19, %s5337_s10 }
  0x37   : > { %p5092_p1 = pneg %p5091_p12  ;;  %p5096_p2 = por %p5095_p9, %p5094_p7 }
  0x39   : > { %p5098_p5 = por %p5097_p4, %p5096_p2 }
  0x3b   : > { %p5099_p0 = pnand %p5098_p5, %p5092_p1 }
  0x3d   : > { %5102 = shalt.err (!%p5099_p0)
}
  0x3e   : > { %s5103_s5 = scalar_lea.vmem %s5339_s17, 1024  ;;  %s5196_s6 = smov [#allocation2]  }
  0x3f   : > { %p5104_p8 = scmp.ne.s32.totalorder %s5339_s17, %s5103_s5  ;;  %s5108_s7 = sshll.u32 %s5196_s6, 4  ;;  %s5109_s7 = int_to_ptr.vmem [resolvable:$false] %s5108_s7 }
  0x40   : > { %s5110_s8 = scalar_lea.vmem %s5109_s7, 2048  ;;  %p5111_p12 = scmp.lt.s32.totalorder %s5339_s17, %s5109_s7 }
  0x41   : > { %p5106_p10 = pnand %p5104_p8, %p5090_p11  ;;  %p5112_p7 = scmp.lt.s32.totalorder %s5110_s8, %s5103_s5 }
  0x43   : > { %p5107_p6 = pneg %p5106_p10  ;;  %p5113_p9 = por %p5112_p7, %p5111_p12 }
  0x45   : > { %p5114_p2 = pnand %p5113_p9, %p5107_p6 }
  0x47   : > { %5117 = shalt.err (!%p5114_p2)
}
  0x48   : > { %s5197_s9 = smov 128   ;;  %s5198_s11 = smov 8  }
  0x49   : > { %4978 = dma.hbm_to_vmem [thread:$0]  (!%p5310_p3), %s5337_s10, 1024, %s5339_s17, %s5341_s30, %s5197_s9, %s5197_s9, %s5198_s11  }
  0x4a   : > { %176 = sbr.rel (%p5291_p13) target bundleno = 1502 (0x5de), region = 32 }
  0x51   : > { %s5372_s19 = sand.u32 1, %s5184_s13   ;;  %p7558_p11 = scmp.ne.s32.totalorder %s7551_s23, 0 }
  0x52   : > { %s7541_s29 = sshll.u32 %s5372_s19, 6  ;;  %s179_s20 = scalar_lea.sflag [#allocation3], %s5372_s19 }
  0x53   : > { %s5378_s22 = scalar_lea.vmem [#allocation2], %s7541_s29 }
  0x54   : > { %5163 = dma.done.wait (%p7558_p11), %s179_s20, 1024  }
  0x55   : > { %5165 = vsyncadd (%p7558_p11), %s179_s20, 4294966272  ;;  %p7559_p3 = scmp.eq.s32.totalorder %s5252_s16, 0 }
  0x57   : > { %5167 = dma.done.wait (%p7559_p3), [#allocation5], 64   ;;  %p7560_p13 = pmov %p7559_p3 }
  0x58   : > { %p7561_p1 = pmov %p7559_p3 }
  0x59   : > { %5169 = vsyncadd (%p7560_p13), [#allocation5], 4294967232 }
  0x5a   : > { %5171 = dma.done.wait (%p7561_p1), [#allocation6], 16   ;;  %p7562_p4 = pmov %p7561_p1 }
  0x5c   : > { %5173 = vsyncadd (%p7562_p4), [#allocation6], 4294967280 }
  0x5d   : > { %195 = sfence }
  0x5e   : > { %v214_v0 = vld [vmem:[%s5378_s22] sm:$0xff]  ;;  %v215_v1 = vld [vmem:[%s5378_s22 + $0x8] sm:$0xff]  ;;  %v216_v2 = vld [vmem:[%s5378_s22 + $0x10] sm:$0xff]  ;;  %vm222_vm0 = vcmask 130048   ;;  %v5199_v3 = vmov 0.0   ;;  %s7542_s23 = smov 3  }
  0x5f   : > { %319 = vrot.lane.b32.xlu0 %v5199_v3, %s7542_s23  ;;  %v217_v4 = vld [vmem:[%s5378_s22 + $0x18] sm:$0xff]  ;;  %v218_v5 = vld [vmem:[%s5378_s22 + $0x20] sm:$0xff]  ;;  %v219_v6 = vld [vmem:[%s5378_s22 + $0x28] sm:$0xff]  ;;  %v5400_v7 = vsel %vm222_vm0, %v214_v0, -inf  ;;  %v5403_v8 = vsel %vm222_vm0, %v215_v1, -inf  ;;  %v5406_v9 = vsel %vm222_vm0, %v216_v2, -inf }
  0x60   : > { %v220_v10 = vld [vmem:[%s5378_s22 + $0x30] sm:$0xff]  ;;  %v221_v11 = vld [vmem:[%s5378_s22 + $0x38] sm:$0xff]  ;;  %v225_v12 = vmax.f32 %v5400_v7, %v5403_v8  ;;  %v5413_v13 = vsel %vm222_vm0, %v217_v4, -inf  ;;  %v5416_v14 = vsel %vm222_vm0, %v218_v5, -inf  ;;  %v5419_v15 = vsel %vm222_vm0, %v219_v6, -inf  ;;  %s4651_s26 = sld [smem:[#allocation7 + $0x2]] }
  0x61   : > { %v234_v16 = vmax.f32 %v5406_v9, %v5413_v13  ;;  %v243_v17 = vmax.f32 %v5416_v14, %v5419_v15  ;;  %v5426_v18 = vsel %vm222_vm0, %v220_v10, -inf  ;;  %v5429_v19 = vsel %vm222_vm0, %v221_v11, -inf  ;;  %s4650_s4 = sld [smem:[#allocation7 + $0x1]]  ;;  %s4653_s10 = sld [smem:[#allocation7 + $0x4]] }
  0x62   : > { %v226_v20 = vrot.slane %v225_v12, 4  ;;  %v252_v21 = vmax.f32 %v5426_v18, %v5429_v19  ;;  %vm304_vm1 = vcmask 1044484   ;;  %v5434_v26 = vsel %vm222_vm0, %v214_v0, 0.0  ;;  %s4652_s17 = sld [smem:[#allocation7 + $0x3]]  ;;  %s5479_s30 = sld [smem:[#allocation7 + $0x6]] }
  0x63   : > { %v235_v22 = vrot.slane %v234_v16, 4  ;;  %v244_v23 = vrot.slane %v243_v17, 4  ;;  %vm306_vm2 = vcmask 1045509   ;;  %v5437_v29 = vsel %vm222_vm0, %v215_v1, 0.0  ;;  %s5481_s27 = sld [smem:[#allocation7 + $0x5]]  ;;  %s4658_s28 = sld [smem:[#allocation7 + $0x9]] }
  0x64   : > { %v227_v24 = vmax.f32 %v225_v12, %v226_v20  ;;  %v253_v25 = vrot.slane %v252_v21, 4  ;;  %v5440_v30 = vsel %vm222_vm0, %v216_v2, 0.0  ;;  %v261_v33 = vadd.f32 %v5437_v29, %v5434_v26  ;;  %s4657_s5 = sld [smem:[#allocation7 + $0x8]]  ;;  %s5489_s6 = sld [smem:[#allocation7 + $0xb]] }
  0x65   : > { %v236_v27 = vmax.f32 %v234_v16, %v235_v22  ;;  %v245_v28 = vmax.f32 %v243_v17, %v244_v23  ;;  %v5445_v34 = vsel %vm222_vm0, %v217_v4, 0.0  ;;  %v5450_v38 = vsel %vm222_vm0, %v218_v5, 0.0  ;;  %s5491_s7 = sld [smem:[#allocation7 + $0xa]]  ;;  %s5201_s8 = smov 126  }
  0x66   : > { %v228_v31 = vrot.slane %v227_v24, 2  ;;  %v254_v32 = vmax.f32 %v252_v21, %v253_v25  ;;  %v270_v37 = vadd.f32 %v5445_v34, %v5440_v30  ;;  %v262_v41 = vrot.slane %v261_v33, 4  ;;  %s5202_s9 = smov 127   ;;  %s4662_s11 = sld [smem:[#allocation7 + $0xd]] }
  0x67   : > { %v237_v35 = vrot.slane %v236_v27, 2  ;;  %v246_v36 = vrot.slane %v245_v28, 2  ;;  %v5453_v42 = vsel %vm222_vm0, %v219_v6, 0.0  ;;  %v5458_v50 = vsel %vm222_vm0, %v220_v10, 0.0  ;;  %s4661_s20 = sld [smem:[#allocation7 + $0xc]]  ;;  %s5579_s29 = sld [smem:[#allocation7 + $0x29]] }
  0x68   : > { %v229_v39 = vmax.f32 %v227_v24, %v228_v31  ;;  %v255_v40 = vrot.slane %v254_v32, 2  ;;  %v271_v45 = vrot.slane %v270_v37, 4  ;;  %v279_v46 = vadd.f32 %v5453_v42, %v5450_v38  ;;  %p7572_p0 = scmp.ne.s32.totalorder %s7552_s24, 0 }
  0x69   : > { %v238_v43 = vmax.f32 %v236_v27, %v237_v35  ;;  %v247_v44 = vmax.f32 %v245_v28, %v246_v36  ;;  %v263_v49 = vadd.f32 %v262_v41, %v261_v33  ;;  %v5461_v58 = vsel %vm222_vm0, %v221_v11, 0.0 }
  0x6a   : > { %v230_v47 = vrot.slane %v229_v39, 1  ;;  %v256_v48 = vmax.f32 %v254_v32, %v255_v40  ;;  %v272_v53 = vadd.f32 %v271_v45, %v270_v37  ;;  %v280_v54 = vrot.slane %v279_v46, 4 }
  0x6b   : > { %v239_v51 = vrot.slane %v238_v43, 1  ;;  %v248_v52 = vrot.slane %v247_v44, 1  ;;  %v264_v57 = vrot.slane %v263_v49, 2  ;;  %vm308_vm3 = vcmask 1046534  }
  0x6c   : > { %v231_v55 = vmax.f32 %v229_v39, %v230_v47  ;;  %v257_v56 = vrot.slane %v256_v48, 1  ;;  %v273_v61 = vrot.slane %v272_v53, 2  ;;  %v281_v62 = vadd.f32 %v280_v54, %v279_v46 }
  0x6d   : > { %v240_v59 = vmax.f32 %v238_v43, %v239_v51  ;;  %v249_v60 = vmax.f32 %v247_v44, %v248_v52  ;;  %v265_v0 = vadd.f32 %v264_v57, %v263_v49  ;;  %v288_v1 = vadd.f32 %v5461_v58, %v5458_v50 }
  0x6e   : > { %v258_v63 = vmax.f32 %v256_v48, %v257_v56  ;;  %vm311_vm4 = vcmask 1042432   ;;  %v274_v3 = vadd.f32 %v273_v61, %v272_v53  ;;  %v282_v4 = vrot.slane %v281_v62, 2 }
  0x6f   : > { %v305_v2 = vsel %vm304_vm1, %v240_v59, %v231_v55  ;;  %vm313_vm5 = vcmask 1046528   ;;  %v266_v6 = vrot.slane %v265_v0, 1  ;;  %v289_v10 = vrot.slane %v288_v1, 4 }
  0x70   : > { %v307_v5 = vsel %vm306_vm2, %v249_v60, %v305_v2  ;;  %v275_v12 = vrot.slane %v274_v3, 1  ;;  %v283_v16 = vadd.f32 %v282_v4, %v281_v62  ;;  %vm323_vm6 = vcmask 23552  }
  0x71   : > { %v309_v11 = vsel %vm308_vm3, %v258_v63, %v307_v5  ;;  %v267_v20 = vadd.f32 %v266_v6, %v265_v0  ;;  %v290_v21 = vadd.f32 %v289_v10, %v288_v1  ;;  %v361_v47 = vstv %s4651_s26  ;;  %s5203_s26 = smov 124  }
  0x72   : > { %v312_v17 = vsel %vm311_vm4, 0.0, %v309_v11  ;;  %v276_v23 = vadd.f32 %v275_v12, %v274_v3  ;;  %v284_v24 = vrot.slane %v283_v16, 1  ;;  %v353_v48 = vstv %s4650_s4  ;;  %s7546_s4 = smov 125  }
  0x73   : > { %v314_v22 = vsel %vm313_vm5, %v312_v17, 0.0  ;;  %v291_v25 = vrot.slane %v290_v21, 2  ;;  %v296_v27 = vmul.f32 0.0625, %v267_v20  ;;  %vm326_vm7 = vcmask 154624  }
  0x74   : > { %317 = vrot.lane.b32.xlu0 %v314_v22, %s7542_s23  ;;  %v285_v28 = vadd.f32 %v284_v24, %v283_v16  ;;  %v297_v31 = vmul.f32 0.0625, %v276_v23  ;;  %v377_v54 = vstv %s4653_s10  ;;  %v369_v55 = vstv %s4652_s17  ;;  %s4665_s10 = sld [smem:[#allocation7 + $0x10]]  ;;  %s4664_s17 = sld [smem:[#allocation7 + $0xf]] }
  0x75   : > { %v292_v32 = vadd.f32 %v291_v25, %v290_v21  ;;  %v393_v59 = vstv %s5479_s30  ;;  %v385_v60 = vstv %s5481_s27  ;;  %v417_v61 = vstv %s4658_s28  ;;  %s7548_s30 = smov 122   ;;  %s7544_s27 = smov 123  }
  0x76   : > { %v298_v33 = vmul.f32 0.0625, %v285_v28  ;;  %v333_v36 = vsel %vm304_vm1, %v297_v31, %v296_v27  ;;  %v408_v62 = vstv %s4657_s5  ;;  %v435_v3 = vstv %s5489_s6  ;;  %s4667_s28 = sld [smem:[#allocation7 + $0x12]]  ;;  %s4666_s5 = sld [smem:[#allocation7 + $0x11]] }
  0x77   : > { %v293_v35 = vrot.slane %v292_v32, 1  ;;  %v426_v4 = vstv %s5491_s7  ;;  %v453_v12 = vstv %s4662_s11  ;;  %v444_v16 = vstv %s4661_s20  ;;  %s4669_s6 = sld [smem:[#allocation7 + $0x14]]  ;;  %s4668_s7 = sld [smem:[#allocation7 + $0x13]] }
  0x78   : > { %v334_v39 = vsel %vm306_vm2, %v298_v33, %v333_v36  ;;  %s4672_s11 = sld [smem:[#allocation7 + $0x17]]  ;;  %s4671_s20 = sld [smem:[#allocation7 + $0x16]]  ;;  %vm739_vm8 = vcmask 1041408   ;;  %vm1362_vm9 = vcmask 130112   ;;  %vm2727_vm10 = vcmask 1045504  }
  0x79   : > { %v294_v37 = vadd.f32 %v293_v35, %v292_v32  ;;  %vm2871_vm11 = vcmask 1044480   ;;  %vm3015_vm12 = vcmask 1043456  }
  0x7a   : > { %v478_v23 = vstv %s4665_s10  ;;  %v469_v24 = vstv %s4664_s17  ;;  %s4674_s10 = sld [smem:[#allocation7 + $0x19]]  ;;  %s4673_s17 = sld [smem:[#allocation7 + $0x18]] }
  0x7b   : > { %v299_v40 = vmul.f32 0.0625, %v294_v37 }
  0x7c   : > { %v496_v32 = vstv %s4667_s28  ;;  %v487_v33 = vstv %s4666_s5  ;;  %s4676_s28 = sld [smem:[#allocation7 + $0x1b]]  ;;  %s4675_s5 = sld [smem:[#allocation7 + $0x1a]] }
  0x7d   : > { %v335_v41 = vsel %vm308_vm3, %v299_v40, %v334_v39  ;;  %v514_v40 = vstv %s4669_s6  ;;  %s4679_s6 = sld [smem:[#allocation7 + $0x1e]] }
  0x7e   : > { %v337_v43 = vsel %vm311_vm4, 0.0, %v335_v41  ;;  %v505_v41 = vstv %s4668_s7  ;;  %s4678_s7 = sld [smem:[#allocation7 + $0x1d]] }
  0x7f   : > { %v338_v44 = vsel %vm313_vm5, %v337_v43, 0.0 }
  0x80   : > { %340 = vrot.lane.b32.xlu1 %v338_v44, %s7542_s23  ;;  %s5581_s23 = sld [smem:[#allocation7 + $0x28]] }
  0xd1   : > { %v5477_v45 = vpop.permute.xlu0 %319 }
  0xe6   : > { %v318_v46 = vpop.permute.xlu0 %317 }
  0xe7   : > { %v324_v49 = vsel %vm323_vm6, 0.0, %v318_v46 }
  0xe8   : > { %v5485_v51 = vsel %vm326_vm7, %v324_v49, 0.0  ;;  %v530_v49 = vstv %s4671_s20  ;;  %s4680_s20 = sld [smem:[#allocation7 + $0x1f]] }
  0xe9   : > { %v362_v52 = vmul.f32 %v361_v47, %v5485_v51  ;;  %v354_v53 = vmul.f32 %v353_v48, %v5485_v51  ;;  %v378_v56 = vmul.f32 %v377_v54, %v5485_v51  ;;  %v370_v57 = vmul.f32 %v369_v55, %v5485_v51 }
  0xea   : > { %v394_v63 = vmul.f32 %v393_v59, %v5485_v51  ;;  %v386_v0 = vmul.f32 %v385_v60, %v5485_v51  ;;  %v418_v1 = vmul.f32 %v417_v61, %v5485_v51  ;;  %v409_v2 = vmul.f32 %v408_v62, %v5485_v51 }
  0xeb   : > { %364 = vrot.lane.b32.xlu0 %v362_v52, %s5201_s8  ;;  %356 = vrot.lane.b32.xlu1 %v354_v53, %s5202_s9  ;;  %v436_v10 = vmul.f32 %v435_v3, %v5485_v51  ;;  %v427_v11 = vmul.f32 %v426_v4, %v5485_v51  ;;  %v454_v21 = vmul.f32 %v453_v12, %v5485_v51  ;;  %v539_v48 = vstv %s4672_s11  ;;  %s4681_s11 = sld [smem:[#allocation7 + $0x20]] }
  0xec   : > { %v420_v5 = vrot.slane %v418_v1, 1  ;;  %v411_v6 = vrot.slane %v409_v2, 1  ;;  %v445_v22 = vmul.f32 %v444_v16, %v5485_v51  ;;  %v479_v28 = vmul.f32 %v478_v23, %v5485_v51 }
  0xed   : > { %v438_v17 = vrot.slane %v436_v10, 1  ;;  %v429_v20 = vrot.slane %v427_v11, 1  ;;  %v456_v25 = vrot.slane %v454_v21, 1  ;;  %v470_v31 = vmul.f32 %v469_v24, %v5485_v51 }
  0xee   : > { %v447_v27 = vrot.slane %v445_v22, 1  ;;  %v481_v35 = vrot.slane %v479_v28, 2  ;;  %v497_v37 = vmul.f32 %v496_v32, %v5485_v51  ;;  %v488_v39 = vmul.f32 %v487_v33, %v5485_v51 }
  0xef   : > { %380 = vrot.lane.b32.xlu0 %v378_v56, %s5203_s26  ;;  %372 = vrot.lane.b32.xlu1 %v370_v57, %s7546_s4  ;;  %v472_v36 = vrot.slane %v470_v31, 2  ;;  %v515_v46 = vmul.f32 %v514_v40, %v5485_v51  ;;  %v506_v47 = vmul.f32 %v505_v41, %v5485_v51  ;;  %v540_v54 = vmul.f32 %v539_v48, %v5485_v51 }
  0xf0   : > { %v499_v43 = vrot.slane %v497_v37, 2  ;;  %v490_v44 = vrot.slane %v488_v39, 2  ;;  %v531_v55 = vmul.f32 %v530_v49, %v5485_v51  ;;  %v557_v56 = vstv %s4674_s10  ;;  %s4683_s10 = sld [smem:[#allocation7 + $0x22]] }
  0xf1   : > { %v517_v52 = vrot.slane %v515_v46, 2  ;;  %v508_v53 = vrot.slane %v506_v47, 2  ;;  %v548_v57 = vstv %s4673_s17  ;;  %v542_v59 = vrot.slane %v540_v54, 3  ;;  %s4682_s17 = sld [smem:[#allocation7 + $0x21]] }
  0xf2   : > { %v533_v60 = vrot.slane %v531_v55, 3  ;;  %v558_v61 = vmul.f32 %v557_v56, %v5485_v51  ;;  %v549_v62 = vmul.f32 %v548_v57, %v5485_v51  ;;  %v341_v28 = vpop.permute.xlu1 %340  ;;  %v325_v47 = vsel %vm323_vm6, 0.0, %v5477_v45 }
  0xf3   : > { %396 = vrot.lane.b32.xlu0 %v394_v63, %s7548_s30  ;;  %388 = vrot.lane.b32.xlu1 %v386_v0, %s7544_s27  ;;  %v575_v63 = vstv %s4676_s28  ;;  %v566_v0 = vstv %s4675_s5  ;;  %s5545_s28 = sld [smem:[#allocation7 + $0x33]]  ;;  %s5547_s5 = sld [smem:[#allocation7 + $0x32]] }
  0xf4   : > { %v560_v1 = vrot.slane %v558_v61, 3  ;;  %v551_v2 = vrot.slane %v549_v62, 3  ;;  %v576_v3 = vmul.f32 %v575_v63, %v5485_v51  ;;  %v567_v4 = vmul.f32 %v566_v0, %v5485_v51 }
  0xf6   : > { %v578_v10 = vrot.slane %v576_v3, 3  ;;  %v569_v11 = vrot.slane %v567_v4, 3 }
  0xf7   : > { %421 = vrot.lane.b32.xlu0 %v420_v5, %s5201_s8  ;;  %412 = vrot.lane.b32.xlu1 %v411_v6, %s5202_s9  ;;  %v600_v5 = vstv %s4679_s6  ;;  %v591_v6 = vstv %s4678_s7  ;;  %s4702_s6 = sld [smem:[#allocation7 + $0x35]]  ;;  %s4701_s7 = sld [smem:[#allocation7 + $0x34]] }
  0xf8   : > { %v601_v12 = vmul.f32 %v600_v5, %v5485_v51  ;;  %v592_v16 = vmul.f32 %v591_v6, %v5485_v51 }
  0xf9   : > { %v836_v37 = vstv %s5545_s28  ;;  %v828_v39 = vstv %s5547_s5  ;;  %s5571_s28 = sld [smem:[#allocation7 + $0x27]]  ;;  %s5573_s5 = sld [smem:[#allocation7 + $0x26]] }
  0xfa   : > { %v603_v21 = vrot.slane %v601_v12, 4  ;;  %v594_v22 = vrot.slane %v592_v16, 4 }
  0xfb   : > { %439 = vrot.lane.b32.xlu0 %v438_v17, %s5203_s26  ;;  %430 = vrot.lane.b32.xlu1 %v429_v20, %s7546_s4  ;;  %v618_v17 = vstv %s4681_s11  ;;  %v609_v20 = vstv %s4680_s20  ;;  %s5560_s11 = sld [smem:[#allocation7 + $0x25]]  ;;  %s5562_s20 = sld [smem:[#allocation7 + $0x24]] }
  0xfc   : > { %v619_v23 = vmul.f32 %v618_v17, %v5485_v51  ;;  %v610_v24 = vmul.f32 %v609_v20, %v5485_v51 }
  0xfd   : > { %v852_v48 = vstv %s4702_s6  ;;  %v844_v49 = vstv %s4701_s7  ;;  %s5594_s6 = sld [smem:[#allocation7 + $0x2c]]  ;;  %s5596_s7 = sld [smem:[#allocation7 + $0x2b]] }
  0xfe   : > { %v621_v31 = vrot.slane %v619_v23, 4  ;;  %v612_v32 = vrot.slane %v610_v24, 4 }
  0xff   : > { %457 = vrot.lane.b32.xlu0 %v456_v25, %s7548_s30  ;;  %448 = vrot.lane.b32.xlu1 %v447_v27, %s7544_s27  ;;  %v636_v25 = vstv %s4683_s10  ;;  %v627_v27 = vstv %s4682_s17  ;;  %s4704_s10 = sld [smem:[#allocation7 + $0x37]]  ;;  %s4703_s17 = sld [smem:[#allocation7 + $0x36]] }
 0x100   : > { %v637_v33 = vmul.f32 %v636_v25, %v5485_v51 }
 0x101   : > { %v656_v55 = vstv %s5562_s20  ;;  %s5616_s20 = sld [smem:[#allocation7 + $0x2d]] }
 0x102   : > { %v639_v40 = vrot.slane %v637_v33, 4 }
 0x103   : > { %482 = vrot.lane.b32.xlu0 %v481_v35, %s5201_s8  ;;  %473 = vrot.lane.b32.xlu1 %v472_v36, %s5202_s9  ;;  %v628_v35 = vmul.f32 %v627_v27, %v5485_v51  ;;  %v343_v36 = vsel %vm323_vm6, 0.0, %v341_v28  ;;  %v759_v28 = vstv %s5594_s6  ;;  %s4711_s6 = sld [smem:[#allocation7 + $0x3e]] }
 0x105   : > { %v630_v41 = vrot.slane %v628_v35, 4  ;;  %v868_v56 = vstv %s4704_s10  ;;  %v860_v57 = vstv %s4703_s17  ;;  %s5640_s10 = sld [smem:[#allocation7 + $0x3a]]  ;;  %s5642_s17 = sld [smem:[#allocation7 + $0x39]] }
 0x107   : > { %500 = vrot.lane.b32.xlu0 %v499_v43, %s5203_s26  ;;  %491 = vrot.lane.b32.xlu1 %v490_v44, %s7546_s4  ;;  %v5565_v43 = vsel %vm326_vm7, %v343_v36, 0.0 }
 0x108   : > { %v837_v44 = vmul.f32 %v836_v37, %v5565_v43  ;;  %v829_v46 = vmul.f32 %v828_v39, %v5565_v43  ;;  %v853_v54 = vmul.f32 %v852_v48, %v5565_v43  ;;  %v845_v45 = vmul.f32 %v844_v49, %v5565_v43 }
 0x109   : > { %v869_v63 = vmul.f32 %v868_v56, %v5565_v43  ;;  %v861_v0 = vmul.f32 %v860_v57, %v5565_v43  ;;  %v760_v37 = vmul.f32 %v759_v28, %v5485_v51  ;;  %v772_v56 = vstv %s5616_s20  ;;  %s4713_s20 = sld [smem:[#allocation7 + $0x40]] }
 0x10b   : > { %518 = vrot.lane.b32.xlu0 %v517_v52, %s7548_s30  ;;  %509 = vrot.lane.b32.xlu1 %v508_v53, %s7544_s27  ;;  %v669_v52 = vstv %s5560_s11  ;;  %v5585_v53 = vsel %vm326_vm7, %v325_v47, 0.0  ;;  %s5614_s11 = sld [smem:[#allocation7 + $0x2e]] }
 0x10c   : > { %v671_v61 = vmul.f32 %v669_v52, %v5585_v53  ;;  %v658_v62 = vmul.f32 %v656_v55, %v5585_v53  ;;  %v761_v47 = vmul.f32 %v759_v28, %v5585_v53 }
 0x10e   : > { %v675_v12 = vrot.slane %v671_v61, 5  ;;  %v662_v16 = vrot.slane %v658_v62, 5  ;;  %v773_v61 = vmul.f32 %v772_v56, %v5485_v51  ;;  %v765_v62 = vrot.slane %v761_v47, 6 }
 0x10f   : > { %543 = vrot.lane.b32.xlu0 %v542_v59, %s5201_s8  ;;  %534 = vrot.lane.b32.xlu1 %v533_v60, %s5202_s9  ;;  %v670_v59 = vmul.f32 %v669_v52, %v5485_v51  ;;  %v657_v60 = vmul.f32 %v656_v55, %v5485_v51 }
 0x111   : > { %v674_v3 = vrot.slane %v670_v59, 5  ;;  %v661_v4 = vrot.slane %v657_v60, 5  ;;  %v785_v55 = vstv %s5614_s11  ;;  %s4714_s11 = sld [smem:[#allocation7 + $0x41]] }
 0x112   : > { %v786_v60 = vmul.f32 %v785_v55, %v5485_v51 }
 0x113   : > { %561 = vrot.lane.b32.xlu0 %v560_v1, %s5203_s26  ;;  %552 = vrot.lane.b32.xlu1 %v551_v2, %s7546_s4  ;;  %v695_v1 = vstv %s5571_s28  ;;  %v682_v2 = vstv %s5573_s5  ;;  %v676_v23 = vsel %vm311_vm4, %v674_v3, %v675_v12  ;;  %v663_v24 = vsel %vm311_vm4, %v661_v4, %v662_v16  ;;  %s5658_s28 = sld [smem:[#allocation7 + $0x3c]]  ;;  %s5660_s5 = sld [smem:[#allocation7 + $0x3b]] }
 0x114   : > { %v696_v5 = vmul.f32 %v695_v1, %v5485_v51  ;;  %v683_v6 = vmul.f32 %v682_v2, %v5485_v51  ;;  %v697_v17 = vmul.f32 %v695_v1, %v5585_v53  ;;  %v684_v20 = vmul.f32 %v682_v2, %v5585_v53 }
 0x115   : > { %v774_v1 = vmul.f32 %v772_v56, %v5585_v53 }
 0x116   : > { %v700_v25 = vrot.slane %v696_v5, 5  ;;  %v687_v27 = vrot.slane %v683_v6, 5  ;;  %v688_v33 = vrot.slane %v684_v20, 5  ;;  %v790_v6 = vrot.slane %v786_v60, 6 }
 0x117   : > { %579 = vrot.lane.b32.xlu0 %v578_v10, %s7548_s30  ;;  %570 = vrot.lane.b32.xlu1 %v569_v11, %s7544_s27  ;;  %v721_v10 = vstv %s5579_s29  ;;  %v708_v11 = vstv %s5581_s23  ;;  %s5628_s29 = sld [smem:[#allocation7 + $0x30]]  ;;  %s5630_s23 = sld [smem:[#allocation7 + $0x2f]] }
 0x118   : > { %v723_v35 = vmul.f32 %v721_v10, %v5585_v53  ;;  %v710_v36 = vmul.f32 %v708_v11, %v5585_v53  ;;  %v953_v56 = vstv %s4714_s11  ;;  %s5709_s11 = sld [smem:[#allocation7 + $0x4a]] }
 0x11a   : > { %v727_v49 = vrot.slane %v723_v35, 5  ;;  %v714_v52 = vrot.slane %v710_v36, 5 }
 0x11b   : > { %604 = vrot.lane.b32.xlu0 %v603_v21, %s5201_s8  ;;  %595 = vrot.lane.b32.xlu1 %v594_v22, %s5202_s9  ;;  %v722_v21 = vmul.f32 %v721_v10, %v5485_v51  ;;  %v709_v22 = vmul.f32 %v708_v11, %v5485_v51  ;;  %v777_v10 = vrot.slane %v773_v61, 6  ;;  %v954_v61 = vmul.f32 %v953_v56, %v5565_v43 }
 0x11d   : > { %v811_v4 = vstv %s5628_s29  ;;  %v798_v5 = vstv %s5630_s23  ;;  %s4716_s29 = sld [smem:[#allocation7 + $0x43]]  ;;  %s4715_s23 = sld [smem:[#allocation7 + $0x42]] }
 0x11e   : > { %v812_v11 = vmul.f32 %v811_v4, %v5485_v51  ;;  %v799_v12 = vmul.f32 %v798_v5, %v5485_v51  ;;  %v813_v20 = vmul.f32 %v811_v4, %v5585_v53 }
 0x11f   : > { %622 = vrot.lane.b32.xlu0 %v621_v31, %s5203_s26  ;;  %613 = vrot.lane.b32.xlu1 %v612_v32, %s7546_s4  ;;  %v746_v31 = vstv %s5596_s7  ;;  %v701_v32 = vrot.slane %v697_v17, 5  ;;  %v778_v17 = vrot.slane %v774_v1, 6  ;;  %s4710_s7 = sld [smem:[#allocation7 + $0x3d]] }
 0x120   : > { %v747_v39 = vmul.f32 %v746_v31, %v5485_v51  ;;  %v748_v48 = vmul.f32 %v746_v31, %v5585_v53  ;;  %v803_v28 = vrot.slane %v799_v12, 6  ;;  %v817_v31 = vrot.slane %v813_v20, 6 }
 0x123   : > { %640 = vrot.lane.b32.xlu0 %v639_v40, %s7548_s30  ;;  %631 = vrot.lane.b32.xlu1 %v630_v41, %s7544_s27  ;;  %v702_v40 = vsel %vm311_vm4, %v700_v25, %v701_v32  ;;  %v689_v41 = vsel %vm311_vm4, %v687_v27, %v688_v33  ;;  %v779_v25 = vsel %vm739_vm8, %v777_v10, %v778_v17  ;;  %v816_v27 = vrot.slane %v812_v11, 6 }
 0x125   : > { %v818_v36 = vsel %vm739_vm8, %v816_v27, %v817_v31 }
 0x127   : > { %839 = vrot.lane.b32.xlu0 %v837_v44, %s5201_s8  ;;  %831 = vrot.lane.b32.xlu1 %v829_v46, %s5202_s9  ;;  %v726_v44 = vrot.slane %v722_v21, 5  ;;  %v713_v46 = vrot.slane %v709_v22, 5  ;;  %v800_v21 = vmul.f32 %v798_v5, %v5585_v53  ;;  %v892_v22 = vstv %s5640_s10  ;;  %s5684_s10 = sld [smem:[#allocation7]] }
 0x128   : > { %v893_v33 = vmul.f32 %v892_v22, %v5565_v43 }
 0x129   : > { %v728_v57 = vsel %vm311_vm4, %v726_v44, %v727_v49  ;;  %v715_v59 = vsel %vm311_vm4, %v713_v46, %v714_v52  ;;  %v804_v32 = vrot.slane %v800_v21, 6  ;;  %v919_v49 = vstv %s4710_s7  ;;  %s5700_s7 = sld [smem:[#allocation7 + $0x47]] }
 0x12b   : > { %855 = vrot.lane.b32.xlu0 %v853_v54, %s5203_s26  ;;  %847 = vrot.lane.b32.xlu1 %v845_v45, %s7546_s4  ;;  %v764_v54 = vrot.slane %v760_v37, 6  ;;  %v751_v45 = vrot.slane %v747_v39, 6  ;;  %v805_v37 = vsel %vm739_vm8, %v803_v28, %v804_v32  ;;  %v910_v39 = vstv %s5658_s28  ;;  %s5690_s28 = sld [smem:[#allocation7 + $0x44]] }
 0x12c   : > { %v911_v46 = vmul.f32 %v910_v39, %v5565_v43 }
 0x12d   : > { %v766_v2 = vsel %vm739_vm8, %v764_v54, %v765_v62  ;;  %v349_v1 = vstv %s5684_s10  ;;  %s5725_s10 = sld [smem:[#allocation7 + $0x4b]] }
 0x12e   : > { %v913_v52 = vrot.slane %v911_v46, 1  ;;  %v350_v12 = vmul.f32 %v349_v1, %v5485_v51 }
 0x12f   : > { %871 = vrot.lane.b32.xlu0 %v869_v63, %s7548_s30  ;;  %863 = vrot.lane.b32.xlu1 %v861_v0, %s7544_s27  ;;  %v752_v63 = vrot.slane %v748_v48, 6  ;;  %v787_v0 = vmul.f32 %v785_v55, %v5585_v53  ;;  %v928_v48 = vstv %s4711_s6  ;;  %v920_v55 = vmul.f32 %v919_v49, %v5565_v43  ;;  %s5698_s6 = sld [smem:[#allocation7 + $0x48]] }
 0x131   : > { %v753_v3 = vsel %vm739_vm8, %v751_v45, %v752_v63  ;;  %v791_v16 = vrot.slane %v787_v0, 6  ;;  %v929_v45 = vmul.f32 %v928_v48, %v5565_v43  ;;  %v922_v60 = vrot.slane %v920_v55, 1 }
 0x132   : > { %v971_v63 = vstv %s4716_s29  ;;  %v962_v0 = vstv %s4715_s23  ;;  %v980_v10 = vstv %s5690_s28  ;;  %s5717_s29 = sld [smem:[#allocation7 + $0x7]]  ;;  %s5723_s23 = sld [smem:[#allocation7 + $0x4c]] }
 0x133   : > { %677 = vrot.lane.b32.xlu0 %v676_v23, %s5201_s8  ;;  %664 = vrot.lane.b32.xlu1 %v663_v24, %s5202_s9  ;;  %v883_v23 = vstv %s5642_s17  ;;  %v792_v24 = vsel %vm739_vm8, %v790_v6, %v791_v16  ;;  %s5688_s17 = sld [smem:[#allocation7 + $0x45]]  ;;  %v972_v4 = vmul.f32 %v971_v63, %v5565_v43  ;;  %v963_v5 = vmul.f32 %v962_v0, %v5565_v43  ;;  %s5735_s28 = sld [smem:[#allocation7 + $0x4e]] }
 0x134   : > { %v884_v35 = vmul.f32 %v883_v23, %v5565_v43  ;;  %v981_v21 = vmul.f32 %v980_v10, %v5565_v43  ;;  %v1005_v23 = vstv %s5700_s7  ;;  %s5751_s7 = sld [smem:[#allocation7 + $0xe]] }
 0x135   : > { %v974_v16 = vrot.slane %v972_v4, 2  ;;  %v965_v17 = vrot.slane %v963_v5, 2  ;;  %v1014_v22 = vstv %s5698_s6  ;;  %s5746_s6 = sld [smem:[#allocation7 + $0x50]] }
 0x136   : > { %v886_v44 = vrot.slane %v884_v35, 1  ;;  %v983_v31 = vrot.slane %v981_v21, 2  ;;  %v1015_v32 = vmul.f32 %v1014_v22, %v5565_v43 }
 0x137   : > { %703 = vrot.lane.b32.xlu0 %v702_v40, %s5203_s26  ;;  %690 = vrot.lane.b32.xlu1 %v689_v41, %s7546_s4  ;;  %v901_v40 = vstv %s5660_s5  ;;  %v895_v41 = vrot.slane %v893_v33, 1  ;;  %s5694_s5 = sld [smem:[#allocation8]]  ;;  %v1006_v33 = vmul.f32 %v1005_v23, %v5565_v43 }
 0x138   : > { %v902_v47 = vmul.f32 %v901_v40, %v5565_v43  ;;  %v401_v40 = vstv %s5717_s29  ;;  %v1017_v46 = vrot.slane %v1015_v32, 3  ;;  %s5763_s29 = sld [smem:[#allocation7 + $0x56]] }
 0x139   : > { %v989_v6 = vstv %s5688_s17  ;;  %s5733_s17 = sld [smem:[#allocation7 + $0x4f]]  ;;  %v402_v56 = vmul.f32 %v401_v40, %v5485_v51 }
 0x13a   : > { %v904_v54 = vrot.slane %v902_v47, 1  ;;  %v990_v20 = vmul.f32 %v989_v6, %v5565_v43  ;;  %v1008_v47 = vrot.slane %v1006_v33, 3  ;;  %v462_v23 = vstv %s5751_s7  ;;  %s5803_s7 = sld [smem:[#allocation7 + $0x5d]] }
 0x13b   : > { %729 = vrot.lane.b32.xlu0 %v728_v57, %s7548_s30  ;;  %716 = vrot.lane.b32.xlu1 %v715_v59, %s7544_s27  ;;  %v944_v57 = vstv %s4713_s20  ;;  %v931_v59 = vrot.slane %v929_v45, 1  ;;  %s5711_s20 = sld [smem:[#allocation7 + $0x49]]  ;;  %v1041_v45 = vstv %s5725_s10  ;;  %s5775_s10 = sld [smem:[#allocation7 + $0x58]]  ;;  %v463_v40 = vmul.f32 %v462_v23, %v5485_v51 }
 0x13c   : > { %v945_v62 = vmul.f32 %v944_v57, %v5565_v43  ;;  %v992_v28 = vrot.slane %v990_v20, 2  ;;  %v1042_v63 = vmul.f32 %v1041_v45, %v5565_v43  ;;  %v1084_v21 = vstv %s5746_s6  ;;  %s5798_s6 = sld [smem:[#allocation7 + $0x15]] }
 0x13d   : > { %v346_v11 = vstv %s5694_s5  ;;  %s5744_s5 = sld [smem:[#allocation7 + $0x51]]  ;;  %v1085_v33 = vmul.f32 %v1084_v21, %v5565_v43 }
 0x13f   : > { %767 = vrot.lane.b32.xlu0 %v766_v2, %s5201_s8  ;;  %754 = vrot.lane.b32.xlu1 %v753_v3, %s5202_s9  ;;  %v956_v2 = vrot.slane %v954_v61, 2  ;;  %v947_v3 = vrot.slane %v945_v62, 2  ;;  %v1075_v1 = vstv %s5733_s17  ;;  %s5777_s17 = sld [smem:[#allocation7 + $0x57]] }
 0x143   : > { %793 = vrot.lane.b32.xlu0 %v792_v24, %s5203_s26  ;;  %780 = vrot.lane.b32.xlu1 %v779_v25, %s7546_s4  ;;  %v351_v24 = vadd.f32 %v350_v12, %v346_v11  ;;  %v1044_v11 = vrot.slane %v1042_v63, 3  ;;  %v1076_v12 = vmul.f32 %v1075_v1, %v5565_v43  ;;  %v1093_v20 = vstv %s5744_s5  ;;  %s5787_s5 = sld [smem:[#allocation7 + $0x59]] }
 0x144   : > { %v1094_v32 = vmul.f32 %v1093_v20, %v5565_v43 }
 0x147   : > { %819 = vrot.lane.b32.xlu0 %v818_v36, %s7548_s30  ;;  %806 = vrot.lane.b32.xlu1 %v805_v37, %s7544_s27  ;;  %v1032_v36 = vstv %s5709_s11  ;;  %v1023_v37 = vstv %s5711_s20  ;;  %s5753_s11 = sld [smem:[#allocation7 + $0x53]]  ;;  %s5759_s20 = sld [smem:[#allocation7 + $0x52]] }
 0x148   : > { %v1033_v48 = vmul.f32 %v1032_v36, %v5565_v43  ;;  %v1024_v49 = vmul.f32 %v1023_v37, %v5565_v43  ;;  %v1144_v37 = vstv %s5763_s29  ;;  %s5820_s29 = sld [smem:[#allocation7 + $0x5e]] }
 0x14a   : > { %v1026_v61 = vrot.slane %v1024_v49, 3  ;;  %v1087_v49 = vrot.slane %v1085_v33, 4 }
 0x14b   : > { %896 = vrot.lane.b32.xlu0 %v895_v41, %s5201_s8  ;;  %887 = vrot.lane.b32.xlu1 %v886_v44, %s5202_s9 }
 0x14d   : > { %v1102_v36 = vstv %s5759_s20  ;;  %s5815_s20 = sld [smem:[#allocation7 + $0x5f]] }
 0x14f   : > { %914 = vrot.lane.b32.xlu0 %v913_v52, %s5203_s26  ;;  %905 = vrot.lane.b32.xlu1 %v904_v54, %s7546_s4  ;;  %v1050_v54 = vstv %s5723_s23  ;;  %s5765_s23 = sld [smem:[#allocation7 + $0x55]] }
 0x150   : > { %v1051_v62 = vmul.f32 %v1050_v54, %v5565_v43  ;;  %v1145_v54 = vmul.f32 %v1144_v37, %v5565_v43 }
 0x152   : > { %v1053_v10 = vrot.slane %v1051_v62, 3  ;;  %v465_v62 = vrot.slane %v463_v40, 2 }
 0x153   : > { %932 = vrot.lane.b32.xlu0 %v931_v59, %s7548_s30  ;;  %923 = vrot.lane.b32.xlu1 %v922_v60, %s7544_s27  ;;  %v1035_v60 = vrot.slane %v1033_v48, 3  ;;  %v1096_v48 = vrot.slane %v1094_v32, 4 }
 0x157   : > { %957 = vrot.lane.b32.xlu0 %v956_v2, %s5201_s8  ;;  %948 = vrot.lane.b32.xlu1 %v947_v3, %s5202_s9  ;;  %v1066_v2 = vstv %s5735_s28  ;;  %v404_v3 = vrot.slane %v402_v56, 1  ;;  %s5785_s28 = sld [smem:[#allocation7 + $0x5a]]  ;;  %v1146_v56 = vmul.f32 %v1144_v37, %v5585_v53 }
 0x15b   : > { %975 = vrot.lane.b32.xlu0 %v974_v16, %s5203_s26  ;;  %966 = vrot.lane.b32.xlu1 %v965_v17, %s7546_s4  ;;  %v1067_v16 = vmul.f32 %v1066_v2, %v5565_v43 }
 0x15d   : > { %v365_v25 = vpop.permute.xlu0 %364  ;;  %v357_v27 = vpop.permute.xlu1 %356 }
 0x15e   : > { %v359_v35 = vadd.f32 %v357_v27, %v351_v24  ;;  %v1111_v24 = vstv %s5753_s11  ;;  %s5805_s11 = sld [smem:[#allocation7 + $0x5c]] }
 0x15f   : > { %993 = vrot.lane.b32.xlu0 %v992_v28, %s7548_s30  ;;  %984 = vrot.lane.b32.xlu1 %v983_v31, %s7544_s27  ;;  %v1078_v28 = vrot.slane %v1076_v12, 4  ;;  %v1069_v31 = vrot.slane %v1067_v16, 4  ;;  %v1196_v12 = vstv %s5785_s28  ;;  %v1183_v16 = vstv %s5787_s5  ;;  %s4684_s28 = sld [smem:[#allocation7 + $0x23]]  ;;  %s4691_s5 = sld [smem:[#allocation7 + $0x2a]] }
 0x160   : > { %v367_v39 = vadd.f32 %v365_v25, %v359_v35  ;;  %v1198_v37 = vmul.f32 %v1196_v12, %v5585_v53 }
 0x161   : > { %v381_v41 = vpop.permute.xlu0 %380  ;;  %v373_v44 = vpop.permute.xlu1 %372 }
 0x162   : > { %v375_v52 = vadd.f32 %v373_v44, %v367_v39  ;;  %v1131_v44 = vstv %s5765_s23  ;;  %s5828_s23 = sld [smem:[#allocation7 + $0x61]] }
 0x163   : > { %1018 = vrot.lane.b32.xlu0 %v1017_v46, %s5201_s8  ;;  %1009 = vrot.lane.b32.xlu1 %v1008_v47, %s5202_s9 }
 0x164   : > { %v383_v55 = vadd.f32 %v381_v41, %v375_v52  ;;  %v1112_v41 = vmul.f32 %v1111_v24, %v5565_v43  ;;  %v1103_v52 = vmul.f32 %v1102_v36, %v5565_v43  ;;  %v523_v36 = vstv %s5798_s6  ;;  %s4698_s6 = sld [smem:[#allocation7 + $0x31]] }
 0x165   : > { %v397_v57 = vpop.permute.xlu0 %396  ;;  %v389_v59 = vpop.permute.xlu1 %388 }
 0x166   : > { %v391_v0 = vadd.f32 %v389_v59, %v383_v55  ;;  %v1132_v55 = vmul.f32 %v1131_v44, %v5565_v43  ;;  %v1133_v59 = vmul.f32 %v1131_v44, %v5585_v53  ;;  %v1114_v1 = vrot.slane %v1112_v41, 4 }
 0x167   : > { %1036 = vrot.lane.b32.xlu0 %v1035_v60, %s5203_s26  ;;  %1027 = vrot.lane.b32.xlu1 %v1026_v61, %s7546_s4  ;;  %v1170_v60 = vstv %s5775_s10  ;;  %v1157_v61 = vstv %s5777_s17  ;;  %v1105_v2 = vrot.slane %v1103_v52, 4  ;;  %s5830_s10 = sld [smem:[#allocation7 + $0x60]]  ;;  %s5851_s17 = sld [smem:[#allocation7 + $0x1c]] }
 0x168   : > { %v399_v4 = vadd.f32 %v397_v57, %v391_v0  ;;  %v1137_v20 = vrot.slane %v1133_v59, 5  ;;  %v1172_v21 = vmul.f32 %v1170_v60, %v5585_v53 }
 0x169   : > { %v422_v5 = vpop.permute.xlu0 %421  ;;  %v413_v6 = vpop.permute.xlu1 %412 }
 0x16a   : > { %v406_v17 = vadd.f32 %v404_v3, %v399_v4  ;;  %v1149_v3 = vrot.slane %v1145_v54, 5  ;;  %v1176_v41 = vrot.slane %v1172_v21, 5 }
 0x16b   : > { %1054 = vrot.lane.b32.xlu0 %v1053_v10, %s7548_s30  ;;  %1045 = vrot.lane.b32.xlu1 %v1044_v11, %s7544_s27  ;;  %v1158_v10 = vmul.f32 %v1157_v61, %v5565_v43  ;;  %v1150_v11 = vrot.slane %v1146_v56, 5 }
 0x16c   : > { %v415_v22 = vadd.f32 %v413_v6, %v406_v17  ;;  %v1171_v6 = vmul.f32 %v1170_v60, %v5565_v43  ;;  %v1202_v60 = vrot.slane %v1198_v37, 5 }
 0x16d   : > { %v440_v25 = vpop.permute.xlu0 %439  ;;  %v431_v27 = vpop.permute.xlu1 %430 }
 0x16e   : > { %v424_v35 = vadd.f32 %v422_v5, %v415_v22  ;;  %v1136_v5 = vrot.slane %v1132_v55, 5  ;;  %v1159_v22 = vmul.f32 %v1157_v61, %v5585_v53  ;;  %v1175_v33 = vrot.slane %v1171_v6, 5 }
 0x16f   : > { %1079 = vrot.lane.b32.xlu0 %v1078_v28, %s5201_s8  ;;  %1070 = vrot.lane.b32.xlu1 %v1069_v31, %s5202_s9  ;;  %v1184_v28 = vmul.f32 %v1183_v16, %v5565_v43 }
 0x170   : > { %v433_v39 = vadd.f32 %v431_v27, %v424_v35  ;;  %v1197_v27 = vmul.f32 %v1196_v12, %v5565_v43  ;;  %v1138_v32 = vsel %vm311_vm4, %v1136_v5, %v1137_v20  ;;  %v1162_v35 = vrot.slane %v1158_v10, 5 }
 0x171   : > { %v458_v46 = vpop.permute.xlu0 %457  ;;  %v449_v47 = vpop.permute.xlu1 %448  ;;  %v1163_v44 = vrot.slane %v1159_v22, 5  ;;  %v1188_v52 = vrot.slane %v1184_v28, 5  ;;  %v1177_v56 = vsel %vm311_vm4, %v1175_v33, %v1176_v41 }
 0x172   : > { %v442_v45 = vadd.f32 %v440_v25, %v433_v39  ;;  %v1151_v25 = vsel %vm311_vm4, %v1149_v3, %v1150_v11  ;;  %v1185_v39 = vmul.f32 %v1183_v16, %v5585_v53  ;;  %v1246_v11 = vstv %s5820_s29  ;;  %s4726_s29 = sld [smem:[#allocation7 + $0x4d]] }
 0x173   : > { %1097 = vrot.lane.b32.xlu0 %v1096_v48, %s5203_s26  ;;  %1088 = vrot.lane.b32.xlu1 %v1087_v49, %s7546_s4  ;;  %v1201_v49 = vrot.slane %v1197_v27, 5  ;;  %v1247_v20 = vmul.f32 %v1246_v11, %v5565_v43 }
 0x174   : > { %v451_v57 = vadd.f32 %v449_v47, %v442_v45  ;;  %v1220_v45 = vstv %s5805_s11  ;;  %v1189_v61 = vrot.slane %v1185_v39, 5  ;;  %s4712_s11 = sld [smem:[#allocation7 + $0x3f]] }
 0x175   : > { %v483_v63 = vpop.permute.xlu0 %482  ;;  %v474_v0 = vpop.permute.xlu1 %473  ;;  %v1221_v59 = vmul.f32 %v1220_v45, %v5565_v43  ;;  %v1203_v5 = vsel %vm311_vm4, %v1201_v49, %v1202_v60 }
 0x176   : > { %v460_v4 = vadd.f32 %v458_v46, %v451_v57  ;;  %v1233_v46 = vstv %s5803_s7  ;;  %v1164_v57 = vsel %vm311_vm4, %v1162_v35, %v1163_v44  ;;  %v1190_v6 = vsel %vm311_vm4, %v1188_v52, %v1189_v61  ;;  %s4705_s7 = sld [smem:[#allocation7 + $0x38]] }
 0x177   : > { %1115 = vrot.lane.b32.xlu0 %v1114_v1, %s7548_s30  ;;  %1106 = vrot.lane.b32.xlu1 %v1105_v2, %s7544_s27  ;;  %v1234_v54 = vmul.f32 %v1233_v46, %v5565_v43  ;;  %v1222_v1 = vmul.f32 %v1220_v45, %v5585_v53  ;;  %v1259_v2 = vstv %s5815_s20  ;;  %v1225_v16 = vrot.slane %v1221_v59, 6  ;;  %s4719_s20 = sld [smem:[#allocation7 + $0x46]] }
 0x178   : > { %v467_v17 = vadd.f32 %v465_v62, %v460_v4  ;;  %v1235_v62 = vmul.f32 %v1233_v46, %v5585_v53  ;;  %v1261_v22 = vmul.f32 %v1259_v2, %v5585_v53  ;;  %v1251_v44 = vrot.slane %v1247_v20, 6 }
 0x179   : > { %v501_v23 = vpop.permute.xlu0 %500  ;;  %v492_v24 = vpop.permute.xlu1 %491  ;;  %v1238_v10 = vrot.slane %v1234_v54, 6  ;;  %v1226_v28 = vrot.slane %v1222_v1, 6  ;;  %v584_v61 = vstv %s5851_s17  ;;  %s7565_s17 = smov 3  }
 0x17a   : > { %v476_v31 = vadd.f32 %v474_v0, %v467_v17  ;;  %v524_v0 = vmul.f32 %v523_v36, %v5485_v51  ;;  %v1260_v17 = vmul.f32 %v1259_v2, %v5565_v43  ;;  %v1239_v21 = vrot.slane %v1235_v62, 6 }
 0x17b   : > { %1152 = vrot.lane.b32.xlu0 %v1151_v25, %s5201_s8  ;;  %1139 = vrot.lane.b32.xlu1 %v1138_v32, %s5202_s9 }
 0x17c   : > { %v485_v40 = vadd.f32 %v483_v63, %v476_v31  ;;  %v526_v25 = vrot.slane %v524_v0, 3  ;;  %v1248_v31 = vmul.f32 %v1246_v11, %v5585_v53  ;;  %v1240_v35 = vsel %vm739_vm8, %v1238_v10, %v1239_v21 }
 0x17d   : > { %v519_v47 = vpop.permute.xlu0 %518  ;;  %v510_v48 = vpop.permute.xlu1 %509  ;;  %v1264_v41 = vrot.slane %v1260_v17, 6 }
 0x17e   : > { %v494_v55 = vadd.f32 %v492_v24, %v485_v40  ;;  %v1272_v24 = vstv %s5830_s10  ;;  %v1227_v40 = vsel %vm739_vm8, %v1225_v16, %v1226_v28  ;;  %v1252_v49 = vrot.slane %v1248_v31, 6  ;;  %s4740_s10 = sld [smem:[#allocation7 + $0x5b]] }
 0x17f   : > { %1178 = vrot.lane.b32.xlu0 %v1177_v56, %s5203_s26  ;;  %1165 = vrot.lane.b32.xlu1 %v1164_v57, %s7546_s4  ;;  %v1273_v37 = vmul.f32 %v1272_v24, %v5565_v43  ;;  %v1274_v52 = vmul.f32 %v1272_v24, %v5585_v53  ;;  %v645_v31 = vstv %s4684_s28  ;;  %s4751_s28 = sld [smem:[#allocation7 + $0x82]] }
 0x180   : > { %v503_v63 = vadd.f32 %v501_v23, %v494_v55  ;;  %v1285_v23 = vstv %s5828_s23  ;;  %v1253_v59 = vsel %vm739_vm8, %v1251_v44, %v1252_v49  ;;  %s4733_s23 = sld [smem:[#allocation7 + $0x54]] }
 0x181   : > { %v544_v3 = vpop.permute.xlu0 %543  ;;  %v535_v4 = vpop.permute.xlu1 %534  ;;  %v1286_v36 = vmul.f32 %v1285_v23, %v5565_v43  ;;  %v1287_v46 = vmul.f32 %v1285_v23, %v5585_v53  ;;  %v1277_v60 = vrot.slane %v1273_v37, 6  ;;  %v1278_v0 = vrot.slane %v1274_v52, 6 }
 0x182   : > { %v512_v12 = vadd.f32 %v510_v48, %v503_v63  ;;  %v1265_v48 = vrot.slane %v1261_v22, 6  ;;  %v647_v37 = vmul.f32 %v645_v31, %v5585_v53 }
 0x183   : > { %1204 = vrot.lane.b32.xlu0 %v1203_v5, %s7548_s30  ;;  %1191 = vrot.lane.b32.xlu1 %v1190_v6, %s7544_s27  ;;  %v1290_v55 = vrot.slane %v1286_v36, 6  ;;  %v1291_v63 = vrot.slane %v1287_v46, 6  ;;  %v585_v5 = vmul.f32 %v584_v61, %v5485_v51  ;;  %v1279_v6 = vsel %vm739_vm8, %v1277_v60, %v1278_v0 }
 0x184   : > { %v521_v27 = vadd.f32 %v519_v47, %v512_v12  ;;  %v1266_v57 = vsel %vm739_vm8, %v1264_v41, %v1265_v48 }
 0x185   : > { %v562_v32 = vpop.permute.xlu0 %561  ;;  %v553_v33 = vpop.permute.xlu1 %552  ;;  %v587_v16 = vrot.slane %v585_v5, 4 }
 0x186   : > { %v528_v39 = vadd.f32 %v526_v25, %v521_v27 }
 0x187   : > { %1241 = vrot.lane.b32.xlu0 %v1240_v35, %s5201_s8  ;;  %1228 = vrot.lane.b32.xlu1 %v1227_v40, %s5202_s9 }
 0x188   : > { %v537_v47 = vadd.f32 %v535_v4, %v528_v39 }
 0x189   : > { %v580_v54 = vpop.permute.xlu0 %579  ;;  %v571_v45 = vpop.permute.xlu1 %570 }
 0x18a   : > { %v546_v56 = vadd.f32 %v544_v3, %v537_v47  ;;  %v1292_v3 = vsel %vm739_vm8, %v1290_v55, %v1291_v63  ;;  %v651_v47 = vrot.slane %v647_v37, 5 }
 0x18b   : > { %1267 = vrot.lane.b32.xlu0 %v1266_v57, %s5203_s26  ;;  %1254 = vrot.lane.b32.xlu1 %v1253_v59, %s7546_s4 }
 0x18c   : > { %v555_v62 = vadd.f32 %v553_v33, %v546_v56  ;;  %v734_v56 = vstv %s4691_s5  ;;  %s4750_s5 = sld [smem:[#allocation7 + $0x81]] }
 0x18d   : > { %v605_v1 = vpop.permute.xlu0 %604  ;;  %v596_v2 = vpop.permute.xlu1 %595  ;;  %v735_v60 = vmul.f32 %v734_v56, %v5485_v51 }
 0x18e   : > { %v564_v4 = vadd.f32 %v562_v32, %v555_v62  ;;  %v646_v32 = vmul.f32 %v645_v31, %v5485_v51  ;;  %v736_v62 = vmul.f32 %v734_v56, %v5585_v53 }
 0x18f   : > { %1293 = vrot.lane.b32.xlu0 %v1292_v3, %s7548_s30  ;;  %1280 = vrot.lane.b32.xlu1 %v1279_v6, %s7544_s27  ;;  %s4759_s27 = sld [smem:[#allocation7 + $0x8a]] }
 0x190   : > { %v573_v10 = vadd.f32 %v571_v45, %v564_v4  ;;  %v650_v40 = vrot.slane %v646_v32, 5  ;;  %v741_v5 = vrot.slane %v736_v62, 6 }
 0x191   : > { %v623_v11 = vpop.permute.xlu0 %622  ;;  %v614_v12 = vpop.permute.xlu1 %613 }
 0x192   : > { %v582_v17 = vadd.f32 %v580_v54, %v573_v10  ;;  %v652_v48 = vsel %vm311_vm4, %v650_v40, %v651_v47 }
 0x194   : > { %v589_v20 = vadd.f32 %v587_v16, %v582_v17 }
 0x195   : > { %v641_v21 = vpop.permute.xlu0 %640  ;;  %v632_v22 = vpop.permute.xlu1 %631 }
 0x196   : > { %v598_v23 = vadd.f32 %v596_v2, %v589_v20  ;;  %v740_v2 = vrot.slane %v735_v60, 6 }
 0x198   : > { %v607_v24 = vadd.f32 %v605_v1, %v598_v23  ;;  %v742_v10 = vsel %vm739_vm8, %v740_v2, %v741_v5 }
 0x199   : > { %v5875_v25 = vpop.permute.xlu0 %839  ;;  %v5877_v27 = vpop.permute.xlu1 %831 }
 0x19a   : > { %v616_v28 = vadd.f32 %v614_v12, %v607_v24 }
 0x19c   : > { %v625_v33 = vadd.f32 %v623_v11, %v616_v28  ;;  %v824_v28 = vstv %s4698_s6  ;;  %s4753_s6 = sld [smem:[#allocation7 + $0x84]] }
 0x19d   : > { %v5880_v35 = vpop.permute.xlu0 %855  ;;  %v5882_v36 = vpop.permute.xlu1 %847  ;;  %v825_v37 = vmul.f32 %v824_v28, %v5565_v43 }
 0x19e   : > { %v634_v39 = vadd.f32 %v632_v22, %v625_v33 }
 0x1a0   : > { %v643_v41 = vadd.f32 %v641_v21, %v634_v39 }
 0x1a1   : > { %v5885_v44 = vpop.permute.xlu0 %871  ;;  %v5887_v46 = vpop.permute.xlu1 %863 }
 0x1a2   : > { %v654_v49 = vadd.f32 %v652_v48, %v643_v41 }
 0x1a5   : > { %v678_v52 = vpop.permute.xlu0 %677  ;;  %v665_v54 = vpop.permute.xlu1 %664 }
 0x1a6   : > { %v667_v45 = vadd.f32 %v665_v54, %v654_v49 }
 0x1a8   : > { %v680_v55 = vadd.f32 %v678_v52, %v667_v45  ;;  %v876_v52 = vstv %s4705_s7  ;;  %s4752_s7 = sld [smem:[#allocation7 + $0x83]] }
 0x1a9   : > { %v704_v57 = vpop.permute.xlu0 %703  ;;  %v691_v59 = vpop.permute.xlu1 %690 }
 0x1aa   : > { %v693_v61 = vadd.f32 %v691_v59, %v680_v55  ;;  %v877_v55 = vmul.f32 %v876_v52, %v5565_v43 }
 0x1ac   : > { %v706_v63 = vadd.f32 %v704_v57, %v693_v61 }
 0x1ad   : > { %v730_v0 = vpop.permute.xlu0 %729  ;;  %v717_v1 = vpop.permute.xlu1 %716 }
 0x1ae   : > { %v719_v4 = vadd.f32 %v717_v1, %v706_v63  ;;  %1305 = vmax.xlane.f32.xlu0 %v5403_v8 }
 0x1b0   : > { %v732_v3 = vadd.f32 %v730_v0, %v719_v4  ;;  %v937_v0 = vstv %s4712_s11  ;;  %s4755_s11 = sld [smem:[#allocation7 + $0x86]] }
 0x1b1   : > { %v768_v6 = vpop.permute.xlu0 %767  ;;  %v755_v11 = vpop.permute.xlu1 %754  ;;  %v938_v4 = vmul.f32 %v937_v0, %v5565_v43 }
 0x1b2   : > { %v744_v12 = vadd.f32 %v742_v10, %v732_v3  ;;  %1307 = vmax.xlane.f32.xlu0 %v5406_v9 }
 0x1b3   : > { %1303 = vmax.xlane.f32.xlu1 %v5400_v7  ;;  %v940_v10 = vrot.slane %v938_v4, 2 }
 0x1b4   : > { %v757_v51 = vadd.f32 %v755_v11, %v744_v12 }
 0x1b5   : > { %v794_v16 = vpop.permute.xlu0 %793  ;;  %v781_v17 = vpop.permute.xlu1 %780 }
 0x1b6   : > { %v770_v20 = vadd.f32 %v768_v6, %v757_v51  ;;  %1311 = vmax.xlane.f32.xlu0 %v5416_v14 }
 0x1b7   : > { %1309 = vmax.xlane.f32.xlu1 %v5413_v13 }
 0x1b8   : > { %v783_v21 = vadd.f32 %v781_v17, %v770_v20  ;;  %v998_v20 = vstv %s4719_s20  ;;  %s4754_s20 = sld [smem:[#allocation7 + $0x85]] }
 0x1b9   : > { %v820_v22 = vpop.permute.xlu0 %819  ;;  %v807_v23 = vpop.permute.xlu1 %806 }
 0x1ba   : > { %v796_v24 = vadd.f32 %v794_v16, %v783_v21  ;;  %1315 = vmax.xlane.f32.xlu0 %v5426_v18 }
 0x1bb   : > { %1313 = vmax.xlane.f32.xlu1 %v5419_v15 }
 0x1bc   : > { %v809_v31 = vadd.f32 %v807_v23, %v796_v24  ;;  %v999_v23 = vmul.f32 %v998_v20, %v5565_v43  ;;  %v1209_v20 = vstv %s4740_s10  ;;  %s4760_s10 = sld [smem:[#allocation7 + $0x8b]] }
 0x1bd   : > { %v897_v32 = vpop.permute.xlu0 %896  ;;  %v888_v33 = vpop.permute.xlu1 %887 }
 0x1be   : > { %v822_v39 = vadd.f32 %v820_v22, %v809_v31  ;;  %1319 = vadd.xlane.f32.xlu0 %v5434_v26 }
 0x1bf   : > { %1317 = vmax.xlane.f32.xlu1 %v5429_v19 }
 0x1c0   : > { %v826_v40 = vadd.f32 %v825_v37, %v822_v39 }
 0x1c1   : > { %v906_v41 = vpop.permute.xlu1 %905  ;;  %v915_v48 = vpop.permute.xlu0 %914 }
 0x1c2   : > { %v834_v47 = vadd.f32 %v5877_v27, %v826_v40  ;;  %1323 = vadd.xlane.f32.xlu0 %v5440_v30 }
 0x1c3   : > { %1321 = vadd.xlane.f32.xlu1 %v5437_v29 }
 0x1c4   : > { %v842_v49 = vadd.f32 %v5875_v25, %v834_v47  ;;  %v879_v25 = vrot.slane %v877_v55, 1 }
 0x1c5   : > { %v924_v45 = vpop.permute.xlu1 %923  ;;  %v933_v27 = vpop.permute.xlu0 %932 }
 0x1c6   : > { %v850_v54 = vadd.f32 %v5882_v36, %v842_v49  ;;  %1327 = vadd.xlane.f32.xlu0 %v5450_v38 }
 0x1c7   : > { %1325 = vadd.xlane.f32.xlu1 %v5445_v34 }
 0x1c8   : > { %v858_v56 = vadd.f32 %v5880_v35, %v850_v54 }
 0x1c9   : > { %v949_v59 = vpop.permute.xlu1 %948  ;;  %v958_v61 = vpop.permute.xlu0 %957 }
 0x1ca   : > { %v866_v57 = vadd.f32 %v5887_v46, %v858_v56  ;;  %1331 = vadd.xlane.f32.xlu0 %v5458_v50 }
 0x1cb   : > { %1329 = vadd.xlane.f32.xlu1 %v5453_v42 }
 0x1cc   : > { %v874_v36 = vadd.f32 %v5885_v44, %v866_v57 }
 0x1cd   : > { %v967_v35 = vpop.permute.xlu1 %966  ;;  %v976_v2 = vpop.permute.xlu0 %975 }
 0x1ce   : > { %v881_v60 = vadd.f32 %v879_v25, %v874_v36 }
 0x1cf   : > { %1333 = vadd.xlane.f32.xlu1 %v5461_v58 }
 0x1d0   : > { %v890_v62 = vadd.f32 %v888_v33, %v881_v60  ;;  %v1001_v33 = vrot.slane %v999_v23, 3 }
 0x1d1   : > { %v985_v3 = vpop.permute.xlu1 %984  ;;  %v994_v44 = vpop.permute.xlu0 %993 }
 0x1d2   : > { %v899_v63 = vadd.f32 %v897_v32, %v890_v62  ;;  %v1120_v62 = vstv %s4733_s23  ;;  %s4757_s23 = sld [smem:[#allocation7 + $0x88]] }
 0x1d3   : > { %v1121_v0 = vmul.f32 %v1120_v62, %v5565_v43 }
 0x1d4   : > { %v908_v1 = vadd.f32 %v906_v41, %v899_v63 }
 0x1d5   : > { %v1010_v51 = vpop.permute.xlu1 %1009  ;;  %v1019_v17 = vpop.permute.xlu0 %1018  ;;  %v1125_v4 = vrot.slane %v1121_v0, 5 }
 0x1d6   : > { %v917_v46 = vadd.f32 %v915_v48, %v908_v1  ;;  %v1059_v48 = vstv %s4726_s29  ;;  %s4758_s29 = sld [smem:[#allocation7 + $0x89]] }
 0x1d8   : > { %v926_v5 = vadd.f32 %v924_v45, %v917_v46  ;;  %v1060_v45 = vmul.f32 %v1059_v48, %v5565_v43 }
 0x1d9   : > { %v1028_v24 = vpop.permute.xlu1 %1027  ;;  %v1037_v31 = vpop.permute.xlu0 %1036 }
 0x1da   : > { %v935_v6 = vadd.f32 %v933_v27, %v926_v5  ;;  %v1062_v57 = vrot.slane %v1060_v45, 4  ;;  %v1351_v45 = vlaneseq }
 0x1dc   : > { %v942_v11 = vadd.f32 %v940_v10, %v935_v6 }
 0x1dd   : > { %v1046_v39 = vpop.permute.xlu1 %1045  ;;  %v1055_v41 = vpop.permute.xlu0 %1054 }
 0x1de   : > { %v951_v12 = vadd.f32 %v949_v59, %v942_v11 }
 0x1e0   : > { %v960_v16 = vadd.f32 %v958_v61, %v951_v12 }
 0x1e1   : > { %v1071_v52 = vpop.permute.xlu1 %1070  ;;  %v1080_v55 = vpop.permute.xlu0 %1079 }
 0x1e2   : > { %v969_v21 = vadd.f32 %v967_v35, %v960_v16 }
 0x1e4   : > { %v978_v22 = vadd.f32 %v976_v2, %v969_v21  ;;  %v1122_v2 = vmul.f32 %v1120_v62, %v5585_v53 }
 0x1e5   : > { %v1089_v25 = vpop.permute.xlu1 %1088  ;;  %v1098_v59 = vpop.permute.xlu0 %1097 }
 0x1e6   : > { %v987_v28 = vadd.f32 %v985_v3, %v978_v22  ;;  %v1126_v3 = vrot.slane %v1122_v2, 5  ;;  %v1210_v22 = vmul.f32 %v1209_v20, %v5565_v43 }
 0x1e8   : > { %v996_v32 = vadd.f32 %v994_v44, %v987_v28  ;;  %v1127_v11 = vsel %vm311_vm4, %v1125_v4, %v1126_v3 }
 0x1e9   : > { %v1107_v63 = vpop.permute.xlu1 %1106  ;;  %v1116_v1 = vpop.permute.xlu0 %1115 }
 0x1ea   : > { %v1003_v37 = vadd.f32 %v1001_v33, %v996_v32  ;;  %v1214_v32 = vrot.slane %v1210_v22, 6 }
 0x1ec   : > { %v1012_v40 = vadd.f32 %v1010_v51, %v1003_v37 }
 0x1ed   : > { %v1140_v6 = vpop.permute.xlu1 %1139  ;;  %v1153_v44 = vpop.permute.xlu0 %1152 }
 0x1ee   : > { %v1021_v47 = vadd.f32 %v1019_v17, %v1012_v40 }
 0x1f0   : > { %v1030_v49 = vadd.f32 %v1028_v24, %v1021_v47  ;;  %v1211_v24 = vmul.f32 %v1209_v20, %v5585_v53 }
 0x1f1   : > { %v1166_v16 = vpop.permute.xlu1 %1165  ;;  %v1179_v21 = vpop.permute.xlu0 %1178 }
 0x1f2   : > { %v1039_v54 = vadd.f32 %v1037_v31, %v1030_v49 }
 0x1f4   : > { %v1048_v56 = vadd.f32 %v1046_v39, %v1039_v54  ;;  %v1215_v39 = vrot.slane %v1211_v24, 6 }
 0x1f5   : > { %v1192_v31 = vpop.permute.xlu1 %1191  ;;  %v1205_v37 = vpop.permute.xlu0 %1204 }
 0x1f6   : > { %v1057_v27 = vadd.f32 %v1055_v41, %v1048_v56  ;;  %v1216_v41 = vsel %vm739_vm8, %v1214_v32, %v1215_v39 }
 0x1f8   : > { %v1064_v36 = vadd.f32 %v1062_v57, %v1057_v27  ;;  %v1352_v27 = vand.u32 127, %v1351_v45 }
 0x1f9   : > { %v5928_v48 = vpop.permute.xlu0 %1241  ;;  %v5930_v49 = vpop.permute.xlu1 %1228 }
 0x1fa   : > { %v1073_v60 = vadd.f32 %v1071_v52, %v1064_v36  ;;  %v1357_v36 = vadd.s32 4294967288, %v1352_v27 }
 0x1fc   : > { %v1082_v61 = vadd.f32 %v1080_v55, %v1073_v60 }
 0x1fd   : > { %v5932_v52 = vpop.permute.xlu0 %1267  ;;  %v5934_v43 = vpop.permute.xlu1 %1254 }
 0x1fe   : > { %v1091_v35 = vadd.f32 %v1089_v25, %v1082_v61 }
 0x200   : > { %v1100_v46 = vadd.f32 %v1098_v59, %v1091_v35  ;;  %v5940_v59 = vshrl.u32 %v1351_v45, 7 }
 0x201   : > { %v5936_v54 = vpop.permute.xlu0 %1293  ;;  %v5938_v56 = vpop.permute.xlu1 %1280 }
 0x202   : > { %v1109_v5 = vadd.f32 %v1107_v63, %v1100_v46  ;;  %7563 = vst [vmem:[#allocation14_spill] sm:$0xff] %v5936_v54  ;;  %7564 = vst [vmem:[#allocation15_spill] sm:$0xff] %v5938_v56  ;;  %v1360_v62 = vsub.s32 %v1357_v36, %v5940_v59  ;;  %v1355_v63 = vsub.s32 %v1352_v27, %v5940_v59 }
 0x204   : > { %v1118_v10 = vadd.f32 %v1116_v1, %v1109_v5 }
 0x206   : > { %v1129_v12 = vadd.f32 %v1127_v11, %v1118_v10 }
 0x208   : > { %v1142_v51 = vadd.f32 %v1140_v6, %v1129_v12 }
 0x20a   : > { %v1155_v17 = vadd.f32 %v1153_v44, %v1142_v51 }
 0x20c   : > { %v1168_v23 = vadd.f32 %v1166_v16, %v1155_v17 }
 0x20e   : > { %v1181_v28 = vadd.f32 %v1179_v21, %v1168_v23 }
 0x210   : > { %v1194_v33 = vadd.f32 %v1192_v31, %v1181_v28 }
 0x212   : > { %v1207_v40 = vadd.f32 %v1205_v37, %v1194_v33 }
 0x214   : > { %v5926_v47 = vadd.f32 %v1216_v41, %v1207_v40 }
 0x23b   : > { %v1306_v55 = vpop.xlane.xlu0 %1305 }
 0x23c   : > { %v1361_v4 = vrot.slane %v1306_v55, %v1360_v62 }
 0x23f   : > { %v1308_v57 = vpop.xlane.xlu0 %1307 }
 0x240   : > { %v1304_v25 = vpop.xlane.xlu1 %1303  ;;  %v1367_v0 = vrot.slane %v1308_v57, %v1355_v63 }
 0x241   : > { %v1356_v5 = vrot.slane %v1304_v25, %v1355_v63 }
 0x243   : > { %v1312_v60 = vpop.xlane.xlu0 %1311  ;;  %v1363_v51 = vsel %vm1362_vm9, %v1361_v4, %v1356_v5 }
 0x244   : > { %v1310_v61 = vpop.xlane.xlu1 %1309  ;;  %v1376_v2 = vrot.slane %v1312_v60, %v1355_v63 }
 0x245   : > { %v1371_v35 = vrot.slane %v1310_v61, %v1360_v62 }
 0x247   : > { %v1316_v1 = vpop.xlane.xlu0 %1315  ;;  %v1372_v6 = vsel %vm1362_vm9, %v1371_v35, %v1367_v0 }
 0x248   : > { %v1314_v46 = vpop.xlane.xlu1 %1313  ;;  %v1385_v10 = vrot.slane %v1316_v1, %v1355_v63  ;;  %v1391_v17 = vsel %vm304_vm1, %v1372_v6, %v1363_v51 }
 0x249   : > { %v1380_v3 = vrot.slane %v1314_v46, %v1360_v62 }
 0x24b   : > { %v1320_v44 = vpop.xlane.xlu0 %1319  ;;  %v1381_v11 = vsel %vm1362_vm9, %v1380_v3, %v1376_v2 }
 0x24c   : > { %v1318_v12 = vpop.xlane.xlu1 %1317  ;;  %v1392_v21 = vsel %vm306_vm2, %v1381_v11, %v1391_v17  ;;  %v1335_v23 = vmul.f32 0.0625, %v1320_v44 }
 0x24d   : > { %v1389_v16 = vrot.slane %v1318_v12, %v1360_v62 }
 0x24e   : > { %v1414_v40 = vrot.slane %v1335_v23, %v1355_v63 }
 0x24f   : > { %v1390_v20 = vsel %vm1362_vm9, %v1389_v16, %v1385_v10  ;;  %v1324_v22 = vpop.xlane.xlu0 %1323 }
 0x250   : > { %v1322_v24 = vpop.xlane.xlu1 %1321  ;;  %v1393_v28 = vsel %vm308_vm3, %v1390_v20, %v1392_v21  ;;  %v1337_v33 = vmul.f32 0.0625, %v1324_v22  ;;  %v1467_v20 = vstv %s4750_s5  ;;  %s4761_s5 = sld [smem:[#allocation7 + $0x8c]] }
 0x251   : > { %v1336_v31 = vmul.f32 0.0625, %v1322_v24  ;;  %v1395_v32 = vsel %vm311_vm4, 0.0, %v1393_v28  ;;  %v1491_v28 = vstv %s4753_s6  ;;  %s4765_s6 = sld [smem:[#allocation7 + $0x90]] }
 0x252   : > { %v1396_v37 = vsel %vm313_vm5, %v1395_v32, 0.0  ;;  %v1423_v55 = vrot.slane %v1337_v33, %v1355_v63 }
 0x253   : > { %1398 = vrot.lane.b32.xlu0 %v1396_v37, %s7565_s17  ;;  %v1328_v39 = vpop.xlane.xlu0 %1327  ;;  %v1418_v41 = vrot.slane %v1336_v31, %v1360_v62  ;;  %v1483_v31 = vstv %s4752_s7  ;;  %v1507_v37 = vstv %s4755_s11  ;;  %s4764_s7 = sld [smem:[#allocation7 + $0x8f]]  ;;  %s7566_s11 = smov 123  }
 0x254   : > { %v1326_v45 = vpop.xlane.xlu1 %1325  ;;  %v1339_v57 = vmul.f32 0.0625, %v1328_v39  ;;  %v1499_v39 = vstv %s4754_s20  ;;  %s4767_s20 = sld [smem:[#allocation7 + $0x92]] }
 0x255   : > { %v1338_v27 = vmul.f32 0.0625, %v1326_v45  ;;  %v1419_v60 = vsel %vm1362_vm9, %v1418_v41, %v1414_v40  ;;  %v1531_v40 = vstv %s4758_s29  ;;  %v1522_v41 = vstv %s4757_s23  ;;  %s4766_s29 = sld [smem:[#allocation7 + $0x91]]  ;;  %s4768_s23 = sld [smem:[#allocation7 + $0x93]] }
 0x256   : > { %v1432_v35 = vrot.slane %v1339_v57, %v1355_v63 }
 0x257   : > { %v1427_v25 = vrot.slane %v1338_v27, %v1360_v62  ;;  %v1332_v36 = vpop.xlane.xlu0 %1331 }
 0x258   : > { %v1330_v61 = vpop.xlane.xlu1 %1329  ;;  %v1341_v2 = vmul.f32 0.0625, %v1332_v36  ;;  %v1540_v36 = vstv %s4759_s27  ;;  %s4769_s27 = sld [smem:[#allocation7 + $0x94]] }
 0x259   : > { %v1428_v0 = vsel %vm1362_vm9, %v1427_v25, %v1423_v55  ;;  %v1340_v1 = vmul.f32 0.0625, %v1330_v61  ;;  %v1549_v25 = vstv %s4760_s10  ;;  %s4772_s10 = sld [smem:[#allocation7 + $0x97]] }
 0x25a   : > { %v1447_v5 = vsel %vm304_vm1, %v1428_v0, %v1419_v60  ;;  %v1441_v6 = vrot.slane %v1341_v2, %v1355_v63  ;;  %v1558_v2 = vstv %s4761_s5  ;;  %s4774_s5 = sld [smem:[#allocation7 + $0x99]] }
 0x25b   : > { %v1436_v46 = vrot.slane %v1340_v1, %v1360_v62 }
 0x25c   : > { %v1334_v4 = vpop.xlane.xlu1 %1333 }
 0x25d   : > { %v1437_v3 = vsel %vm1362_vm9, %v1436_v46, %v1432_v35  ;;  %v1342_v10 = vmul.f32 0.0625, %v1334_v4 }
 0x25e   : > { %v1448_v11 = vsel %vm306_vm2, %v1437_v3, %v1447_v5 }
 0x25f   : > { %v1445_v44 = vrot.slane %v1342_v10, %v1360_v62  ;;  %v1475_v62 = vstv %s4751_s28  ;;  %s4762_s28 = sld [smem:[#allocation7 + $0x8d]]  ;;  %v1583_v10 = vstv %s4764_s7  ;;  %s4776_s7 = sld [smem:[#allocation7 + $0x9b]] }
 0x261   : > { %v1446_v12 = vsel %vm1362_vm9, %v1445_v44, %v1441_v6  ;;  %v1592_v6 = vstv %s4765_s6  ;;  %s4773_s6 = sld [smem:[#allocation7 + $0x98]] }
 0x262   : > { %v1449_v51 = vsel %vm308_vm3, %v1446_v12, %v1448_v11 }
 0x263   : > { %v1451_v16 = vsel %vm311_vm4, 0.0, %v1449_v51 }
 0x264   : > { %v1452_v17 = vsel %vm313_vm5, %v1451_v16, 0.0  ;;  %v1610_v16 = vstv %s4767_s20  ;;  %s4775_s20 = sld [smem:[#allocation7 + $0x9a]] }
 0x265   : > { %1454 = vrot.lane.b32.xlu1 %v1452_v17, %s7565_s17  ;;  %v1567_v1 = vstv %s4762_s28  ;;  %v1601_v17 = vstv %s4766_s29  ;;  %s4771_s28 = sld [smem:[#allocation7 + $0x96]] }
 0x266   : > { %s4779_s29 = sld [smem:[#allocation7 + $0x9e]] }
 0x2c5   : > { %v1399_v63 = vpop.permute.xlu0 %1398 }
 0x2c6   : > { %v1401_v21 = vsel %vm323_vm6, 0.0, %v1399_v63 }
 0x2c7   : > { %v5966_v22 = vsel %vm326_vm7, %v1401_v21, 0.0 }
 0x2c8   : > { %v1476_v23 = vmul.f32 %v1475_v62, %v5966_v22  ;;  %v1468_v24 = vmul.f32 %v1467_v20, %v5966_v22  ;;  %v1492_v32 = vmul.f32 %v1491_v28, %v5966_v22  ;;  %v1484_v33 = vmul.f32 %v1483_v31, %v5966_v22 }
 0x2c9   : > { %v1508_v45 = vmul.f32 %v1507_v37, %v5966_v22  ;;  %v1500_v55 = vmul.f32 %v1499_v39, %v5966_v22  ;;  %v1532_v27 = vmul.f32 %v1531_v40, %v5966_v22  ;;  %v1523_v57 = vmul.f32 %v1522_v41, %v5966_v22 }
 0x2ca   : > { %1478 = vrot.lane.b32.xlu0 %v1476_v23, %s5201_s8  ;;  %1470 = vrot.lane.b32.xlu1 %v1468_v24, %s5202_s9  ;;  %v1550_v0 = vmul.f32 %v1549_v25, %v5966_v22  ;;  %v1541_v35 = vmul.f32 %v1540_v36, %v5966_v22  ;;  %v1568_v5 = vmul.f32 %v1567_v1, %v5966_v22  ;;  %v1628_v23 = vstv %s4769_s27  ;;  %s4778_s27 = sld [smem:[#allocation7 + $0x9d]] }
 0x2cb   : > { %v1534_v60 = vrot.slane %v1532_v27, 1  ;;  %v1525_v61 = vrot.slane %v1523_v57, 1  ;;  %v1559_v3 = vmul.f32 %v1558_v2, %v5966_v22  ;;  %v1593_v12 = vmul.f32 %v1592_v6, %v5966_v22 }
 0x2cc   : > { %v1552_v46 = vrot.slane %v1550_v0, 1  ;;  %v1543_v4 = vrot.slane %v1541_v35, 1  ;;  %v1570_v44 = vrot.slane %v1568_v5, 1  ;;  %v1584_v51 = vmul.f32 %v1583_v10, %v5966_v22 }
 0x2cd   : > { %v1561_v11 = vrot.slane %v1559_v3, 1  ;;  %v1595_v63 = vrot.slane %v1593_v12, 2  ;;  %v1611_v20 = vmul.f32 %v1610_v16, %v5966_v22  ;;  %v1602_v21 = vmul.f32 %v1601_v17, %v5966_v22 }
 0x2ce   : > { %1494 = vrot.lane.b32.xlu0 %v1492_v32, %s5203_s26  ;;  %1486 = vrot.lane.b32.xlu1 %v1484_v33, %s7546_s4  ;;  %v1586_v62 = vrot.slane %v1584_v51, 2  ;;  %v1619_v24 = vstv %s4768_s23  ;;  %v1629_v32 = vmul.f32 %v1628_v23, %v5966_v22  ;;  %v1653_v37 = vstv %s4772_s10  ;;  %s4781_s23 = sld [smem:[#allocation7 + $0xa0]]  ;;  %s4780_s10 = sld [smem:[#allocation7 + $0x9f]] }
 0x2cf   : > { %v1613_v28 = vrot.slane %v1611_v20, 2  ;;  %v1604_v31 = vrot.slane %v1602_v21, 2  ;;  %v1620_v33 = vmul.f32 %v1619_v24, %v5966_v22  ;;  %v1644_v39 = vstv %s4771_s28  ;;  %s4783_s28 = sld [smem:[#allocation7 + $0xa2]] }
 0x2d0   : > { %v1631_v40 = vrot.slane %v1629_v32, 2  ;;  %v1671_v27 = vstv %s4774_s5  ;;  %v1662_v57 = vstv %s4773_s6  ;;  %v1689_v0 = vstv %s4776_s7  ;;  %s4782_s5 = sld [smem:[#allocation7 + $0xa1]]  ;;  %s6014_s6 = sld [smem:[#allocation7 + $0xa5]] }
 0x2d1   : > { %v1622_v41 = vrot.slane %v1620_v33, 2  ;;  %v1680_v35 = vstv %s4775_s20  ;;  %v1714_v5 = vstv %s4779_s29  ;;  %v1705_v3 = vstv %s4778_s27  ;;  %s6016_s7 = sld [smem:[#allocation7 + $0xa4]]  ;;  %s6024_s20 = sld [smem:[#allocation7 + $0xa7]] }
 0x2d2   : > { %1510 = vrot.lane.b32.xlu0 %v1508_v45, %s7548_s30  ;;  %1502 = vrot.lane.b32.xlu1 %v1500_v55, %s7566_s11  ;;  %v1654_v45 = vmul.f32 %v1653_v37, %v5966_v22  ;;  %v1645_v55 = vmul.f32 %v1644_v39, %v5966_v22  ;;  %s6026_s29 = sld [smem:[#allocation7 + $0xa6]]  ;;  %s6030_s27 = sld [smem:[#allocation7 + $0xa9]] }
 0x2d4   : > { %v1656_v25 = vrot.slane %v1654_v45, 3  ;;  %v1647_v36 = vrot.slane %v1645_v55, 3  ;;  %v1732_v12 = vstv %s4781_s23  ;;  %v1723_v51 = vstv %s4780_s10  ;;  %s6032_s23 = sld [smem:[#allocation7 + $0xa8]]  ;;  %s6044_s10 = sld [smem:[#allocation7 + $0xac]] }
 0x2d5   : > { %v1750_v20 = vstv %s4783_s28  ;;  %s6048_s28 = sld [smem:[#allocation7 + $0xab]] }
 0x2d6   : > { %1535 = vrot.lane.b32.xlu0 %v1534_v60, %s5201_s8  ;;  %1526 = vrot.lane.b32.xlu1 %v1525_v61, %s5202_s9  ;;  %v1672_v60 = vmul.f32 %v1671_v27, %v5966_v22  ;;  %v1663_v61 = vmul.f32 %v1662_v57, %v5966_v22  ;;  %v1741_v21 = vstv %s4782_s5  ;;  %v1783_v23 = vstv %s6014_s6  ;;  %s6060_s5 = sld [smem:[#allocation7 + $0xae]]  ;;  %s6062_s6 = sld [smem:[#allocation7 + $0xad]] }
 0x2d7   : > { %v1770_v24 = vstv %s6016_s7  ;;  %v1751_v32 = vmul.f32 %v1750_v20, %v5966_v22  ;;  %v1742_v33 = vmul.f32 %v1741_v21, %v5966_v22  ;;  %v1784_v37 = vmul.f32 %v1783_v23, %v5966_v22  ;;  %s6071_s7 = sld [smem:[#allocation7 + $0xb0]] }
 0x2d8   : > { %v1674_v1 = vrot.slane %v1672_v60, 3  ;;  %v1665_v2 = vrot.slane %v1663_v61, 3  ;;  %v1771_v39 = vmul.f32 %v1770_v24, %v5966_v22  ;;  %v1809_v27 = vstv %s6024_s20  ;;  %s6075_s20 = sld [smem:[#allocation7 + $0xaf]] }
 0x2d9   : > { %v1753_v45 = vrot.slane %v1751_v32, 4  ;;  %v1744_v55 = vrot.slane %v1742_v33, 4  ;;  %v1796_v57 = vstv %s6026_s29  ;;  %v1810_v60 = vmul.f32 %v1809_v27, %v5966_v22  ;;  %s6100_s29 = sld [smem:[#allocation7 + $0xb3]] }
 0x2da   : > { %1553 = vrot.lane.b32.xlu0 %v1552_v46, %s5203_s26  ;;  %1544 = vrot.lane.b32.xlu1 %v1543_v4, %s7546_s4  ;;  %v1690_v46 = vmul.f32 %v1689_v0, %v5966_v22  ;;  %v1681_v4 = vmul.f32 %v1680_v35, %v5966_v22  ;;  %v1797_v61 = vmul.f32 %v1796_v57, %v5966_v22  ;;  %v1835_v0 = vstv %s6030_s27  ;;  %s6102_s27 = sld [smem:[#allocation7 + $0xb2]] }
 0x2db   : > { %v1822_v35 = vstv %s6032_s23  ;;  %v1859_v21 = vstv %s6048_s28  ;;  %s4802_s23 = sld [smem:[#allocation7 + $0xb5]]  ;;  %s4804_s28 = sld [smem:[#allocation7 + $0xb7]] }
 0x2dc   : > { %v1692_v6 = vrot.slane %v1690_v46, 3  ;;  %v1683_v10 = vrot.slane %v1681_v4, 3  ;;  %v1811_v46 = vmul.f32 %v1809_v27, %v5585_v53  ;;  %v1798_v4 = vmul.f32 %v1796_v57, %v5585_v53 }
 0x2de   : > { %1571 = vrot.lane.b32.xlu0 %v1570_v44, %s7548_s30  ;;  %1562 = vrot.lane.b32.xlu1 %v1561_v11, %s7566_s11  ;;  %v1715_v44 = vmul.f32 %v1714_v5, %v5966_v22  ;;  %v1706_v11 = vmul.f32 %v1705_v3, %v5966_v22  ;;  %v1836_v5 = vmul.f32 %v1835_v0, %v5966_v22 }
 0x2df   : > { %v1823_v3 = vmul.f32 %v1822_v35, %v5966_v22 }
 0x2e0   : > { %v1717_v16 = vrot.slane %v1715_v44, 4  ;;  %v1708_v17 = vrot.slane %v1706_v11, 4  ;;  %v1814_v44 = vrot.slane %v1810_v60, 5  ;;  %v1801_v11 = vrot.slane %v1797_v61, 5 }
 0x2e2   : > { %1596 = vrot.lane.b32.xlu0 %v1595_v63, %s5201_s8  ;;  %1587 = vrot.lane.b32.xlu1 %v1586_v62, %s5202_s9  ;;  %v1733_v63 = vmul.f32 %v1732_v12, %v5966_v22  ;;  %v1724_v62 = vmul.f32 %v1723_v51, %v5966_v22  ;;  %v1837_v12 = vmul.f32 %v1835_v0, %v5585_v53  ;;  %v1815_v51 = vrot.slane %v1811_v46, 5 }
 0x2e4   : > { %v1841_v32 = vrot.slane %v1837_v12, 5 }
 0x2e6   : > { %1614 = vrot.lane.b32.xlu0 %v1613_v28, %s5203_s26  ;;  %1605 = vrot.lane.b32.xlu1 %v1604_v31, %s7546_s4  ;;  %v1735_v28 = vrot.slane %v1733_v63, 4  ;;  %v1726_v31 = vrot.slane %v1724_v62, 4  ;;  %v1872_v63 = vstv %s6044_s10  ;;  %v1840_v62 = vrot.slane %v1836_v5, 5  ;;  %s4801_s10 = sld [smem:[#allocation7 + $0xb4]] }
 0x2e7   : > { %v1873_v20 = vmul.f32 %v1872_v63, %v5966_v22  ;;  %v1874_v33 = vmul.f32 %v1872_v63, %v5585_v53 }
 0x2e9   : > { %v1878_v60 = vrot.slane %v1874_v33, 6  ;;  %v1941_v33 = vstv %s6102_s27  ;;  %s4810_s27 = sld [smem:[#allocation7 + $0xbd]] }
 0x2ea   : > { %1632 = vrot.lane.b32.xlu0 %v1631_v40, %s7548_s30  ;;  %1623 = vrot.lane.b32.xlu1 %v1622_v41, %s7566_s11  ;;  %v1785_v40 = vmul.f32 %v1783_v23, %v5585_v53  ;;  %v1772_v41 = vmul.f32 %v1770_v24, %v5585_v53  ;;  %v1816_v23 = vsel %vm311_vm4, %v1814_v44, %v1815_v51 }
 0x2ee   : > { %1657 = vrot.lane.b32.xlu0 %v1656_v25, %s5201_s8  ;;  %1648 = vrot.lane.b32.xlu1 %v1647_v36, %s5202_s9  ;;  %v1788_v25 = vrot.slane %v1784_v37, 5  ;;  %v1775_v36 = vrot.slane %v1771_v39, 5  ;;  %v1861_v39 = vmul.f32 %v1859_v21, %v5585_v53 }
 0x2f0   : > { %v1865_v61 = vrot.slane %v1861_v39, 6 }
 0x2f2   : > { %1675 = vrot.lane.b32.xlu0 %v1674_v1, %s5203_s26  ;;  %1666 = vrot.lane.b32.xlu1 %v1665_v2, %s7546_s4  ;;  %v1789_v1 = vrot.slane %v1785_v40, 5  ;;  %v1776_v2 = vrot.slane %v1772_v41, 5  ;;  %v1842_v40 = vsel %vm311_vm4, %v1840_v62, %v1841_v32  ;;  %v1877_v41 = vrot.slane %v1873_v20, 6 }
 0x2f3   : > { %v1949_v32 = vstv %s6100_s29  ;;  %s4811_s29 = sld [smem:[#allocation7 + $0xbe]] }
 0x2f6   : > { %1693 = vrot.lane.b32.xlu0 %v1692_v6, %s7548_s30  ;;  %1684 = vrot.lane.b32.xlu1 %v1683_v10, %s7566_s11  ;;  %v1790_v6 = vsel %vm311_vm4, %v1788_v25, %v1789_v1  ;;  %v1777_v10 = vsel %vm311_vm4, %v1775_v36, %v1776_v2  ;;  %v1924_v1 = vstv %s6071_s7  ;;  %v1879_v2 = vsel %vm739_vm8, %v1877_v41, %v1878_v60  ;;  %s4806_s7 = sld [smem:[#allocation7 + $0xb9]] }
 0x2f7   : > { %v1925_v46 = vmul.f32 %v1924_v1, %v5966_v22  ;;  %v1926_v12 = vmul.f32 %v1924_v1, %v5585_v53  ;;  %v1965_v41 = vstv %s4802_s23  ;;  %s7567_s23 = smov 125  }
 0x2f9   : > { %v1929_v62 = vrot.slane %v1925_v46, 6 }
 0x2fa   : > { %1718 = vrot.lane.b32.xlu0 %v1717_v16, %s5201_s8  ;;  %1709 = vrot.lane.b32.xlu1 %v1708_v17, %s5202_s9  ;;  %v1802_v16 = vrot.slane %v1798_v4, 5  ;;  %v1824_v17 = vmul.f32 %v1822_v35, %v5585_v53  ;;  %v1911_v4 = vstv %s6075_s20  ;;  %s4809_s20 = sld [smem:[#allocation7 + $0xbc]] }
 0x2fb   : > { %v1913_v51 = vmul.f32 %v1911_v4, %v5585_v53 }
 0x2fc   : > { %v1803_v24 = vsel %vm311_vm4, %v1801_v11, %v1802_v16  ;;  %v1828_v37 = vrot.slane %v1824_v17, 5  ;;  %v1455_v16 = vpop.permute.xlu1 %1454  ;;  %v1996_v60 = vstv %s4806_s7  ;;  %s6144_s7 = sld [smem:[#allocation7 + $0xc5]] }
 0x2fe   : > { %1736 = vrot.lane.b32.xlu0 %v1735_v28, %s5203_s26  ;;  %1727 = vrot.lane.b32.xlu1 %v1726_v31, %s7546_s4  ;;  %v1827_v28 = vrot.slane %v1823_v3, 5  ;;  %v1860_v31 = vmul.f32 %v1859_v21, %v5966_v22  ;;  %v1930_v21 = vrot.slane %v1926_v12, 6 }
 0x300   : > { %v1829_v27 = vsel %vm311_vm4, %v1827_v28, %v1828_v37  ;;  %v1864_v57 = vrot.slane %v1860_v31, 6  ;;  %v1931_v28 = vsel %vm739_vm8, %v1929_v62, %v1930_v21 }
 0x302   : > { %1754 = vrot.lane.b32.xlu0 %v1753_v45, %s7548_s30  ;;  %1745 = vrot.lane.b32.xlu1 %v1744_v55, %s7566_s11  ;;  %v1898_v45 = vstv %s6060_s5  ;;  %v1885_v55 = vstv %s6062_s6  ;;  %v1866_v5 = vsel %vm739_vm8, %v1864_v57, %v1865_v61  ;;  %s4803_s5 = sld [smem:[#allocation7 + $0xb6]]  ;;  %s4807_s6 = sld [smem:[#allocation7 + $0xba]] }
 0x303   : > { %v1899_v25 = vmul.f32 %v1898_v45, %v5966_v22  ;;  %v1886_v36 = vmul.f32 %v1885_v55, %v5966_v22  ;;  %v1900_v0 = vmul.f32 %v1898_v45, %v5585_v53  ;;  %v1887_v35 = vmul.f32 %v1885_v55, %v5585_v53 }
 0x304   : > { %v1957_v45 = vstv %s4801_s10  ;;  %v1981_v57 = vstv %s4804_s28  ;;  %s4814_s10 = sld [smem:[#allocation7 + $0xc1]]  ;;  %s4813_s28 = sld [smem:[#allocation7 + $0xc0]] }
 0x305   : > { %v1903_v3 = vrot.slane %v1899_v25, 6  ;;  %v1904_v44 = vrot.slane %v1900_v0, 6  ;;  %v1891_v11 = vrot.slane %v1887_v35, 6 }
 0x306   : > { %1791 = vrot.lane.b32.xlu0 %v1790_v6, %s5201_s8  ;;  %1778 = vrot.lane.b32.xlu1 %v1777_v10, %s5202_s9  ;;  %v1890_v6 = vrot.slane %v1886_v36, 6  ;;  %v1912_v10 = vmul.f32 %v1911_v4, %v5966_v22 }
 0x307   : > { %v1905_v17 = vsel %vm739_vm8, %v1903_v3, %v1904_v44  ;;  %v2032_v44 = vstv %s4810_s27  ;;  %s6154_s27 = sld [smem:[#allocation7 + $0xc8]] }
 0x308   : > { %v1892_v63 = vsel %vm739_vm8, %v1890_v6, %v1891_v11  ;;  %v1916_v20 = vrot.slane %v1912_v10, 6  ;;  %v1973_v25 = vstv %s4803_s5  ;;  %v2005_v36 = vstv %s4807_s6  ;;  %s4816_s5 = sld [smem:[#allocation7 + $0xc3]]  ;;  %s4815_s6 = sld [smem:[#allocation7 + $0xc2]] }
 0x309   : > { %v2041_v10 = vstv %s4811_s29  ;;  %s6150_s29 = sld [smem:[#allocation8 + $0x1]] }
 0x30a   : > { %1817 = vrot.lane.b32.xlu0 %v1816_v23, %s5203_s26  ;;  %1804 = vrot.lane.b32.xlu1 %v1803_v24, %s7546_s4  ;;  %v1917_v23 = vrot.slane %v1913_v51, 6  ;;  %v1457_v24 = vsel %vm323_vm6, 0.0, %v1455_v16 }
 0x30b   : > { %v6120_v37 = vsel %vm326_vm7, %v1457_v24, 0.0 }
 0x30c   : > { %v1918_v31 = vsel %vm739_vm8, %v1916_v20, %v1917_v23  ;;  %v1950_v39 = vmul.f32 %v1949_v32, %v6120_v37  ;;  %v1966_v55 = vmul.f32 %v1965_v41, %v6120_v37  ;;  %v1982_v61 = vmul.f32 %v1981_v57, %v6120_v37 }
 0x30d   : > { %v1974_v0 = vmul.f32 %v1973_v25, %v6120_v37  ;;  %v2006_v35 = vmul.f32 %v2005_v36, %v6120_v37  ;;  %v1997_v1 = vmul.f32 %v1996_v60, %v6120_v37  ;;  %v2042_v51 = vmul.f32 %v2041_v10, %v6120_v37 }
 0x30e   : > { %1843 = vrot.lane.b32.xlu0 %v1842_v40, %s7548_s30  ;;  %1830 = vrot.lane.b32.xlu1 %v1829_v27, %s7566_s11  ;;  %v1942_v40 = vmul.f32 %v1941_v33, %v6120_v37  ;;  %v1958_v27 = vmul.f32 %v1957_v45, %v6120_v37  ;;  %v2033_v16 = vmul.f32 %v2032_v44, %v6120_v37  ;;  %v2084_v24 = vstv %s4816_s5  ;;  %s6167_s5 = sld [smem:[#allocation7 + $0xc9]] }
 0x30f   : > { %v2008_v4 = vrot.slane %v2006_v35, 1  ;;  %v2044_v62 = vrot.slane %v2042_v51, 1  ;;  %v2102_v41 = vstv %s6144_s7  ;;  %s6181_s7 = sld [smem:[#allocation7 + $0xcb]] }
 0x310   : > { %v2035_v20 = vrot.slane %v2033_v16, 1  ;;  %v2103_v36 = vmul.f32 %v2102_v41, %v6120_v37 }
 0x312   : > { %1880 = vrot.lane.b32.xlu0 %v1879_v2, %s5201_s8  ;;  %1867 = vrot.lane.b32.xlu1 %v1866_v5, %s5202_s9  ;;  %v2023_v2 = vstv %s4809_s20  ;;  %v1999_v5 = vrot.slane %v1997_v1, 1  ;;  %s6146_s20 = sld [smem:[#allocation7 + $0xc4]] }
 0x313   : > { %v2024_v3 = vmul.f32 %v2023_v2, %v6120_v37 }
 0x314   : > { %v2136_v44 = vstv %s6167_s5  ;;  %s6213_s5 = sld [smem:[#allocation7 + $0xd2]] }
 0x315   : > { %v2026_v11 = vrot.slane %v2024_v3, 1 }
 0x316   : > { %1906 = vrot.lane.b32.xlu0 %v1905_v17, %s5203_s26  ;;  %1893 = vrot.lane.b32.xlu1 %v1892_v63, %s7546_s4  ;;  %s4808_s4 = sld [smem:[#allocation7 + $0xbb]]  ;;  %v2066_v17 = vstv %s4814_s10  ;;  %v2057_v63 = vstv %s4813_s28  ;;  %s6156_s10 = sld [smem:[#allocation7 + $0xc7]] }
 0x317   : > { %v2067_v21 = vmul.f32 %v2066_v17, %v6120_v37  ;;  %v2058_v23 = vmul.f32 %v2057_v63, %v6120_v37  ;;  %s6165_s28 = sld [smem:[#allocation7 + $0xca]] }
 0x318   : > { %v2093_v45 = vstv %s6146_s20  ;;  %s6189_s20 = sld [smem:[#allocation7 + $0xcf]] }
 0x319   : > { %v2069_v32 = vrot.slane %v2067_v21, 2  ;;  %v2060_v33 = vrot.slane %v2058_v23, 2  ;;  %v2094_v60 = vmul.f32 %v2093_v45, %v6120_v37 }
 0x31a   : > { %1932 = vrot.lane.b32.xlu0 %v1931_v28, %s7548_s30  ;;  %1919 = vrot.lane.b32.xlu1 %v1918_v31, %s7566_s11  ;;  %v2075_v28 = vstv %s4815_s6  ;;  %s6173_s6 = sld [smem:[#allocation7 + $0x87]] }
 0x31c   : > { %v2014_v46 = vstv %s4808_s4  ;;  %s6140_s4 = sld [smem:[#allocation7 + $0x80]] }
 0x31d   : > { %v2015_v6 = vmul.f32 %v2014_v46, %v6120_v37  ;;  %v2105_v46 = vrot.slane %v2103_v36, 2  ;;  %v2145_v10 = vstv %s6165_s28  ;;  %s6211_s28 = sld [smem:[#allocation7 + $0xd3]] }
 0x31e   : > { %1952 = vrot.lane.b32.xlu0 %v1950_v39, %s5201_s8  ;;  %1944 = vrot.lane.b32.xlu1 %v1942_v40, %s5202_s9  ;;  %v2085_v39 = vmul.f32 %v2084_v24, %v6120_v37  ;;  %v2076_v40 = vmul.f32 %v2075_v28, %v6120_v37  ;;  %v2154_v24 = vstv %s6181_s7  ;;  %s6222_s7 = sld [smem:[#allocation7 + $0xd5]] }
 0x31f   : > { %v2017_v12 = vrot.slane %v2015_v6, 1  ;;  %v2155_v45 = vmul.f32 %v2154_v24, %v6120_v37 }
 0x320   : > { %v2087_v57 = vrot.slane %v2085_v39, 2  ;;  %v2078_v25 = vrot.slane %v2076_v40, 2 }
 0x322   : > { %1968 = vrot.lane.b32.xlu0 %v1966_v55, %s5203_s26  ;;  %1960 = vrot.lane.b32.xlu1 %v1958_v27, %s7567_s23  ;;  %v1463_v31 = vstv %s6140_s4  ;;  %v1460_v55 = vstv %s6150_s29  ;;  %s6179_s4 = sld [smem:[#allocation7 + $0xcc]]  ;;  %s6191_s29 = sld [smem:[#allocation7 + $0xce]] }
 0x323   : > { %v1464_v27 = vmul.f32 %v1463_v31, %v5966_v22 }
 0x324   : > { %v2244_v24 = vstv %s6222_s7  ;;  %s7568_s7 = smov 122  }
 0x325   : > { %v1465_v35 = vadd.f32 %v1464_v27, %v1460_v55  ;;  %v2188_v27 = vstv %s6189_s20  ;;  %s6230_s20 = sld [smem:[#allocation7 + $0xd8]] }
 0x326   : > { %1984 = vrot.lane.b32.xlu0 %v1982_v61, %s7548_s30  ;;  %1976 = vrot.lane.b32.xlu1 %v1974_v0, %s7566_s11  ;;  %v2127_v61 = vstv %s6154_s27  ;;  %v2118_v0 = vstv %s6156_s10  ;;  %s6196_s27 = sld [smem:[#allocation7 + $0xd1]]  ;;  %s6202_s10 = sld [smem:[#allocation7 + $0xd0]] }
 0x327   : > { %v2119_v3 = vmul.f32 %v2118_v0, %v6120_v37 }
 0x328   : > { %v2163_v23 = vstv %s6179_s4  ;;  %s6220_s4 = sld [smem:[#allocation7 + $0xd6]] }
 0x329   : > { %v2121_v63 = vrot.slane %v2119_v3, 3  ;;  %v2164_v41 = vmul.f32 %v2163_v23, %v6120_v37 }
 0x32a   : > { %2009 = vrot.lane.b32.xlu0 %v2008_v4, %s5201_s8  ;;  %2000 = vrot.lane.b32.xlu1 %v1999_v5, %s5202_s9  ;;  %v2096_v4 = vrot.slane %v2094_v60, 2  ;;  %v2128_v5 = vmul.f32 %v2127_v61, %v6120_v37 }
 0x32c   : > { %v2130_v17 = vrot.slane %v2128_v5, 3  ;;  %v2206_v60 = vstv %s6196_s27  ;;  %v2197_v5 = vstv %s6202_s10  ;;  %s6240_s27 = sld [smem:[#allocation7 + $0xda]]  ;;  %s6242_s10 = sld [smem:[#allocation7 + $0xd9]] }
 0x32e   : > { %2027 = vrot.lane.b32.xlu0 %v2026_v11, %s5203_s26  ;;  %2018 = vrot.lane.b32.xlu1 %v2017_v12, %s7567_s23  ;;  %v1515_v12 = vstv %s6173_s6  ;;  %s6217_s6 = sld [smem:[#allocation7 + $0x8e]]  ;;  %v2257_v23 = vstv %s6220_s4  ;;  %s6263_s4 = sld [smem:[#allocation7 + $0x95]] }
 0x32f   : > { %v1516_v31 = vmul.f32 %v1515_v12, %v5966_v22 }
 0x332   : > { %2045 = vrot.lane.b32.xlu0 %v2044_v62, %s7548_s30  ;;  %2036 = vrot.lane.b32.xlu1 %v2035_v20, %s7566_s11  ;;  %v2146_v62 = vmul.f32 %v2145_v10, %v6120_v37  ;;  %v2137_v20 = vmul.f32 %v2136_v44, %v6120_v37 }
 0x334   : > { %v2148_v39 = vrot.slane %v2146_v62, 3  ;;  %v2139_v40 = vrot.slane %v2137_v20, 3  ;;  %v1576_v62 = vstv %s6217_s6  ;;  %s6260_s6 = sld [smem:[#allocation7 + $0xde]] }
 0x336   : > { %2070 = vrot.lane.b32.xlu0 %v2069_v32, %s5201_s8  ;;  %2061 = vrot.lane.b32.xlu1 %v2060_v33, %s5202_s9 }
 0x33a   : > { %2088 = vrot.lane.b32.xlu0 %v2087_v57, %s5203_s26  ;;  %2079 = vrot.lane.b32.xlu1 %v2078_v25, %s7567_s23  ;;  %v2179_v57 = vstv %s6191_s29  ;;  %v1518_v25 = vrot.slane %v1516_v31, 1  ;;  %s6232_s29 = sld [smem:[#allocation7 + $0xd7]] }
 0x33c   : > { %v1479_v1 = vpop.permute.xlu0 %1478  ;;  %v1471_v2 = vpop.permute.xlu1 %1470 }
 0x33d   : > { %v1473_v6 = vadd.f32 %v1471_v2, %v1465_v35  ;;  %v2166_v35 = vrot.slane %v2164_v41, 3  ;;  %v2189_v2 = vmul.f32 %v2188_v27, %v6120_v37  ;;  %v2259_v27 = vmul.f32 %v2257_v23, %v5585_v53 }
 0x33e   : > { %2106 = vrot.lane.b32.xlu0 %v2105_v46, %s7548_s30  ;;  %2097 = vrot.lane.b32.xlu1 %v2096_v4, %s7566_s11  ;;  %v2180_v46 = vmul.f32 %v2179_v57, %v6120_v37 }
 0x33f   : > { %v1481_v11 = vadd.f32 %v1479_v1, %v1473_v6  ;;  %v2157_v1 = vrot.slane %v2155_v45, 3  ;;  %v2207_v6 = vmul.f32 %v2206_v60, %v6120_v37  ;;  %v1577_v45 = vmul.f32 %v1576_v62, %v5966_v22 }
 0x340   : > { %v1495_v51 = vpop.permute.xlu0 %1494  ;;  %v1487_v16 = vpop.permute.xlu1 %1486  ;;  %v2182_v12 = vrot.slane %v2180_v46, 4  ;;  %v2270_v60 = vstv %s6232_s29  ;;  %s6278_s29 = sld [smem:[#allocation7 + $0xe0]] }
 0x341   : > { %v1489_v21 = vadd.f32 %v1487_v16, %v1481_v11  ;;  %v2191_v11 = vrot.slane %v2189_v2, 4 }
 0x342   : > { %2131 = vrot.lane.b32.xlu0 %v2130_v17, %s5201_s8  ;;  %2122 = vrot.lane.b32.xlu1 %v2121_v63, %s5202_s9  ;;  %v2224_v17 = vstv %s6211_s28  ;;  %v2215_v63 = vstv %s6213_s5  ;;  %s6251_s28 = sld [smem:[#allocation7 + $0xdc]]  ;;  %s6258_s5 = sld [smem:[#allocation7 + $0xdf]] }
 0x343   : > { %v1497_v28 = vadd.f32 %v1495_v51, %v1489_v21  ;;  %v2198_v51 = vmul.f32 %v2197_v5, %v6120_v37  ;;  %v2209_v21 = vrot.slane %v2207_v6, 4  ;;  %v2271_v6 = vmul.f32 %v2270_v60, %v6120_v37 }
 0x344   : > { %v1511_v32 = vpop.permute.xlu0 %1510  ;;  %v1503_v33 = vpop.permute.xlu1 %1502 }
 0x345   : > { %v1505_v55 = vadd.f32 %v1503_v33, %v1497_v28  ;;  %v2225_v33 = vmul.f32 %v2224_v17, %v6120_v37  ;;  %v2272_v17 = vmul.f32 %v2270_v60, %v5585_v53 }
 0x346   : > { %2149 = vrot.lane.b32.xlu0 %v2148_v39, %s5203_s26  ;;  %2140 = vrot.lane.b32.xlu1 %v2139_v40, %s7567_s23  ;;  %v2216_v39 = vmul.f32 %v2215_v63, %v6120_v37  ;;  %v2258_v40 = vmul.f32 %v2257_v23, %v6120_v37 }
 0x347   : > { %v1513_v36 = vadd.f32 %v1511_v32, %v1505_v55  ;;  %v2200_v32 = vrot.slane %v2198_v51, 4  ;;  %v2245_v55 = vmul.f32 %v2244_v24, %v6120_v37 }
 0x348   : > { %v1536_v61 = vpop.permute.xlu0 %1535  ;;  %v1527_v0 = vpop.permute.xlu1 %1526  ;;  %v2262_v2 = vrot.slane %v2258_v40, 5 }
 0x349   : > { %v1520_v4 = vadd.f32 %v1518_v25, %v1513_v36  ;;  %v2246_v25 = vmul.f32 %v2244_v24, %v5585_v53  ;;  %v2283_v36 = vstv %s6230_s20  ;;  %s6274_s20 = sld [smem:[#allocation7 + $0xe1]] }
 0x34a   : > { %2167 = vrot.lane.b32.xlu0 %v2166_v35, %s7548_s30  ;;  %2158 = vrot.lane.b32.xlu1 %v2157_v1, %s7566_s11  ;;  %s6246_s30 = sld [smem:[#allocation7 + $0xdd]]  ;;  %v2227_v35 = vrot.slane %v2225_v33, 4  ;;  %v2218_v1 = vrot.slane %v2216_v39, 4  ;;  %v2284_v46 = vmul.f32 %v2283_v36, %v6120_v37  ;;  %v2275_v33 = vrot.slane %v2271_v6, 5 }
 0x34b   : > { %v1529_v3 = vadd.f32 %v1527_v0, %v1520_v4  ;;  %v1579_v4 = vrot.slane %v1577_v45, 2  ;;  %v2372_v45 = vstv %s6258_s5  ;;  %s4805_s5 = sld [smem:[#allocation7 + $0xb8]] }
 0x34c   : > { %v1554_v10 = vpop.permute.xlu0 %1553  ;;  %v1545_v44 = vpop.permute.xlu1 %1544  ;;  %v2288_v23 = vrot.slane %v2284_v46, 5 }
 0x34d   : > { %v1538_v16 = vadd.f32 %v1536_v61, %v1529_v3  ;;  %v2249_v3 = vrot.slane %v2245_v55, 5  ;;  %v2359_v55 = vstv %s6260_s6  ;;  %s4812_s6 = sld [smem:[#allocation7 + $0xbf]] }
 0x34e   : > { %2192 = vrot.lane.b32.xlu0 %v2191_v11, %s5201_s8  ;;  %2183 = vrot.lane.b32.xlu1 %v2182_v12, %s5202_s9  ;;  %v2309_v11 = vstv %s6240_s27  ;;  %v2296_v12 = vstv %s6242_s10  ;;  %s4784_s27 = sld [smem:[#allocation7 + $0xa3]]  ;;  %s4791_s10 = sld [smem:[#allocation7 + $0xaa]] }
 0x34f   : > { %v1547_v20 = vadd.f32 %v1545_v44, %v1538_v16  ;;  %v2285_v44 = vmul.f32 %v2283_v36, %v5585_v53  ;;  %v2250_v16 = vrot.slane %v2246_v25, 5  ;;  %v2310_v24 = vmul.f32 %v2309_v11, %v6120_v37 }
 0x350   : > { %v1572_v28 = vpop.permute.xlu0 %1571  ;;  %v1563_v31 = vpop.permute.xlu1 %1562  ;;  %v2346_v63 = vstv %s6246_s30  ;;  %v2297_v39 = vmul.f32 %v2296_v12, %v6120_v37  ;;  %v2276_v25 = vrot.slane %v2272_v17, 5  ;;  %v2298_v36 = vmul.f32 %v2296_v12, %v5585_v53  ;;  %s6310_s30 = sld [smem:[#allocation7 + $0x9c]] }
 0x351   : > { %v1556_v41 = vadd.f32 %v1554_v10, %v1547_v20  ;;  %v2263_v10 = vrot.slane %v2259_v27, 5  ;;  %v2289_v40 = vrot.slane %v2285_v44, 5  ;;  %v2348_v46 = vmul.f32 %v2346_v63, %v5585_v53 }
 0x352   : > { %2210 = vrot.lane.b32.xlu0 %v2209_v21, %s5203_s26  ;;  %2201 = vrot.lane.b32.xlu1 %v2200_v32, %s7567_s23  ;;  %v2251_v32 = vsel %vm311_vm4, %v2249_v3, %v2250_v16  ;;  %v2301_v3 = vrot.slane %v2297_v39, 5  ;;  %v2374_v16 = vmul.f32 %v2372_v45, %v5585_v53  ;;  %v2385_v17 = vstv %s6278_s29  ;;  %s4850_s29 = sld [smem:[#allocation7 + $0x101]] }
 0x353   : > { %v1565_v57 = vadd.f32 %v1563_v31, %v1556_v41  ;;  %v2264_v21 = vsel %vm311_vm4, %v2262_v2, %v2263_v10  ;;  %v2311_v41 = vmul.f32 %v2309_v11, %v5585_v53  ;;  %v2347_v2 = vmul.f32 %v2346_v63, %v6120_v37 }
 0x354   : > { %v1597_v61 = vpop.permute.xlu0 %1596  ;;  %v1588_v0 = vpop.permute.xlu1 %1587  ;;  %v2398_v11 = vstv %s6274_s20  ;;  %s4833_s20 = sld [smem:[#allocation7 + $0xd4]] }
 0x355   : > { %v1574_v5 = vadd.f32 %v1572_v28, %v1565_v57  ;;  %v2333_v28 = vstv %s6251_s28  ;;  %v1637_v57 = vstv %s6263_s4  ;;  %v2315_v10 = vrot.slane %v2311_v41, 5  ;;  %s4798_s28 = sld [smem:[#allocation7 + $0xb1]]  ;;  %s4826_s4 = sld [smem:[#allocation7 + $0xcd]] }
 0x356   : > { %2228 = vrot.lane.b32.xlu0 %v2227_v35, %s7568_s7  ;;  %2219 = vrot.lane.b32.xlu1 %v2218_v1, %s7566_s11  ;;  %v2290_v35 = vsel %vm311_vm4, %v2288_v23, %v2289_v40  ;;  %v2314_v1 = vrot.slane %v2310_v24, 5  ;;  %v1638_v6 = vmul.f32 %v1637_v57, %v5966_v22  ;;  %v2335_v44 = vmul.f32 %v2333_v28, %v5585_v53 }
 0x357   : > { %v1581_v51 = vadd.f32 %v1579_v4, %v1574_v5  ;;  %v2277_v5 = vsel %vm311_vm4, %v2275_v33, %v2276_v25  ;;  %v2351_v23 = vrot.slane %v2347_v2, 6  ;;  %v2352_v24 = vrot.slane %v2348_v46, 6 }
 0x358   : > { %v1615_v62 = vpop.permute.xlu0 %1614  ;;  %v1606_v20 = vpop.permute.xlu1 %1605  ;;  %v1640_v40 = vrot.slane %v1638_v6, 3  ;;  %v2361_v41 = vmul.f32 %v2359_v55, %v5585_v53  ;;  %v2417_v57 = vmax.f32 %v5406_v9, %v5426_v18  ;;  %v2419_v25 = vmax.f32 %v5403_v8, %v5419_v15 }
 0x359   : > { %v1590_v31 = vadd.f32 %v1588_v0, %v1581_v51  ;;  %v2302_v51 = vrot.slane %v2298_v36, 5  ;;  %v2420_v36 = vmax.f32 %v5413_v13, %v5429_v19  ;;  %v2378_v8 = vrot.slane %v2374_v16, 6 }
 0x35a   : > { %2265 = vrot.lane.b32.xlu0 %v2264_v21, %s5201_s8  ;;  %2252 = vrot.lane.b32.xlu1 %v2251_v32, %s5202_s9  ;;  %v2316_v21 = vsel %vm311_vm4, %v2314_v1, %v2315_v10  ;;  %v2353_v1 = vsel %vm739_vm8, %v2351_v23, %v2352_v24  ;;  %v2400_v9 = vmul.f32 %v2398_v11, %v5585_v53  ;;  %v2365_v18 = vrot.slane %v2361_v41, 6 }
 0x35b   : > { %v1599_v27 = vadd.f32 %v1597_v61, %v1590_v31  ;;  %v2334_v61 = vmul.f32 %v2333_v28, %v6120_v37  ;;  %v2373_v31 = vmul.f32 %v2372_v45, %v6120_v37  ;;  %v2303_v33 = vsel %vm311_vm4, %v2301_v3, %v2302_v51 }
 0x35c   : > { %v1633_v60 = vpop.permute.xlu0 %1632  ;;  %v1624_v0 = vpop.permute.xlu1 %1623  ;;  %v2360_v28 = vmul.f32 %v2359_v55, %v6120_v37  ;;  %v2399_v55 = vmul.f32 %v2398_v11, %v6120_v37  ;;  %v2387_v13 = vmul.f32 %v2385_v17, %v5585_v53  ;;  %v1698_v51 = vstv %s6310_s30  ;;  %s4840_s30 = sld [smem:[#allocation7 + $0xdb]] }
 0x35d   : > { %v1608_v4 = vadd.f32 %v1606_v20, %v1599_v27  ;;  %v2338_v39 = vrot.slane %v2334_v61, 6  ;;  %v2416_v27 = vmax.f32 %v5400_v7, %v5416_v14  ;;  %v2377_v2 = vrot.slane %v2373_v31, 6 }
 0x35e   : > { %2291 = vrot.lane.b32.xlu0 %v2290_v35, %s5203_s26  ;;  %2278 = vrot.lane.b32.xlu1 %v2277_v5, %s7567_s23  ;;  %v2364_v14 = vrot.slane %v2360_v28, 6  ;;  %v2404_v11 = vrot.slane %v2400_v9, 6 }
 0x35f   : > { %v1617_v12 = vadd.f32 %v1615_v62, %v1608_v4  ;;  %v2339_v62 = vrot.slane %v2335_v44, 6  ;;  %v2418_v19 = vmax.f32 %v2416_v27, %v2417_v57  ;;  %v2421_v4 = vmax.f32 %v2419_v25, %v2420_v36 }
 0x360   : > { %v1658_v63 = vpop.permute.xlu0 %1657  ;;  %v1649_v20 = vpop.permute.xlu1 %1648  ;;  %v2379_v61 = vsel %vm739_vm8, %v2377_v2, %v2378_v8  ;;  %v2366_v10 = vsel %vm739_vm8, %v2364_v14, %v2365_v18  ;;  %v2403_v44 = vrot.slane %v2399_v55, 6  ;;  %v1759_v2 = vstv %s4784_s27  ;;  %s4851_s27 = sld [smem:[#allocation7 + $0x102]] }
 0x361   : > { %v1626_v32 = vadd.f32 %v1624_v0, %v1617_v12  ;;  %v2340_v7 = vsel %vm739_vm8, %v2338_v39, %v2339_v62 }
 0x362   : > { %2317 = vrot.lane.b32.xlu0 %v2316_v21, %s7568_s7  ;;  %2304 = vrot.lane.b32.xlu1 %v2303_v33, %s7566_s11  ;;  %v2434_v21 = vrot.slane %v2421_v4, 5 }
 0x363   : > { %v1635_v45 = vadd.f32 %v1633_v60, %v1626_v32  ;;  %v2386_v60 = vmul.f32 %v2385_v17, %v6120_v37  ;;  %v2391_v17 = vrot.slane %v2387_v13, 6  ;;  %v1699_v32 = vmul.f32 %v1698_v51, %v5966_v22 }
 0x364   : > { %v1676_v0 = vpop.permute.xlu0 %1675  ;;  %v1667_v35 = vpop.permute.xlu1 %1666  ;;  %v2439_v25 = vsel %vm311_vm4, %v2434_v21, 0.0 }
 0x365   : > { %v1642_v46 = vadd.f32 %v1640_v40, %v1635_v45  ;;  %v2390_v12 = vrot.slane %v2386_v60, 6  ;;  %v1701_v27 = vrot.slane %v1699_v32, 4  ;;  %v1761_v60 = vmul.f32 %v1759_v2, %v5585_v53 }
 0x366   : > { %2354 = vrot.lane.b32.xlu0 %v2353_v1, %s5201_s8  ;;  %2341 = vrot.lane.b32.xlu1 %v2340_v7, %s5202_s9 }
 0x367   : > { %v1651_v15 = vadd.f32 %v1649_v20, %v1642_v46  ;;  %v2433_v20 = vrot.slane %v2418_v19, 5  ;;  %v2392_v33 = vsel %vm739_vm8, %v2390_v12, %v2391_v17  ;;  %v1760_v46 = vmul.f32 %v1759_v2, %v5966_v22 }
 0x368   : > { %v1694_v5 = vpop.permute.xlu0 %1693  ;;  %v1685_v3 = vpop.permute.xlu1 %1684  ;;  %v1765_v19 = vrot.slane %v1761_v60, 5 }
 0x369   : > { %v1660_v6 = vadd.f32 %v1658_v63, %v1651_v15  ;;  %v2405_v63 = vsel %vm739_vm8, %v2403_v44, %v2404_v11  ;;  %v2435_v28 = vsel %vm311_vm4, %v2433_v20, %v2434_v21  ;;  %v2438_v40 = vsel %vm311_vm4, 0.0, %v2433_v20 }
 0x36a   : > { %2380 = vrot.lane.b32.xlu0 %v2379_v61, %s5203_s26  ;;  %2367 = vrot.lane.b32.xlu1 %v2366_v10, %s7567_s23  ;;  %v1764_v9 = vrot.slane %v1760_v46, 5  ;;  %v1848_v11 = vstv %s4791_s10  ;;  %s6385_s10 = sld [smem:[#allocation7 + $0x103]] }
 0x36b   : > { %v1669_v16 = vadd.f32 %v1667_v35, %v1660_v6  ;;  %v1850_v20 = vmul.f32 %v1848_v11, %v5585_v53 }
 0x36c   : > { %v1719_v23 = vpop.permute.xlu0 %1718  ;;  %v1710_v24 = vpop.permute.xlu1 %1709 }
 0x36d   : > { %v1678_v31 = vadd.f32 %v1676_v0, %v1669_v16  ;;  %v1849_v16 = vmul.f32 %v1848_v11, %v5966_v22  ;;  %v2425_v22 = vadd.f32 %v5445_v34, %v5437_v29 }
 0x36e   : > { %2406 = vrot.lane.b32.xlu0 %v2405_v63, %s7568_s7  ;;  %2393 = vrot.lane.b32.xlu1 %v2392_v33, %s7566_s11  ;;  %v1854_v63 = vrot.slane %v1850_v20, 6 }
 0x36f   : > { %v1687_v39 = vadd.f32 %v1685_v3, %v1678_v31  ;;  %v1853_v31 = vrot.slane %v1849_v16, 6 }
 0x370   : > { %v1737_v62 = vpop.permute.xlu0 %1736  ;;  %v1728_v41 = vpop.permute.xlu1 %1727 }
 0x371   : > { %v1696_v45 = vadd.f32 %v1694_v5, %v1687_v39  ;;  %v1766_v5 = vsel %vm311_vm4, %v1764_v9, %v1765_v19 }
 0x372   : > { %2444 = vrot.lane.b32.xlu0 %v2435_v28, %s7565_s17  ;;  %2442 = vrot.lane.b32.xlu1 %v2438_v40, %s7565_s17  ;;  %v1855_v40 = vsel %vm739_vm8, %v1853_v31, %v1854_v63 }
 0x373   : > { %v1703_v57 = vadd.f32 %v1701_v27, %v1696_v45 }
 0x374   : > { %v1755_v36 = vpop.permute.xlu0 %1754  ;;  %v1746_v0 = vpop.permute.xlu1 %1745 }
 0x375   : > { %v1712_v35 = vadd.f32 %v1710_v24, %v1703_v57 }
 0x376   : > { %2446 = vrot.lane.b32.xlu1 %v2439_v25, %s7565_s17  ;;  %v2426_v25 = vadd.f32 %v2425_v22, %v5453_v42 }
 0x377   : > { %v1721_v1 = vadd.f32 %v1719_v23, %v1712_v35 }
 0x378   : > { %v1792_v55 = vpop.permute.xlu0 %1791  ;;  %v1779_v7 = vpop.permute.xlu1 %1778  ;;  %v2427_v35 = vadd.f32 %v2426_v25, %v5461_v58 }
 0x379   : > { %v1730_v14 = vadd.f32 %v1728_v41, %v1721_v1 }
 0x37b   : > { %v1739_v8 = vadd.f32 %v1737_v62, %v1730_v14  ;;  %v2422_v62 = vadd.f32 %v5440_v30, %v5434_v26  ;;  %v2430_v30 = vmul.f32 0.25, %v2427_v35  ;;  %v1937_v14 = vstv %s4798_s28  ;;  %s4853_s28 = sld [smem:[#allocation7 + $0x104]] }
 0x37c   : > { %v1818_v13 = vpop.permute.xlu0 %1817  ;;  %v1805_v15 = vpop.permute.xlu1 %1804 }
 0x37d   : > { %v1748_v18 = vadd.f32 %v1746_v0, %v1739_v8  ;;  %v2423_v57 = vadd.f32 %v2422_v62, %v5450_v38  ;;  %v2460_v34 = vrot.slane %v2430_v30, 5 }
 0x37f   : > { %v1757_v4 = vadd.f32 %v1755_v36, %v1748_v18  ;;  %v2424_v0 = vadd.f32 %v2423_v57, %v5458_v50  ;;  %v2465_v50 = vsel %vm311_vm4, %v2460_v34, 0.0 }
 0x380   : > { %v1844_v3 = vpop.permute.xlu0 %1843  ;;  %v1831_v61 = vpop.permute.xlu1 %1830 }
 0x381   : > { %v1768_v6 = vadd.f32 %v1766_v5, %v1757_v4  ;;  %v2429_v26 = vmul.f32 0.25, %v2424_v0 }
 0x383   : > { %v1781_v10 = vadd.f32 %v1779_v7, %v1768_v6  ;;  %v2459_v29 = vrot.slane %v2429_v26, 5  ;;  %v1989_v6 = vstv %s4805_s5  ;;  %s4854_s5 = sld [smem:[#allocation7 + $0x105]] }
 0x384   : > { %v1881_v44 = vpop.permute.xlu0 %1880  ;;  %v1868_v12 = vpop.permute.xlu1 %1867  ;;  %v1990_v11 = vmul.f32 %v1989_v6, %v6120_v37 }
 0x385   : > { %v1794_v51 = vadd.f32 %v1792_v55, %v1781_v10  ;;  %v2464_v38 = vsel %vm311_vm4, 0.0, %v2459_v29  ;;  %v2461_v42 = vsel %vm311_vm4, %v2459_v29, %v2460_v34 }
 0x386   : > { %2468 = vrot.lane.b32.xlu0 %v2464_v38, %s7565_s17  ;;  %2470 = vrot.lane.b32.xlu1 %v2461_v42, %s7565_s17 }
 0x387   : > { %v1807_v17 = vadd.f32 %v1805_v15, %v1794_v51 }
 0x388   : > { %v1907_v21 = vpop.permute.xlu0 %1906  ;;  %v1894_v23 = vpop.permute.xlu1 %1893 }
 0x389   : > { %v1820_v24 = vadd.f32 %v1818_v13, %v1807_v17  ;;  %v1938_v13 = vmul.f32 %v1937_v14, %v6120_v37 }
 0x38a   : > { %2472 = vrot.lane.b32.xlu0 %v2465_v50, %s7565_s17  ;;  %s4819_s17 = sld [smem:[#allocation7 + $0xc6]] }
 0x38b   : > { %v1833_v32 = vadd.f32 %v1831_v61, %v1820_v24 }
 0x38c   : > { %v1933_v33 = vpop.permute.xlu0 %1932  ;;  %v1920_v39 = vpop.permute.xlu1 %1919 }
 0x38d   : > { %v1846_v28 = vadd.f32 %v1844_v3, %v1833_v32 }
 0x38f   : > { %v1857_v41 = vadd.f32 %v1855_v40, %v1846_v28 }
 0x390   : > { %v1953_v27 = vpop.permute.xlu0 %1952  ;;  %v1945_v45 = vpop.permute.xlu1 %1944 }
 0x391   : > { %v1870_v36 = vadd.f32 %v1868_v12, %v1857_v41 }
 0x393   : > { %v1883_v1 = vadd.f32 %v1881_v44, %v1870_v36 }
 0x394   : > { %v1969_v2 = vpop.permute.xlu0 %1968  ;;  %v1961_v55 = vpop.permute.xlu1 %1960 }
 0x395   : > { %v1896_v46 = vadd.f32 %v1894_v23, %v1883_v1  ;;  %v1992_v23 = vrot.slane %v1990_v11, 1 }
 0x397   : > { %v1909_v7 = vadd.f32 %v1907_v21, %v1896_v46  ;;  %v2111_v46 = vstv %s4819_s17  ;;  %s4855_s17 = sld [smem:[#allocation7 + $0x106]] }
 0x398   : > { %v1985_v60 = vpop.permute.xlu0 %1984  ;;  %v1977_v8 = vpop.permute.xlu1 %1976 }
 0x399   : > { %v1922_v9 = vadd.f32 %v1920_v39, %v1909_v7  ;;  %v2050_v39 = vstv %s4812_s6  ;;  %s4857_s6 = sld [smem:[#allocation7 + $0x108]] }
 0x39a   : > { %v2051_v41 = vmul.f32 %v2050_v39, %v6120_v37 }
 0x39b   : > { %v1935_v58 = vadd.f32 %v1933_v33, %v1922_v9 }
 0x39c   : > { %v2010_v15 = vpop.permute.xlu0 %2009  ;;  %v2001_v18 = vpop.permute.xlu1 %2000  ;;  %v2053_v36 = vrot.slane %v2051_v41, 2 }
 0x39d   : > { %v1939_v19 = vadd.f32 %v1938_v13, %v1935_v58 }
 0x39f   : > { %v1947_v4 = vadd.f32 %v1945_v45, %v1939_v19 }
 0x3a0   : > { %v2028_v5 = vpop.permute.xlu0 %2027  ;;  %v2019_v3 = vpop.permute.xlu1 %2018 }
 0x3a1   : > { %v1955_v61 = vadd.f32 %v1953_v27, %v1947_v4  ;;  %v2172_v4 = vstv %s4826_s4  ;;  %s4858_s4 = sld [smem:[#allocation7 + $0x109]] }
 0x3a3   : > { %v1963_v10 = vadd.f32 %v1961_v55, %v1955_v61 }
 0x3a4   : > { %v2046_v44 = vpop.permute.xlu0 %2045  ;;  %v2037_v12 = vpop.permute.xlu1 %2036 }
 0x3a5   : > { %v1971_v51 = vadd.f32 %v1969_v2, %v1963_v10  ;;  %v2173_v10 = vmul.f32 %v2172_v4, %v6120_v37 }
 0x3a7   : > { %v1979_v16 = vadd.f32 %v1977_v8, %v1971_v51 }
 0x3a8   : > { %v2071_v17 = vpop.permute.xlu0 %2070  ;;  %v2062_v20 = vpop.permute.xlu1 %2061 }
 0x3a9   : > { %v1987_v21 = vadd.f32 %v1985_v60, %v1979_v16  ;;  %v2112_v60 = vmul.f32 %v2111_v46, %v6120_v37  ;;  %v2175_v16 = vrot.slane %v2173_v10, 4  ;;  %v2535_v10 = vstv %s4853_s28  ;;  %s4865_s28 = sld [smem:[#allocation7 + $0x110]] }
 0x3ab   : > { %v1994_v24 = vadd.f32 %v1992_v23, %v1987_v21  ;;  %v2114_v50 = vrot.slane %v2112_v60, 3 }
 0x3ac   : > { %v2089_v31 = vpop.permute.xlu0 %2088  ;;  %v2080_v32 = vpop.permute.xlu1 %2079 }
 0x3ad   : > { %v2003_v63 = vadd.f32 %v2001_v18, %v1994_v24 }
 0x3af   : > { %v2012_v33 = vadd.f32 %v2010_v15, %v2003_v63  ;;  %v2233_v63 = vstv %s4833_s20  ;;  %s4859_s20 = sld [smem:[#allocation7 + $0x10a]] }
 0x3b0   : > { %v2107_v28 = vpop.permute.xlu0 %2106  ;;  %v2098_v40 = vpop.permute.xlu1 %2097 }
 0x3b1   : > { %v2021_v62 = vadd.f32 %v2019_v3, %v2012_v33  ;;  %v2234_v33 = vmul.f32 %v2233_v63, %v6120_v37 }
 0x3b3   : > { %v2030_v22 = vadd.f32 %v2028_v5, %v2021_v62  ;;  %v2238_v41 = vrot.slane %v2234_v33, 5 }
 0x3b4   : > { %v2132_v27 = vpop.permute.xlu0 %2131  ;;  %v2123_v45 = vpop.permute.xlu1 %2122 }
 0x3b5   : > { %v2039_v57 = vadd.f32 %v2037_v12, %v2030_v22 }
 0x3b7   : > { %v2048_v25 = vadd.f32 %v2046_v44, %v2039_v57 }
 0x3b8   : > { %v2150_v0 = vpop.permute.xlu0 %2149  ;;  %v2141_v35 = vpop.permute.xlu1 %2140 }
 0x3b9   : > { %v2055_v1 = vadd.f32 %v2053_v36, %v2048_v25 }
 0x3bb   : > { %v2064_v2 = vadd.f32 %v2062_v20, %v2055_v1 }
 0x3bc   : > { %v2168_v55 = vpop.permute.xlu0 %2167  ;;  %v2159_v26 = vpop.permute.xlu1 %2158 }
 0x3bd   : > { %v2073_v30 = vadd.f32 %v2071_v17, %v2064_v2 }
 0x3bf   : > { %v2082_v29 = vadd.f32 %v2080_v32, %v2073_v30 }
 0x3c0   : > { %v2193_v34 = vpop.permute.xlu0 %2192  ;;  %v2184_v7 = vpop.permute.xlu1 %2183 }
 0x3c1   : > { %v2091_v14 = vadd.f32 %v2089_v31, %v2082_v29 }
 0x3c3   : > { %v2100_v8 = vadd.f32 %v2098_v40, %v2091_v14  ;;  %v2322_v14 = vstv %s4840_s30  ;;  %s4861_s30 = sld [smem:[#allocation7 + $0x10c]] }
 0x3c4   : > { %v2211_v38 = vpop.permute.xlu0 %2210  ;;  %v2202_v42 = vpop.permute.xlu1 %2201 }
 0x3c5   : > { %v2109_v9 = vadd.f32 %v2107_v28, %v2100_v8  ;;  %v2235_v28 = vmul.f32 %v2233_v63, %v5585_v53 }
 0x3c7   : > { %v2116_v58 = vadd.f32 %v2114_v50, %v2109_v9  ;;  %v2324_v50 = vmul.f32 %v2322_v14, %v5585_v53 }
 0x3c8   : > { %v2229_v13 = vpop.permute.xlu0 %2228  ;;  %v2220_v15 = vpop.permute.xlu1 %2219 }
 0x3c9   : > { %v2125_v18 = vadd.f32 %v2123_v45, %v2116_v58  ;;  %v2239_v45 = vrot.slane %v2235_v28, 5  ;;  %v2615_v28 = vstv %s4858_s4  ;;  %s4869_s4 = sld [smem:[#allocation7 + $0x114]] }
 0x3cb   : > { %v2134_v19 = vadd.f32 %v2132_v27, %v2125_v18 }
 0x3cc   : > { %v2266_v5 = vpop.permute.xlu0 %2265  ;;  %v2253_v3 = vpop.permute.xlu1 %2252 }
 0x3cd   : > { %v2143_v61 = vadd.f32 %v2141_v35, %v2134_v19  ;;  %v2521_v19 = vstv %s6385_s10  ;;  %s4864_s10 = sld [smem:[#allocation7 + $0x10f]] }
 0x3cf   : > { %v2152_v6 = vadd.f32 %v2150_v0, %v2143_v61  ;;  %v2240_v0 = vsel %vm311_vm4, %v2238_v41, %v2239_v45 }
 0x3d0   : > { %v2292_v44 = vpop.permute.xlu0 %2291  ;;  %v2279_v12 = vpop.permute.xlu1 %2278 }
 0x3d1   : > { %v2161_v51 = vadd.f32 %v2159_v26, %v2152_v6 }
 0x3d3   : > { %v2170_v11 = vadd.f32 %v2168_v55, %v2161_v51  ;;  %v2493_v55 = vstv %s4850_s29  ;;  %s4860_s29 = sld [smem:[#allocation7 + $0x10b]] }
 0x3d4   : > { %v2318_v17 = vpop.permute.xlu0 %2317  ;;  %v2305_v20 = vpop.permute.xlu1 %2304 }
 0x3d5   : > { %v2177_v21 = vadd.f32 %v2175_v16, %v2170_v11  ;;  %v2549_v16 = vstv %s4854_s5  ;;  %s4866_s5 = sld [smem:[#allocation7 + $0x111]] }
 0x3d7   : > { %v2186_v23 = vadd.f32 %v2184_v7, %v2177_v21 }
 0x3d8   : > { %v6370_v24 = vpop.permute.xlu0 %2354  ;;  %v6372_v31 = vpop.permute.xlu1 %2341 }
 0x3d9   : > { %v2195_v32 = vadd.f32 %v2193_v34, %v2186_v23 }
 0x3db   : > { %v2204_v39 = vadd.f32 %v2202_v42, %v2195_v32  ;;  %v2507_v42 = vstv %s4851_s27  ;;  %v2563_v32 = vstv %s4855_s17  ;;  %s4862_s27 = sld [smem:[#allocation7 + $0x10d]]  ;;  %s4868_s17 = sld [smem:[#allocation7 + $0x113]] }
 0x3dc   : > { %v6376_v40 = vpop.permute.xlu0 %2380  ;;  %v6378_v62 = vpop.permute.xlu1 %2367 }
 0x3dd   : > { %v2213_v22 = vadd.f32 %v2211_v38, %v2204_v39  ;;  %v2323_v38 = vmul.f32 %v2322_v14, %v6120_v37  ;;  %v2328_v37 = vrot.slane %v2324_v50, 6 }
 0x3df   : > { %v2222_v27 = vadd.f32 %v2220_v15, %v2213_v22  ;;  %v2327_v18 = vrot.slane %v2323_v38, 6  ;;  %v2636_v22 = vstv %s4859_s20  ;;  %s4871_s20 = sld [smem:[#allocation7 + $0x116]] }
 0x3e0   : > { %v6380_v57 = vpop.permute.xlu0 %2406  ;;  %v6382_v25 = vpop.permute.xlu1 %2393 }
 0x3e1   : > { %v2231_v36 = vadd.f32 %v2229_v13, %v2222_v27  ;;  %v2329_v6 = vsel %vm739_vm8, %v2327_v18, %v2328_v37  ;;  %v2699_v37 = vstv %s4862_s27  ;;  %s4874_s27 = sld [smem:[#allocation7 + $0x119]] }
 0x3e3   : > { %v2242_v35 = vadd.f32 %v2240_v0, %v2231_v36 }
 0x3e4   : > { %v2445_v1 = vpop.permute.xlu0 %2444  ;;  %v2443_v2 = vpop.permute.xlu1 %2442 }
 0x3e5   : > { %v2255_v26 = vadd.f32 %v2253_v3, %v2242_v35  ;;  %v2452_v30 = vsel %vm323_vm6, 0.0, %v2445_v1  ;;  %v2451_v46 = vsel %vm323_vm6, 0.0, %v2443_v2 }
 0x3e6   : > { %v6390_v29 = vsel %vm326_vm7, %v2452_v30, 0.0  ;;  %v6393_v34 = vsel %vm326_vm7, %v2451_v46, 0.0 }
 0x3e7   : > { %v2268_v7 = vadd.f32 %v2266_v5, %v2255_v26  ;;  %v2495_v60 = vmul.f32 %v2493_v55, %v6390_v29  ;;  %v2494_v8 = vmul.f32 %v2493_v55, %v6393_v34  ;;  %v2509_v13 = vmul.f32 %v2507_v42, %v6390_v29 }
 0x3e8   : > { %v2508_v15 = vmul.f32 %v2507_v42, %v6393_v34  ;;  %v2447_v3 = vpop.permute.xlu1 %2446  ;;  %v2523_v61 = vmul.f32 %v2521_v19, %v6390_v29  ;;  %v2522_v53 = vmul.f32 %v2521_v19, %v6393_v34  ;;  %v2537_v51 = vmul.f32 %v2535_v10, %v6390_v29 }
 0x3e9   : > { %v2281_v9 = vadd.f32 %v2279_v12, %v2268_v7  ;;  %2500 = vrot.lane.b32.xlu0 %v2495_v60, %s5202_s9  ;;  %2498 = vrot.lane.b32.xlu1 %v2494_v8, %s5202_s9  ;;  %v2453_v12 = vsel %vm323_vm6, 0.0, %v2447_v3  ;;  %v2536_v11 = vmul.f32 %v2535_v10, %v6393_v34  ;;  %v2551_v21 = vmul.f32 %v2549_v16, %v6390_v29 }
 0x3ea   : > { %v2550_v23 = vmul.f32 %v2549_v16, %v6393_v34  ;;  %v2565_v41 = vmul.f32 %v2563_v32, %v6390_v29  ;;  %v2564_v27 = vmul.f32 %v2563_v32, %v6393_v34  ;;  %v2616_v45 = vmul.f32 %v2615_v28, %v6393_v34 }
 0x3eb   : > { %v2294_v58 = vadd.f32 %v2292_v44, %v2281_v9  ;;  %v2617_v36 = vmul.f32 %v2615_v28, %v6390_v29  ;;  %v2657_v55 = vstv %s4860_s29  ;;  %v2637_v46 = vmul.f32 %v2636_v22, %v6393_v34  ;;  %s4872_s29 = sld [smem:[#allocation7 + $0x117]] }
 0x3ec   : > { %v2622_v26 = vrot.slane %v2616_v45, 1  ;;  %v2638_v7 = vmul.f32 %v2636_v22, %v6390_v29  ;;  %v2678_v42 = vstv %s4861_s30  ;;  %s4873_s30 = sld [smem:[#allocation7 + $0x118]] }
 0x3ed   : > { %v2307_v4 = vadd.f32 %v2305_v20, %v2294_v58  ;;  %2514 = vrot.lane.b32.xlu0 %v2509_v13, %s5201_s8  ;;  %2512 = vrot.lane.b32.xlu1 %v2508_v15, %s5201_s8  ;;  %v2594_v20 = vstv %s4857_s6  ;;  %v2623_v30 = vrot.slane %v2617_v36, 1  ;;  %v2643_v9 = vrot.slane %v2637_v46, 1  ;;  %s4867_s6 = sld [smem:[#allocation7 + $0x112]] }
 0x3ee   : > { %v2595_v63 = vmul.f32 %v2594_v20, %v6393_v34  ;;  %v2596_v33 = vmul.f32 %v2594_v20, %v6390_v29  ;;  %v2644_v50 = vrot.slane %v2638_v7, 1  ;;  %v2658_v58 = vmul.f32 %v2657_v55, %v6393_v34 }
 0x3ef   : > { %v2320_v5 = vadd.f32 %v2318_v17, %v2307_v4  ;;  %v6417_v17 = vsel %vm326_vm7, %v2453_v12, 0.0  ;;  %v2659_v13 = vmul.f32 %v2657_v55, %v6390_v29  ;;  %v2624_v15 = vsel %vm313_vm5, %v2622_v26, %v2623_v30 }
 0x3f0   : > { %v2597_v39 = vmul.f32 %v2594_v20, %v6417_v17  ;;  %v2601_v0 = vrot.slane %v2595_v63, 1  ;;  %v2602_v35 = vrot.slane %v2596_v33, 1  ;;  %v2618_v2 = vmul.f32 %v2615_v28, %v6417_v17 }
 0x3f1   : > { %v6409_v44 = vadd.f32 %v2329_v6, %v2320_v5  ;;  %2528 = vrot.lane.b32.xlu0 %v2523_v61, %s7567_s23  ;;  %2526 = vrot.lane.b32.xlu1 %v2522_v53, %s7567_s23  ;;  %v2639_v38 = vmul.f32 %v2636_v22, %v6417_v17  ;;  %v2660_v4 = vmul.f32 %v2657_v55, %v6417_v17  ;;  %v2664_v3 = vrot.slane %v2658_v58, 1 }
 0x3f2   : > { %v2604_v1 = vrot.slane %v2597_v39, 1  ;;  %v2603_v14 = vsel %vm313_vm5, %v2601_v0, %v2602_v35  ;;  %v2625_v8 = vrot.slane %v2618_v2, 1  ;;  %v2645_v5 = vsel %vm313_vm5, %v2643_v9, %v2644_v50 }
 0x3f3   : > { %v2646_v19 = vrot.slane %v2639_v38, 1  ;;  %v2665_v61 = vrot.slane %v2659_v13, 1  ;;  %v2679_v53 = vmul.f32 %v2678_v42, %v6393_v34  ;;  %v2667_v10 = vrot.slane %v2660_v4, 1 }
 0x3f4   : > { %v2605_v60 = vsel %vm313_vm5, %v2602_v35, %v2604_v1  ;;  %v2626_v18 = vsel %vm313_vm5, %v2623_v30, %v2625_v8  ;;  %v2680_v12 = vmul.f32 %v2678_v42, %v6390_v29  ;;  %v2702_v39 = vmul.f32 %v2699_v37, %v6417_v17 }
 0x3f5   : > { %2542 = vrot.lane.b32.xlu0 %v2537_v51, %s5203_s26  ;;  %2540 = vrot.lane.b32.xlu1 %v2536_v11, %s5203_s26  ;;  %v2647_v6 = vsel %vm313_vm5, %v2644_v50, %v2646_v19  ;;  %v2681_v51 = vmul.f32 %v2678_v42, %v6417_v17  ;;  %v2738_v11 = vstv %s4864_s10  ;;  %v2666_v16 = vsel %vm313_vm5, %v2664_v3, %v2665_v61  ;;  %s4875_s10 = sld [smem:[#allocation7 + $0x11a]] }
 0x3f6   : > { %v2685_v20 = vrot.slane %v2679_v53, 1  ;;  %v2668_v32 = vsel %vm313_vm5, %v2665_v61, %v2667_v10  ;;  %v2686_v63 = vrot.slane %v2680_v12, 1  ;;  %v2759_v28 = vstv %s4865_s28  ;;  %s4876_s28 = sld [smem:[#allocation7 + $0x11b]] }
 0x3f7   : > { %v2688_v33 = vrot.slane %v2681_v51, 1  ;;  %v2740_v45 = vmul.f32 %v2738_v11, %v6390_v29  ;;  %v2709_v35 = vrot.slane %v2702_v39, 1  ;;  %v2741_v1 = vmul.f32 %v2738_v11, %v6417_v17 }
 0x3f8   : > { %v2687_v36 = vsel %vm313_vm5, %v2685_v20, %v2686_v63  ;;  %v2780_v2 = vstv %s4866_s5  ;;  %v2760_v46 = vmul.f32 %v2759_v28, %v6393_v34  ;;  %v2762_v8 = vmul.f32 %v2759_v28, %v6417_v17  ;;  %s4878_s5 = sld [smem:[#allocation7 + $0x11d]] }
 0x3f9   : > { %2556 = vrot.lane.b32.xlu0 %v2551_v21, %s7566_s11  ;;  %2554 = vrot.lane.b32.xlu1 %v2550_v23, %s7566_s11  ;;  %v2700_v21 = vmul.f32 %v2699_v37, %v6393_v34  ;;  %v2701_v23 = vmul.f32 %v2699_v37, %v6390_v29  ;;  %v2689_v0 = vsel %vm313_vm5, %v2686_v63, %v2688_v33  ;;  %v2746_v30 = vrot.slane %v2740_v45, 2 }
 0x3fa   : > { %v2801_v38 = vstv %s4867_s6  ;;  %v2766_v9 = vrot.slane %v2760_v46, 2  ;;  %v2781_v50 = vmul.f32 %v2780_v2, %v6393_v34  ;;  %v2782_v58 = vmul.f32 %v2780_v2, %v6390_v29  ;;  %s4879_s6 = sld [smem:[#allocation7 + $0x11e]] }
 0x3fb   : > { %v2706_v22 = vrot.slane %v2700_v21, 1  ;;  %v2783_v19 = vmul.f32 %v2780_v2, %v6417_v17  ;;  %v2822_v4 = vstv %s4868_s17  ;;  %v2802_v3 = vmul.f32 %v2801_v38, %v6393_v34  ;;  %s4880_s17 = sld [smem:[#allocation7 + $0x11f]] }
 0x3fc   : > { %v2787_v37 = vrot.slane %v2781_v50, 2  ;;  %v2803_v61 = vmul.f32 %v2801_v38, %v6390_v29  ;;  %v2804_v12 = vmul.f32 %v2801_v38, %v6417_v17  ;;  %v2843_v51 = vstv %s4869_s4  ;;  %s4881_s4 = sld [smem:[#allocation7 + $0x120]] }
 0x3fd   : > { %2570 = vrot.lane.b32.xlu0 %v2565_v41, %s7568_s7  ;;  %2568 = vrot.lane.b32.xlu1 %v2564_v27, %s7568_s7  ;;  %v2707_v41 = vrot.slane %v2701_v23, 1  ;;  %v2739_v27 = vmul.f32 %v2738_v11, %v6393_v34  ;;  %v2790_v10 = vrot.slane %v2783_v19, 2  ;;  %v2823_v21 = vmul.f32 %v2822_v4, %v6393_v34 }
 0x3fe   : > { %v2809_v20 = vrot.slane %v2803_v61, 2  ;;  %v2824_v63 = vmul.f32 %v2822_v4, %v6390_v29  ;;  %v2825_v33 = vmul.f32 %v2822_v4, %v6417_v17  ;;  %v2882_v39 = vstv %s4871_s20  ;;  %s4882_s20 = sld [smem:[#allocation7 + $0x121]] }
 0x3ff   : > { %v2708_v55 = vsel %vm313_vm5, %v2706_v22, %v2707_v41  ;;  %v2745_v26 = vrot.slane %v2739_v27, 2  ;;  %v2710_v7 = vsel %vm313_vm5, %v2707_v41, %v2709_v35  ;;  %v2829_v22 = vrot.slane %v2823_v21, 2 }
 0x400   : > { %v2844_v41 = vmul.f32 %v2843_v51, %v6393_v34  ;;  %v2845_v27 = vmul.f32 %v2843_v51, %v6390_v29  ;;  %v2846_v35 = vmul.f32 %v2843_v51, %v6417_v17  ;;  %v2945_v19 = vstv %s4874_s27  ;;  %s4886_s27 = sld [smem:[#allocation7 + $0x125]] }
 0x401   : > { %2606 = vrot.lane.b32.xlu1 %v2603_v14, %s5202_s9  ;;  %2608 = vrot.lane.b32.xlu0 %v2605_v60, %s5202_s9  ;;  %v2748_v14 = vrot.slane %v2741_v1, 2  ;;  %v2761_v60 = vmul.f32 %v2759_v28, %v6390_v29  ;;  %v2747_v42 = vsel %vm2727_vm10, %v2745_v26, %v2746_v30  ;;  %v2903_v1 = vstv %s4872_s29  ;;  %s4883_s29 = sld [smem:[#allocation7 + $0x122]] }
 0x402   : > { %v2850_v2 = vrot.slane %v2844_v41, 2  ;;  %v2883_v26 = vmul.f32 %v2882_v39, %v6393_v34  ;;  %v2904_v50 = vmul.f32 %v2903_v1, %v6393_v34 }
 0x403   : > { %v2749_v13 = vsel %vm2727_vm10, %v2746_v30, %v2748_v14  ;;  %v2884_v30 = vmul.f32 %v2882_v39, %v6390_v29  ;;  %v2853_v14 = vrot.slane %v2846_v35, 2  ;;  %v3026_v35 = vstv %s4878_s5  ;;  %s4889_s5 = sld [smem:[#allocation7 + $0x128]] }
 0x405   : > { %2627 = vrot.lane.b32.xlu1 %v2624_v15, %s5201_s8  ;;  %2629 = vrot.lane.b32.xlu0 %v2626_v18, %s5201_s8  ;;  %v2767_v15 = vrot.slane %v2761_v60, 2  ;;  %v2769_v18 = vrot.slane %v2762_v8, 2  ;;  %v2885_v60 = vmul.f32 %v2882_v39, %v6417_v17  ;;  %v2924_v8 = vstv %s4873_s30  ;;  %s4885_s30 = sld [smem:[#allocation7 + $0x124]] }
 0x407   : > { %v2768_v53 = vsel %vm2727_vm10, %v2766_v9, %v2767_v15  ;;  %v2890_v9 = vrot.slane %v2884_v30, 3 }
 0x409   : > { %2648 = vrot.lane.b32.xlu1 %v2645_v5, %s7567_s23  ;;  %2650 = vrot.lane.b32.xlu0 %v2647_v6, %s7567_s23  ;;  %v2788_v5 = vrot.slane %v2782_v58, 2  ;;  %v2770_v6 = vsel %vm2727_vm10, %v2767_v15, %v2769_v18  ;;  %v2905_v15 = vmul.f32 %v2903_v1, %v6390_v29  ;;  %v2906_v18 = vmul.f32 %v2903_v1, %v6417_v17 }
 0x40b   : > { %v2789_v11 = vsel %vm2727_vm10, %v2787_v37, %v2788_v5  ;;  %v2791_v23 = vsel %vm2727_vm10, %v2788_v5, %v2790_v10  ;;  %v2910_v37 = vrot.slane %v2904_v50, 3  ;;  %v2925_v5 = vmul.f32 %v2924_v8, %v6393_v34 }
 0x40c   : > { %v2927_v10 = vmul.f32 %v2924_v8, %v6417_v17 }
 0x40d   : > { %2669 = vrot.lane.b32.xlu1 %v2666_v16, %s5203_s26  ;;  %2671 = vrot.lane.b32.xlu0 %v2668_v32, %s5203_s26  ;;  %v2808_v16 = vrot.slane %v2802_v3, 2  ;;  %v2811_v32 = vrot.slane %v2804_v12, 2  ;;  %v2926_v3 = vmul.f32 %v2924_v8, %v6390_v29  ;;  %v2966_v12 = vstv %s4875_s10  ;;  %s4887_s10 = sld [smem:[#allocation7 + $0x126]] }
 0x40e   : > { %v2931_v51 = vrot.slane %v2925_v5, 3  ;;  %v2967_v41 = vmul.f32 %v2966_v12, %v6393_v34 }
 0x40f   : > { %v2810_v28 = vsel %vm2727_vm10, %v2808_v16, %v2809_v20  ;;  %v2812_v45 = vsel %vm2727_vm10, %v2809_v20, %v2811_v32  ;;  %v2946_v16 = vmul.f32 %v2945_v19, %v6393_v34  ;;  %v2947_v20 = vmul.f32 %v2945_v19, %v6390_v29 }
 0x410   : > { %v2934_v32 = vrot.slane %v2927_v10, 3  ;;  %v3089_v10 = vstv %s4881_s4  ;;  %s4893_s4 = sld [smem:[#allocation7 + $0x12c]] }
 0x411   : > { %2690 = vrot.lane.b32.xlu1 %v2687_v36, %s7566_s11  ;;  %2692 = vrot.lane.b32.xlu0 %v2689_v0, %s7566_s11  ;;  %v2830_v36 = vrot.slane %v2824_v63, 2  ;;  %v2832_v0 = vrot.slane %v2825_v33, 2  ;;  %v2948_v63 = vmul.f32 %v2945_v19, %v6417_v17  ;;  %v2987_v33 = vstv %s4876_s28  ;;  %s4888_s28 = sld [smem:[#allocation7 + $0x127]] }
 0x413   : > { %v2831_v46 = vsel %vm2727_vm10, %v2829_v22, %v2830_v36  ;;  %v2953_v22 = vrot.slane %v2947_v20, 3 }
 0x415   : > { %2711 = vrot.lane.b32.xlu1 %v2708_v55, %s7568_s7  ;;  %2713 = vrot.lane.b32.xlu0 %v2710_v7, %s7568_s7  ;;  %v2851_v55 = vrot.slane %v2845_v27, 2  ;;  %v2833_v7 = vsel %vm2727_vm10, %v2830_v36, %v2832_v0  ;;  %v2968_v36 = vmul.f32 %v2966_v12, %v6390_v29  ;;  %v2969_v0 = vmul.f32 %v2966_v12, %v6417_v17 }
 0x417   : > { %v2852_v38 = vsel %vm2727_vm10, %v2850_v2, %v2851_v55  ;;  %v2854_v58 = vsel %vm2727_vm10, %v2851_v55, %v2853_v14  ;;  %v2973_v2 = vrot.slane %v2967_v41, 3  ;;  %v2988_v55 = vmul.f32 %v2987_v33, %v6393_v34 }
 0x418   : > { %v2990_v14 = vmul.f32 %v2987_v33, %v6417_v17 }
 0x419   : > { %2750 = vrot.lane.b32.xlu1 %v2747_v42, %s5202_s9  ;;  %2752 = vrot.lane.b32.xlu0 %v2749_v13, %s5202_s9  ;;  %v2889_v42 = vrot.slane %v2883_v26, 3  ;;  %v2892_v13 = vrot.slane %v2885_v60, 3  ;;  %v2989_v26 = vmul.f32 %v2987_v33, %v6390_v29  ;;  %v3047_v60 = vstv %s4879_s6  ;;  %s4890_s6 = sld [smem:[#allocation7 + $0x129]] }
 0x41a   : > { %v2994_v8 = vrot.slane %v2988_v55, 3  ;;  %v3048_v5 = vmul.f32 %v3047_v60, %v6393_v34 }
 0x41b   : > { %v2891_v4 = vsel %vm2871_vm11, %v2889_v42, %v2890_v9  ;;  %v2893_v61 = vsel %vm2871_vm11, %v2890_v9, %v2892_v13  ;;  %v3027_v42 = vmul.f32 %v3026_v35, %v6393_v34  ;;  %v3028_v9 = vmul.f32 %v3026_v35, %v6390_v29 }
 0x41c   : > { %v2997_v13 = vrot.slane %v2990_v14, 3 }
 0x41d   : > { %2771 = vrot.lane.b32.xlu1 %v2768_v53, %s5201_s8  ;;  %2773 = vrot.lane.b32.xlu0 %v2770_v6, %s5201_s8  ;;  %v2911_v53 = vrot.slane %v2905_v15, 3  ;;  %v2913_v6 = vrot.slane %v2906_v18, 3  ;;  %v3029_v15 = vmul.f32 %v3026_v35, %v6417_v17  ;;  %v3068_v18 = vstv %s4880_s17  ;;  %v6575_v35 = vpop.permute.xlu0 %2468  ;;  %s4892_s17 = sld [smem:[#allocation7 + $0x12b]] }
 0x41f   : > { %v2912_v21 = vsel %vm2871_vm11, %v2910_v37, %v2911_v53  ;;  %v3034_v37 = vrot.slane %v3028_v9, 4 }
 0x421   : > { %2792 = vrot.lane.b32.xlu1 %v2789_v11, %s7567_s23  ;;  %2794 = vrot.lane.b32.xlu0 %v2791_v23, %s7567_s23  ;;  %v2932_v11 = vrot.slane %v2926_v3, 3  ;;  %v2914_v23 = vsel %vm2871_vm11, %v2911_v53, %v2913_v6  ;;  %v3049_v53 = vmul.f32 %v3047_v60, %v6390_v29  ;;  %v3050_v6 = vmul.f32 %v3047_v60, %v6417_v17 }
 0x422   : > { %v3169_v60 = vstv %s4885_s30  ;;  %s4896_s30 = sld [smem:[#allocation7 + $0x12f]] }
 0x423   : > { %v2933_v39 = vsel %vm2871_vm11, %v2931_v51, %v2932_v11  ;;  %v2935_v27 = vsel %vm2871_vm11, %v2932_v11, %v2934_v32  ;;  %v3054_v51 = vrot.slane %v3048_v5, 4  ;;  %v3069_v11 = vmul.f32 %v3068_v18, %v6393_v34 }
 0x424   : > { %v3071_v32 = vmul.f32 %v3068_v18, %v6417_v17 }
 0x425   : > { %2813 = vrot.lane.b32.xlu1 %v2810_v28, %s5203_s26  ;;  %2815 = vrot.lane.b32.xlu0 %v2812_v45, %s5203_s26  ;;  %v2952_v28 = vrot.slane %v2946_v16, 3  ;;  %v2955_v45 = vrot.slane %v2948_v63, 3  ;;  %v3070_v16 = vmul.f32 %v3068_v18, %v6390_v29  ;;  %v3110_v63 = vstv %s4882_s20  ;;  %v6591_v18 = vpop.permute.xlu0 %2472  ;;  %s4894_s20 = sld [smem:[#allocation7 + $0x12d]] }
 0x426   : > { %v3075_v33 = vrot.slane %v3069_v11, 4  ;;  %v3111_v55 = vmul.f32 %v3110_v63, %v6393_v34  ;;  %v3113_v14 = vmul.f32 %v3110_v63, %v6417_v17 }
 0x427   : > { %v2954_v1 = vsel %vm2871_vm11, %v2952_v28, %v2953_v22  ;;  %v2956_v30 = vsel %vm2871_vm11, %v2953_v22, %v2955_v45  ;;  %v3090_v28 = vmul.f32 %v3089_v10, %v6393_v34  ;;  %v3091_v22 = vmul.f32 %v3089_v10, %v6390_v29 }
 0x428   : > { %v3078_v45 = vrot.slane %v3071_v32, 4 }
 0x429   : > { %2834 = vrot.lane.b32.xlu1 %v2831_v46, %s7566_s11  ;;  %2836 = vrot.lane.b32.xlu0 %v2833_v7, %s7566_s11  ;;  %v2974_v46 = vrot.slane %v2968_v36, 3  ;;  %v2976_v7 = vrot.slane %v2969_v0, 3  ;;  %v3092_v36 = vmul.f32 %v3089_v10, %v6417_v17  ;;  %v3131_v0 = vstv %s4883_s29  ;;  %s4895_s29 = sld [smem:[#allocation7 + $0x12e]] }
 0x42a   : > { %v3132_v9 = vmul.f32 %v3131_v0, %v6393_v34 }
 0x42b   : > { %v2975_v50 = vsel %vm2871_vm11, %v2973_v2, %v2974_v46  ;;  %v3097_v2 = vrot.slane %v3091_v22, 4  ;;  %v3232_v22 = vstv %s4888_s28  ;;  %s6692_s28 = sld [smem:[#allocation8 + $0x2]] }
 0x42c   : > { %v3138_v5 = vrot.slane %v3132_v9, 4 }
 0x42d   : > { %2855 = vrot.lane.b32.xlu1 %v2852_v38, %s7568_s7  ;;  %2857 = vrot.lane.b32.xlu0 %v2854_v58, %s7568_s7  ;;  %v2995_v38 = vrot.slane %v2989_v26, 3  ;;  %v2977_v58 = vsel %vm2871_vm11, %v2974_v46, %v2976_v7  ;;  %v3112_v26 = vmul.f32 %v3110_v63, %v6390_v29  ;;  %v3099_v7 = vrot.slane %v3092_v36, 4 }
 0x42f   : > { %v2996_v19 = vsel %vm2871_vm11, %v2994_v8, %v2995_v38  ;;  %v2998_v3 = vsel %vm2871_vm11, %v2995_v38, %v2997_v13  ;;  %v3117_v38 = vrot.slane %v3111_v55, 4  ;;  %v3133_v13 = vmul.f32 %v3131_v0, %v6390_v29 }
 0x431   : > { %2894 = vrot.lane.b32.xlu1 %v2891_v4, %s5202_s9  ;;  %2896 = vrot.lane.b32.xlu0 %v2893_v61, %s5202_s9  ;;  %v3033_v4 = vrot.slane %v3027_v42, 4  ;;  %v3036_v61 = vrot.slane %v3029_v15, 4  ;;  %v3118_v42 = vrot.slane %v3112_v26, 4  ;;  %v3134_v15 = vmul.f32 %v3131_v0, %v6417_v17 }
 0x433   : > { %v3035_v12 = vsel %vm3015_vm12, %v3033_v4, %v3034_v37  ;;  %v3037_v20 = vsel %vm3015_vm12, %v3034_v37, %v3036_v61  ;;  %v6593_v4 = vpop.permute.xlu1 %2470  ;;  %v3119_v37 = vsel %vm3015_vm12, %v3117_v38, %v3118_v42  ;;  %v3171_v61 = vmul.f32 %v3169_v60, %v6390_v29 }
 0x434   : > { %v3141_v10 = vrot.slane %v3134_v15, 4  ;;  %v3234_v38 = vmul.f32 %v3232_v22, %v6390_v29  ;;  %v3274_v15 = vstv %s4890_s6  ;;  %s6730_s6 = sld [smem:[#allocation7 + $0x132]] }
 0x435   : > { %2915 = vrot.lane.b32.xlu1 %v2912_v21, %s5201_s8  ;;  %2917 = vrot.lane.b32.xlu0 %v2914_v23, %s5201_s8  ;;  %v3055_v21 = vrot.slane %v3049_v53, 4  ;;  %v3057_v23 = vrot.slane %v3050_v6, 4  ;;  %v3139_v6 = vrot.slane %v3133_v13, 4 }
 0x437   : > { %v3056_v41 = vsel %vm3015_vm12, %v3054_v51, %v3055_v21  ;;  %v3140_v63 = vsel %vm3015_vm12, %v3138_v5, %v3139_v6 }
 0x439   : > { %2936 = vrot.lane.b32.xlu1 %v2933_v39, %s7567_s23  ;;  %2938 = vrot.lane.b32.xlu0 %v2935_v27, %s7567_s23  ;;  %v3076_v39 = vrot.slane %v3070_v16, 4  ;;  %v3058_v27 = vsel %vm3015_vm12, %v3055_v21, %v3057_v23  ;;  %v3177_v21 = vrot.slane %v3171_v61, 5 }
 0x43b   : > { %v3079_v46 = vsel %vm3015_vm12, %v3076_v39, %v3078_v45 }
 0x43d   : > { %2957 = vrot.lane.b32.xlu1 %v2954_v1, %s5203_s26  ;;  %2959 = vrot.lane.b32.xlu0 %v2956_v30, %s5203_s26  ;;  %v3096_v1 = vrot.slane %v3090_v28, 4  ;;  %v3077_v30 = vsel %vm3015_vm12, %v3075_v33, %v3076_v39  ;;  %v3142_v33 = vsel %vm3015_vm12, %v3139_v6, %v3141_v10  ;;  %v3211_v28 = vstv %s4887_s10  ;;  %s4897_s10 = sld [smem:[#allocation7 + $0x130]] }
 0x43e   : > { %v3212_v55 = vmul.f32 %v3211_v28, %v6393_v34  ;;  %v3213_v26 = vmul.f32 %v3211_v28, %v6390_v29 }
 0x43f   : > { %v3098_v8 = vsel %vm3015_vm12, %v3096_v1, %v3097_v2 }
 0x441   : > { %2978 = vrot.lane.b32.xlu1 %v2975_v50, %s7566_s11  ;;  %2980 = vrot.lane.b32.xlu0 %v2977_v58, %s7566_s11  ;;  %v3100_v50 = vsel %vm3015_vm12, %v3097_v2, %v3099_v7  ;;  %v3120_v58 = vrot.slane %v3113_v14, 4 }
 0x443   : > { %v3121_v53 = vsel %vm3015_vm12, %v3118_v42, %v3120_v58  ;;  %v3235_v42 = vmul.f32 %v3232_v22, %v6417_v17  ;;  %v3219_v58 = vrot.slane %v3213_v26, 5 }
 0x445   : > { %2999 = vrot.lane.b32.xlu1 %v2996_v19, %s7568_s7  ;;  %3001 = vrot.lane.b32.xlu0 %v2998_v3, %s7568_s7  ;;  %v3190_v19 = vstv %s4886_s27  ;;  %v3170_v3 = vmul.f32 %v3169_v60, %v6393_v34  ;;  %v3242_v61 = vrot.slane %v3235_v42, 5  ;;  %s6679_s27 = sld [smem:[#allocation7 + $0x100]] }
 0x446   : > { %v3191_v51 = vmul.f32 %v3190_v19, %v6393_v34  ;;  %v3192_v23 = vmul.f32 %v3190_v19, %v6390_v29  ;;  %v3193_v32 = vmul.f32 %v3190_v19, %v6417_v17 }
 0x448   : > { %v3197_v36 = vrot.slane %v3191_v51, 5  ;;  %v3198_v0 = vrot.slane %v3192_v23, 5  ;;  %v3200_v1 = vrot.slane %v3193_v32, 5 }
 0x449   : > { %3038 = vrot.lane.b32.xlu1 %v3035_v12, %s5202_s9  ;;  %3040 = vrot.lane.b32.xlu0 %v3037_v20, %s5202_s9  ;;  %v3172_v12 = vmul.f32 %v3169_v60, %v6417_v17  ;;  %v3176_v20 = vrot.slane %v3170_v3, 5  ;;  %v3240_v3 = vrot.slane %v3234_v38, 5 }
 0x44a   : > { %v3199_v60 = vsel %vm311_vm4, %v3197_v36, %v3198_v0  ;;  %v3201_v9 = vsel %vm311_vm4, %v3198_v0, %v3200_v1  ;;  %v3277_v36 = vmul.f32 %v3274_v15, %v6417_v17  ;;  %v3333_v0 = vstv %s4893_s4  ;;  %s6766_s4 = sld [smem:[#allocation7 + $0x134]] }
 0x44b   : > { %v3179_v39 = vrot.slane %v3172_v12, 5  ;;  %v3178_v45 = vsel %vm311_vm4, %v3176_v20, %v3177_v21  ;;  %v3312_v20 = vstv %s4892_s17  ;;  %s6745_s17 = sld [smem:[#allocation7 + $0x133]] }
 0x44c   : > { %v3313_v26 = vmul.f32 %v3312_v20, %v6393_v34  ;;  %v3284_v42 = vrot.slane %v3277_v36, 5 }
 0x44d   : > { %3059 = vrot.lane.b32.xlu1 %v3056_v41, %s5201_s8  ;;  %3061 = vrot.lane.b32.xlu0 %v3058_v27, %s5201_s8  ;;  %v3180_v2 = vsel %vm311_vm4, %v3177_v21, %v3179_v39  ;;  %v3275_v39 = vmul.f32 %v3274_v15, %v6393_v34 }
 0x451   : > { %3080 = vrot.lane.b32.xlu1 %v3077_v30, %s7567_s23  ;;  %3082 = vrot.lane.b32.xlu0 %v3079_v46, %s7567_s23  ;;  %v3214_v30 = vmul.f32 %v3211_v28, %v6417_v17  ;;  %v3253_v46 = vstv %s4889_s5  ;;  %s6720_s5 = sld [smem:[#allocation7 + $0x107]] }
 0x452   : > { %v3255_v12 = vmul.f32 %v3253_v46, %v6390_v29  ;;  %v3256_v51 = vmul.f32 %v3253_v46, %v6417_v17 }
 0x453   : > { %v3221_v13 = vrot.slane %v3214_v30, 5  ;;  %v3314_v30 = vmul.f32 %v3312_v20, %v6390_v29 }
 0x454   : > { %v3261_v28 = vrot.slane %v3255_v12, 5  ;;  %v3375_v12 = vstv %s4895_s29  ;;  %s4863_s29 = sld [smem:[#allocation7 + $0x10e]] }
 0x455   : > { %3101 = vrot.lane.b32.xlu1 %v3098_v8, %s5203_s26  ;;  %3103 = vrot.lane.b32.xlu0 %v3100_v50, %s5203_s26  ;;  %v3233_v8 = vmul.f32 %v3232_v22, %v6393_v34  ;;  %v3218_v50 = vrot.slane %v3212_v55, 5  ;;  %v3222_v10 = vsel %vm311_vm4, %v3219_v58, %v3221_v13  ;;  %v3263_v22 = vrot.slane %v3256_v51, 5 }
 0x456   : > { %v3281_v55 = vrot.slane %v3275_v39, 5  ;;  %v3319_v13 = vrot.slane %v3313_v26, 6 }
 0x457   : > { %v3239_v5 = vrot.slane %v3233_v8, 5  ;;  %v3220_v6 = vsel %vm311_vm4, %v3218_v50, %v3219_v58  ;;  %v3264_v8 = vsel %vm311_vm4, %v3261_v28, %v3263_v22 }
 0x459   : > { %3122 = vrot.lane.b32.xlu1 %v3119_v37, %s7566_s11  ;;  %3124 = vrot.lane.b32.xlu0 %v3121_v53, %s7566_s11  ;;  %v3254_v53 = vmul.f32 %v3253_v46, %v6393_v34  ;;  %v3241_v32 = vsel %vm311_vm4, %v3239_v5, %v3240_v3  ;;  %v3315_v46 = vmul.f32 %v3312_v20, %v6417_v17 }
 0x45b   : > { %v6603_v11 = vpop.permute.xlu0 %2500  ;;  %v6605_v16 = vpop.permute.xlu1 %2498  ;;  %v3322_v5 = vrot.slane %v3315_v46, 6 }
 0x45d   : > { %3143 = vrot.lane.b32.xlu1 %v3140_v63, %s7568_s7  ;;  %3145 = vrot.lane.b32.xlu0 %v3142_v33, %s7568_s7  ;;  %v3243_v63 = vsel %vm311_vm4, %v3240_v3, %v3242_v61  ;;  %v3260_v33 = vrot.slane %v3254_v53, 5  ;;  %v3334_v3 = vmul.f32 %v3333_v0, %v6393_v34 }
 0x45f   : > { %v6613_v41 = vpop.permute.xlu0 %2514  ;;  %v6615_v27 = vpop.permute.xlu1 %2512 }
 0x461   : > { %3181 = vrot.lane.b32.xlu1 %v3178_v45, %s5202_s9  ;;  %3183 = vrot.lane.b32.xlu0 %v3180_v2, %s5202_s9  ;;  %v3276_v45 = vmul.f32 %v3274_v15, %v6390_v29  ;;  %v3320_v15 = vrot.slane %v3314_v30, 6 }
 0x463   : > { %v6624_v7 = vpop.permute.xlu0 %2528  ;;  %v6626_v14 = vpop.permute.xlu1 %2526  ;;  %v3282_v38 = vrot.slane %v3276_v45, 5 }
 0x465   : > { %3202 = vrot.lane.b32.xlu1 %v3199_v60, %s5201_s8  ;;  %3204 = vrot.lane.b32.xlu0 %v3201_v9, %s5201_s8  ;;  %v3262_v60 = vsel %vm311_vm4, %v3260_v33, %v3261_v28  ;;  %v3354_v9 = vstv %s4894_s20  ;;  %v3283_v61 = vsel %vm311_vm4, %v3281_v55, %v3282_v38  ;;  %v3285_v53 = vsel %vm311_vm4, %v3282_v38, %v3284_v42  ;;  %s6787_s20 = sld [smem:[#allocation7 + $0x135]] }
 0x466   : > { %v3355_v33 = vmul.f32 %v3354_v9, %v6393_v34  ;;  %v3356_v39 = vmul.f32 %v3354_v9, %v6390_v29  ;;  %v3323_v28 = vsel %vm739_vm8, %v3320_v15, %v3322_v5  ;;  %v3357_v36 = vmul.f32 %v3354_v9, %v6417_v17 }
 0x467   : > { %v6635_v19 = vpop.permute.xlu0 %2542  ;;  %v6637_v37 = vpop.permute.xlu1 %2540  ;;  %v3417_v5 = vstv %s4897_s10  ;;  %s6806_s10 = sld [smem:[#allocation7 + $0x137]] }
 0x468   : > { %v3361_v30 = vrot.slane %v3355_v33, 6  ;;  %v3362_v46 = vrot.slane %v3356_v39, 6  ;;  %v3364_v9 = vrot.slane %v3357_v36, 6 }
 0x469   : > { %3223 = vrot.lane.b32.xlu1 %v3220_v6, %s7567_s23  ;;  %3225 = vrot.lane.b32.xlu0 %v3222_v10, %s7567_s23  ;;  %v3335_v6 = vmul.f32 %v3333_v0, %v6390_v29  ;;  %v3336_v10 = vmul.f32 %v3333_v0, %v6417_v17  ;;  %v3376_v0 = vmul.f32 %v3375_v12, %v6393_v34 }
 0x46b   : > { %v6646_v21 = vpop.permute.xlu0 %2556  ;;  %v6648_v23 = vpop.permute.xlu1 %2554  ;;  %v3341_v22 = vrot.slane %v3335_v6, 6  ;;  %v3343_v45 = vrot.slane %v3336_v10, 6  ;;  %v3382_v6 = vrot.slane %v3376_v0, 6 }
 0x46d   : > { %3244 = vrot.lane.b32.xlu1 %v3241_v32, %s5203_s26  ;;  %3246 = vrot.lane.b32.xlu0 %v3243_v63, %s5203_s26  ;;  %v3321_v32 = vsel %vm739_vm8, %v3319_v13, %v3320_v15  ;;  %v3340_v63 = vrot.slane %v3334_v3, 6  ;;  %v3344_v42 = vsel %vm739_vm8, %v3341_v22, %v3343_v45  ;;  %v3396_v13 = vstv %s4896_s30  ;;  %s6799_s30 = sld [smem:[#allocation7 + $0x136]] }
 0x46e   : > { %v2487_v15 = vstv %s6679_s27  ;;  %v3398_v33 = vmul.f32 %v3396_v13, %v6390_v29  ;;  %v3399_v39 = vmul.f32 %v3396_v13, %v6417_v17  ;;  %s4906_s27 = sld [smem:[#allocation7 + $0x139]] }
 0x46f   : > { %v6657_v1 = vpop.permute.xlu0 %2570  ;;  %v6659_v2 = vpop.permute.xlu1 %2568  ;;  %v3342_v38 = vsel %vm739_vm8, %v3340_v63, %v3341_v22  ;;  %v3397_v63 = vmul.f32 %v3396_v13, %v6393_v34  ;;  %v2489_v22 = vmul.f32 %v2487_v15, %v6390_v29  ;;  %v2488_v45 = vmul.f32 %v2487_v15, %v6393_v34 }
 0x470   : > { %v3406_v13 = vrot.slane %v3399_v39, 6 }
 0x471   : > { %3265 = vrot.lane.b32.xlu1 %v3262_v60, %s7566_s11  ;;  %3267 = vrot.lane.b32.xlu0 %v3264_v8, %s7566_s11  ;;  %v3377_v60 = vmul.f32 %v3375_v12, %v6390_v29  ;;  %v3378_v8 = vmul.f32 %v3375_v12, %v6417_v17 }
 0x473   : > { %v6668_v50 = vpop.permute.xlu0 %2608  ;;  %v6670_v58 = vpop.permute.xlu1 %2606  ;;  %v3383_v10 = vrot.slane %v3377_v60, 6  ;;  %v3385_v12 = vrot.slane %v3378_v8, 6  ;;  %v3419_v60 = vmul.f32 %v3417_v5, %v6390_v29  ;;  %v3420_v8 = vmul.f32 %v3417_v5, %v6417_v17 }
 0x475   : > { %3286 = vrot.lane.b32.xlu1 %v3283_v61, %s7568_s7  ;;  %3288 = vrot.lane.b32.xlu0 %v3285_v53, %s7568_s7  ;;  %v3363_v53 = vsel %vm739_vm8, %v3361_v30, %v3362_v46  ;;  %v3384_v30 = vsel %vm739_vm8, %v3382_v6, %v3383_v10  ;;  %v2477_v6 = vsel %vm323_vm6, 0.0, %v6575_v35  ;;  %v3425_v56 = vrot.slane %v3419_v60, 6 }
 0x477   : > { %v6681_v51 = vpop.permute.xlu0 %2629  ;;  %v6683_v20 = vpop.permute.xlu1 %2627 }
 0x479   : > { %3324 = vrot.lane.b32.xlu1 %v3321_v32, %s5202_s9  ;;  %3326 = vrot.lane.b32.xlu0 %v3323_v28, %s5202_s9  ;;  %v3365_v32 = vsel %vm739_vm8, %v3362_v46, %v3364_v9  ;;  %v2484_v28 = vstv %s6692_s28  ;;  %v3418_v46 = vmul.f32 %v3417_v5, %v6393_v34  ;;  %v3404_v9 = vrot.slane %v3398_v33, 6  ;;  %s6814_s28 = sld [smem:[#allocation7 + $0x13a]] }
 0x47a   : > { %v2491_v15 = vadd.f32 %v2489_v22, %v2484_v28  ;;  %v2577_v22 = vstv %s6720_s5  ;;  %s6830_s5 = sld [smem:[#allocation7 + $0x13b]] }
 0x47b   : > { %v6695_v55 = vpop.permute.xlu0 %2650  ;;  %v6697_v26 = vpop.permute.xlu1 %2648  ;;  %v3424_v54 = vrot.slane %v3418_v46, 6  ;;  %v3407_v39 = vsel %vm739_vm8, %v3404_v9, %v3406_v13  ;;  %v3444_v46 = vstv %s6730_s6  ;;  %s6854_s6 = sld [smem:[#allocation7 + $0x13c]] }
 0x47d   : > { %3345 = vrot.lane.b32.xlu1 %v3342_v38, %s5201_s8  ;;  %3347 = vrot.lane.b32.xlu0 %v3344_v42, %s5201_s8  ;;  %v3386_v38 = vsel %vm739_vm8, %v3383_v10, %v3385_v12  ;;  %v3403_v42 = vrot.slane %v3397_v63, 6  ;;  %v3427_v10 = vrot.slane %v3420_v8, 6  ;;  %v2505_v12 = vadd.f32 %v6603_v11, %v2491_v15 }
 0x47e   : > { %v2478_v11 = vsel %vm323_vm6, 0.0, %v6593_v4  ;;  %v2580_v4 = vmul.f32 %v2577_v22, %v6417_v17 }
 0x47f   : > { %v6706_v3 = vpop.permute.xlu0 %2671  ;;  %v6708_v61 = vpop.permute.xlu1 %2669  ;;  %v3405_v33 = vsel %vm739_vm8, %v3403_v42, %v3404_v9  ;;  %v2519_v35 = vadd.f32 %v6613_v41, %v2505_v12  ;;  %v3426_v41 = vsel %vm739_vm8, %v3424_v54, %v3425_v56  ;;  %v2578_v42 = vmul.f32 %v2577_v22, %v6393_v34 }
 0x481   : > { %3366 = vrot.lane.b32.xlu1 %v3363_v53, %s7567_s23  ;;  %3368 = vrot.lane.b32.xlu0 %v3365_v32, %s7567_s23  ;;  %v2490_v53 = vadd.f32 %v2488_v45, %v2484_v28  ;;  %v6753_v45 = vsel %vm326_vm7, %v2477_v6, 0.0  ;;  %v2533_v60 = vadd.f32 %v6624_v7, %v2519_v35  ;;  %v6774_v7 = vsel %vm326_vm7, %v2478_v11, 0.0 }
 0x482   : > { %v3445_v13 = vmul.f32 %v3444_v46, %v6753_v45  ;;  %v3446_v15 = vmul.f32 %v3444_v46, %v6774_v7 }
 0x483   : > { %v6722_v36 = vpop.permute.xlu0 %2692  ;;  %v6724_v0 = vpop.permute.xlu1 %2690  ;;  %v2504_v63 = vadd.f32 %v6605_v16, %v2490_v53  ;;  %v2547_v54 = vadd.f32 %v6635_v19, %v2533_v60  ;;  %v2587_v19 = vrot.slane %v2580_v4, 1  ;;  %v2479_v4 = vsel %vm323_vm6, 0.0, %v6591_v18 }
 0x485   : > { %3387 = vrot.lane.b32.xlu1 %v3384_v30, %s5203_s26  ;;  %3389 = vrot.lane.b32.xlu0 %v3386_v38, %s5203_s26  ;;  %v2518_v28 = vadd.f32 %v6615_v27, %v2504_v63  ;;  %v3428_v27 = vsel %vm739_vm8, %v3425_v56, %v3427_v10  ;;  %v2579_v38 = vmul.f32 %v2577_v22, %v6390_v29  ;;  %v3458_v10 = vstv %s6745_s17  ;;  %s6865_s17 = sld [smem:[#allocation7 + $0x115]] }
 0x486   : > { %v2561_v53 = vadd.f32 %v6646_v21, %v2547_v54  ;;  %v2584_v63 = vrot.slane %v2578_v42, 1  ;;  %v3460_v35 = vmul.f32 %v3458_v10, %v6774_v7 }
 0x487   : > { %v6737_v32 = vpop.permute.xlu0 %2713  ;;  %v6739_v5 = vpop.permute.xlu1 %2711  ;;  %v2532_v8 = vadd.f32 %v6626_v14, %v2518_v28  ;;  %v2585_v12 = vrot.slane %v2579_v38, 1  ;;  %v3472_v28 = vstv %s6766_s4  ;;  %v2720_v38 = vstv %s4863_s29  ;;  %s6877_s4 = sld [smem:[#allocation7 + $0x13d]]  ;;  %s6910_s29 = sld [smem:[#allocation7 + $0x140]] }
 0x489   : > { %3408 = vrot.lane.b32.xlu1 %v3405_v33, %s7566_s11  ;;  %3410 = vrot.lane.b32.xlu0 %v3407_v39, %s7566_s11  ;;  %v2546_v56 = vadd.f32 %v6637_v37, %v2532_v8  ;;  %v2575_v37 = vadd.f32 %v6657_v1, %v2561_v53  ;;  %v2588_v22 = vsel %vm313_vm5, %v2585_v12, %v2587_v19 }
 0x48a   : > { %v2586_v11 = vsel %vm313_vm5, %v2584_v63, %v2585_v12  ;;  %v3473_v8 = vmul.f32 %v3472_v28, %v6753_v45  ;;  %v6836_v12 = vsel %vm326_vm7, %v2479_v4, 0.0  ;;  %v2723_v19 = vmul.f32 %v2720_v38, %v6417_v17 }
 0x48b   : > { %v6757_v16 = vpop.permute.xlu0 %2752  ;;  %v6759_v30 = vpop.permute.xlu1 %2750  ;;  %v2560_v6 = vadd.f32 %v6648_v23, %v2546_v56  ;;  %v3459_v23 = vmul.f32 %v3458_v10, %v6753_v45  ;;  %v2592_v1 = vadd.f32 %v2588_v22, %v2575_v37  ;;  %v2721_v63 = vmul.f32 %v2720_v38, %v6393_v34 }
 0x48d   : > { %3429 = vrot.lane.b32.xlu1 %v3426_v41, %s7568_s7  ;;  %3431 = vrot.lane.b32.xlu0 %v3428_v27, %s7568_s7  ;;  %v2574_v33 = vadd.f32 %v6659_v2, %v2560_v6  ;;  %v3474_v41 = vmul.f32 %v3472_v28, %v6774_v7  ;;  %v3486_v27 = vstv %s6787_s20  ;;  %v2613_v42 = vadd.f32 %v6668_v50, %v2592_v1  ;;  %s6891_s20 = sld [smem:[#allocation7 + $0x13e]] }
 0x48e   : > { %v3488_v53 = vmul.f32 %v3486_v27, %v6774_v7  ;;  %v3500_v6 = vstv %s6799_s30  ;;  %v2722_v50 = vmul.f32 %v2720_v38, %v6390_v29  ;;  %v3566_v1 = vstv %s6814_s28  ;;  %s6925_s30 = sld [smem:[#allocation7 + $0x141]]  ;;  %s6958_s28 = sld [smem:[#allocation7 + $0x143]] }
 0x48f   : > { %v6778_v14 = vpop.permute.xlu0 %2773  ;;  %v6780_v9 = vpop.permute.xlu1 %2771  ;;  %v2591_v2 = vadd.f32 %v2586_v11, %v2574_v33  ;;  %v2634_v10 = vadd.f32 %v6681_v51, %v2613_v42  ;;  %v3514_v33 = vstv %s6806_s10  ;;  %v3502_v28 = vmul.f32 %v3500_v6, %v6774_v7  ;;  %s6951_s10 = sld [smem:[#allocation7 + $0x142]] }
 0x490   : > { %v3515_v38 = vmul.f32 %v3514_v33, %v6753_v45  ;;  %v3516_v4 = vmul.f32 %v3514_v33, %v6774_v7 }
 0x491   : > { %3449 = vrot.lane.b32.xlu1 %v3445_v13, %s5202_s9  ;;  %3451 = vrot.lane.b32.xlu0 %v3446_v15, %s5202_s9  ;;  %v2612_v54 = vadd.f32 %v6670_v58, %v2591_v2  ;;  %v3487_v15 = vmul.f32 %v3486_v27, %v6753_v45  ;;  %v3545_v58 = vstv %s4906_s27  ;;  %v2655_v37 = vadd.f32 %v6695_v55, %v2634_v10  ;;  %s6939_s27 = sld [smem:[#allocation7 + $0x11c]] }
 0x492   : > { %v3546_v22 = vmul.f32 %v3545_v58, %v6753_v45  ;;  %v3547_v11 = vmul.f32 %v3545_v58, %v6774_v7  ;;  %v2729_v2 = vrot.slane %v2722_v50, 2  ;;  %v2728_v27 = vrot.slane %v2721_v63, 2 }
 0x493   : > { %v6793_v39 = vpop.permute.xlu0 %2794  ;;  %v6795_v21 = vpop.permute.xlu1 %2792  ;;  %v2633_v18 = vadd.f32 %v6683_v20, %v2612_v54  ;;  %v3501_v20 = vmul.f32 %v3500_v6, %v6753_v45  ;;  %v2676_v55 = vadd.f32 %v6706_v3, %v2655_v37  ;;  %v3569_v54 = vmul.f32 %v3566_v1, %v6836_v12 }
 0x494   : > { %v3552_v6 = vrot.slane %v3546_v22, 1  ;;  %v3553_v10 = vrot.slane %v3547_v11, 1  ;;  %v3587_v50 = vstv %s6830_s5  ;;  %v2730_v63 = vsel %vm2727_vm10, %v2728_v27, %v2729_v2  ;;  %s6984_s5 = sld [smem:[#allocation7 + $0x144]] }
 0x495   : > { %3463 = vrot.lane.b32.xlu1 %v3459_v23, %s5201_s8  ;;  %3465 = vrot.lane.b32.xlu0 %v3460_v35, %s5201_s8  ;;  %v2654_v51 = vadd.f32 %v6697_v26, %v2633_v18  ;;  %v2697_v42 = vadd.f32 %v6722_v36, %v2676_v55  ;;  %v3567_v18 = vmul.f32 %v3566_v1, %v6753_v45  ;;  %v3608_v11 = vstv %s6854_s6  ;;  %s7001_s6 = sld [smem:[#allocation7 + $0x145]] }
 0x496   : > { %v3590_v22 = vmul.f32 %v3587_v50, %v6836_v12  ;;  %v3610_v27 = vmul.f32 %v3608_v11, %v6774_v7 }
 0x497   : > { %v6808_v46 = vpop.permute.xlu0 %2815  ;;  %v6810_v60 = vpop.permute.xlu1 %2813  ;;  %v2675_v26 = vadd.f32 %v6708_v61, %v2654_v51  ;;  %v3568_v61 = vmul.f32 %v3566_v1, %v6774_v7  ;;  %v3576_v51 = vrot.slane %v3569_v54, 1 }
 0x499   : > { %3477 = vrot.lane.b32.xlu1 %v3473_v8, %s7567_s23  ;;  %3479 = vrot.lane.b32.xlu0 %v3474_v41, %s7567_s23  ;;  %v3548_v8 = vmul.f32 %v3545_v58, %v6836_v12  ;;  %v2731_v41 = vrot.slane %v2723_v19, 2  ;;  %v2696_v3 = vadd.f32 %v6724_v0, %v2675_v26  ;;  %v2718_v58 = vadd.f32 %v6737_v32, %v2697_v42 }
 0x49a   : > { %v3574_v37 = vrot.slane %v3568_v61, 1 }
 0x49b   : > { %v6823_v56 = vpop.permute.xlu0 %2836  ;;  %v6825_v13 = vpop.permute.xlu1 %2834  ;;  %v2717_v36 = vadd.f32 %v6739_v5, %v2696_v3  ;;  %v3555_v0 = vrot.slane %v3548_v8, 1  ;;  %v2732_v19 = vsel %vm2727_vm10, %v2729_v2, %v2731_v41  ;;  %v3554_v5 = vsel %vm313_vm5, %v3552_v6, %v3553_v10 }
 0x49c   : > { %v2736_v1 = vadd.f32 %v2732_v19, %v2718_v58  ;;  %v3588_v2 = vmul.f32 %v3587_v50, %v6753_v45  ;;  %v3611_v8 = vmul.f32 %v3608_v11, %v6836_v12  ;;  %v2864_v41 = vstv %s6865_s17  ;;  %s7016_s17 = sld [smem:[#allocation7 + $0x147]] }
 0x49d   : > { %3491 = vrot.lane.b32.xlu1 %v3487_v15, %s5203_s26  ;;  %3493 = vrot.lane.b32.xlu0 %v3488_v53, %s5203_s26  ;;  %v2735_v55 = vadd.f32 %v2730_v63, %v2717_v36  ;;  %v3556_v26 = vsel %vm313_vm5, %v3553_v10, %v3555_v0  ;;  %v3577_v3 = vsel %vm313_vm5, %v3574_v37, %v3576_v51  ;;  %v3597_v6 = vrot.slane %v3590_v22, 1 }
 0x49e   : > { %v2757_v10 = vadd.f32 %v6757_v16, %v2736_v1  ;;  %v3629_v58 = vstv %s6877_s4  ;;  %v2866_v36 = vmul.f32 %v2864_v41, %v6390_v29  ;;  %v3618_v0 = vrot.slane %v3611_v8, 1  ;;  %s7032_s4 = sld [smem:[#allocation7 + $0x123]] }
 0x49f   : > { %v6846_v23 = vpop.permute.xlu0 %2857  ;;  %v6848_v35 = vpop.permute.xlu1 %2855  ;;  %v3650_v22 = vstv %s6891_s20  ;;  %s7046_s20 = sld [smem:[#allocation7 + $0x148]] }
 0x4a0   : > { %v2778_v19 = vadd.f32 %v6778_v14, %v2757_v10 }
 0x4a1   : > { %3505 = vrot.lane.b32.xlu1 %v3501_v20, %s7566_s11  ;;  %3507 = vrot.lane.b32.xlu0 %v3502_v28, %s7566_s11  ;;  %v3589_v20 = vmul.f32 %v3587_v50, %v6774_v7  ;;  %v3573_v28 = vrot.slane %v3567_v18, 1  ;;  %v2756_v18 = vadd.f32 %v6759_v30, %v2735_v55  ;;  %v3594_v50 = vrot.slane %v3588_v2, 1 }
 0x4a2   : > { %v2867_v55 = vmul.f32 %v2864_v41, %v6417_v17 }
 0x4a3   : > { %v6869_v15 = vpop.permute.xlu0 %2896  ;;  %v6871_v53 = vpop.permute.xlu1 %2894  ;;  %v3575_v61 = vsel %vm313_vm5, %v3573_v28, %v3574_v37  ;;  %v3595_v54 = vrot.slane %v3589_v20, 1  ;;  %v2777_v63 = vadd.f32 %v6780_v9, %v2756_v18  ;;  %v3616_v37 = vrot.slane %v3610_v27, 1 }
 0x4a4   : > { %v3631_v20 = vmul.f32 %v3629_v58, %v6774_v7  ;;  %v3630_v28 = vmul.f32 %v3629_v58, %v6753_v45  ;;  %v3652_v27 = vmul.f32 %v3650_v22, %v6774_v7  ;;  %v3688_v18 = vstv %s6910_s29  ;;  %s7062_s29 = sld [smem:[#allocation7 + $0x149]] }
 0x4a5   : > { %3519 = vrot.lane.b32.xlu1 %v3515_v38, %s7568_s7  ;;  %3521 = vrot.lane.b32.xlu0 %v3516_v4, %s7568_s7  ;;  %v3609_v38 = vmul.f32 %v3608_v11, %v6753_v45  ;;  %v2799_v11 = vadd.f32 %v6793_v39, %v2778_v19  ;;  %v2798_v14 = vadd.f32 %v6795_v21, %v2777_v63 }
 0x4a6   : > { %v3598_v9 = vsel %vm313_vm5, %v3595_v54, %v3597_v6  ;;  %v3596_v1 = vsel %vm313_vm5, %v3594_v50, %v3595_v54  ;;  %v3619_v2 = vsel %vm313_vm5, %v3616_v37, %v3618_v0  ;;  %v3636_v54 = vrot.slane %v3630_v28, 1 }
 0x4a7   : > { %v6884_v32 = vpop.permute.xlu0 %2917  ;;  %v6886_v33 = vpop.permute.xlu1 %2915  ;;  %v3615_v16 = vrot.slane %v3609_v38, 1  ;;  %v2820_v8 = vadd.f32 %v6808_v46, %v2799_v11  ;;  %v2819_v39 = vadd.f32 %v6810_v60, %v2798_v14  ;;  %v3653_v6 = vmul.f32 %v3650_v22, %v6836_v12 }
 0x4a8   : > { %v3651_v60 = vmul.f32 %v3650_v22, %v6753_v45  ;;  %v2873_v50 = vrot.slane %v2866_v36, 3  ;;  %v3691_v19 = vmul.f32 %v3688_v18, %v6836_v12 }
 0x4a9   : > { %3557 = vrot.lane.b32.xlu1 %v3554_v5, %s5202_s9  ;;  %3559 = vrot.lane.b32.xlu0 %v3556_v26, %s5202_s9  ;;  %v3632_v5 = vmul.f32 %v3629_v58, %v6836_v12  ;;  %v2865_v26 = vmul.f32 %v2864_v41, %v6393_v34  ;;  %v3617_v21 = vsel %vm313_vm5, %v3615_v16, %v3616_v37  ;;  %v2875_v58 = vrot.slane %v2867_v55, 3 }
 0x4aa   : > { %v2841_v10 = vadd.f32 %v6823_v56, %v2820_v8  ;;  %v2840_v46 = vadd.f32 %v6825_v13, %v2819_v39  ;;  %v3658_v16 = vrot.slane %v3652_v27, 1  ;;  %v3660_v22 = vrot.slane %v3653_v6, 1 }
 0x4ab   : > { %v6901_v4 = vpop.permute.xlu0 %2938  ;;  %v6903_v42 = vpop.permute.xlu1 %2936  ;;  %v2872_v0 = vrot.slane %v2865_v26, 3  ;;  %v3657_v11 = vrot.slane %v3651_v60, 1  ;;  %v3008_v26 = vstv %s6939_s27  ;;  %s7094_s27 = sld [smem:[#allocation7 + $0x14b]] }
 0x4ac   : > { %v2862_v63 = vadd.f32 %v6846_v23, %v2841_v10  ;;  %v2861_v56 = vadd.f32 %v6848_v35, %v2840_v46  ;;  %v3689_v23 = vmul.f32 %v3688_v18, %v6753_v45  ;;  %v2876_v35 = vsel %vm2871_vm11, %v2873_v50, %v2875_v58 }
 0x4ad   : > { %3580 = vrot.lane.b32.xlu0 %v3577_v3, %s5201_s8  ;;  %3578 = vrot.lane.b32.xlu1 %v3575_v61, %s5201_s8  ;;  %v3637_v3 = vrot.slane %v3631_v20, 1  ;;  %v3639_v61 = vrot.slane %v3632_v5, 1  ;;  %v3690_v20 = vmul.f32 %v3688_v18, %v6774_v7  ;;  %v3709_v5 = vstv %s6925_s30  ;;  %s7070_s30 = sld [smem:[#allocation7 + $0x14a]] }
 0x4ae   : > { %v2874_v14 = vsel %vm2871_vm11, %v2872_v0, %v2873_v50  ;;  %v3712_v27 = vmul.f32 %v3709_v5, %v6836_v12  ;;  %v3695_v6 = vrot.slane %v3689_v23, 2  ;;  %v3730_v10 = vstv %s6951_s10  ;;  %s7105_s10 = sld [smem:[#allocation7 + $0x14c]] }
 0x4af   : > { %v6917_v51 = vpop.permute.xlu0 %2959  ;;  %v6919_v30 = vpop.permute.xlu1 %2957  ;;  %v3640_v36 = vsel %vm313_vm5, %v3637_v3, %v3639_v61  ;;  %v3638_v28 = vsel %vm313_vm5, %v3636_v54, %v3637_v3  ;;  %v2879_v55 = vadd.f32 %v2874_v14, %v2861_v56  ;;  %v3710_v3 = vmul.f32 %v3709_v5, %v6753_v45 }
 0x4b0   : > { %v3661_v61 = vsel %vm313_vm5, %v3658_v16, %v3660_v22  ;;  %v3659_v54 = vsel %vm313_vm5, %v3657_v11, %v3658_v16  ;;  %v6987_v46 = vmul.f32 %v3008_v26, %v6390_v29  ;;  %v3751_v0 = vstv %s6958_s28  ;;  %s7116_s28 = sld [smem:[#allocation7 + $0x12a]] }
 0x4b1   : > { %3601 = vrot.lane.b32.xlu0 %v3598_v9, %s7567_s23  ;;  %3599 = vrot.lane.b32.xlu1 %v3596_v1, %s7567_s23  ;;  %v3698_v9 = vrot.slane %v3691_v19, 2  ;;  %v2880_v1 = vadd.f32 %v2876_v35, %v2862_v63  ;;  %v2900_v50 = vadd.f32 %v6871_v53, %v2879_v55  ;;  %v3719_v56 = vrot.slane %v3712_v27, 2 }
 0x4b2   : > { %v3732_v16 = vmul.f32 %v3730_v10, %v6774_v7  ;;  %v3011_v22 = vmul.f32 %v3008_v26, %v6417_v17  ;;  %v3009_v11 = vmul.f32 %v3008_v26, %v6393_v34  ;;  %v3753_v23 = vmul.f32 %v3751_v0, %v6774_v7 }
 0x4b3   : > { %v6942_v38 = vpop.permute.xlu0 %2980  ;;  %v6944_v41 = vpop.permute.xlu1 %2978  ;;  %v2901_v18 = vadd.f32 %v6869_v15, %v2880_v1  ;;  %v2921_v15 = vadd.f32 %v6886_v33, %v2900_v50  ;;  %v3754_v33 = vmul.f32 %v3751_v0, %v6836_v12  ;;  %v3752_v14 = vmul.f32 %v3751_v0, %v6753_v45 }
 0x4b5   : > { %3622 = vrot.lane.b32.xlu0 %v3619_v2, %s5203_s26  ;;  %3620 = vrot.lane.b32.xlu1 %v3617_v21, %s5203_s26  ;;  %v3711_v2 = vmul.f32 %v3709_v5, %v6774_v7  ;;  %v3696_v21 = vrot.slane %v3690_v20, 2  ;;  %v3733_v20 = vmul.f32 %v3730_v10, %v6836_v12  ;;  %v2922_v5 = vadd.f32 %v6884_v32, %v2901_v18 }
 0x4b6   : > { %v2942_v32 = vadd.f32 %v6903_v42, %v2921_v15  ;;  %v3761_v50 = vrot.slane %v3754_v33, 2 }
 0x4b7   : > { %v6960_v13 = vpop.permute.xlu0 %3001  ;;  %v6962_v37 = vpop.permute.xlu1 %2999  ;;  %v3699_v60 = vsel %vm2727_vm10, %v3696_v21, %v3698_v9  ;;  %v3717_v58 = vrot.slane %v3711_v2, 2  ;;  %v3697_v53 = vsel %vm2727_vm10, %v3695_v6, %v3696_v21  ;;  %v2943_v35 = vadd.f32 %v6901_v4, %v2922_v5 }
 0x4b8   : > { %v3738_v2 = vrot.slane %v3732_v16, 2  ;;  %v3740_v21 = vrot.slane %v3733_v20, 2  ;;  %v2963_v42 = vadd.f32 %v6919_v30, %v2942_v32  ;;  %v3016_v6 = vrot.slane %v3009_v11, 4 }
 0x4b9   : > { %3643 = vrot.lane.b32.xlu0 %v3640_v36, %s7566_s11  ;;  %3641 = vrot.lane.b32.xlu1 %v3638_v28, %s7566_s11  ;;  %v3716_v36 = vrot.slane %v3710_v3, 2  ;;  %v3731_v28 = vmul.f32 %v3730_v10, %v6753_v45  ;;  %v3720_v55 = vsel %vm2727_vm10, %v3717_v58, %v3719_v56  ;;  %v2964_v4 = vadd.f32 %v6917_v51, %v2943_v35 }
 0x4ba   : > { %v3772_v3 = vstv %s6984_s5  ;;  %v3759_v10 = vrot.slane %v3753_v23, 2  ;;  %v2984_v18 = vadd.f32 %v6944_v41, %v2963_v42  ;;  %v3758_v51 = vrot.slane %v3752_v14, 2  ;;  %s7122_s5 = sld [smem:[#allocation7 + $0x14e]] }
 0x4bb   : > { %v6975_v8 = vpop.permute.xlu0 %3040  ;;  %v6977_v39 = vpop.permute.xlu1 %3038  ;;  %v3718_v26 = vsel %vm2727_vm10, %v3716_v36, %v3717_v58  ;;  %v3737_v27 = vrot.slane %v3731_v28, 2  ;;  %v3775_v0 = vmul.f32 %v3772_v3, %v6836_v12  ;;  %v3773_v56 = vmul.f32 %v3772_v3, %v6753_v45 }
 0x4bc   : > { %v3793_v36 = vstv %s7001_s6  ;;  %v3005_v41 = vadd.f32 %v6962_v37, %v2984_v18  ;;  %v3741_v16 = vsel %vm2727_vm10, %v3738_v2, %v3740_v21  ;;  %v3831_v37 = vstv %s7016_s17  ;;  %s7129_s6 = sld [smem:[#allocation7 + $0x14f]]  ;;  %s7147_s17 = sld [smem:[#allocation7 + $0x150]] }
 0x4bd   : > { %3664 = vrot.lane.b32.xlu0 %v3661_v61, %s7568_s7  ;;  %3662 = vrot.lane.b32.xlu1 %v3659_v54, %s7568_s7  ;;  %v3017_v61 = vrot.slane %v6987_v46, 4  ;;  %v3019_v54 = vrot.slane %v3011_v22, 4  ;;  %v3774_v46 = vmul.f32 %v3772_v3, %v6774_v7  ;;  %v3739_v20 = vsel %vm2727_vm10, %v3737_v27, %v3738_v2 }
 0x4be   : > { %v3782_v23 = vrot.slane %v3775_v0, 2  ;;  %v3779_v35 = vrot.slane %v3773_v56, 2  ;;  %v3796_v32 = vmul.f32 %v3793_v36, %v6836_v12  ;;  %v3834_v2 = vmul.f32 %v3831_v37, %v6836_v12 }
 0x4bf   : > { %v6995_v19 = vpop.permute.xlu0 %3061  ;;  %v6997_v63 = vpop.permute.xlu1 %3059  ;;  %v3020_v5 = vsel %vm3015_vm12, %v3017_v61, %v3019_v54  ;;  %v3018_v15 = vsel %vm3015_vm12, %v3016_v6, %v3017_v61  ;;  %v3780_v11 = vrot.slane %v3774_v46, 2  ;;  %v3152_v21 = vstv %s7032_s4  ;;  %s7158_s4 = sld [smem:[#allocation7 + $0x151]] }
 0x4c0   : > { %v3023_v14 = vadd.f32 %v3018_v15, %v3005_v41  ;;  %v3832_v42 = vmul.f32 %v3831_v37, %v6753_v45  ;;  %v3154_v46 = vmul.f32 %v3152_v21, %v6390_v29  ;;  %v3841_v0 = vrot.slane %v3834_v2, 3 }
 0x4c1   : > { %3702 = vrot.lane.b32.xlu0 %v3699_v60, %s5202_s9  ;;  %3700 = vrot.lane.b32.xlu1 %v3697_v53, %s5202_s9  ;;  %v2985_v60 = vadd.f32 %v6942_v38, %v2964_v4  ;;  %v3762_v53 = vsel %vm2727_vm10, %v3759_v10, %v3761_v50  ;;  %v3833_v4 = vmul.f32 %v3831_v37, %v6774_v7 }
 0x4c2   : > { %v3783_v61 = vsel %vm2727_vm10, %v3780_v11, %v3782_v23  ;;  %v3781_v54 = vsel %vm2727_vm10, %v3779_v35, %v3780_v11  ;;  %v3044_v18 = vadd.f32 %v6977_v39, %v3023_v14  ;;  %v3838_v41 = vrot.slane %v3832_v42, 3 }
 0x4c3   : > { %v7018_v9 = vpop.permute.xlu0 %3082  ;;  %v7020_v1 = vpop.permute.xlu1 %3080  ;;  %v3006_v38 = vadd.f32 %v6960_v13, %v2985_v60  ;;  %v3795_v13 = vmul.f32 %v3793_v36, %v6774_v7  ;;  %v3155_v37 = vmul.f32 %v3152_v21, %v6417_v17  ;;  %v3160_v11 = vrot.slane %v3154_v46, 5 }
 0x4c4   : > { %v3153_v23 = vmul.f32 %v3152_v21, %v6393_v34 }
 0x4c5   : > { %3723 = vrot.lane.b32.xlu0 %v3720_v55, %s5201_s8  ;;  %3721 = vrot.lane.b32.xlu1 %v3718_v26, %s5201_s8  ;;  %v3024_v33 = vadd.f32 %v3020_v5, %v3006_v38  ;;  %v3760_v55 = vsel %vm2727_vm10, %v3758_v51, %v3759_v10  ;;  %v3794_v26 = vmul.f32 %v3793_v36, %v6753_v45  ;;  %v3801_v6 = vrot.slane %v3795_v13, 2 }
 0x4c6   : > { %v3803_v10 = vrot.slane %v3796_v32, 2  ;;  %v3852_v51 = vstv %s7046_s20  ;;  %v3065_v36 = vadd.f32 %v6997_v63, %v3044_v18  ;;  %v3839_v38 = vrot.slane %v3833_v4, 3  ;;  %s7170_s20 = sld [smem:[#allocation7 + $0x152]] }
 0x4c7   : > { %v7034_v30 = vpop.permute.xlu0 %3103  ;;  %v7036_v58 = vpop.permute.xlu1 %3101  ;;  %v3045_v60 = vadd.f32 %v6975_v8, %v3024_v33  ;;  %v3800_v50 = vrot.slane %v3794_v26, 2  ;;  %v3855_v5 = vmul.f32 %v3852_v51, %v6836_v12  ;;  %v3853_v15 = vmul.f32 %v3852_v51, %v6753_v45 }
 0x4c8   : > { %v3804_v39 = vsel %vm2727_vm10, %v3801_v6, %v3803_v10  ;;  %v3873_v13 = vstv %s7062_s29  ;;  %v3842_v35 = vsel %vm2871_vm11, %v3839_v38, %v3841_v0  ;;  %v3840_v32 = vsel %vm2871_vm11, %v3838_v41, %v3839_v38  ;;  %s7182_s29 = sld [smem:[#allocation7 + $0x153]] }
 0x4c9   : > { %3744 = vrot.lane.b32.xlu0 %v3741_v16, %s7567_s23  ;;  %3742 = vrot.lane.b32.xlu1 %v3739_v20, %s7567_s23  ;;  %v3066_v56 = vadd.f32 %v6995_v19, %v3045_v60  ;;  %v3854_v20 = vmul.f32 %v3852_v51, %v6774_v7  ;;  %v3086_v19 = vadd.f32 %v7020_v1, %v3065_v36  ;;  %v3894_v33 = vstv %s7070_s30  ;;  %s7187_s30 = sld [smem:[#allocation7 + $0x131]] }
 0x4ca   : > { %v3802_v63 = vsel %vm2727_vm10, %v3800_v50, %v3801_v6  ;;  %v3862_v2 = vrot.slane %v3855_v5, 3  ;;  %v3859_v21 = vrot.slane %v3853_v15, 3  ;;  %v3875_v4 = vmul.f32 %v3873_v13, %v6774_v7 }
 0x4cb   : > { %v7055_v28 = vpop.permute.xlu0 %3124  ;;  %v7057_v22 = vpop.permute.xlu1 %3122  ;;  %v3107_v1 = vadd.f32 %v7036_v58, %v3086_v19  ;;  %v3860_v26 = vrot.slane %v3854_v20, 3  ;;  %v3874_v58 = vmul.f32 %v3873_v13, %v6753_v45  ;;  %v3159_v6 = vrot.slane %v3153_v23, 5 }
 0x4cc   : > { %v3896_v10 = vmul.f32 %v3894_v33, %v6774_v7  ;;  %v3897_v60 = vmul.f32 %v3894_v33, %v6836_v12  ;;  %v3915_v41 = vstv %s7094_s27  ;;  %v3936_v19 = vstv %s7105_s10  ;;  %s7191_s27 = sld [smem:[#allocation7 + $0x155]]  ;;  %s7199_s10 = sld [smem:[#allocation7 + $0x156]] }
 0x4cd   : > { %3765 = vrot.lane.b32.xlu0 %v3762_v53, %s5203_s26  ;;  %3763 = vrot.lane.b32.xlu1 %v3760_v55, %s5203_s26  ;;  %v3087_v53 = vadd.f32 %v7018_v9, %v3066_v56  ;;  %v3863_v46 = vsel %vm2871_vm11, %v3860_v26, %v3862_v2  ;;  %v3861_v0 = vsel %vm2871_vm11, %v3859_v21, %v3860_v26  ;;  %v3881_v56 = vrot.slane %v3875_v4, 3 }
 0x4ce   : > { %v3880_v38 = vrot.slane %v3874_v58, 3  ;;  %v3904_v20 = vrot.slane %v3897_v60, 3  ;;  %v3918_v23 = vmul.f32 %v3915_v41, %v6836_v12  ;;  %v3939_v58 = vmul.f32 %v3936_v19, %v6836_v12 }
 0x4cf   : > { %v3146_v27 = vpop.permute.xlu0 %3145  ;;  %v3144_v3 = vpop.permute.xlu1 %3143  ;;  %v3108_v9 = vadd.f32 %v7034_v30, %v3087_v53  ;;  %v3876_v30 = vmul.f32 %v3873_v13, %v6836_v12 }
 0x4d1   : > { %3786 = vrot.lane.b32.xlu0 %v3783_v61, %s7566_s11  ;;  %3784 = vrot.lane.b32.xlu1 %v3781_v54, %s7566_s11  ;;  %v3129_v42 = vadd.f32 %v7055_v28, %v3108_v9  ;;  %v3128_v61 = vadd.f32 %v7057_v22, %v3107_v1  ;;  %v3162_v54 = vrot.slane %v3155_v37, 5  ;;  %v3895_v22 = vmul.f32 %v3894_v33, %v6753_v45 }
 0x4d2   : > { %v3883_v36 = vrot.slane %v3876_v30, 3  ;;  %v3917_v37 = vmul.f32 %v3915_v41, %v6774_v7  ;;  %v3916_v9 = vmul.f32 %v3915_v41, %v6753_v45  ;;  %v3295_v1 = vstv %s7116_s28  ;;  %s7215_s28 = sld [smem:[#allocation7 + $0x157]] }
 0x4d3   : > { %v7082_v16 = vpop.permute.xlu0 %3183  ;;  %v7084_v8 = vpop.permute.xlu1 %3181  ;;  %v3150_v28 = vadd.f32 %v3146_v27, %v3129_v42  ;;  %v3149_v18 = vadd.f32 %v3144_v3, %v3128_v61  ;;  %v3161_v27 = vsel %vm311_vm4, %v3159_v6, %v3160_v11  ;;  %v3902_v3 = vrot.slane %v3896_v10, 3 }
 0x4d4   : > { %v3901_v53 = vrot.slane %v3895_v22, 3  ;;  %v3923_v61 = vrot.slane %v3917_v37, 3  ;;  %v3925_v30 = vrot.slane %v3918_v23, 3  ;;  %v3922_v60 = vrot.slane %v3916_v9, 3 }
 0x4d5   : > { %3807 = vrot.lane.b32.xlu0 %v3804_v39, %s7568_s7  ;;  %3805 = vrot.lane.b32.xlu1 %v3802_v63, %s7568_s7  ;;  %v3163_v39 = vsel %vm311_vm4, %v3160_v11, %v3162_v54  ;;  %v3166_v15 = vadd.f32 %v3161_v27, %v3149_v18  ;;  %v3884_v11 = vsel %vm2871_vm11, %v3881_v56, %v3883_v36 }
 0x4d6   : > { %v3167_v5 = vadd.f32 %v3163_v39, %v3150_v28  ;;  %v3905_v2 = vsel %vm2871_vm11, %v3902_v3, %v3904_v20  ;;  %v3903_v21 = vsel %vm2871_vm11, %v3901_v53, %v3902_v3  ;;  %v3937_v54 = vmul.f32 %v3936_v19, %v6753_v45 }
 0x4d7   : > { %v3205_v14 = vpop.permute.xlu0 %3204  ;;  %v3203_v55 = vpop.permute.xlu1 %3202  ;;  %v3187_v26 = vadd.f32 %v7084_v8, %v3166_v15  ;;  %v3974_v28 = vstv %s7122_s5  ;;  %v3298_v8 = vmul.f32 %v3295_v1, %v6417_v17  ;;  %v3296_v18 = vmul.f32 %v3295_v1, %v6393_v34  ;;  %s7227_s5 = sld [smem:[#allocation7 + $0x158]] }
 0x4d8   : > { %v3188_v33 = vadd.f32 %v7082_v16, %v3167_v5  ;;  %v3297_v16 = vmul.f32 %v3295_v1, %v6390_v29  ;;  %v3943_v41 = vrot.slane %v3937_v54, 3  ;;  %v3976_v39 = vmul.f32 %v3974_v28, %v6774_v7 }
 0x4d9   : > { %3845 = vrot.lane.b32.xlu0 %v3842_v35, %s5202_s9  ;;  %3843 = vrot.lane.b32.xlu1 %v3840_v32, %s5202_s9  ;;  %v3882_v35 = vsel %vm2871_vm11, %v3880_v38, %v3881_v56  ;;  %v3938_v32 = vmul.f32 %v3936_v19, %v6774_v7  ;;  %v3208_v10 = vadd.f32 %v3203_v55, %v3187_v26  ;;  %v3995_v55 = vstv %s7129_s6  ;;  %s7240_s6 = sld [smem:[#allocation7 + $0x159]] }
 0x4da   : > { %v3209_v6 = vadd.f32 %v3205_v14, %v3188_v33  ;;  %v3977_v14 = vmul.f32 %v3974_v28, %v6836_v12  ;;  %v3946_v38 = vrot.slane %v3939_v58, 3  ;;  %v3975_v27 = vmul.f32 %v3974_v28, %v6753_v45 }
 0x4db   : > { %v3226_v50 = vpop.permute.xlu0 %3225  ;;  %v3224_v51 = vpop.permute.xlu1 %3223  ;;  %v3944_v22 = vrot.slane %v3938_v32, 3  ;;  %v3926_v34 = vsel %vm2871_vm11, %v3923_v61, %v3925_v30  ;;  %v3305_v3 = vrot.slane %v3298_v8, 6  ;;  %v3302_v20 = vrot.slane %v3296_v18, 6 }
 0x4dc   : > { %v3997_v5 = vmul.f32 %v3995_v55, %v6774_v7  ;;  %v3984_v19 = vrot.slane %v3977_v14, 4  ;;  %v3981_v9 = vrot.slane %v3975_v27, 4  ;;  %v3996_v33 = vmul.f32 %v3995_v55, %v6753_v45 }
 0x4dd   : > { %3866 = vrot.lane.b32.xlu0 %v3863_v46, %s5201_s8  ;;  %3864 = vrot.lane.b32.xlu1 %v3861_v0, %s5201_s8  ;;  %v3230_v46 = vadd.f32 %v3226_v50, %v3209_v6  ;;  %v3229_v0 = vadd.f32 %v3224_v51, %v3208_v10  ;;  %v3924_v50 = vsel %vm2871_vm11, %v3922_v60, %v3923_v61  ;;  %v3303_v51 = vrot.slane %v3297_v16, 6 }
 0x4de   : > { %v3947_v23 = vsel %vm2871_vm11, %v3944_v22, %v3946_v38  ;;  %v4016_v26 = vstv %s7147_s17  ;;  %v4037_v60 = vstv %s7158_s4  ;;  %v4002_v18 = vrot.slane %v3996_v33, 4  ;;  %s7251_s17 = sld [smem:[#allocation7 + $0x15a]]  ;;  %s7265_s4 = sld [smem:[#allocation7 + $0x15c]] }
 0x4df   : > { %v3247_v63 = vpop.permute.xlu0 %3246  ;;  %v3245_v13 = vpop.permute.xlu1 %3244  ;;  %v4018_v54 = vmul.f32 %v4016_v26, %v6774_v7  ;;  %v4019_v6 = vmul.f32 %v4016_v26, %v6836_v12  ;;  %v4017_v10 = vmul.f32 %v4016_v26, %v6753_v45 }
 0x4e0   : > { %v3251_v29 = vadd.f32 %v3247_v63, %v3230_v46  ;;  %v3250_v17 = vadd.f32 %v3245_v13, %v3229_v0  ;;  %v3998_v63 = vmul.f32 %v3995_v55, %v6836_v12  ;;  %v4039_v0 = vmul.f32 %v4037_v60, %v6774_v7 }
 0x4e1   : > { %3887 = vrot.lane.b32.xlu0 %v3884_v11, %s7567_s23  ;;  %3885 = vrot.lane.b32.xlu1 %v3882_v35, %s7567_s23  ;;  %v3945_v11 = vsel %vm2871_vm11, %v3943_v41, %v3944_v22  ;;  %v3982_v35 = vrot.slane %v3976_v39, 4  ;;  %v4040_v22 = vmul.f32 %v4037_v60, %v6836_v12  ;;  %v4023_v38 = vrot.slane %v4017_v10, 4 }
 0x4e2   : > { %v4005_v61 = vrot.slane %v3998_v63, 4  ;;  %v4038_v41 = vmul.f32 %v4037_v60, %v6753_v45 }
 0x4e3   : > { %v3268_v4 = vpop.permute.xlu0 %3267  ;;  %v3266_v42 = vpop.permute.xlu1 %3265  ;;  %v3983_v8 = vsel %vm3015_vm12, %v3981_v9, %v3982_v35 }
 0x4e4   : > { %v3272_v15 = vadd.f32 %v3268_v4, %v3251_v29  ;;  %v3271_v53 = vadd.f32 %v3266_v42, %v3250_v17  ;;  %v3985_v4 = vsel %vm3015_vm12, %v3982_v35, %v3984_v19  ;;  %v4003_v42 = vrot.slane %v3997_v5, 4 }
 0x4e5   : > { %3908 = vrot.lane.b32.xlu0 %v3905_v2, %s5203_s26  ;;  %3906 = vrot.lane.b32.xlu1 %v3903_v21, %s5203_s26  ;;  %v3306_v2 = vsel %vm739_vm8, %v3303_v51, %v3305_v3  ;;  %v3304_v21 = vsel %vm739_vm8, %v3302_v20, %v3303_v51  ;;  %v4058_v17 = vstv %s7170_s20  ;;  %v4045_v3 = vrot.slane %v4039_v0, 4  ;;  %s4942_s20 = sld [smem:[#allocation7 + $0x15d]] }
 0x4e6   : > { %v4006_v46 = vsel %vm3015_vm12, %v4003_v42, %v4005_v61  ;;  %v4004_v29 = vsel %vm3015_vm12, %v4002_v18, %v4003_v42  ;;  %v4061_v20 = vmul.f32 %v4058_v17, %v6836_v12  ;;  %v4044_v63 = vrot.slane %v4038_v41, 4 }
 0x4e7   : > { %v3289_v56 = vpop.permute.xlu0 %3288  ;;  %v3287_v36 = vpop.permute.xlu1 %3286  ;;  %v4079_v35 = vstv %s7182_s29  ;;  %s4943_s29 = sld [smem:[#allocation7 + $0x15e]] }
 0x4e8   : > { %v3293_v1 = vadd.f32 %v3289_v56, %v3272_v15  ;;  %v3292_v32 = vadd.f32 %v3287_v36, %v3271_v53  ;;  %v4024_v56 = vrot.slane %v4018_v54, 4  ;;  %v4026_v36 = vrot.slane %v4019_v6, 4 }
 0x4e9   : > { %3929 = vrot.lane.b32.xlu0 %v3926_v34, %s7566_s11  ;;  %3927 = vrot.lane.b32.xlu1 %v3924_v50, %s7566_s11  ;;  %v4047_v34 = vrot.slane %v4040_v22, 4  ;;  %v4068_v26 = vrot.slane %v4061_v20, 4  ;;  %v4046_v42 = vsel %vm3015_vm12, %v4044_v63, %v4045_v3  ;;  %v4081_v61 = vmul.f32 %v4079_v35, %v6774_v7 }
 0x4ea   : > { %v3310_v28 = vadd.f32 %v3306_v2, %v3293_v1  ;;  %v3309_v16 = vadd.f32 %v3304_v21, %v3292_v32  ;;  %v4027_v53 = vsel %vm3015_vm12, %v4024_v56, %v4026_v36  ;;  %v4025_v19 = vsel %vm3015_vm12, %v4023_v38, %v4024_v56 }
 0x4eb   : > { %v3327_v13 = vpop.permute.xlu0 %3326  ;;  %v3325_v37 = vpop.permute.xlu1 %3324  ;;  %v4048_v9 = vsel %vm3015_vm12, %v4045_v3, %v4047_v34  ;;  %v3438_v1 = vstv %s7187_s30  ;;  %v4117_v2 = vstv %s7191_s27  ;;  %s4944_s30 = sld [smem:[#allocation7 + $0x15f]]  ;;  %s4945_s27 = sld [smem:[#allocation7 + $0x160]] }
 0x4ec   : > { %v3331_v39 = vadd.f32 %v3327_v13, %v3310_v28  ;;  %v3330_v27 = vadd.f32 %v3325_v37, %v3309_v16  ;;  %v4060_v13 = vmul.f32 %v4058_v17, %v6774_v7  ;;  %v2344_v28 = vadd.f32 %v6372_v31, %v6409_v44 }
 0x4ed   : > { %3950 = vrot.lane.b32.xlu0 %v3947_v23, %s7568_s7  ;;  %3948 = vrot.lane.b32.xlu1 %v3945_v11, %s7568_s7  ;;  %v4059_v11 = vmul.f32 %v4058_v17, %v6753_v45  ;;  %v3440_v16 = vmul.f32 %v3438_v1, %v6774_v7  ;;  %v4120_v22 = vmul.f32 %v4117_v2, %v6836_v12 }
 0x4ee   : > { %v4066_v10 = vrot.slane %v4060_v13, 4  ;;  %v4119_v31 = vmul.f32 %v4117_v2, %v6774_v7 }
 0x4ef   : > { %v3348_v30 = vpop.permute.xlu0 %3347  ;;  %v3346_v58 = vpop.permute.xlu1 %3345  ;;  %v4065_v60 = vrot.slane %v4059_v11, 4 }
 0x4f0   : > { %v3352_v50 = vadd.f32 %v3348_v30, %v3331_v39  ;;  %v3351_v51 = vadd.f32 %v3346_v58, %v3330_v27  ;;  %v4082_v30 = vmul.f32 %v4079_v35, %v6836_v12  ;;  %v4080_v58 = vmul.f32 %v4079_v35, %v6753_v45 }
 0x4f1   : > { %3988 = vrot.lane.b32.xlu0 %v3985_v4, %s5202_s9  ;;  %3986 = vrot.lane.b32.xlu1 %v3983_v8, %s5202_s9  ;;  %v3439_v8 = vmul.f32 %v3438_v1, %v6753_v45  ;;  %v4069_v18 = vsel %vm3015_vm12, %v4066_v10, %v4068_v26  ;;  %v4067_v41 = vsel %vm3015_vm12, %v4065_v60, %v4066_v10 }
 0x4f2   : > { %v4089_v56 = vrot.slane %v4082_v30, 4  ;;  %v4086_v36 = vrot.slane %v4080_v58, 4  ;;  %v4118_v39 = vmul.f32 %v4117_v2, %v6753_v45  ;;  %v2357_v27 = vadd.f32 %v6370_v24, %v2344_v28 }
 0x4f3   : > { %v3369_v14 = vpop.permute.xlu0 %3368  ;;  %v3367_v55 = vpop.permute.xlu1 %3366 }
 0x4f4   : > { %v3373_v37 = vadd.f32 %v3369_v14, %v3352_v50  ;;  %v3372_v23 = vadd.f32 %v3367_v55, %v3351_v51  ;;  %v4087_v55 = vrot.slane %v4081_v61, 4  ;;  %v4127_v50 = vrot.slane %v4120_v22, 5 }
 0x4f5   : > { %4009 = vrot.lane.b32.xlu0 %v4006_v46, %s5201_s8  ;;  %4007 = vrot.lane.b32.xlu1 %v4004_v29, %s5201_s8  ;;  %v4138_v46 = vstv %s7199_s10  ;;  %v4124_v13 = vrot.slane %v4118_v39, 5  ;;  %s4946_s10 = sld [smem:[#allocation7 + $0x161]] }
 0x4f6   : > { %v4140_v29 = vmul.f32 %v4138_v46, %v6774_v7  ;;  %v4141_v51 = vmul.f32 %v4138_v46, %v6836_v12  ;;  %v4139_v24 = vmul.f32 %v4138_v46, %v6753_v45 }
 0x4f7   : > { %v3390_v5 = vpop.permute.xlu0 %3389  ;;  %v3388_v15 = vpop.permute.xlu1 %3387 }
 0x4f8   : > { %v3394_v32 = vadd.f32 %v3390_v5, %v3373_v37  ;;  %v3393_v33 = vadd.f32 %v3388_v15, %v3372_v23  ;;  %v4090_v5 = vsel %vm3015_vm12, %v4087_v55, %v4089_v56  ;;  %v4088_v15 = vsel %vm3015_vm12, %v4086_v36, %v4087_v55 }
 0x4f9   : > { %4030 = vrot.lane.b32.xlu0 %v4027_v53, %s7567_s23  ;;  %4028 = vrot.lane.b32.xlu1 %v4025_v19, %s7567_s23  ;;  %v4125_v53 = vrot.slane %v4119_v31, 5  ;;  %v4159_v37 = vstv %s7215_s28  ;;  %v2370_v23 = vadd.f32 %v6378_v62, %v2357_v27  ;;  %v4146_v35 = vrot.slane %v4140_v29, 5  ;;  %s4955_s28 = sshll.u32 %s5252_s16, 10 }
 0x4fa   : > { %v4161_v26 = vmul.f32 %v4159_v37, %v6774_v7  ;;  %v4162_v2 = vmul.f32 %v4159_v37, %v6836_v12  ;;  %v4160_v61 = vmul.f32 %v4159_v37, %v6753_v45  ;;  %v4260_v37 = vstv %s7265_s4 }
 0x4fb   : > { %v3411_v21 = vpop.permute.xlu0 %3410  ;;  %v3409_v4 = vpop.permute.xlu1 %3408  ;;  %v4128_v11 = vsel %vm311_vm4, %v4125_v53, %v4127_v50  ;;  %v4126_v62 = vsel %vm311_vm4, %v4124_v13, %v4125_v53  ;;  %v2383_v30 = vadd.f32 %v6376_v40, %v2370_v23 }
 0x4fc   : > { %v3415_v54 = vadd.f32 %v3411_v21, %v3394_v32  ;;  %v3414_v6 = vadd.f32 %v3409_v4, %v3393_v33  ;;  %v4145_v33 = vrot.slane %v4139_v24, 5  ;;  %v4180_v21 = vstv %s7227_s5  ;;  %s7571_s5 = sshll.u32 %s5372_s19, 6 }
 0x4fd   : > { %4051 = vrot.lane.b32.xlu0 %v4048_v9, %s5203_s26  ;;  %4049 = vrot.lane.b32.xlu1 %v4046_v42, %s5203_s26  ;;  %v4148_v9 = vrot.slane %v4141_v51, 5  ;;  %v4182_v58 = vmul.f32 %v4180_v21, %v6774_v7  ;;  %v4166_v46 = vrot.slane %v4160_v61, 5 }
 0x4ff   : > { %v3432_v0 = vpop.permute.xlu0 %3431  ;;  %v3430_v14 = vpop.permute.xlu1 %3429  ;;  %v4149_v28 = vsel %vm311_vm4, %v4146_v35, %v4148_v9  ;;  %v4188_v55 = vrot.slane %v4182_v58, 5 }
 0x500   : > { %v3436_v44 = vadd.f32 %v3432_v0, %v3415_v54  ;;  %v3435_v38 = vadd.f32 %v3430_v14, %v3414_v6  ;;  %v4183_v54 = vmul.f32 %v4180_v21, %v6836_v12  ;;  %v4181_v6 = vmul.f32 %v4180_v21, %v6753_v45 }
 0x501   : > { %4072 = vrot.lane.b32.xlu0 %v4069_v18, %s7566_s11  ;;  %4070 = vrot.lane.b32.xlu1 %v4067_v41, %s7566_s11  ;;  %v4169_v18 = vrot.slane %v4162_v2, 5  ;;  %v4201_v0 = vstv %s7240_s6  ;;  %v2396_v14 = vadd.f32 %v6382_v25, %v2383_v30  ;;  %v4262_v2 = vmul.f32 %v4260_v37, %v6774_v7  ;;  %s7458_s6 = scalar_lea.vmem [#allocation9], %s7571_s5 }
 0x502   : > { %v3442_v17 = vadd.f32 %v3440_v16, %v3436_v44  ;;  %v3441_v34 = vadd.f32 %v3439_v8, %v3435_v38  ;;  %v4147_v16 = vsel %vm311_vm4, %v4145_v33, %v4146_v35  ;;  %v4167_v8 = vrot.slane %v4161_v26, 5 }
 0x503   : > { %v3452_v3 = vpop.permute.xlu0 %3451  ;;  %v3450_v20 = vpop.permute.xlu1 %3449  ;;  %v4190_v56 = vrot.slane %v4183_v54, 5  ;;  %v4187_v36 = vrot.slane %v4181_v6, 5  ;;  %v4203_v41 = vmul.f32 %v4201_v0, %v6774_v7  ;;  %v4204_v39 = vmul.f32 %v4201_v0, %v6836_v12 }
 0x504   : > { %v3456_v19 = vadd.f32 %v3452_v3, %v3442_v17  ;;  %v3455_v63 = vadd.f32 %v3450_v20, %v3441_v34  ;;  %v4170_v38 = vsel %vm311_vm4, %v4167_v8, %v4169_v18  ;;  %v4202_v25 = vmul.f32 %v4201_v0, %v6753_v45 }
 0x505   : > { %4093 = vrot.lane.b32.xlu0 %v4090_v5, %s7568_s7  ;;  %4091 = vrot.lane.b32.xlu1 %v4088_v15, %s7568_s7  ;;  %v4168_v17 = vsel %vm311_vm4, %v4166_v46, %v4167_v8  ;;  %v4222_v34 = vstv %s7251_s17  ;;  %v2409_v50 = vadd.f32 %v6380_v57, %v2396_v14  ;;  %v4209_v5 = vrot.slane %v4203_v41, 5  ;;  %s4540_s17 = sshll.u32 %s7458_s6, 4  ;;  %s7479_s17 = int_to_ptr.vmem [resolvable:$true] %s4540_s17 }
 0x506   : > { %v4225_v51 = vmul.f32 %v4222_v34, %v6836_v12  ;;  %v4211_v15 = vrot.slane %v4204_v39, 5  ;;  %v4208_v53 = vrot.slane %v4202_v25, 5  ;;  %v4224_v24 = vmul.f32 %v4222_v34, %v6774_v7 }
 0x507   : > { %v3466_v1 = vpop.permute.xlu0 %3465  ;;  %v3464_v32 = vpop.permute.xlu1 %3463  ;;  %v4189_v57 = vsel %vm311_vm4, %v4187_v36, %v4188_v55  ;;  %v4847_v13 = vmul.f32 -1.442695, %v2409_v50  ;;  %v4281_v33 = vstv %s4942_s20  ;;  %v4263_v21 = vmul.f32 %v4260_v37, %v6836_v12  ;;  %s7477_s20 = scalar_lea.hbm %s7537_s3, %s4955_s28 }
 0x508   : > { %v3470_v4 = vadd.f32 %v3466_v1, %v3456_v19  ;;  %v3469_v42 = vadd.f32 %v3464_v32, %v3455_v63  ;;  %v4191_v19 = vsel %vm311_vm4, %v4188_v55, %v4190_v56  ;;  %v4223_v63 = vmul.f32 %v4222_v34, %v6753_v45 }
 0x509   : > { %4131 = vrot.lane.b32.xlu0 %v4128_v11, %s5202_s9  ;;  %4129 = vrot.lane.b32.xlu1 %v4126_v62, %s5202_s9  ;;  %v4232_v23 = vrot.slane %v4225_v51, 5  ;;  %v4212_v9 = vsel %vm311_vm4, %v4209_v5, %v4211_v15  ;;  %v4210_v1 = vsel %vm311_vm4, %v4208_v53, %v4209_v5  ;;  %v4230_v32 = vrot.slane %v4224_v24, 5 }
 0x50a   : > { %v4229_v26 = vrot.slane %v4223_v63, 5  ;;  %5036 = vpow2.f32 %v4847_v13  ;;  %v4283_v30 = vmul.f32 %v4281_v33, %v6774_v7  ;;  %v4284_v58 = vmul.f32 %v4281_v33, %v6836_v12 }
 0x50b   : > { %v3480_v10 = vpop.permute.xlu0 %3479  ;;  %v3478_v60 = vpop.permute.xlu1 %3477  ;;  %v4282_v54 = vmul.f32 %v4281_v33, %v6753_v45  ;;  %v4302_v6 = vstv %s4943_s29  ;;  %v4344_v53 = vstv %s4945_s27  ;;  %s4527_s29 = scalar_lea.sflag [#allocation4], %s5372_s19  ;;  %s5208_s27 = smov [#allocation9]  }
 0x50c   : > { %v3484_v22 = vadd.f32 %v3480_v10, %v3470_v4  ;;  %v3483_v40 = vadd.f32 %v3478_v60, %v3469_v42  ;;  %v4261_v4 = vmul.f32 %v4260_v37, %v6753_v45  ;;  %v4233_v42 = vsel %vm311_vm4, %v4230_v32, %v4232_v23 }
 0x50d   : > { %4152 = vrot.lane.b32.xlu0 %v4149_v28, %s5201_s8  ;;  %4150 = vrot.lane.b32.xlu1 %v4147_v16, %s5201_s8  ;;  %v4231_v10 = vsel %vm311_vm4, %v4229_v26, %v4230_v32  ;;  %v4268_v60 = vrot.slane %v4262_v2, 6  ;;  %v4270_v28 = vrot.slane %v4263_v21, 6  ;;  %v4304_v8 = vmul.f32 %v4302_v6, %v6774_v7 }
 0x50e   : > { %v4267_v16 = vrot.slane %v4261_v4, 6  ;;  %v4305_v18 = vmul.f32 %v4302_v6, %v6836_v12  ;;  %v4289_v46 = vrot.slane %v4283_v30, 6  ;;  %v4291_v0 = vrot.slane %v4284_v58, 6 }
 0x50f   : > { %v3494_v31 = vpop.permute.xlu0 %3493  ;;  %v3492_v44 = vpop.permute.xlu1 %3491  ;;  %v4303_v14 = vmul.f32 %v4302_v6, %v6753_v45  ;;  %v4271_v55 = vsel %vm739_vm8, %v4268_v60, %v4270_v28  ;;  %v4288_v36 = vrot.slane %v4282_v54, 6  ;;  %v4347_v32 = vmul.f32 %v4344_v53, %v6836_v12 }
 0x510   : > { %v7271_v27 = vadd.f32 %v3494_v31, %v3484_v22  ;;  %v7273_v29 = vadd.f32 %v3492_v44, %v3483_v40  ;;  %v4269_v56 = vsel %vm739_vm8, %v4267_v16, %v4268_v60  ;;  %v4323_v31 = vstv %s4944_s30  ;;  %s5118_s30 = scalar_lea.vmem %s7479_s17, 1024 }
 0x511   : > { %4173 = vrot.lane.b32.xlu0 %v4170_v38, %s7567_s23  ;;  %4171 = vrot.lane.b32.xlu1 %v4168_v17, %s7567_s23  ;;  %v4310_v44 = vrot.slane %v4304_v8, 6  ;;  %v4312_v38 = vrot.slane %v4305_v18, 6  ;;  %v4309_v17 = vrot.slane %v4303_v14, 6  ;;  %v4325_v34 = vmul.f32 %v4323_v31, %v6774_v7  ;;  %p5119_p5 = scmp.ne.s32.totalorder %s7479_s17, %s5118_s30 }
 0x512   : > { %v4326_v50 = vmul.f32 %v4323_v31, %v6836_v12  ;;  %v4324_v51 = vmul.f32 %v4323_v31, %v6753_v45  ;;  %v4292_v5 = vsel %vm739_vm8, %v4289_v46, %v4291_v0  ;;  %v4290_v15 = vsel %vm739_vm8, %v4288_v36, %v4289_v46 }
 0x513   : > { %v7281_v3 = vpop.permute.xlu0 %3507  ;;  %v7283_v20 = vpop.permute.xlu1 %3505  ;;  %v4311_v13 = vsel %vm739_vm8, %v4309_v17, %v4310_v44  ;;  %v4331_v37 = vrot.slane %v4325_v34, 6  ;;  %v4345_v33 = vmul.f32 %v4344_v53, %v6753_v45  ;;  %v4365_v26 = vstv %s4946_s10  ;;  %p5120_p8 = pnand %p5119_p5, %p7572_p0  ;;  %s5122_s10 = sshll.u32 %s5208_s27, 4  ;;  %s5123_s10 = int_to_ptr.vmem [resolvable:$false] %s5122_s10 }
 0x514   : > { %v5037_v41 = vpop.eup %5036  ;;  %v4333_v23 = vrot.slane %v4326_v50, 6  ;;  %v4367_v30 = vmul.f32 %v4365_v26, %v6774_v7  ;;  %v4368_v58 = vmul.f32 %v4365_v26, %v6836_v12  ;;  %v4354_v6 = vrot.slane %v4347_v32, 6  ;;  %p5125_p6 = scmp.lt.s32.totalorder %s7479_s17, %s5123_s10 }
 0x515   : > { %4194 = vrot.lane.b32.xlu0 %v4191_v19, %s5203_s26  ;;  %4192 = vrot.lane.b32.xlu1 %v4189_v57, %s5203_s26  ;;  %v2413_v24 = vadd.f32 1.0, %v5037_v41  ;;  %v4313_v19 = vsel %vm739_vm8, %v4310_v44, %v4312_v38  ;;  %v4366_v60 = vmul.f32 %v4365_v26, %v6753_v45  ;;  %v7375_v41 = vsub.s32 0, %v5940_v59  ;;  %p5121_p10 = pneg %p5120_p8 }
 0x516   : > { %v4334_v4 = vsel %vm739_vm8, %v4331_v37, %v4333_v23  ;;  %v4373_v8 = vrot.slane %v4367_v30, 6  ;;  %v4375_v0 = vrot.slane %v4368_v58, 6  ;;  %v4485_v30 = vsub.s32 3, %v5940_v59 }
 0x517   : > { %v7292_v11 = vpop.permute.xlu0 %3521  ;;  %v7294_v35 = vpop.permute.xlu1 %3519  ;;  %5038 = vrcp.f32 %v2413_v24  ;;  %v4372_v14 = vrot.slane %v4366_v60, 6  ;;  %v3512_v24 = vadd.f32 %v7281_v3, %v7271_v27 }
 0x518   : > { %v4376_v44 = vsel %vm739_vm8, %v4373_v8, %v4375_v0 }
 0x519   : > { %4215 = vrot.lane.b32.xlu0 %v4212_v9, %s7566_s11  ;;  %4213 = vrot.lane.b32.xlu1 %v4210_v1, %s7566_s11  ;;  %v4330_v9 = vrot.slane %v4324_v51, 6  ;;  %v4346_v1 = vmul.f32 %v4344_v53, %v6774_v7  ;;  %v4374_v38 = vsel %vm739_vm8, %v4372_v14, %v4373_v8  ;;  %v4463_v53 = vsub.s32 1, %v5940_v59 }
 0x51a   : > { %v3526_v26 = vadd.f32 %v7292_v11, %v3512_v24 }
 0x51b   : > { %v7304_v62 = vpop.permute.xlu0 %3559  ;;  %v7306_v61 = vpop.permute.xlu1 %3557  ;;  %v4352_v54 = vrot.slane %v4346_v1, 6 }
 0x51d   : > { %4236 = vrot.lane.b32.xlu0 %v4233_v42, %s7568_s7  ;;  %4234 = vrot.lane.b32.xlu1 %v4231_v10, %s7568_s7  ;;  %v4332_v42 = vsel %vm739_vm8, %v4330_v9, %v4331_v37  ;;  %v4351_v10 = vrot.slane %v4345_v33, 6  ;;  %v4355_v18 = vsel %vm739_vm8, %v4352_v54, %v4354_v6  ;;  %v4474_v33 = vsub.s32 2, %v5940_v59 }
 0x51f   : > { %v7316_v22 = vpop.permute.xlu0 %3580  ;;  %v7318_v40 = vpop.permute.xlu1 %3578  ;;  %v4353_v46 = vsel %vm739_vm8, %v4351_v10, %v4352_v54 }
 0x521   : > { %4274 = vrot.lane.b32.xlu0 %v4271_v55, %s5202_s9  ;;  %4272 = vrot.lane.b32.xlu1 %v4269_v56, %s5202_s9  ;;  %v5039_v31 = vpop.eup %5038  ;;  %s4912_s9 = sld [smem:[#allocation7 + $0x13f]] }
 0x522   : > { %v4464_v32 = vrot.slane %v5039_v31, %v4463_v53  ;;  %v4486_v10 = vrot.slane %v5039_v31, %v4485_v30 }
 0x523   : > { %v7325_v39 = vpop.permute.xlu0 %3601  ;;  %v7327_v25 = vpop.permute.xlu1 %3599 }
 0x525   : > { %4295 = vrot.lane.b32.xlu0 %v4292_v5, %s5201_s8  ;;  %4293 = vrot.lane.b32.xlu1 %v4290_v15, %s5201_s8  ;;  %s4905_s8 = sld [smem:[#allocation7 + $0x138]]  ;;  %v4453_v15 = vrot.slane %v5039_v31, %v7375_v41 }
 0x527   : > { %v7337_v57 = vpop.permute.xlu0 %3622  ;;  %v7339_v63 = vpop.permute.xlu1 %3620 }
 0x529   : > { %4316 = vrot.lane.b32.xlu0 %v4313_v19, %s7567_s23  ;;  %4314 = vrot.lane.b32.xlu1 %v4311_v13, %s7567_s23  ;;  %v3511_v19 = vadd.f32 %v7283_v20, %v7273_v29  ;;  %s4933_s23 = sld [smem:[#allocation7 + $0x154]] }
 0x52b   : > { %v7347_v2 = vpop.permute.xlu0 %3643  ;;  %v7349_v21 = vpop.permute.xlu1 %3641  ;;  %v3528_v55 = vstv %s4905_s8  ;;  %s5124_s8 = scalar_lea.vmem %s5123_s10, 2048 }
 0x52c   : > { %v3530_v17 = vmul.f32 %v3528_v55, %v6774_v7  ;;  %v3531_v34 = vmul.f32 %v3528_v55, %v6836_v12  ;;  %v3529_v50 = vmul.f32 %v3528_v55, %v6753_v45  ;;  %p5126_p12 = scmp.lt.s32.totalorder %s5124_s8, %s5118_s30 }
 0x52d   : > { %4337 = vrot.lane.b32.xlu0 %v4334_v4, %s5203_s26  ;;  %4335 = vrot.lane.b32.xlu1 %v4332_v42, %s5203_s26  ;;  %v3525_v4 = vadd.f32 %v7294_v35, %v3511_v19  ;;  %v4475_v42 = vrot.slane %v5039_v31, %v4474_v33  ;;  %s4919_s26 = sld [smem:[#allocation7 + $0x146]] }
 0x52e   : > { %v3536_v13 = vrot.slane %v3530_v17, 1  ;;  %v3538_v37 = vrot.slane %v3531_v34, 1  ;;  %v3535_v23 = vrot.slane %v3529_v50, 1  ;;  %p5127_p7 = por %p5126_p12, %p5125_p6 }
 0x52f   : > { %v7358_v28 = vpop.permute.xlu0 %3664  ;;  %v7360_v16 = vpop.permute.xlu1 %3662 }
 0x530   : > { %v3539_v27 = vsel %vm313_vm5, %v3536_v13, %v3538_v37  ;;  %v3537_v29 = vsel %vm313_vm5, %v3535_v23, %v3536_v13  ;;  %p5128_p9 = pnand %p5127_p7, %p5121_p10 }
 0x531   : > { %4358 = vrot.lane.b32.xlu0 %v4355_v18, %s7566_s11  ;;  %4356 = vrot.lane.b32.xlu1 %v4353_v46, %s7566_s11  ;;  %v3543_v58 = vadd.f32 %v3539_v27, %v3526_v26  ;;  %v3542_v54 = vadd.f32 %v3537_v29, %v3525_v4  ;;  %v3671_v46 = vstv %s4912_s9  ;;  %s4926_s11 = sld [smem:[#allocation7 + $0x14d]] }
 0x532   : > { %v3674_v31 = vmul.f32 %v3671_v46, %v6836_v12 }
 0x533   : > { %v7366_v56 = vpop.permute.xlu0 %3702  ;;  %v7368_v36 = vpop.permute.xlu1 %3700  ;;  %v3564_v35 = vadd.f32 %v7304_v62, %v3543_v58  ;;  %v3563_v60 = vadd.f32 %v7306_v61, %v3542_v54  ;;  %v3672_v62 = vmul.f32 %v3671_v46, %v6753_v45  ;;  %v3814_v27 = vstv %s4919_s26 }
 0x534   : > { %v3816_v30 = vmul.f32 %v3814_v27, %v6774_v7  ;;  %v3817_v58 = vmul.f32 %v3814_v27, %v6836_v12  ;;  %v3815_v54 = vmul.f32 %v3814_v27, %v6753_v45 }
 0x535   : > { %4379 = vrot.lane.b32.xlu0 %v4376_v44, %s7568_s7  ;;  %4377 = vrot.lane.b32.xlu1 %v4374_v38, %s7568_s7  ;;  %v3585_v8 = vadd.f32 %v7316_v22, %v3564_v35  ;;  %v3584_v18 = vadd.f32 %v7318_v40, %v3563_v60  ;;  %v3673_v38 = vmul.f32 %v3671_v46, %v6774_v7  ;;  %v3678_v53 = vrot.slane %v3672_v62, 2  ;;  %s4940_s7 = sld [smem:[#allocation7 + $0x15b]] }
 0x537   : > { %v7380_v51 = vpop.permute.xlu0 %3723  ;;  %v7382_v5 = vpop.permute.xlu1 %3721  ;;  %v3606_v55 = vadd.f32 %v7325_v39, %v3585_v8  ;;  %v3605_v44 = vadd.f32 %v7327_v25, %v3584_v18  ;;  %v3681_v39 = vrot.slane %v3674_v31, 2  ;;  %v3824_v18 = vrot.slane %v3817_v58, 3 }
 0x538   : > { %v1231_v58 = vadd.f32 %v5930_v49, %v5926_v47 }
 0x539   : > { %4459 = vbcast.lane.b32.xlu0 %v4453_v15, 264  ;;  %4455 = vbcast.lane.b32.xlu1 %v4453_v15, 256  ;;  %v3627_v61 = vadd.f32 %v7337_v57, %v3606_v55  ;;  %v3626_v17 = vadd.f32 %v7339_v63, %v3605_v44  ;;  %v3679_v15 = vrot.slane %v3673_v38, 2 }
 0x53b   : > { %v7390_v9 = vpop.permute.xlu0 %3744  ;;  %v7392_v1 = vpop.permute.xlu1 %3742  ;;  %v3648_v40 = vadd.f32 %v7347_v2, %v3627_v61  ;;  %v3647_v50 = vadd.f32 %v7349_v21, %v3626_v17  ;;  %v3682_v57 = vsel %vm2727_vm10, %v3679_v15, %v3681_v39  ;;  %v3680_v63 = vsel %vm2727_vm10, %v3678_v53, %v3679_v15 }
 0x53c   : > { %v3957_v15 = vstv %s4926_s11 }
 0x53d   : > { %4470 = vbcast.lane.b32.xlu0 %v4464_v32, 264  ;;  %4466 = vbcast.lane.b32.xlu1 %v4464_v32, 256  ;;  %v3669_v25 = vadd.f32 %v7358_v28, %v3648_v40  ;;  %v3668_v24 = vadd.f32 %v7360_v16, %v3647_v50 }
 0x53f   : > { %v3766_v3 = vpop.permute.xlu0 %3765  ;;  %v3764_v20 = vpop.permute.xlu1 %3763  ;;  %v3686_v37 = vadd.f32 %v3682_v57, %v3669_v25  ;;  %v3685_v23 = vadd.f32 %v3680_v63, %v3668_v24  ;;  %v3959_v25 = vmul.f32 %v3957_v15, %v6774_v7  ;;  %v3960_v24 = vmul.f32 %v3957_v15, %v6836_v12 }
 0x540   : > { %v3958_v57 = vmul.f32 %v3957_v15, %v6753_v45 }
 0x541   : > { %4481 = vbcast.lane.b32.xlu0 %v4475_v42, 264  ;;  %4477 = vbcast.lane.b32.xlu1 %v4475_v42, 256  ;;  %v3707_v21 = vadd.f32 %v7366_v56, %v3686_v37  ;;  %v3706_v33 = vadd.f32 %v7368_v36, %v3685_v23 }
 0x543   : > { %v3787_v6 = vpop.permute.xlu0 %3786  ;;  %v3785_v11 = vpop.permute.xlu1 %3784  ;;  %v3728_v28 = vadd.f32 %v7380_v51, %v3707_v21  ;;  %v3727_v16 = vadd.f32 %v7382_v5, %v3706_v33  ;;  %v3822_v51 = vrot.slane %v3816_v30, 3  ;;  %v3821_v5 = vrot.slane %v3815_v54, 3 }
 0x545   : > { %4492 = vbcast.lane.b32.xlu0 %v4486_v10, 264  ;;  %4488 = vbcast.lane.b32.xlu1 %v4486_v10, 256  ;;  %v3749_v29 = vadd.f32 %v7390_v9, %v3728_v28  ;;  %v3748_v42 = vadd.f32 %v7392_v1, %v3727_v16  ;;  %v3825_v1 = vsel %vm2871_vm11, %v3822_v51, %v3824_v18 }
 0x546   : > { %v3823_v38 = vsel %vm2871_vm11, %v3821_v5, %v3822_v51  ;;  %v4100_v51 = vstv %s4933_s23 }
 0x547   : > { %v3808_v0 = vpop.permute.xlu0 %3807  ;;  %v3806_v14 = vpop.permute.xlu1 %3805  ;;  %v3770_v36 = vadd.f32 %v3766_v3, %v3749_v29  ;;  %v3769_v35 = vadd.f32 %v3764_v20, %v3748_v42 }
 0x549   : > { %v3791_v60 = vadd.f32 %v3787_v6, %v3770_v36  ;;  %v3790_v8 = vadd.f32 %v3785_v11, %v3769_v35  ;;  %v1244_v35 = vadd.f32 %v5928_v48, %v1231_v58 }
 0x54b   : > { %v3846_v22 = vpop.permute.xlu0 %3845  ;;  %v3844_v34 = vpop.permute.xlu1 %3843  ;;  %v3812_v9 = vadd.f32 %v3808_v0, %v3791_v60  ;;  %v3811_v44 = vadd.f32 %v3806_v14, %v3790_v8  ;;  %v1257_v47 = vadd.f32 %v5934_v43, %v1244_v35 }
 0x54d   : > { %v3829_v61 = vadd.f32 %v3825_v1, %v3812_v9  ;;  %v3828_v17 = vadd.f32 %v3823_v38, %v3811_v44  ;;  %v4101_v9 = vmul.f32 %v4100_v51, %v6753_v45 }
 0x54f   : > { %v3867_v19 = vpop.permute.xlu0 %3866  ;;  %v3865_v13 = vpop.permute.xlu1 %3864  ;;  %v3850_v6 = vadd.f32 %v3846_v22, %v3829_v61  ;;  %v3849_v11 = vadd.f32 %v3844_v34, %v3828_v17  ;;  %v3965_v34 = vrot.slane %v3959_v25, 4  ;;  %v4107_v17 = vrot.slane %v4101_v9, 5 }
 0x551   : > { %v3871_v40 = vadd.f32 %v3867_v19, %v3850_v6  ;;  %v3870_v50 = vadd.f32 %v3865_v13, %v3849_v11  ;;  %v3967_v19 = vrot.slane %v3960_v24, 4  ;;  %v3964_v13 = vrot.slane %v3958_v57, 4 }
 0x552   : > { %v1270_v6 = vadd.f32 %v5932_v52, %v1257_v47 }
 0x553   : > { %v3888_v32 = vpop.permute.xlu0 %3887  ;;  %v3886_v2 = vpop.permute.xlu1 %3885  ;;  %v3966_v29 = vsel %vm3015_vm12, %v3964_v13, %v3965_v34 }
 0x554   : > { %v3892_v0 = vadd.f32 %v3888_v32, %v3871_v40  ;;  %v3891_v14 = vadd.f32 %v3886_v2, %v3870_v50  ;;  %v3968_v2 = vsel %vm3015_vm12, %v3965_v34, %v3967_v19 }
 0x557   : > { %v3909_v26 = vpop.permute.xlu0 %3908  ;;  %v3907_v4 = vpop.permute.xlu1 %3906 }
 0x558   : > { %v3913_v63 = vadd.f32 %v3909_v26, %v3892_v0  ;;  %v3912_v37 = vadd.f32 %v3907_v4, %v3891_v14 }
 0x55b   : > { %v3930_v56 = vpop.permute.xlu0 %3929  ;;  %v3928_v10 = vpop.permute.xlu1 %3927 }
 0x55c   : > { %v3934_v33 = vadd.f32 %v3930_v56, %v3913_v63  ;;  %v3933_v22 = vadd.f32 %v3928_v10, %v3912_v37  ;;  %v7570_v63 = vld [vmem:[#allocation14_spill] sm:$0xff] }
 0x55f   : > { %v3951_v46 = vpop.permute.xlu0 %3950  ;;  %v3949_v55 = vpop.permute.xlu1 %3948 }
 0x560   : > { %v3955_v28 = vadd.f32 %v3951_v46, %v3934_v33  ;;  %v3954_v16 = vadd.f32 %v3949_v55, %v3933_v22  ;;  %v4102_v46 = vmul.f32 %v4100_v51, %v6774_v7  ;;  %v4103_v55 = vmul.f32 %v4100_v51, %v6836_v12 }
 0x561   : > { %v4243_v22 = vstv %s4940_s7 }
 0x562   : > { %v3972_v42 = vadd.f32 %v3968_v2, %v3955_v28  ;;  %v3971_v30 = vadd.f32 %v3966_v29, %v3954_v16  ;;  %v4108_v48 = vrot.slane %v4102_v46, 5  ;;  %v4110_v61 = vrot.slane %v4103_v55, 5 }
 0x563   : > { %v3989_v31 = vpop.permute.xlu0 %3988  ;;  %v3987_v62 = vpop.permute.xlu1 %3986  ;;  %v4244_v2 = vmul.f32 %v4243_v22, %v6753_v45 }
 0x564   : > { %v3993_v54 = vadd.f32 %v3989_v31, %v3972_v42  ;;  %v3992_v56 = vadd.f32 %v3987_v62, %v3971_v30  ;;  %v4111_v50 = vsel %vm311_vm4, %v4108_v48, %v4110_v61  ;;  %v4109_v15 = vsel %vm311_vm4, %v4107_v17, %v4108_v48 }
 0x567   : > { %v4010_v3 = vpop.permute.xlu0 %4009  ;;  %v4008_v20 = vpop.permute.xlu1 %4007 }
 0x568   : > { %v4014_v60 = vadd.f32 %v4010_v3, %v3993_v54  ;;  %v4013_v8 = vadd.f32 %v4008_v20, %v3992_v56 }
 0x56b   : > { %v4031_v39 = vpop.permute.xlu0 %4030  ;;  %v4029_v53 = vpop.permute.xlu1 %4028 }
 0x56c   : > { %v4035_v18 = vadd.f32 %v4031_v39, %v4014_v60  ;;  %v4034_v5 = vadd.f32 %v4029_v53, %v4013_v8  ;;  %v7569_v53 = vld [vmem:[#allocation15_spill] sm:$0xff] }
 0x56d   : > { %v1283_v0 = vadd.f32 %v7569_v53, %v1270_v6 }
 0x56f   : > { %v4052_v23 = vpop.permute.xlu0 %4051  ;;  %v4050_v21 = vpop.permute.xlu1 %4049  ;;  %v1296_v37 = vadd.f32 %v7570_v63, %v1283_v0 }
 0x570   : > { %v4056_v49 = vadd.f32 %v4052_v23, %v4035_v18  ;;  %v4055_v38 = vadd.f32 %v4050_v21, %v4034_v5 }
 0x571   : > { %v4747_v13 = vmul.f32 -1.442695, %v1296_v37 }
 0x573   : > { %v4073_v27 = vpop.permute.xlu0 %4072  ;;  %v4071_v32 = vpop.permute.xlu1 %4070  ;;  %5040 = vpow2.f32 %v4747_v13 }
 0x574   : > { %v4077_v31 = vadd.f32 %v4073_v27, %v4056_v49  ;;  %v4076_v62 = vadd.f32 %v4071_v32, %v4055_v38  ;;  %v4245_v27 = vmul.f32 %v4243_v22, %v6774_v7  ;;  %v4246_v32 = vmul.f32 %v4243_v22, %v6836_v12 }
 0x576   : > { %v4251_v54 = vrot.slane %v4245_v27, 6  ;;  %v4253_v56 = vrot.slane %v4246_v32, 6 }
 0x577   : > { %v4094_v26 = vpop.permute.xlu0 %4093  ;;  %v4092_v4 = vpop.permute.xlu1 %4091 }
 0x578   : > { %v4098_v11 = vadd.f32 %v4094_v26, %v4077_v31  ;;  %v4097_v40 = vadd.f32 %v4092_v4, %v4076_v62  ;;  %v4254_v7 = vsel %vm739_vm8, %v4251_v54, %v4253_v56 }
 0x57a   : > { %v4115_v14 = vadd.f32 %v4111_v50, %v4098_v11  ;;  %v4114_v25 = vadd.f32 %v4109_v15, %v4097_v40  ;;  %v5207_v11 = vmov 1966171168  }
 0x57b   : > { %v4132_v10 = vpop.permute.xlu0 %4131  ;;  %v4130_v36 = vpop.permute.xlu1 %4129  ;;  %v4399_v40 = vunpack.c.l.s4 %v5207_v11  ;;  %v5055_v11 = vld [vmem:[%s5378_s22] sm:$0xff] }
 0x57c   : > { %v4136_v23 = vadd.f32 %v4132_v10, %v4115_v14  ;;  %v4135_v21 = vadd.f32 %v4130_v36, %v4114_v25  ;;  %v4250_v10 = vrot.slane %v4244_v2, 6 }
 0x57d   : > { %v5041_v46 = vpop.eup %5040  ;;  %v4400_v14 = vunpack.c.0.s8 %v4399_v40 }
 0x57e   : > { %v4252_v12 = vsel %vm739_vm8, %v4250_v10, %v4251_v54  ;;  %v1300_v38 = vadd.f32 1.0, %v5041_v46 }
 0x57f   : > { %v4153_v44 = vpop.permute.xlu0 %4152  ;;  %v4151_v1 = vpop.permute.xlu1 %4150  ;;  %v4403_v25 = vsub.s32 %v4400_v14, %v5940_v59 }
 0x580   : > { %v4157_v52 = vadd.f32 %v4153_v44, %v4136_v23  ;;  %v4156_v33 = vadd.f32 %v4151_v1, %v4135_v21  ;;  %5042 = vrcp.f32 %v1300_v38 }
 0x583   : > { %v4174_v3 = vpop.permute.xlu0 %4173  ;;  %v4172_v20 = vpop.permute.xlu1 %4171 }
 0x584   : > { %v4178_v28 = vadd.f32 %v4174_v3, %v4157_v52  ;;  %v4177_v16 = vadd.f32 %v4172_v20, %v4156_v33 }
 0x587   : > { %v4195_v39 = vpop.permute.xlu0 %4194  ;;  %v4193_v43 = vpop.permute.xlu1 %4192 }
 0x588   : > { %v4199_v29 = vadd.f32 %v4195_v39, %v4178_v28  ;;  %v4198_v42 = vadd.f32 %v4193_v43, %v4177_v16 }
 0x58b   : > { %v4216_v24 = vpop.permute.xlu0 %4215  ;;  %v4214_v57 = vpop.permute.xlu1 %4213 }
 0x58c   : > { %v4220_v4 = vadd.f32 %v4216_v24, %v4199_v29  ;;  %v4219_v58 = vadd.f32 %v4214_v57, %v4198_v42  ;;  %v5043_v24 = vpop.eup %5042 }
 0x58d   : > { %v4404_v57 = vrot.slane %v5043_v24, %v4403_v25 }
 0x58f   : > { %v4237_v34 = vpop.permute.xlu0 %4236  ;;  %v4235_v19 = vpop.permute.xlu1 %4234  ;;  %v4405_v21 = vcombine.high %v4404_v57, %v4404_v57 }
 0x590   : > { %v4241_v36 = vadd.f32 %v4237_v34, %v4220_v4  ;;  %v4240_v35 = vadd.f32 %v4235_v19, %v4219_v58  ;;  %v4412_v19 = vrot.slane %v4404_v57, %v4403_v25 }
 0x591   : > { %v4419_v13 = vrot.slane %v4405_v21, %v4403_v25  ;;  %v5059_v25 = vld [vmem:[%s5378_s22 + $0x30] sm:$0xff] }
 0x592   : > { %v4258_v51 = vadd.f32 %v4254_v7, %v4241_v36  ;;  %v4257_v45 = vadd.f32 %v4252_v12, %v4240_v35  ;;  %v4420_v16 = vcombine.high %v4412_v19, %v4412_v19  ;;  %v4425_v59 = vrot.slane %v4412_v19, %v7375_v41 }
 0x593   : > { %v4275_v30 = vpop.permute.xlu0 %4274  ;;  %v4273_v26 = vpop.permute.xlu1 %4272  ;;  %v4421_v27 = vcombine.high %v4419_v13, %v4419_v13  ;;  %v4429_v29 = vrot.slane %v4419_v13, %v7375_v41 }
 0x594   : > { %v4279_v55 = vadd.f32 %v4275_v30, %v4258_v51  ;;  %v4278_v9 = vadd.f32 %v4273_v26, %v4257_v45  ;;  %v4433_v42 = vrot.slane %v4420_v16, %v7375_v41 }
 0x595   : > { %v4437_v30 = vrot.slane %v4421_v27, %v7375_v41 }
 0x597   : > { %v4296_v60 = vpop.permute.xlu0 %4295  ;;  %v4294_v8 = vpop.permute.xlu1 %4293 }
 0x598   : > { %v4300_v47 = vadd.f32 %v4296_v60, %v4279_v55  ;;  %v4299_v49 = vadd.f32 %v4294_v8, %v4278_v9 }
 0x59b   : > { %v4317_v18 = vpop.permute.xlu0 %4316  ;;  %v4315_v5 = vpop.permute.xlu1 %4314 }
 0x59c   : > { %v4321_v31 = vadd.f32 %v4317_v18, %v4300_v47  ;;  %v4320_v62 = vadd.f32 %v4315_v5, %v4299_v49 }
 0x59f   : > { %v4338_v44 = vpop.permute.xlu0 %4337  ;;  %v4336_v1 = vpop.permute.xlu1 %4335 }
 0x5a0   : > { %v4342_v17 = vadd.f32 %v4338_v44, %v4321_v31  ;;  %v4341_v3 = vadd.f32 %v4336_v1, %v4320_v62  ;;  %v5052_v62 = vld [vmem:[%s5378_s22 + $0x8] sm:$0xff] }
 0x5a3   : > { %v4359_v48 = vpop.permute.xlu0 %4358  ;;  %v4357_v61 = vpop.permute.xlu1 %4356 }
 0x5a4   : > { %v4363_v20 = vadd.f32 %v4359_v48, %v4342_v17  ;;  %v4362_v6 = vadd.f32 %v4357_v61, %v4341_v3  ;;  %v5053_v61 = vld [vmem:[%s5378_s22 + $0x18] sm:$0xff]  ;;  %v5054_v3 = vld [vmem:[%s5378_s22 + $0x28] sm:$0xff] }
 0x5a7   : > { %v4380_v50 = vpop.permute.xlu0 %4379  ;;  %v4378_v15 = vpop.permute.xlu1 %4377 }
 0x5a8   : > { %v4384_v39 = vadd.f32 %v4380_v50, %v4363_v20  ;;  %v4383_v43 = vadd.f32 %v4378_v15, %v4362_v6  ;;  %v5056_v50 = vld [vmem:[%s5378_s22 + $0x10] sm:$0xff] }
 0x5aa   : > { %v4948_v53 = vmul.f32 -1.442695, %v4384_v39  ;;  %v4947_v0 = vmul.f32 -1.442695, %v4383_v43  ;;  %v5057_v39 = vld [vmem:[%s5378_s22 + $0x20] sm:$0xff] }
 0x5ab   : > { %v4460_v63 = vpop.permute.xlu0 %4459  ;;  %v4456_v37 = vpop.permute.xlu1 %4455 }
 0x5ac   : > { %5044 = vpow2.f32 %v4948_v53 }
 0x5ad   : > { %5046 = vpow2.f32 %v4947_v0  ;;  %v5058_v0 = vld [vmem:[%s5378_s22 + $0x38] sm:$0xff] }
 0x5af   : > { %v4471_v34 = vpop.permute.xlu0 %4470  ;;  %v4467_v28 = vpop.permute.xlu1 %4466 }
 0x5b3   : > { %v4482_v32 = vpop.permute.xlu0 %4481  ;;  %v4478_v2 = vpop.permute.xlu1 %4477 }
 0x5b6   : > { %v5045_v23 = vpop.eup %5044 }
 0x5b7   : > { %v5047_v52 = vpop.eup %5046  ;;  %v4392_v33 = vadd.f32 1.0, %v5045_v23  ;;  %v4493_v8 = vpop.permute.xlu0 %4492 }
 0x5b8   : > { %v4391_v22 = vadd.f32 1.0, %v5047_v52  ;;  %v4489_v5 = vpop.permute.xlu1 %4488 }
 0x5b9   : > { %5048 = vrcp.f32 %v4392_v33 }
 0x5ba   : > { %5050 = vrcp.f32 %v4391_v22 }
 0x5c3   : > { %v5049_v26 = vpop.eup %5048 }
 0x5c4   : > { %v5051_v4 = vpop.eup %5050  ;;  %v4443_v58 = vadd.f32 %v5049_v26, %v4425_v59  ;;  %v4445_v54 = vadd.f32 %v5049_v26, %v4429_v29  ;;  %v4447_v56 = vadd.f32 %v5049_v26, %v4433_v42  ;;  %v4449_v10 = vadd.f32 %v5049_v26, %v4437_v30 }
 0x5c5   : > { %v4442_v36 = vadd.f32 %v5051_v4, %v4425_v59  ;;  %v4444_v35 = vadd.f32 %v5051_v4, %v4429_v29  ;;  %v4446_v60 = vadd.f32 %v5051_v4, %v4433_v42  ;;  %v4448_v7 = vadd.f32 %v5051_v4, %v4437_v30 }
 0x5c6   : > { %v4495_v12 = vadd.f32 %v4460_v63, %v4443_v58  ;;  %v4497_v51 = vadd.f32 %v4471_v34, %v4445_v54  ;;  %v4499_v45 = vadd.f32 %v4482_v32, %v4447_v56  ;;  %v4501_v18 = vadd.f32 %v4493_v8, %v4449_v10 }
 0x5c7   : > { %v4494_v41 = vadd.f32 %v4456_v37, %v4442_v36  ;;  %v4496_v46 = vadd.f32 %v4467_v28, %v4444_v35  ;;  %v4498_v55 = vadd.f32 %v4478_v2, %v4446_v60  ;;  %v4500_v9 = vadd.f32 %v4489_v5, %v4448_v7 }
 0x5c8   : > { %v4503_v44 = vmul.f32 0.33333334, %v4495_v12  ;;  %v4505_v1 = vmul.f32 0.33333334, %v4497_v51  ;;  %v4507_v47 = vmul.f32 0.33333334, %v4499_v45 }
 0x5c9   : > { %v4502_v49 = vmul.f32 0.33333334, %v4494_v41  ;;  %v4504_v38 = vmul.f32 0.33333334, %v4496_v46  ;;  %v4506_v31 = vmul.f32 0.33333334, %v4498_v55 }
 0x5ca   : > { %v4511_v48 = vmul.f32 %v5052_v62, %v4503_v44  ;;  %v4513_v17 = vmul.f32 %v5053_v61, %v4505_v1  ;;  %v4515_v20 = vmul.f32 %v5054_v3, %v4507_v47  ;;  %v4509_v6 = vmul.f32 0.33333334, %v4501_v18 }
 0x5cb   : > { %v4510_v40 = vmul.f32 %v5055_v11, %v4502_v49  ;;  %v4512_v15 = vmul.f32 %v5056_v50, %v4504_v38  ;;  %v4514_v43 = vmul.f32 %v5057_v39, %v4506_v31  ;;  %v4508_v53 = vmul.f32 0.33333334, %v4500_v9 }
 0x5cc   : > { %4519 = vst.msk [vmem:[%s7458_s6 + $0x8] sm:$0xff] %vm222_vm0, %v4511_v48  ;;  %4521 = vst.msk [vmem:[%s7458_s6 + $0x18] sm:$0xff] %vm222_vm0, %v4513_v17  ;;  %v4517_v14 = vmul.f32 %v5058_v0, %v4509_v6 }
 0x5cd   : > { %4523 = vst.msk [vmem:[%s7458_s6 + $0x28] sm:$0xff] %vm222_vm0, %v4515_v20  ;;  %4518 = vst.msk [vmem:[%s7458_s6] sm:$0xff] %vm222_vm0, %v4510_v40  ;;  %v4516_v24 = vmul.f32 %v5059_v25, %v4508_v53 }
 0x5ce   : > { %4520 = vst.msk [vmem:[%s7458_s6 + $0x10] sm:$0xff] %vm222_vm0, %v4512_v15  ;;  %4522 = vst.msk [vmem:[%s7458_s6 + $0x20] sm:$0xff] %vm222_vm0, %v4514_v43 }
 0x5cf   : > { %4525 = vst.msk [vmem:[%s7458_s6 + $0x38] sm:$0xff] %vm222_vm0, %v4517_v14  ;;  %4524 = vst.msk [vmem:[%s7458_s6 + $0x30] sm:$0xff] %vm222_vm0, %v4516_v24 }
 0x5d0   : > { %5131 = shalt.err (!%p5128_p9)
}
 0x5d1   : > { %s5132_s22 = scalar_lea.hbm %s7477_s20, 1024  ;;  %s5136_s11 = scalar_lea.hbm %s7537_s3, 2048 }
 0x5d2   : > { %p5133_p2 = scmp.ne.s32.totalorder %s7477_s20, %s5132_s22  ;;  %p5137_p13 = scmp.lt.u32.totalorder %s7477_s20, %s7537_s3 }
 0x5d3   : > { %p5138_p1 = scmp.lt.u32.totalorder %s5136_s11, %s5132_s22  ;;  %p5140_p5 = scmp.lt.u32.totalorder %s5132_s22, %s7477_s20 }
 0x5d4   : > { %p5134_p11 = pnand %p5133_p2, %p7572_p0 }
 0x5d5   : > { %p5139_p4 = por %p5138_p1, %p5137_p13 }
 0x5d6   : > { %p5135_p3 = pneg %p5134_p11 }
 0x5d7   : > { %p5141_p8 = por %p5140_p5, %p5139_p4 }
 0x5d9   : > { %p5142_p10 = pnand %p5141_p8, %p5135_p3 }
 0x5db   : > { %5145 = shalt.err (!%p5142_p10)
}
 0x5dc   : > { %s5209_s28 = smov 128   ;;  %s5210_s5 = smov 8  }
 0x5dd   : > { %4966 = dma.vmem_to_hbm [thread:$0]  (%p7572_p0), %s7479_s17, 1024, %s7477_s20, %s4527_s29, %s5209_s28, %s5209_s28, %s5210_s5  }
 0x5de PF: > { %s4555_s6 = sand.u32 1, %s5180_s12   ;;  %p7573_p6 = scmp.ne.s32.totalorder %s7553_s25, 0 }
 0x5df   : > { %p7574_p12 = scmp.ge.s32.totalorder %s5192_s15, 2  ;;  %s4556_s16 = scalar_lea.sflag [#allocation4], %s4555_s6 }
 0x5e1   : > { %p4980_p7 = pnand %p7574_p12, %p7573_p6 }
 0x5e3   : > { %5175 = dma.done.wait (!%p4980_p7), %s4556_s16, 1024  }
 0x5e4   : > { %5177 = vsyncadd (!%p4980_p7), %s4556_s16, 4294966272  ;;  %p18_p9 = scmp.ge.s32.totalorder %s5256_s18, 4   ;;  %s7575_s12 = smov %s5184_s13 }
 0x5e5   : > { %s7576_s13 = smov %s5188_s14  ;;  %s7577_s14 = smov %s5268_s21 }
 0x5e6   : > { %s7578_s15 = smov %s5256_s18  ;;  %20 = sbr.rel (!%p18_p9) target bundleno = 7 (0x7), region = 87 }
 0x5ed   :  { %4561 = vsyncpa [#allocation3], 1 }
 0x5ee   :  { %4563 = vsyncpa [#allocation3 + $0x1], 1 }
 0x5ef   :  { %4564 = vsyncpa [#allocation4], 1 }
 0x5f0   :  { %4566 = vsyncpa [#allocation4 + $0x1], 1 }
 0x5f1   :  { %4567 = vsyncpa [#allocation5], 1 }
 0x5f2   :  { %4569 = vsyncpa [#allocation5 + $0x1], 1 }
 0x5f3   :  { %4570 = vsyncpa [#allocation6], 1 }
 0x5f4   :  { %4572 = vsyncpa [#allocation6 + $0x1], 1 }

</bundles_post_ra>
